<compile_context>
chip_gen: v7x
topology: tpu7x:2x2x1
jax: 0.10.0
libtpu: 0.0.40
codegen_flags: <defaults>
</compile_context>

<pallas_src>
import functools
import math

import jax
import jax.numpy as jnp
from jax.experimental import pallas as pl
from jax.experimental.pallas import tpu as pltpu


# ----------------------------------------------------------------------------
# Fused RRDB kernel
# ----------------------------------------------------------------------------
def _rrdb_kernel(x_ref,
                 w1_ref, w2_ref, w3_ref, w4_ref, w5_ref,
                 b1_ref, b2_ref, b3_ref, b4_ref, b5_ref,
                 out_ref,
                 pat_ref, res_ref,
                 *, H, W, nf, gc):
    """Fused RRDB forward on one image of the batch.

    x_ref   : (1, nf, H*W) f32          input image (channels-first, flat spatial)
    wK_ref  : (3, Cout_K, 9*Cin_K) bf16 im2col-ordered, pre-transposed weights
    bK_ref  : (3, Cout_K, 1) f32        biases
    out_ref : (1, nf, H*W)              output image
    pat_ref : (9*ctot, H*W) bf16        im2col matrix; conv K reads rows [:9*Cin_K]
    res_ref : (nf, H*W) f32             residual stream of the current RDB
    """
    HW = H * W
    taps = [(dy - 1, dx - 1) for dy in range(3) for dx in range(3)]

    # channel offsets / sizes of the 5 source blocks (x, x1, x2, x3, x4)
    blk_ch0 = [0, nf, nf + gc, nf + 2 * gc, nf + 3 * gc]
    blk_sz = [nf, gc, gc, gc, gc]
    kdims = [9 * (nf + i * gc) for i in range(5)]      # 288 .. 864

    # Lane masks for the horizontal taps: zero the columns whose x-neighbour
    # falls outside the image (the vertical halo is handled by the zero-fill
    # of the flat shift below).
    xcol = jax.lax.broadcasted_iota(jnp.int32, (1, HW), 1) % W
    mask_l = (xcol != 0).astype(jnp.float32)           # ox = -1: zero where x == 0
    mask_r = (xcol != W - 1).astype(jnp.float32)       # ox = +1: zero where x == W-1

    def fill_block(s, val_f32):
        """Append one activation block (C, HW) to the im2col matrix as 9
        flat-shifted copies (lane-dense stores, zero halo via fill + mask)."""
        C = blk_sz[s]
        row0 = 9 * blk_ch0[s]
        for t, (oy, ox) in enumerate(taps):
            sft = oy * W + ox
            if sft == 0:
                sh = val_f32
            elif sft > 0:
                sh = jnp.concatenate(
                    [val_f32[:, sft:], jnp.zeros((C, sft), jnp.float32)], axis=1)
            else:
                sh = jnp.concatenate(
                    [jnp.zeros((C, -sft), jnp.float32), val_f32[:, :HW + sft]],
                    axis=1)
            if ox == -1:
                sh = sh * mask_l
            elif ox == 1:
                sh = sh * mask_r
            pat_ref[row0 + t * C: row0 + (t + 1) * C, :] = sh.astype(pat_ref.dtype)

    w_refs = [w1_ref, w2_ref, w3_ref, w4_ref, w5_ref]
    b_refs = [b1_ref, b2_ref, b3_ref, b4_ref, b5_ref]

    x0 = x_ref[0].astype(jnp.float32)                  # (nf, HW)
    res_ref[...] = x0
    fill_block(0, x0)

    for r in range(3):                                 # 3 RDBs (unrolled)
        # conv1..conv4: matmul + bias + LeakyReLU(0.2), appended as a new block
        for k in range(4):
            acc = jnp.dot(w_refs[k][r], pat_ref[:kdims[k], :],
                          preferred_element_type=jnp.float32)   # (gc, HW) f32
            acc = acc + b_refs[k][r]                   # (gc, 1) broadcast
            acc = jnp.maximum(acc, 0.2 * acc)          # LeakyReLU(0.2)
            fill_block(k + 1, acc)
        # conv5: no activation; fuse  x5 * 0.2 + rdb_input
        acc = jnp.dot(w_refs[4][r], pat_ref[:kdims[4], :],
                      preferred_element_type=jnp.float32)       # (nf, HW) f32
        acc = acc + b_refs[4][r]
        stream = acc * 0.2 + res_ref[...]
        if r < 2:
            res_ref[...] = stream
            fill_block(0, stream)                      # input of next RDB
        else:
            # final RRDB residual: RDB3(...) * 0.2 + original x
            out = stream * 0.2 + x_ref[0].astype(jnp.float32)
            out_ref[0] = out.astype(out_ref.dtype)


# ----------------------------------------------------------------------------
# Wrapper
# ----------------------------------------------------------------------------
def _pack_weights(params, nf, gc):
    """Reorder each HWIO conv weight into im2col row order, transpose to
    (Cout, 9*Cin), and stack the 3 RDBs.

    Row order matches the im2col matrix: source blocks [x, x1, ...] in order,
    and within a block row = (dy*3+dx)*C_block + c.
    """
    packed_w = [[] for _ in range(5)]
    packed_b = [[] for _ in range(5)]
    for block in params:                        # 3 RDBs
        for k, (w, b) in enumerate(block):      # 5 convs
            cout = w.shape[-1]
            sizes = [nf] + [gc] * k             # per-source channel split of Cin
            pieces, off = [], 0
            for C in sizes:
                pieces.append(w[:, :, off:off + C, :].reshape(9 * C, cout))
                off += C
            wk = jnp.concatenate(pieces, axis=0)           # (9*Cin_k, Cout)
            packed_w[k].append(wk.T)                       # (Cout, 9*Cin_k)
            packed_b[k].append(b.reshape(cout, 1))
    ws = [jnp.stack(p).astype(jnp.bfloat16) for p in packed_w]  # (3, Cout, 9*Cin_k)
    bs = [jnp.stack(p).astype(jnp.float32) for p in packed_b]   # (3, Cout, 1)
    return ws, bs


def rrdb_forward(x_nchw, params, nf, gc):
    """RRDB forward. Accepts NCHW input like the PyTorch module."""
    N, C, H, W = x_nchw.shape
    assert C == nf
    HW = H * W
    x = x_nchw.reshape(N, nf, HW)              # NCHW consumed directly (free reshape)
    ws, bs = _pack_weights(params, nf, gc)

    kdims = [9 * (nf + i * gc) for i in range(5)]
    couts = [gc, gc, gc, gc, nf]
    ctot = nf + 4 * gc

    in_specs = [pl.BlockSpec((1, nf, HW), lambda n: (n, 0, 0))]
    in_specs += [pl.BlockSpec((3, couts[k], kdims[k]), lambda n: (0, 0, 0))
                 for k in range(5)]
    in_specs += [pl.BlockSpec((3, couts[k], 1), lambda n: (0, 0, 0))
                 for k in range(5)]

    kernel = functools.partial(_rrdb_kernel, H=H, W=W, nf=nf, gc=gc)
    out = pl.pallas_call(
        kernel,
        out_shape=jax.ShapeDtypeStruct((N, nf, HW), x.dtype),
        grid=(N,),
        in_specs=in_specs,
        out_specs=pl.BlockSpec((1, nf, HW), lambda n: (n, 0, 0)),
        scratch_shapes=[
            pltpu.VMEM((9 * ctot, HW), jnp.bfloat16),   # im2col, lane axis = H*W
            pltpu.VMEM((nf, HW), jnp.float32),          # f32 residual stream
        ],
        compiler_params=pltpu.CompilerParams(
            dimension_semantics=("parallel",)),
    )(x, *ws, *bs)
    return out.reshape(N, nf, H, W)                     # back to NCHW (free)


# ----------------------------------------------------------------------------
# Deterministic parameter initialization (synthetic, ESRGAN-style small scale)
# ----------------------------------------------------------------------------
def init_rrdb_params(key, nf, gc):
    params = []
    cins = [nf, nf + gc, nf + 2 * gc, nf + 3 * gc, nf + 4 * gc]
    couts = [gc, gc, gc, gc, nf]
    for _ in range(3):
        block = []
        for cin, cout in zip(cins, couts):
            key, kw, kb = jax.random.split(key, 3)
            fan_in = 9 * cin
            w = jax.random.normal(kw, (3, 3, cin, cout), jnp.float32)
            w = w * (0.1 * math.sqrt(2.0 / fan_in))
            b = jax.random.normal(kb, (cout,), jnp.float32) * 0.01
            block.append((w, b))
        params.append(block)
    return params


# ----------------------------------------------------------------------------
# Pure-JAX reference (for correctness check)
# ----------------------------------------------------------------------------
def _ref_conv(x, w, b):
    y = jax.lax.conv_general_dilated(
        x, w, window_strides=(1, 1), padding="SAME",
        dimension_numbers=("NHWC", "HWIO", "NHWC"))
    return y + b


def _ref_rdb(x, block_params):
    lrelu = lambda t: jnp.where(t >= 0, t, 0.2 * t)
    (w1, b1), (w2, b2), (w3, b3), (w4, b4), (w5, b5) = block_params
    x1 = lrelu(_ref_conv(x, w1, b1))
    x2 = lrelu(_ref_conv(jnp.concatenate([x, x1], -1), w2, b2))
    x3 = lrelu(_ref_conv(jnp.concatenate([x, x1, x2], -1), w3, b3))
    x4 = lrelu(_ref_conv(jnp.concatenate([x, x1, x2, x3], -1), w4, b4))
    x5 = _ref_conv(jnp.concatenate([x, x1, x2, x3, x4], -1), w5, b5)
    return x5 * 0.2 + x


def rrdb_reference(x_nchw, params):
    x = jnp.transpose(x_nchw, (0, 2, 3, 1))
    out = x
    for bp in params:
        out = _ref_rdb(out, bp)
    out = out * 0.2 + x
    return jnp.transpose(out, (0, 3, 1, 2))


# ----------------------------------------------------------------------------
if __name__ == "__main__":
    nf, gc = 32, 16          # small RRDB(nf=32, gc=16)
    N, H, W = 2, 16, 16

    key = jax.random.PRNGKey(0)
    kx, kp = jax.random.split(key)
    x = jax.random.normal(kx, (N, nf, H, W), jnp.float32)   # NCHW, like PyTorch
    params = init_rrdb_params(kp, nf, gc)

    out = jax.block_until_ready(rrdb_forward(x, params, nf, gc))
    ref = jax.block_until_ready(rrdb_reference(x, params))

    assert out.shape == x.shape and out.dtype == x.dtype
    # bf16 MXU operands (f32 accumulation / f32 elementwise) => looser tolerance
    # than a pure-f32 implementation.
    assert jnp.allclose(out, ref, atol=2e-2, rtol=2e-2), "mismatch vs reference"
    print("KERNEL_OK")
</pallas_src>

<mosaic_0001>
module attributes {stable_mosaic.version = 11 : i64} {
  func.func @_rrdb_kernel(%arg0: i32, %arg1: memref<1x32x256xf32, #tpu.memory_space<vmem>>, %arg2: memref<3x16x288xbf16, #tpu.memory_space<vmem>>, %arg3: memref<3x16x432xbf16, #tpu.memory_space<vmem>>, %arg4: memref<3x16x576xbf16, #tpu.memory_space<vmem>>, %arg5: memref<3x16x720xbf16, #tpu.memory_space<vmem>>, %arg6: memref<3x32x864xbf16, #tpu.memory_space<vmem>>, %arg7: memref<3x16x1xf32, #tpu.memory_space<vmem>>, %arg8: memref<3x16x1xf32, #tpu.memory_space<vmem>>, %arg9: memref<3x16x1xf32, #tpu.memory_space<vmem>>, %arg10: memref<3x16x1xf32, #tpu.memory_space<vmem>>, %arg11: memref<3x32x1xf32, #tpu.memory_space<vmem>>, %arg12: memref<1x32x256xf32, #tpu.memory_space<vmem>>, %arg13: memref<864x256xbf16, #tpu.memory_space<vmem>>, %arg14: memref<32x256xf32, #tpu.memory_space<vmem>>) attributes {dimension_semantics = [#tpu.dimension_semantics<parallel>], iteration_bounds = array<i64: 2>, scalar_prefetch = 0 : i64, scratch_operands = 2 : i64, tpu.core_type = #tpu.core_type<tc>, window_params = [{transform_indices = @transform_0, window_bounds = array<i64: 1, 32, 256>}, {pipeline_mode = #tpu.pipeline_mode<synchronous>, transform_indices = @transform_1, window_bounds = array<i64: 3, 16, 288>}, {pipeline_mode = #tpu.pipeline_mode<synchronous>, transform_indices = @transform_2, window_bounds = array<i64: 3, 16, 432>}, {pipeline_mode = #tpu.pipeline_mode<synchronous>, transform_indices = @transform_3, window_bounds = array<i64: 3, 16, 576>}, {pipeline_mode = #tpu.pipeline_mode<synchronous>, transform_indices = @transform_4, window_bounds = array<i64: 3, 16, 720>}, {pipeline_mode = #tpu.pipeline_mode<synchronous>, transform_indices = @transform_5, window_bounds = array<i64: 3, 32, 864>}, {pipeline_mode = #tpu.pipeline_mode<synchronous>, transform_indices = @transform_6, window_bounds = array<i64: 3, 16, 1>}, {pipeline_mode = #tpu.pipeline_mode<synchronous>, transform_indices = @transform_7, window_bounds = array<i64: 3, 16, 1>}, {pipeline_mode = #tpu.pipeline_mode<synchronous>, transform_indices = @transform_8, window_bounds = array<i64: 3, 16, 1>}, {pipeline_mode = #tpu.pipeline_mode<synchronous>, transform_indices = @transform_9, window_bounds = array<i64: 3, 16, 1>}, {pipeline_mode = #tpu.pipeline_mode<synchronous>, transform_indices = @transform_10, window_bounds = array<i64: 3, 32, 1>}, {transform_indices = @transform_11, window_bounds = array<i64: 1, 32, 256>}]} {
    %0 = tpu.iota {dimensions = array<i32: 1>} : vector<1x256xi32>
    %c16_i32 = arith.constant 16 : i32
    %c0_i32 = arith.constant 0 : i32
    %1 = arith.cmpi eq, %c16_i32, %c0_i32 : i32
    %c1_i32 = arith.constant 1 : i32
    %2 = arith.select %1, %c1_i32, %c16_i32 : i32
    %3 = vector.broadcast %2 : i32 to vector<1x256xi32>
    %4 = arith.remsi %0, %3 : vector<1x256xi32>
    %c0_i32_0 = arith.constant 0 : i32
    %5 = vector.broadcast %c0_i32_0 : i32 to vector<1x256xi32>
    %6 = arith.cmpi ne, %4, %5 : vector<1x256xi32>
    %c0_i32_1 = arith.constant 0 : i32
    %7 = vector.broadcast %c0_i32_1 : i32 to vector<1x256xi32>
    %8 = arith.cmpi slt, %4, %7 : vector<1x256xi32>
    %c0_i32_2 = arith.constant 0 : i32
    %9 = arith.cmpi slt, %2, %c0_i32_2 : i32
    %10 = vector.broadcast %9 : i1 to vector<1x256xi1>
    %11 = vector.broadcast %10 : vector<1x256xi1> to vector<1x256xi1>
    %12 = arith.xori %8, %11 : vector<1x256xi1>
    %13 = arith.andi %12, %6 : vector<1x256xi1>
    %14 = vector.broadcast %2 : i32 to vector<1x256xi32>
    %15 = arith.addi %4, %14 : vector<1x256xi32>
    %16 = arith.select %13, %15, %4 : vector<1x256xi1>, vector<1x256xi32>
    %c0_i32_3 = arith.constant 0 : i32
    %17 = vector.broadcast %c0_i32_3 : i32 to vector<1x256xi32>
    %18 = arith.cmpi ne, %16, %17 : vector<1x256xi32>
    %19 = arith.extui %18 : vector<1x256xi1> to vector<1x256xi32>
    %20 = arith.sitofp %19 : vector<1x256xi32> to vector<1x256xf32>
    %c15_i32 = arith.constant 15 : i32
    %21 = vector.broadcast %c15_i32 : i32 to vector<1x256xi32>
    %22 = arith.cmpi ne, %16, %21 : vector<1x256xi32>
    %23 = arith.extui %22 : vector<1x256xi1> to vector<1x256xi32>
    %24 = arith.sitofp %23 : vector<1x256xi32> to vector<1x256xf32>
    %c0 = arith.constant 0 : index
    %c0_4 = arith.constant 0 : index
    %c0_5 = arith.constant 0 : index
    %25 = vector.load %arg1[%c0, %c0_4, %c0_5] : memref<1x32x256xf32, #tpu.memory_space<vmem>>, vector<1x32x256xf32>
    %26 = vector.shape_cast %25 : vector<1x32x256xf32> to vector<32x256xf32>
    %c0_6 = arith.constant 0 : index
    %c0_7 = arith.constant 0 : index
    %27 = vector.load %arg14[%c0_6, %c0_7] : memref<32x256xf32, #tpu.memory_space<vmem>>, vector<32x256xf32>
    tpu.vector_store %arg14[%c0_6, %c0_7], %26 {strides = array<i32>} : memref<32x256xf32, #tpu.memory_space<vmem>>, vector<32x256xf32>,
    %cst = arith.constant 0.000000e+00 : f32
    %28 = vector.broadcast %cst : f32 to vector<32x17xf32>
    %29 = vector.extract_strided_slice %26 {offsets = [0, 0], sizes = [32, 239], strides = [1, 1]} : vector<32x256xf32> to vector<32x239xf32>
    %30 = tpu.concatenate %28, %29 in 1 : vector<32x17xf32>, vector<32x239xf32> -> vector<32x256xf32>
    %31 = vector.broadcast %20 : vector<1x256xf32> to vector<32x256xf32>
    %32 = arith.mulf %30, %31 : vector<32x256xf32>
    %33 = arith.truncf %32 : vector<32x256xf32> to vector<32x256xbf16>
    %c0_8 = arith.constant 0 : index
    %c0_9 = arith.constant 0 : index
    %34 = vector.load %arg13[%c0_8, %c0_9] : memref<864x256xbf16, #tpu.memory_space<vmem>>, vector<32x256xbf16>
    tpu.vector_store %arg13[%c0_8, %c0_9], %33 {strides = array<i32>} : memref<864x256xbf16, #tpu.memory_space<vmem>>, vector<32x256xbf16>,
    %cst_10 = arith.constant 0.000000e+00 : f32
    %35 = vector.broadcast %cst_10 : f32 to vector<32x16xf32>
    %36 = vector.extract_strided_slice %26 {offsets = [0, 0], sizes = [32, 240], strides = [1, 1]} : vector<32x256xf32> to vector<32x240xf32>
    %37 = tpu.concatenate %35, %36 in 1 : vector<32x16xf32>, vector<32x240xf32> -> vector<32x256xf32>
    %38 = arith.truncf %37 : vector<32x256xf32> to vector<32x256xbf16>
    %c32 = arith.constant 32 : index
    %c0_11 = arith.constant 0 : index
    %39 = vector.load %arg13[%c32, %c0_11] : memref<864x256xbf16, #tpu.memory_space<vmem>>, vector<32x256xbf16>
    tpu.vector_store %arg13[%c32, %c0_11], %38 {strides = array<i32>} : memref<864x256xbf16, #tpu.memory_space<vmem>>, vector<32x256xbf16>,
    %cst_12 = arith.constant 0.000000e+00 : f32
    %40 = vector.broadcast %cst_12 : f32 to vector<32x15xf32>
    %41 = vector.extract_strided_slice %26 {offsets = [0, 0], sizes = [32, 241], strides = [1, 1]} : vector<32x256xf32> to vector<32x241xf32>
    %42 = tpu.concatenate %40, %41 in 1 : vector<32x15xf32>, vector<32x241xf32> -> vector<32x256xf32>
    %43 = vector.broadcast %24 : vector<1x256xf32> to vector<32x256xf32>
    %44 = arith.mulf %42, %43 : vector<32x256xf32>
    %45 = arith.truncf %44 : vector<32x256xf32> to vector<32x256xbf16>
    %c64 = arith.constant 64 : index
    %c0_13 = arith.constant 0 : index
    %46 = vector.load %arg13[%c64, %c0_13] : memref<864x256xbf16, #tpu.memory_space<vmem>>, vector<32x256xbf16>
    tpu.vector_store %arg13[%c64, %c0_13], %45 {strides = array<i32>} : memref<864x256xbf16, #tpu.memory_space<vmem>>, vector<32x256xbf16>,
    %cst_14 = arith.constant 0.000000e+00 : f32
    %47 = vector.broadcast %cst_14 : f32 to vector<32x1xf32>
    %48 = vector.extract_strided_slice %26 {offsets = [0, 0], sizes = [32, 255], strides = [1, 1]} : vector<32x256xf32> to vector<32x255xf32>
    %49 = tpu.concatenate %47, %48 in 1 : vector<32x1xf32>, vector<32x255xf32> -> vector<32x256xf32>
    %50 = vector.broadcast %20 : vector<1x256xf32> to vector<32x256xf32>
    %51 = arith.mulf %49, %50 : vector<32x256xf32>
    %52 = arith.truncf %51 : vector<32x256xf32> to vector<32x256xbf16>
    %c96 = arith.constant 96 : index
    %c0_15 = arith.constant 0 : index
    %53 = vector.load %arg13[%c96, %c0_15] : memref<864x256xbf16, #tpu.memory_space<vmem>>, vector<32x256xbf16>
    tpu.vector_store %arg13[%c96, %c0_15], %52 {strides = array<i32>} : memref<864x256xbf16, #tpu.memory_space<vmem>>, vector<32x256xbf16>,
    %54 = arith.truncf %26 : vector<32x256xf32> to vector<32x256xbf16>
    %c128 = arith.constant 128 : index
    %c0_16 = arith.constant 0 : index
    %55 = vector.load %arg13[%c128, %c0_16] : memref<864x256xbf16, #tpu.memory_space<vmem>>, vector<32x256xbf16>
    tpu.vector_store %arg13[%c128, %c0_16], %54 {strides = array<i32>} : memref<864x256xbf16, #tpu.memory_space<vmem>>, vector<32x256xbf16>,
    %56 = vector.extract_strided_slice %26 {offsets = [0, 1], sizes = [32, 255], strides = [1, 1]} : vector<32x256xf32> to vector<32x255xf32>
    %cst_17 = arith.constant 0.000000e+00 : f32
    %57 = vector.broadcast %cst_17 : f32 to vector<32x1xf32>
    %58 = tpu.concatenate %56, %57 in 1 : vector<32x255xf32>, vector<32x1xf32> -> vector<32x256xf32>
    %59 = vector.broadcast %24 : vector<1x256xf32> to vector<32x256xf32>
    %60 = arith.mulf %58, %59 : vector<32x256xf32>
    %61 = arith.truncf %60 : vector<32x256xf32> to vector<32x256xbf16>
    %c160 = arith.constant 160 : index
    %c0_18 = arith.constant 0 : index
    %62 = vector.load %arg13[%c160, %c0_18] : memref<864x256xbf16, #tpu.memory_space<vmem>>, vector<32x256xbf16>
    tpu.vector_store %arg13[%c160, %c0_18], %61 {strides = array<i32>} : memref<864x256xbf16, #tpu.memory_space<vmem>>, vector<32x256xbf16>,
    %63 = vector.extract_strided_slice %26 {offsets = [0, 15], sizes = [32, 241], strides = [1, 1]} : vector<32x256xf32> to vector<32x241xf32>
    %cst_19 = arith.constant 0.000000e+00 : f32
    %64 = vector.broadcast %cst_19 : f32 to vector<32x15xf32>
    %65 = tpu.concatenate %63, %64 in 1 : vector<32x241xf32>, vector<32x15xf32> -> vector<32x256xf32>
    %66 = vector.broadcast %20 : vector<1x256xf32> to vector<32x256xf32>
    %67 = arith.mulf %65, %66 : vector<32x256xf32>
    %68 = arith.truncf %67 : vector<32x256xf32> to vector<32x256xbf16>
    %c192 = arith.constant 192 : index
    %c0_20 = arith.constant 0 : index
    %69 = vector.load %arg13[%c192, %c0_20] : memref<864x256xbf16, #tpu.memory_space<vmem>>, vector<32x256xbf16>
    tpu.vector_store %arg13[%c192, %c0_20], %68 {strides = array<i32>} : memref<864x256xbf16, #tpu.memory_space<vmem>>, vector<32x256xbf16>,
    %70 = vector.extract_strided_slice %26 {offsets = [0, 16], sizes = [32, 240], strides = [1, 1]} : vector<32x256xf32> to vector<32x240xf32>
    %cst_21 = arith.constant 0.000000e+00 : f32
    %71 = vector.broadcast %cst_21 : f32 to vector<32x16xf32>
    %72 = tpu.concatenate %70, %71 in 1 : vector<32x240xf32>, vector<32x16xf32> -> vector<32x256xf32>
    %73 = arith.truncf %72 : vector<32x256xf32> to vector<32x256xbf16>
    %c224 = arith.constant 224 : index
    %c0_22 = arith.constant 0 : index
    %74 = vector.load %arg13[%c224, %c0_22] : memref<864x256xbf16, #tpu.memory_space<vmem>>, vector<32x256xbf16>
    tpu.vector_store %arg13[%c224, %c0_22], %73 {strides = array<i32>} : memref<864x256xbf16, #tpu.memory_space<vmem>>, vector<32x256xbf16>,
    %75 = vector.extract_strided_slice %26 {offsets = [0, 17], sizes = [32, 239], strides = [1, 1]} : vector<32x256xf32> to vector<32x239xf32>
    %cst_23 = arith.constant 0.000000e+00 : f32
    %76 = vector.broadcast %cst_23 : f32 to vector<32x17xf32>
    %77 = tpu.concatenate %75, %76 in 1 : vector<32x239xf32>, vector<32x17xf32> -> vector<32x256xf32>
    %78 = vector.broadcast %24 : vector<1x256xf32> to vector<32x256xf32>
    %79 = arith.mulf %77, %78 : vector<32x256xf32>
    %80 = arith.truncf %79 : vector<32x256xf32> to vector<32x256xbf16>
    %c256 = arith.constant 256 : index
    %c0_24 = arith.constant 0 : index
    %81 = vector.load %arg13[%c256, %c0_24] : memref<864x256xbf16, #tpu.memory_space<vmem>>, vector<32x256xbf16>
    tpu.vector_store %arg13[%c256, %c0_24], %80 {strides = array<i32>} : memref<864x256xbf16, #tpu.memory_space<vmem>>, vector<32x256xbf16>,
    %c0_25 = arith.constant 0 : index
    %c0_26 = arith.constant 0 : index
    %c0_27 = arith.constant 0 : index
    %82 = vector.load %arg2[%c0_25, %c0_26, %c0_27] : memref<3x16x288xbf16, #tpu.memory_space<vmem>>, vector<1x16x288xbf16>
    %83 = vector.shape_cast %82 : vector<1x16x288xbf16> to vector<16x288xbf16>
    %c0_28 = arith.constant 0 : index
    %c0_29 = arith.constant 0 : index
    %84 = vector.load %arg13[%c0_28, %c0_29] : memref<864x256xbf16, #tpu.memory_space<vmem>>, vector<288x256xbf16>
    %cst_30 = arith.constant dense<0.000000e+00> : vector<16x256xf32>
    %85 = tpu.matmul %83, %84, %cst_30 {dimension_numbers = #tpu.dot_dimension_numbers<[1], [0], [0], [1], [0, 0, 1, 1], [], []>} : vector<16x288xbf16>, vector<288x256xbf16>, vector<16x256xf32> -> vector<16x256xf32>
    %c0_31 = arith.constant 0 : index
    %c0_32 = arith.constant 0 : index
    %c0_33 = arith.constant 0 : index
    %86 = vector.load %arg7[%c0_31, %c0_32, %c0_33] : memref<3x16x1xf32, #tpu.memory_space<vmem>>, vector<1x16x1xf32>
    %87 = vector.shape_cast %86 : vector<1x16x1xf32> to vector<16x1xf32>
    %88 = vector.broadcast %87 : vector<16x1xf32> to vector<16x256xf32>
    %89 = arith.addf %85, %88 : vector<16x256xf32>
    %cst_34 = arith.constant 2.000000e-01 : f32
    %90 = vector.broadcast %cst_34 : f32 to vector<16x256xf32>
    %91 = arith.mulf %90, %89 : vector<16x256xf32>
    %92 = arith.maximumf %89, %91 : vector<16x256xf32>
    %cst_35 = arith.constant 0.000000e+00 : f32
    %93 = vector.broadcast %cst_35 : f32 to vector<16x17xf32>
    %94 = vector.extract_strided_slice %92 {offsets = [0, 0], sizes = [16, 239], strides = [1, 1]} : vector<16x256xf32> to vector<16x239xf32>
    %95 = tpu.concatenate %93, %94 in 1 : vector<16x17xf32>, vector<16x239xf32> -> vector<16x256xf32>
    %96 = vector.broadcast %20 : vector<1x256xf32> to vector<16x256xf32>
    %97 = arith.mulf %95, %96 : vector<16x256xf32>
    %98 = arith.truncf %97 : vector<16x256xf32> to vector<16x256xbf16>
    %c288 = arith.constant 288 : index
    %c0_36 = arith.constant 0 : index
    %99 = vector.load %arg13[%c288, %c0_36] : memref<864x256xbf16, #tpu.memory_space<vmem>>, vector<16x256xbf16>
    tpu.vector_store %arg13[%c288, %c0_36], %98 {strides = array<i32>} : memref<864x256xbf16, #tpu.memory_space<vmem>>, vector<16x256xbf16>,
    %cst_37 = arith.constant 0.000000e+00 : f32
    %100 = vector.broadcast %cst_37 : f32 to vector<16x16xf32>
    %101 = vector.extract_strided_slice %92 {offsets = [0, 0], sizes = [16, 240], strides = [1, 1]} : vector<16x256xf32> to vector<16x240xf32>
    %102 = tpu.concatenate %100, %101 in 1 : vector<16x16xf32>, vector<16x240xf32> -> vector<16x256xf32>
    %103 = arith.truncf %102 : vector<16x256xf32> to vector<16x256xbf16>
    %c304 = arith.constant 304 : index
    %c0_38 = arith.constant 0 : index
    %104 = vector.load %arg13[%c304, %c0_38] : memref<864x256xbf16, #tpu.memory_space<vmem>>, vector<16x256xbf16>
    tpu.vector_store %arg13[%c304, %c0_38], %103 {strides = array<i32>} : memref<864x256xbf16, #tpu.memory_space<vmem>>, vector<16x256xbf16>,
    %cst_39 = arith.constant 0.000000e+00 : f32
    %105 = vector.broadcast %cst_39 : f32 to vector<16x15xf32>
    %106 = vector.extract_strided_slice %92 {offsets = [0, 0], sizes = [16, 241], strides = [1, 1]} : vector<16x256xf32> to vector<16x241xf32>
    %107 = tpu.concatenate %105, %106 in 1 : vector<16x15xf32>, vector<16x241xf32> -> vector<16x256xf32>
    %108 = vector.broadcast %24 : vector<1x256xf32> to vector<16x256xf32>
    %109 = arith.mulf %107, %108 : vector<16x256xf32>
    %110 = arith.truncf %109 : vector<16x256xf32> to vector<16x256xbf16>
    %c320 = arith.constant 320 : index
    %c0_40 = arith.constant 0 : index
    %111 = vector.load %arg13[%c320, %c0_40] : memref<864x256xbf16, #tpu.memory_space<vmem>>, vector<16x256xbf16>
    tpu.vector_store %arg13[%c320, %c0_40], %110 {strides = array<i32>} : memref<864x256xbf16, #tpu.memory_space<vmem>>, vector<16x256xbf16>,
    %cst_41 = arith.constant 0.000000e+00 : f32
    %112 = vector.broadcast %cst_41 : f32 to vector<16x1xf32>
    %113 = vector.extract_strided_slice %92 {offsets = [0, 0], sizes = [16, 255], strides = [1, 1]} : vector<16x256xf32> to vector<16x255xf32>
    %114 = tpu.concatenate %112, %113 in 1 : vector<16x1xf32>, vector<16x255xf32> -> vector<16x256xf32>
    %115 = vector.broadcast %20 : vector<1x256xf32> to vector<16x256xf32>
    %116 = arith.mulf %114, %115 : vector<16x256xf32>
    %117 = arith.truncf %116 : vector<16x256xf32> to vector<16x256xbf16>
    %c336 = arith.constant 336 : index
    %c0_42 = arith.constant 0 : index
    %118 = vector.load %arg13[%c336, %c0_42] : memref<864x256xbf16, #tpu.memory_space<vmem>>, vector<16x256xbf16>
    tpu.vector_store %arg13[%c336, %c0_42], %117 {strides = array<i32>} : memref<864x256xbf16, #tpu.memory_space<vmem>>, vector<16x256xbf16>,
    %119 = arith.truncf %92 : vector<16x256xf32> to vector<16x256xbf16>
    %c352 = arith.constant 352 : index
    %c0_43 = arith.constant 0 : index
    %120 = vector.load %arg13[%c352, %c0_43] : memref<864x256xbf16, #tpu.memory_space<vmem>>, vector<16x256xbf16>
    tpu.vector_store %arg13[%c352, %c0_43], %119 {strides = array<i32>} : memref<864x256xbf16, #tpu.memory_space<vmem>>, vector<16x256xbf16>,
    %121 = vector.extract_strided_slice %92 {offsets = [0, 1], sizes = [16, 255], strides = [1, 1]} : vector<16x256xf32> to vector<16x255xf32>
    %cst_44 = arith.constant 0.000000e+00 : f32
    %122 = vector.broadcast %cst_44 : f32 to vector<16x1xf32>
    %123 = tpu.concatenate %121, %122 in 1 : vector<16x255xf32>, vector<16x1xf32> -> vector<16x256xf32>
    %124 = vector.broadcast %24 : vector<1x256xf32> to vector<16x256xf32>
    %125 = arith.mulf %123, %124 : vector<16x256xf32>
    %126 = arith.truncf %125 : vector<16x256xf32> to vector<16x256xbf16>
    %c368 = arith.constant 368 : index
    %c0_45 = arith.constant 0 : index
    %127 = vector.load %arg13[%c368, %c0_45] : memref<864x256xbf16, #tpu.memory_space<vmem>>, vector<16x256xbf16>
    tpu.vector_store %arg13[%c368, %c0_45], %126 {strides = array<i32>} : memref<864x256xbf16, #tpu.memory_space<vmem>>, vector<16x256xbf16>,
    %128 = vector.extract_strided_slice %92 {offsets = [0, 15], sizes = [16, 241], strides = [1, 1]} : vector<16x256xf32> to vector<16x241xf32>
    %cst_46 = arith.constant 0.000000e+00 : f32
    %129 = vector.broadcast %cst_46 : f32 to vector<16x15xf32>
    %130 = tpu.concatenate %128, %129 in 1 : vector<16x241xf32>, vector<16x15xf32> -> vector<16x256xf32>
    %131 = vector.broadcast %20 : vector<1x256xf32> to vector<16x256xf32>
    %132 = arith.mulf %130, %131 : vector<16x256xf32>
    %133 = arith.truncf %132 : vector<16x256xf32> to vector<16x256xbf16>
    %c384 = arith.constant 384 : index
    %c0_47 = arith.constant 0 : index
    %134 = vector.load %arg13[%c384, %c0_47] : memref<864x256xbf16, #tpu.memory_space<vmem>>, vector<16x256xbf16>
    tpu.vector_store %arg13[%c384, %c0_47], %133 {strides = array<i32>} : memref<864x256xbf16, #tpu.memory_space<vmem>>, vector<16x256xbf16>,
    %135 = vector.extract_strided_slice %92 {offsets = [0, 16], sizes = [16, 240], strides = [1, 1]} : vector<16x256xf32> to vector<16x240xf32>
    %cst_48 = arith.constant 0.000000e+00 : f32
    %136 = vector.broadcast %cst_48 : f32 to vector<16x16xf32>
    %137 = tpu.concatenate %135, %136 in 1 : vector<16x240xf32>, vector<16x16xf32> -> vector<16x256xf32>
    %138 = arith.truncf %137 : vector<16x256xf32> to vector<16x256xbf16>
    %c400 = arith.constant 400 : index
    %c0_49 = arith.constant 0 : index
    %139 = vector.load %arg13[%c400, %c0_49] : memref<864x256xbf16, #tpu.memory_space<vmem>>, vector<16x256xbf16>
    tpu.vector_store %arg13[%c400, %c0_49], %138 {strides = array<i32>} : memref<864x256xbf16, #tpu.memory_space<vmem>>, vector<16x256xbf16>,
    %140 = vector.extract_strided_slice %92 {offsets = [0, 17], sizes = [16, 239], strides = [1, 1]} : vector<16x256xf32> to vector<16x239xf32>
    %cst_50 = arith.constant 0.000000e+00 : f32
    %141 = vector.broadcast %cst_50 : f32 to vector<16x17xf32>
    %142 = tpu.concatenate %140, %141 in 1 : vector<16x239xf32>, vector<16x17xf32> -> vector<16x256xf32>
    %143 = vector.broadcast %24 : vector<1x256xf32> to vector<16x256xf32>
    %144 = arith.mulf %142, %143 : vector<16x256xf32>
    %145 = arith.truncf %144 : vector<16x256xf32> to vector<16x256xbf16>
    %c416 = arith.constant 416 : index
    %c0_51 = arith.constant 0 : index
    %146 = vector.load %arg13[%c416, %c0_51] : memref<864x256xbf16, #tpu.memory_space<vmem>>, vector<16x256xbf16>
    tpu.vector_store %arg13[%c416, %c0_51], %145 {strides = array<i32>} : memref<864x256xbf16, #tpu.memory_space<vmem>>, vector<16x256xbf16>,
    %c0_52 = arith.constant 0 : index
    %c0_53 = arith.constant 0 : index
    %c0_54 = arith.constant 0 : index
    %147 = vector.load %arg3[%c0_52, %c0_53, %c0_54] : memref<3x16x432xbf16, #tpu.memory_space<vmem>>, vector<1x16x432xbf16>
    %148 = vector.shape_cast %147 : vector<1x16x432xbf16> to vector<16x432xbf16>
    %c0_55 = arith.constant 0 : index
    %c0_56 = arith.constant 0 : index
    %149 = vector.load %arg13[%c0_55, %c0_56] : memref<864x256xbf16, #tpu.memory_space<vmem>>, vector<432x256xbf16>
    %cst_57 = arith.constant dense<0.000000e+00> : vector<16x256xf32>
    %150 = tpu.matmul %148, %149, %cst_57 {dimension_numbers = #tpu.dot_dimension_numbers<[1], [0], [0], [1], [0, 0, 1, 1], [], []>} : vector<16x432xbf16>, vector<432x256xbf16>, vector<16x256xf32> -> vector<16x256xf32>
    %c0_58 = arith.constant 0 : index
    %c0_59 = arith.constant 0 : index
    %c0_60 = arith.constant 0 : index
    %151 = vector.load %arg8[%c0_58, %c0_59, %c0_60] : memref<3x16x1xf32, #tpu.memory_space<vmem>>, vector<1x16x1xf32>
    %152 = vector.shape_cast %151 : vector<1x16x1xf32> to vector<16x1xf32>
    %153 = vector.broadcast %152 : vector<16x1xf32> to vector<16x256xf32>
    %154 = arith.addf %150, %153 : vector<16x256xf32>
    %cst_61 = arith.constant 2.000000e-01 : f32
    %155 = vector.broadcast %cst_61 : f32 to vector<16x256xf32>
    %156 = arith.mulf %155, %154 : vector<16x256xf32>
    %157 = arith.maximumf %154, %156 : vector<16x256xf32>
    %cst_62 = arith.constant 0.000000e+00 : f32
    %158 = vector.broadcast %cst_62 : f32 to vector<16x17xf32>
    %159 = vector.extract_strided_slice %157 {offsets = [0, 0], sizes = [16, 239], strides = [1, 1]} : vector<16x256xf32> to vector<16x239xf32>
    %160 = tpu.concatenate %158, %159 in 1 : vector<16x17xf32>, vector<16x239xf32> -> vector<16x256xf32>
    %161 = vector.broadcast %20 : vector<1x256xf32> to vector<16x256xf32>
    %162 = arith.mulf %160, %161 : vector<16x256xf32>
    %163 = arith.truncf %162 : vector<16x256xf32> to vector<16x256xbf16>
    %c432 = arith.constant 432 : index
    %c0_63 = arith.constant 0 : index
    %164 = vector.load %arg13[%c432, %c0_63] : memref<864x256xbf16, #tpu.memory_space<vmem>>, vector<16x256xbf16>
    tpu.vector_store %arg13[%c432, %c0_63], %163 {strides = array<i32>} : memref<864x256xbf16, #tpu.memory_space<vmem>>, vector<16x256xbf16>,
    %cst_64 = arith.constant 0.000000e+00 : f32
    %165 = vector.broadcast %cst_64 : f32 to vector<16x16xf32>
    %166 = vector.extract_strided_slice %157 {offsets = [0, 0], sizes = [16, 240], strides = [1, 1]} : vector<16x256xf32> to vector<16x240xf32>
    %167 = tpu.concatenate %165, %166 in 1 : vector<16x16xf32>, vector<16x240xf32> -> vector<16x256xf32>
    %168 = arith.truncf %167 : vector<16x256xf32> to vector<16x256xbf16>
    %c448 = arith.constant 448 : index
    %c0_65 = arith.constant 0 : index
    %169 = vector.load %arg13[%c448, %c0_65] : memref<864x256xbf16, #tpu.memory_space<vmem>>, vector<16x256xbf16>
    tpu.vector_store %arg13[%c448, %c0_65], %168 {strides = array<i32>} : memref<864x256xbf16, #tpu.memory_space<vmem>>, vector<16x256xbf16>,
    %cst_66 = arith.constant 0.000000e+00 : f32
    %170 = vector.broadcast %cst_66 : f32 to vector<16x15xf32>
    %171 = vector.extract_strided_slice %157 {offsets = [0, 0], sizes = [16, 241], strides = [1, 1]} : vector<16x256xf32> to vector<16x241xf32>
    %172 = tpu.concatenate %170, %171 in 1 : vector<16x15xf32>, vector<16x241xf32> -> vector<16x256xf32>
    %173 = vector.broadcast %24 : vector<1x256xf32> to vector<16x256xf32>
    %174 = arith.mulf %172, %173 : vector<16x256xf32>
    %175 = arith.truncf %174 : vector<16x256xf32> to vector<16x256xbf16>
    %c464 = arith.constant 464 : index
    %c0_67 = arith.constant 0 : index
    %176 = vector.load %arg13[%c464, %c0_67] : memref<864x256xbf16, #tpu.memory_space<vmem>>, vector<16x256xbf16>
    tpu.vector_store %arg13[%c464, %c0_67], %175 {strides = array<i32>} : memref<864x256xbf16, #tpu.memory_space<vmem>>, vector<16x256xbf16>,
    %cst_68 = arith.constant 0.000000e+00 : f32
    %177 = vector.broadcast %cst_68 : f32 to vector<16x1xf32>
    %178 = vector.extract_strided_slice %157 {offsets = [0, 0], sizes = [16, 255], strides = [1, 1]} : vector<16x256xf32> to vector<16x255xf32>
    %179 = tpu.concatenate %177, %178 in 1 : vector<16x1xf32>, vector<16x255xf32> -> vector<16x256xf32>
    %180 = vector.broadcast %20 : vector<1x256xf32> to vector<16x256xf32>
    %181 = arith.mulf %179, %180 : vector<16x256xf32>
    %182 = arith.truncf %181 : vector<16x256xf32> to vector<16x256xbf16>
    %c480 = arith.constant 480 : index
    %c0_69 = arith.constant 0 : index
    %183 = vector.load %arg13[%c480, %c0_69] : memref<864x256xbf16, #tpu.memory_space<vmem>>, vector<16x256xbf16>
    tpu.vector_store %arg13[%c480, %c0_69], %182 {strides = array<i32>} : memref<864x256xbf16, #tpu.memory_space<vmem>>, vector<16x256xbf16>,
    %184 = arith.truncf %157 : vector<16x256xf32> to vector<16x256xbf16>
    %c496 = arith.constant 496 : index
    %c0_70 = arith.constant 0 : index
    %185 = vector.load %arg13[%c496, %c0_70] : memref<864x256xbf16, #tpu.memory_space<vmem>>, vector<16x256xbf16>
    tpu.vector_store %arg13[%c496, %c0_70], %184 {strides = array<i32>} : memref<864x256xbf16, #tpu.memory_space<vmem>>, vector<16x256xbf16>,
    %186 = vector.extract_strided_slice %157 {offsets = [0, 1], sizes = [16, 255], strides = [1, 1]} : vector<16x256xf32> to vector<16x255xf32>
    %cst_71 = arith.constant 0.000000e+00 : f32
    %187 = vector.broadcast %cst_71 : f32 to vector<16x1xf32>
    %188 = tpu.concatenate %186, %187 in 1 : vector<16x255xf32>, vector<16x1xf32> -> vector<16x256xf32>
    %189 = vector.broadcast %24 : vector<1x256xf32> to vector<16x256xf32>
    %190 = arith.mulf %188, %189 : vector<16x256xf32>
    %191 = arith.truncf %190 : vector<16x256xf32> to vector<16x256xbf16>
    %c512 = arith.constant 512 : index
    %c0_72 = arith.constant 0 : index
    %192 = vector.load %arg13[%c512, %c0_72] : memref<864x256xbf16, #tpu.memory_space<vmem>>, vector<16x256xbf16>
    tpu.vector_store %arg13[%c512, %c0_72], %191 {strides = array<i32>} : memref<864x256xbf16, #tpu.memory_space<vmem>>, vector<16x256xbf16>,
    %193 = vector.extract_strided_slice %157 {offsets = [0, 15], sizes = [16, 241], strides = [1, 1]} : vector<16x256xf32> to vector<16x241xf32>
    %cst_73 = arith.constant 0.000000e+00 : f32
    %194 = vector.broadcast %cst_73 : f32 to vector<16x15xf32>
    %195 = tpu.concatenate %193, %194 in 1 : vector<16x241xf32>, vector<16x15xf32> -> vector<16x256xf32>
    %196 = vector.broadcast %20 : vector<1x256xf32> to vector<16x256xf32>
    %197 = arith.mulf %195, %196 : vector<16x256xf32>
    %198 = arith.truncf %197 : vector<16x256xf32> to vector<16x256xbf16>
    %c528 = arith.constant 528 : index
    %c0_74 = arith.constant 0 : index
    %199 = vector.load %arg13[%c528, %c0_74] : memref<864x256xbf16, #tpu.memory_space<vmem>>, vector<16x256xbf16>
    tpu.vector_store %arg13[%c528, %c0_74], %198 {strides = array<i32>} : memref<864x256xbf16, #tpu.memory_space<vmem>>, vector<16x256xbf16>,
    %200 = vector.extract_strided_slice %157 {offsets = [0, 16], sizes = [16, 240], strides = [1, 1]} : vector<16x256xf32> to vector<16x240xf32>
    %cst_75 = arith.constant 0.000000e+00 : f32
    %201 = vector.broadcast %cst_75 : f32 to vector<16x16xf32>
    %202 = tpu.concatenate %200, %201 in 1 : vector<16x240xf32>, vector<16x16xf32> -> vector<16x256xf32>
    %203 = arith.truncf %202 : vector<16x256xf32> to vector<16x256xbf16>
    %c544 = arith.constant 544 : index
    %c0_76 = arith.constant 0 : index
    %204 = vector.load %arg13[%c544, %c0_76] : memref<864x256xbf16, #tpu.memory_space<vmem>>, vector<16x256xbf16>
    tpu.vector_store %arg13[%c544, %c0_76], %203 {strides = array<i32>} : memref<864x256xbf16, #tpu.memory_space<vmem>>, vector<16x256xbf16>,
    %205 = vector.extract_strided_slice %157 {offsets = [0, 17], sizes = [16, 239], strides = [1, 1]} : vector<16x256xf32> to vector<16x239xf32>
    %cst_77 = arith.constant 0.000000e+00 : f32
    %206 = vector.broadcast %cst_77 : f32 to vector<16x17xf32>
    %207 = tpu.concatenate %205, %206 in 1 : vector<16x239xf32>, vector<16x17xf32> -> vector<16x256xf32>
    %208 = vector.broadcast %24 : vector<1x256xf32> to vector<16x256xf32>
    %209 = arith.mulf %207, %208 : vector<16x256xf32>
    %210 = arith.truncf %209 : vector<16x256xf32> to vector<16x256xbf16>
    %c560 = arith.constant 560 : index
    %c0_78 = arith.constant 0 : index
    %211 = vector.load %arg13[%c560, %c0_78] : memref<864x256xbf16, #tpu.memory_space<vmem>>, vector<16x256xbf16>
    tpu.vector_store %arg13[%c560, %c0_78], %210 {strides = array<i32>} : memref<864x256xbf16, #tpu.memory_space<vmem>>, vector<16x256xbf16>,
    %c0_79 = arith.constant 0 : index
    %c0_80 = arith.constant 0 : index
    %c0_81 = arith.constant 0 : index
    %212 = vector.load %arg4[%c0_79, %c0_80, %c0_81] : memref<3x16x576xbf16, #tpu.memory_space<vmem>>, vector<1x16x576xbf16>
    %213 = vector.shape_cast %212 : vector<1x16x576xbf16> to vector<16x576xbf16>
    %c0_82 = arith.constant 0 : index
    %c0_83 = arith.constant 0 : index
    %214 = vector.load %arg13[%c0_82, %c0_83] : memref<864x256xbf16, #tpu.memory_space<vmem>>, vector<576x256xbf16>
    %cst_84 = arith.constant dense<0.000000e+00> : vector<16x256xf32>
    %215 = tpu.matmul %213, %214, %cst_84 {dimension_numbers = #tpu.dot_dimension_numbers<[1], [0], [0], [1], [0, 0, 1, 1], [], []>} : vector<16x576xbf16>, vector<576x256xbf16>, vector<16x256xf32> -> vector<16x256xf32>
    %c0_85 = arith.constant 0 : index
    %c0_86 = arith.constant 0 : index
    %c0_87 = arith.constant 0 : index
    %216 = vector.load %arg9[%c0_85, %c0_86, %c0_87] : memref<3x16x1xf32, #tpu.memory_space<vmem>>, vector<1x16x1xf32>
    %217 = vector.shape_cast %216 : vector<1x16x1xf32> to vector<16x1xf32>
    %218 = vector.broadcast %217 : vector<16x1xf32> to vector<16x256xf32>
    %219 = arith.addf %215, %218 : vector<16x256xf32>
    %cst_88 = arith.constant 2.000000e-01 : f32
    %220 = vector.broadcast %cst_88 : f32 to vector<16x256xf32>
    %221 = arith.mulf %220, %219 : vector<16x256xf32>
    %222 = arith.maximumf %219, %221 : vector<16x256xf32>
    %cst_89 = arith.constant 0.000000e+00 : f32
    %223 = vector.broadcast %cst_89 : f32 to vector<16x17xf32>
    %224 = vector.extract_strided_slice %222 {offsets = [0, 0], sizes = [16, 239], strides = [1, 1]} : vector<16x256xf32> to vector<16x239xf32>
    %225 = tpu.concatenate %223, %224 in 1 : vector<16x17xf32>, vector<16x239xf32> -> vector<16x256xf32>
    %226 = vector.broadcast %20 : vector<1x256xf32> to vector<16x256xf32>
    %227 = arith.mulf %225, %226 : vector<16x256xf32>
    %228 = arith.truncf %227 : vector<16x256xf32> to vector<16x256xbf16>
    %c576 = arith.constant 576 : index
    %c0_90 = arith.constant 0 : index
    %229 = vector.load %arg13[%c576, %c0_90] : memref<864x256xbf16, #tpu.memory_space<vmem>>, vector<16x256xbf16>
    tpu.vector_store %arg13[%c576, %c0_90], %228 {strides = array<i32>} : memref<864x256xbf16, #tpu.memory_space<vmem>>, vector<16x256xbf16>,
    %cst_91 = arith.constant 0.000000e+00 : f32
    %230 = vector.broadcast %cst_91 : f32 to vector<16x16xf32>
    %231 = vector.extract_strided_slice %222 {offsets = [0, 0], sizes = [16, 240], strides = [1, 1]} : vector<16x256xf32> to vector<16x240xf32>
    %232 = tpu.concatenate %230, %231 in 1 : vector<16x16xf32>, vector<16x240xf32> -> vector<16x256xf32>
    %233 = arith.truncf %232 : vector<16x256xf32> to vector<16x256xbf16>
    %c592 = arith.constant 592 : index
    %c0_92 = arith.constant 0 : index
    %234 = vector.load %arg13[%c592, %c0_92] : memref<864x256xbf16, #tpu.memory_space<vmem>>, vector<16x256xbf16>
    tpu.vector_store %arg13[%c592, %c0_92], %233 {strides = array<i32>} : memref<864x256xbf16, #tpu.memory_space<vmem>>, vector<16x256xbf16>,
    %cst_93 = arith.constant 0.000000e+00 : f32
    %235 = vector.broadcast %cst_93 : f32 to vector<16x15xf32>
    %236 = vector.extract_strided_slice %222 {offsets = [0, 0], sizes = [16, 241], strides = [1, 1]} : vector<16x256xf32> to vector<16x241xf32>
    %237 = tpu.concatenate %235, %236 in 1 : vector<16x15xf32>, vector<16x241xf32> -> vector<16x256xf32>
    %238 = vector.broadcast %24 : vector<1x256xf32> to vector<16x256xf32>
    %239 = arith.mulf %237, %238 : vector<16x256xf32>
    %240 = arith.truncf %239 : vector<16x256xf32> to vector<16x256xbf16>
    %c608 = arith.constant 608 : index
    %c0_94 = arith.constant 0 : index
    %241 = vector.load %arg13[%c608, %c0_94] : memref<864x256xbf16, #tpu.memory_space<vmem>>, vector<16x256xbf16>
    tpu.vector_store %arg13[%c608, %c0_94], %240 {strides = array<i32>} : memref<864x256xbf16, #tpu.memory_space<vmem>>, vector<16x256xbf16>,
    %cst_95 = arith.constant 0.000000e+00 : f32
    %242 = vector.broadcast %cst_95 : f32 to vector<16x1xf32>
    %243 = vector.extract_strided_slice %222 {offsets = [0, 0], sizes = [16, 255], strides = [1, 1]} : vector<16x256xf32> to vector<16x255xf32>
    %244 = tpu.concatenate %242, %243 in 1 : vector<16x1xf32>, vector<16x255xf32> -> vector<16x256xf32>
    %245 = vector.broadcast %20 : vector<1x256xf32> to vector<16x256xf32>
    %246 = arith.mulf %244, %245 : vector<16x256xf32>
    %247 = arith.truncf %246 : vector<16x256xf32> to vector<16x256xbf16>
    %c624 = arith.constant 624 : index
    %c0_96 = arith.constant 0 : index
    %248 = vector.load %arg13[%c624, %c0_96] : memref<864x256xbf16, #tpu.memory_space<vmem>>, vector<16x256xbf16>
    tpu.vector_store %arg13[%c624, %c0_96], %247 {strides = array<i32>} : memref<864x256xbf16, #tpu.memory_space<vmem>>, vector<16x256xbf16>,
    %249 = arith.truncf %222 : vector<16x256xf32> to vector<16x256xbf16>
    %c640 = arith.constant 640 : index
    %c0_97 = arith.constant 0 : index
    %250 = vector.load %arg13[%c640, %c0_97] : memref<864x256xbf16, #tpu.memory_space<vmem>>, vector<16x256xbf16>
    tpu.vector_store %arg13[%c640, %c0_97], %249 {strides = array<i32>} : memref<864x256xbf16, #tpu.memory_space<vmem>>, vector<16x256xbf16>,
    %251 = vector.extract_strided_slice %222 {offsets = [0, 1], sizes = [16, 255], strides = [1, 1]} : vector<16x256xf32> to vector<16x255xf32>
    %cst_98 = arith.constant 0.000000e+00 : f32
    %252 = vector.broadcast %cst_98 : f32 to vector<16x1xf32>
    %253 = tpu.concatenate %251, %252 in 1 : vector<16x255xf32>, vector<16x1xf32> -> vector<16x256xf32>
    %254 = vector.broadcast %24 : vector<1x256xf32> to vector<16x256xf32>
    %255 = arith.mulf %253, %254 : vector<16x256xf32>
    %256 = arith.truncf %255 : vector<16x256xf32> to vector<16x256xbf16>
    %c656 = arith.constant 656 : index
    %c0_99 = arith.constant 0 : index
    %257 = vector.load %arg13[%c656, %c0_99] : memref<864x256xbf16, #tpu.memory_space<vmem>>, vector<16x256xbf16>
    tpu.vector_store %arg13[%c656, %c0_99], %256 {strides = array<i32>} : memref<864x256xbf16, #tpu.memory_space<vmem>>, vector<16x256xbf16>,
    %258 = vector.extract_strided_slice %222 {offsets = [0, 15], sizes = [16, 241], strides = [1, 1]} : vector<16x256xf32> to vector<16x241xf32>
    %cst_100 = arith.constant 0.000000e+00 : f32
    %259 = vector.broadcast %cst_100 : f32 to vector<16x15xf32>
    %260 = tpu.concatenate %258, %259 in 1 : vector<16x241xf32>, vector<16x15xf32> -> vector<16x256xf32>
    %261 = vector.broadcast %20 : vector<1x256xf32> to vector<16x256xf32>
    %262 = arith.mulf %260, %261 : vector<16x256xf32>
    %263 = arith.truncf %262 : vector<16x256xf32> to vector<16x256xbf16>
    %c672 = arith.constant 672 : index
    %c0_101 = arith.constant 0 : index
    %264 = vector.load %arg13[%c672, %c0_101] : memref<864x256xbf16, #tpu.memory_space<vmem>>, vector<16x256xbf16>
    tpu.vector_store %arg13[%c672, %c0_101], %263 {strides = array<i32>} : memref<864x256xbf16, #tpu.memory_space<vmem>>, vector<16x256xbf16>,
    %265 = vector.extract_strided_slice %222 {offsets = [0, 16], sizes = [16, 240], strides = [1, 1]} : vector<16x256xf32> to vector<16x240xf32>
    %cst_102 = arith.constant 0.000000e+00 : f32
    %266 = vector.broadcast %cst_102 : f32 to vector<16x16xf32>
    %267 = tpu.concatenate %265, %266 in 1 : vector<16x240xf32>, vector<16x16xf32> -> vector<16x256xf32>
    %268 = arith.truncf %267 : vector<16x256xf32> to vector<16x256xbf16>
    %c688 = arith.constant 688 : index
    %c0_103 = arith.constant 0 : index
    %269 = vector.load %arg13[%c688, %c0_103] : memref<864x256xbf16, #tpu.memory_space<vmem>>, vector<16x256xbf16>
    tpu.vector_store %arg13[%c688, %c0_103], %268 {strides = array<i32>} : memref<864x256xbf16, #tpu.memory_space<vmem>>, vector<16x256xbf16>,
    %270 = vector.extract_strided_slice %222 {offsets = [0, 17], sizes = [16, 239], strides = [1, 1]} : vector<16x256xf32> to vector<16x239xf32>
    %cst_104 = arith.constant 0.000000e+00 : f32
    %271 = vector.broadcast %cst_104 : f32 to vector<16x17xf32>
    %272 = tpu.concatenate %270, %271 in 1 : vector<16x239xf32>, vector<16x17xf32> -> vector<16x256xf32>
    %273 = vector.broadcast %24 : vector<1x256xf32> to vector<16x256xf32>
    %274 = arith.mulf %272, %273 : vector<16x256xf32>
    %275 = arith.truncf %274 : vector<16x256xf32> to vector<16x256xbf16>
    %c704 = arith.constant 704 : index
    %c0_105 = arith.constant 0 : index
    %276 = vector.load %arg13[%c704, %c0_105] : memref<864x256xbf16, #tpu.memory_space<vmem>>, vector<16x256xbf16>
    tpu.vector_store %arg13[%c704, %c0_105], %275 {strides = array<i32>} : memref<864x256xbf16, #tpu.memory_space<vmem>>, vector<16x256xbf16>,
    %c0_106 = arith.constant 0 : index
    %c0_107 = arith.constant 0 : index
    %c0_108 = arith.constant 0 : index
    %277 = vector.load %arg5[%c0_106, %c0_107, %c0_108] : memref<3x16x720xbf16, #tpu.memory_space<vmem>>, vector<1x16x720xbf16>
    %278 = vector.shape_cast %277 : vector<1x16x720xbf16> to vector<16x720xbf16>
    %c0_109 = arith.constant 0 : index
    %c0_110 = arith.constant 0 : index
    %279 = vector.load %arg13[%c0_109, %c0_110] : memref<864x256xbf16, #tpu.memory_space<vmem>>, vector<720x256xbf16>
    %cst_111 = arith.constant dense<0.000000e+00> : vector<16x256xf32>
    %280 = tpu.matmul %278, %279, %cst_111 {dimension_numbers = #tpu.dot_dimension_numbers<[1], [0], [0], [1], [0, 0, 1, 1], [], []>} : vector<16x720xbf16>, vector<720x256xbf16>, vector<16x256xf32> -> vector<16x256xf32>
    %c0_112 = arith.constant 0 : index
    %c0_113 = arith.constant 0 : index
    %c0_114 = arith.constant 0 : index
    %281 = vector.load %arg10[%c0_112, %c0_113, %c0_114] : memref<3x16x1xf32, #tpu.memory_space<vmem>>, vector<1x16x1xf32>
    %282 = vector.shape_cast %281 : vector<1x16x1xf32> to vector<16x1xf32>
    %283 = vector.broadcast %282 : vector<16x1xf32> to vector<16x256xf32>
    %284 = arith.addf %280, %283 : vector<16x256xf32>
    %cst_115 = arith.constant 2.000000e-01 : f32
    %285 = vector.broadcast %cst_115 : f32 to vector<16x256xf32>
    %286 = arith.mulf %285, %284 : vector<16x256xf32>
    %287 = arith.maximumf %284, %286 : vector<16x256xf32>
    %cst_116 = arith.constant 0.000000e+00 : f32
    %288 = vector.broadcast %cst_116 : f32 to vector<16x17xf32>
    %289 = vector.extract_strided_slice %287 {offsets = [0, 0], sizes = [16, 239], strides = [1, 1]} : vector<16x256xf32> to vector<16x239xf32>
    %290 = tpu.concatenate %288, %289 in 1 : vector<16x17xf32>, vector<16x239xf32> -> vector<16x256xf32>
    %291 = vector.broadcast %20 : vector<1x256xf32> to vector<16x256xf32>
    %292 = arith.mulf %290, %291 : vector<16x256xf32>
    %293 = arith.truncf %292 : vector<16x256xf32> to vector<16x256xbf16>
    %c720 = arith.constant 720 : index
    %c0_117 = arith.constant 0 : index
    %294 = vector.load %arg13[%c720, %c0_117] : memref<864x256xbf16, #tpu.memory_space<vmem>>, vector<16x256xbf16>
    tpu.vector_store %arg13[%c720, %c0_117], %293 {strides = array<i32>} : memref<864x256xbf16, #tpu.memory_space<vmem>>, vector<16x256xbf16>,
    %cst_118 = arith.constant 0.000000e+00 : f32
    %295 = vector.broadcast %cst_118 : f32 to vector<16x16xf32>
    %296 = vector.extract_strided_slice %287 {offsets = [0, 0], sizes = [16, 240], strides = [1, 1]} : vector<16x256xf32> to vector<16x240xf32>
    %297 = tpu.concatenate %295, %296 in 1 : vector<16x16xf32>, vector<16x240xf32> -> vector<16x256xf32>
    %298 = arith.truncf %297 : vector<16x256xf32> to vector<16x256xbf16>
    %c736 = arith.constant 736 : index
    %c0_119 = arith.constant 0 : index
    %299 = vector.load %arg13[%c736, %c0_119] : memref<864x256xbf16, #tpu.memory_space<vmem>>, vector<16x256xbf16>
    tpu.vector_store %arg13[%c736, %c0_119], %298 {strides = array<i32>} : memref<864x256xbf16, #tpu.memory_space<vmem>>, vector<16x256xbf16>,
    %cst_120 = arith.constant 0.000000e+00 : f32
    %300 = vector.broadcast %cst_120 : f32 to vector<16x15xf32>
    %301 = vector.extract_strided_slice %287 {offsets = [0, 0], sizes = [16, 241], strides = [1, 1]} : vector<16x256xf32> to vector<16x241xf32>
    %302 = tpu.concatenate %300, %301 in 1 : vector<16x15xf32>, vector<16x241xf32> -> vector<16x256xf32>
    %303 = vector.broadcast %24 : vector<1x256xf32> to vector<16x256xf32>
    %304 = arith.mulf %302, %303 : vector<16x256xf32>
    %305 = arith.truncf %304 : vector<16x256xf32> to vector<16x256xbf16>
    %c752 = arith.constant 752 : index
    %c0_121 = arith.constant 0 : index
    %306 = vector.load %arg13[%c752, %c0_121] : memref<864x256xbf16, #tpu.memory_space<vmem>>, vector<16x256xbf16>
    tpu.vector_store %arg13[%c752, %c0_121], %305 {strides = array<i32>} : memref<864x256xbf16, #tpu.memory_space<vmem>>, vector<16x256xbf16>,
    %cst_122 = arith.constant 0.000000e+00 : f32
    %307 = vector.broadcast %cst_122 : f32 to vector<16x1xf32>
    %308 = vector.extract_strided_slice %287 {offsets = [0, 0], sizes = [16, 255], strides = [1, 1]} : vector<16x256xf32> to vector<16x255xf32>
    %309 = tpu.concatenate %307, %308 in 1 : vector<16x1xf32>, vector<16x255xf32> -> vector<16x256xf32>
    %310 = vector.broadcast %20 : vector<1x256xf32> to vector<16x256xf32>
    %311 = arith.mulf %309, %310 : vector<16x256xf32>
    %312 = arith.truncf %311 : vector<16x256xf32> to vector<16x256xbf16>
    %c768 = arith.constant 768 : index
    %c0_123 = arith.constant 0 : index
    %313 = vector.load %arg13[%c768, %c0_123] : memref<864x256xbf16, #tpu.memory_space<vmem>>, vector<16x256xbf16>
    tpu.vector_store %arg13[%c768, %c0_123], %312 {strides = array<i32>} : memref<864x256xbf16, #tpu.memory_space<vmem>>, vector<16x256xbf16>,
    %314 = arith.truncf %287 : vector<16x256xf32> to vector<16x256xbf16>
    %c784 = arith.constant 784 : index
    %c0_124 = arith.constant 0 : index
    %315 = vector.load %arg13[%c784, %c0_124] : memref<864x256xbf16, #tpu.memory_space<vmem>>, vector<16x256xbf16>
    tpu.vector_store %arg13[%c784, %c0_124], %314 {strides = array<i32>} : memref<864x256xbf16, #tpu.memory_space<vmem>>, vector<16x256xbf16>,
    %316 = vector.extract_strided_slice %287 {offsets = [0, 1], sizes = [16, 255], strides = [1, 1]} : vector<16x256xf32> to vector<16x255xf32>
    %cst_125 = arith.constant 0.000000e+00 : f32
    %317 = vector.broadcast %cst_125 : f32 to vector<16x1xf32>
    %318 = tpu.concatenate %316, %317 in 1 : vector<16x255xf32>, vector<16x1xf32> -> vector<16x256xf32>
    %319 = vector.broadcast %24 : vector<1x256xf32> to vector<16x256xf32>
    %320 = arith.mulf %318, %319 : vector<16x256xf32>
    %321 = arith.truncf %320 : vector<16x256xf32> to vector<16x256xbf16>
    %c800 = arith.constant 800 : index
    %c0_126 = arith.constant 0 : index
    %322 = vector.load %arg13[%c800, %c0_126] : memref<864x256xbf16, #tpu.memory_space<vmem>>, vector<16x256xbf16>
    tpu.vector_store %arg13[%c800, %c0_126], %321 {strides = array<i32>} : memref<864x256xbf16, #tpu.memory_space<vmem>>, vector<16x256xbf16>,
    %323 = vector.extract_strided_slice %287 {offsets = [0, 15], sizes = [16, 241], strides = [1, 1]} : vector<16x256xf32> to vector<16x241xf32>
    %cst_127 = arith.constant 0.000000e+00 : f32
    %324 = vector.broadcast %cst_127 : f32 to vector<16x15xf32>
    %325 = tpu.concatenate %323, %324 in 1 : vector<16x241xf32>, vector<16x15xf32> -> vector<16x256xf32>
    %326 = vector.broadcast %20 : vector<1x256xf32> to vector<16x256xf32>
    %327 = arith.mulf %325, %326 : vector<16x256xf32>
    %328 = arith.truncf %327 : vector<16x256xf32> to vector<16x256xbf16>
    %c816 = arith.constant 816 : index
    %c0_128 = arith.constant 0 : index
    %329 = vector.load %arg13[%c816, %c0_128] : memref<864x256xbf16, #tpu.memory_space<vmem>>, vector<16x256xbf16>
    tpu.vector_store %arg13[%c816, %c0_128], %328 {strides = array<i32>} : memref<864x256xbf16, #tpu.memory_space<vmem>>, vector<16x256xbf16>,
    %330 = vector.extract_strided_slice %287 {offsets = [0, 16], sizes = [16, 240], strides = [1, 1]} : vector<16x256xf32> to vector<16x240xf32>
    %cst_129 = arith.constant 0.000000e+00 : f32
    %331 = vector.broadcast %cst_129 : f32 to vector<16x16xf32>
    %332 = tpu.concatenate %330, %331 in 1 : vector<16x240xf32>, vector<16x16xf32> -> vector<16x256xf32>
    %333 = arith.truncf %332 : vector<16x256xf32> to vector<16x256xbf16>
    %c832 = arith.constant 832 : index
    %c0_130 = arith.constant 0 : index
    %334 = vector.load %arg13[%c832, %c0_130] : memref<864x256xbf16, #tpu.memory_space<vmem>>, vector<16x256xbf16>
    tpu.vector_store %arg13[%c832, %c0_130], %333 {strides = array<i32>} : memref<864x256xbf16, #tpu.memory_space<vmem>>, vector<16x256xbf16>,
    %335 = vector.extract_strided_slice %287 {offsets = [0, 17], sizes = [16, 239], strides = [1, 1]} : vector<16x256xf32> to vector<16x239xf32>
    %cst_131 = arith.constant 0.000000e+00 : f32
    %336 = vector.broadcast %cst_131 : f32 to vector<16x17xf32>
    %337 = tpu.concatenate %335, %336 in 1 : vector<16x239xf32>, vector<16x17xf32> -> vector<16x256xf32>
    %338 = vector.broadcast %24 : vector<1x256xf32> to vector<16x256xf32>
    %339 = arith.mulf %337, %338 : vector<16x256xf32>
    %340 = arith.truncf %339 : vector<16x256xf32> to vector<16x256xbf16>
    %c848 = arith.constant 848 : index
    %c0_132 = arith.constant 0 : index
    %341 = vector.load %arg13[%c848, %c0_132] : memref<864x256xbf16, #tpu.memory_space<vmem>>, vector<16x256xbf16>
    tpu.vector_store %arg13[%c848, %c0_132], %340 {strides = array<i32>} : memref<864x256xbf16, #tpu.memory_space<vmem>>, vector<16x256xbf16>,
    %c0_133 = arith.constant 0 : index
    %c0_134 = arith.constant 0 : index
    %c0_135 = arith.constant 0 : index
    %342 = vector.load %arg6[%c0_133, %c0_134, %c0_135] : memref<3x32x864xbf16, #tpu.memory_space<vmem>>, vector<1x32x864xbf16>
    %343 = vector.shape_cast %342 : vector<1x32x864xbf16> to vector<32x864xbf16>
    %c0_136 = arith.constant 0 : index
    %c0_137 = arith.constant 0 : index
    %344 = vector.load %arg13[%c0_136, %c0_137] : memref<864x256xbf16, #tpu.memory_space<vmem>>, vector<864x256xbf16>
    %cst_138 = arith.constant dense<0.000000e+00> : vector<32x256xf32>
    %345 = tpu.matmul %343, %344, %cst_138 {dimension_numbers = #tpu.dot_dimension_numbers<[1], [0], [0], [1], [0, 0, 1, 1], [], []>} : vector<32x864xbf16>, vector<864x256xbf16>, vector<32x256xf32> -> vector<32x256xf32>
    %c0_139 = arith.constant 0 : index
    %c0_140 = arith.constant 0 : index
    %c0_141 = arith.constant 0 : index
    %346 = vector.load %arg11[%c0_139, %c0_140, %c0_141] : memref<3x32x1xf32, #tpu.memory_space<vmem>>, vector<1x32x1xf32>
    %347 = vector.shape_cast %346 : vector<1x32x1xf32> to vector<32x1xf32>
    %348 = vector.broadcast %347 : vector<32x1xf32> to vector<32x256xf32>
    %349 = arith.addf %345, %348 : vector<32x256xf32>
    %cst_142 = arith.constant 2.000000e-01 : f32
    %350 = vector.broadcast %cst_142 : f32 to vector<32x256xf32>
    %351 = arith.mulf %349, %350 : vector<32x256xf32>
    %c0_143 = arith.constant 0 : index
    %c0_144 = arith.constant 0 : index
    %352 = vector.load %arg14[%c0_143, %c0_144] : memref<32x256xf32, #tpu.memory_space<vmem>>, vector<32x256xf32>
    %353 = arith.addf %351, %352 : vector<32x256xf32>
    %c0_145 = arith.constant 0 : index
    %c0_146 = arith.constant 0 : index
    %354 = vector.load %arg14[%c0_145, %c0_146] : memref<32x256xf32, #tpu.memory_space<vmem>>, vector<32x256xf32>
    tpu.vector_store %arg14[%c0_145, %c0_146], %353 {strides = array<i32>} : memref<32x256xf32, #tpu.memory_space<vmem>>, vector<32x256xf32>,
    %cst_147 = arith.constant 0.000000e+00 : f32
    %355 = vector.broadcast %cst_147 : f32 to vector<32x17xf32>
    %356 = vector.extract_strided_slice %353 {offsets = [0, 0], sizes = [32, 239], strides = [1, 1]} : vector<32x256xf32> to vector<32x239xf32>
    %357 = tpu.concatenate %355, %356 in 1 : vector<32x17xf32>, vector<32x239xf32> -> vector<32x256xf32>
    %358 = vector.broadcast %20 : vector<1x256xf32> to vector<32x256xf32>
    %359 = arith.mulf %357, %358 : vector<32x256xf32>
    %360 = arith.truncf %359 : vector<32x256xf32> to vector<32x256xbf16>
    %c0_148 = arith.constant 0 : index
    %c0_149 = arith.constant 0 : index
    %361 = vector.load %arg13[%c0_148, %c0_149] : memref<864x256xbf16, #tpu.memory_space<vmem>>, vector<32x256xbf16>
    tpu.vector_store %arg13[%c0_148, %c0_149], %360 {strides = array<i32>} : memref<864x256xbf16, #tpu.memory_space<vmem>>, vector<32x256xbf16>,
    %cst_150 = arith.constant 0.000000e+00 : f32
    %362 = vector.broadcast %cst_150 : f32 to vector<32x16xf32>
    %363 = vector.extract_strided_slice %353 {offsets = [0, 0], sizes = [32, 240], strides = [1, 1]} : vector<32x256xf32> to vector<32x240xf32>
    %364 = tpu.concatenate %362, %363 in 1 : vector<32x16xf32>, vector<32x240xf32> -> vector<32x256xf32>
    %365 = arith.truncf %364 : vector<32x256xf32> to vector<32x256xbf16>
    %c32_151 = arith.constant 32 : index
    %c0_152 = arith.constant 0 : index
    %366 = vector.load %arg13[%c32_151, %c0_152] : memref<864x256xbf16, #tpu.memory_space<vmem>>, vector<32x256xbf16>
    tpu.vector_store %arg13[%c32_151, %c0_152], %365 {strides = array<i32>} : memref<864x256xbf16, #tpu.memory_space<vmem>>, vector<32x256xbf16>,
    %cst_153 = arith.constant 0.000000e+00 : f32
    %367 = vector.broadcast %cst_153 : f32 to vector<32x15xf32>
    %368 = vector.extract_strided_slice %353 {offsets = [0, 0], sizes = [32, 241], strides = [1, 1]} : vector<32x256xf32> to vector<32x241xf32>
    %369 = tpu.concatenate %367, %368 in 1 : vector<32x15xf32>, vector<32x241xf32> -> vector<32x256xf32>
    %370 = vector.broadcast %24 : vector<1x256xf32> to vector<32x256xf32>
    %371 = arith.mulf %369, %370 : vector<32x256xf32>
    %372 = arith.truncf %371 : vector<32x256xf32> to vector<32x256xbf16>
    %c64_154 = arith.constant 64 : index
    %c0_155 = arith.constant 0 : index
    %373 = vector.load %arg13[%c64_154, %c0_155] : memref<864x256xbf16, #tpu.memory_space<vmem>>, vector<32x256xbf16>
    tpu.vector_store %arg13[%c64_154, %c0_155], %372 {strides = array<i32>} : memref<864x256xbf16, #tpu.memory_space<vmem>>, vector<32x256xbf16>,
    %cst_156 = arith.constant 0.000000e+00 : f32
    %374 = vector.broadcast %cst_156 : f32 to vector<32x1xf32>
    %375 = vector.extract_strided_slice %353 {offsets = [0, 0], sizes = [32, 255], strides = [1, 1]} : vector<32x256xf32> to vector<32x255xf32>
    %376 = tpu.concatenate %374, %375 in 1 : vector<32x1xf32>, vector<32x255xf32> -> vector<32x256xf32>
    %377 = vector.broadcast %20 : vector<1x256xf32> to vector<32x256xf32>
    %378 = arith.mulf %376, %377 : vector<32x256xf32>
    %379 = arith.truncf %378 : vector<32x256xf32> to vector<32x256xbf16>
    %c96_157 = arith.constant 96 : index
    %c0_158 = arith.constant 0 : index
    %380 = vector.load %arg13[%c96_157, %c0_158] : memref<864x256xbf16, #tpu.memory_space<vmem>>, vector<32x256xbf16>
    tpu.vector_store %arg13[%c96_157, %c0_158], %379 {strides = array<i32>} : memref<864x256xbf16, #tpu.memory_space<vmem>>, vector<32x256xbf16>,
    %381 = arith.truncf %353 : vector<32x256xf32> to vector<32x256xbf16>
    %c128_159 = arith.constant 128 : index
    %c0_160 = arith.constant 0 : index
    %382 = vector.load %arg13[%c128_159, %c0_160] : memref<864x256xbf16, #tpu.memory_space<vmem>>, vector<32x256xbf16>
    tpu.vector_store %arg13[%c128_159, %c0_160], %381 {strides = array<i32>} : memref<864x256xbf16, #tpu.memory_space<vmem>>, vector<32x256xbf16>,
    %383 = vector.extract_strided_slice %353 {offsets = [0, 1], sizes = [32, 255], strides = [1, 1]} : vector<32x256xf32> to vector<32x255xf32>
    %cst_161 = arith.constant 0.000000e+00 : f32
    %384 = vector.broadcast %cst_161 : f32 to vector<32x1xf32>
    %385 = tpu.concatenate %383, %384 in 1 : vector<32x255xf32>, vector<32x1xf32> -> vector<32x256xf32>
    %386 = vector.broadcast %24 : vector<1x256xf32> to vector<32x256xf32>
    %387 = arith.mulf %385, %386 : vector<32x256xf32>
    %388 = arith.truncf %387 : vector<32x256xf32> to vector<32x256xbf16>
    %c160_162 = arith.constant 160 : index
    %c0_163 = arith.constant 0 : index
    %389 = vector.load %arg13[%c160_162, %c0_163] : memref<864x256xbf16, #tpu.memory_space<vmem>>, vector<32x256xbf16>
    tpu.vector_store %arg13[%c160_162, %c0_163], %388 {strides = array<i32>} : memref<864x256xbf16, #tpu.memory_space<vmem>>, vector<32x256xbf16>,
    %390 = vector.extract_strided_slice %353 {offsets = [0, 15], sizes = [32, 241], strides = [1, 1]} : vector<32x256xf32> to vector<32x241xf32>
    %cst_164 = arith.constant 0.000000e+00 : f32
    %391 = vector.broadcast %cst_164 : f32 to vector<32x15xf32>
    %392 = tpu.concatenate %390, %391 in 1 : vector<32x241xf32>, vector<32x15xf32> -> vector<32x256xf32>
    %393 = vector.broadcast %20 : vector<1x256xf32> to vector<32x256xf32>
    %394 = arith.mulf %392, %393 : vector<32x256xf32>
    %395 = arith.truncf %394 : vector<32x256xf32> to vector<32x256xbf16>
    %c192_165 = arith.constant 192 : index
    %c0_166 = arith.constant 0 : index
    %396 = vector.load %arg13[%c192_165, %c0_166] : memref<864x256xbf16, #tpu.memory_space<vmem>>, vector<32x256xbf16>
    tpu.vector_store %arg13[%c192_165, %c0_166], %395 {strides = array<i32>} : memref<864x256xbf16, #tpu.memory_space<vmem>>, vector<32x256xbf16>,
    %397 = vector.extract_strided_slice %353 {offsets = [0, 16], sizes = [32, 240], strides = [1, 1]} : vector<32x256xf32> to vector<32x240xf32>
    %cst_167 = arith.constant 0.000000e+00 : f32
    %398 = vector.broadcast %cst_167 : f32 to vector<32x16xf32>
    %399 = tpu.concatenate %397, %398 in 1 : vector<32x240xf32>, vector<32x16xf32> -> vector<32x256xf32>
    %400 = arith.truncf %399 : vector<32x256xf32> to vector<32x256xbf16>
    %c224_168 = arith.constant 224 : index
    %c0_169 = arith.constant 0 : index
    %401 = vector.load %arg13[%c224_168, %c0_169] : memref<864x256xbf16, #tpu.memory_space<vmem>>, vector<32x256xbf16>
    tpu.vector_store %arg13[%c224_168, %c0_169], %400 {strides = array<i32>} : memref<864x256xbf16, #tpu.memory_space<vmem>>, vector<32x256xbf16>,
    %402 = vector.extract_strided_slice %353 {offsets = [0, 17], sizes = [32, 239], strides = [1, 1]} : vector<32x256xf32> to vector<32x239xf32>
    %cst_170 = arith.constant 0.000000e+00 : f32
    %403 = vector.broadcast %cst_170 : f32 to vector<32x17xf32>
    %404 = tpu.concatenate %402, %403 in 1 : vector<32x239xf32>, vector<32x17xf32> -> vector<32x256xf32>
    %405 = vector.broadcast %24 : vector<1x256xf32> to vector<32x256xf32>
    %406 = arith.mulf %404, %405 : vector<32x256xf32>
    %407 = arith.truncf %406 : vector<32x256xf32> to vector<32x256xbf16>
    %c256_171 = arith.constant 256 : index
    %c0_172 = arith.constant 0 : index
    %408 = vector.load %arg13[%c256_171, %c0_172] : memref<864x256xbf16, #tpu.memory_space<vmem>>, vector<32x256xbf16>
    tpu.vector_store %arg13[%c256_171, %c0_172], %407 {strides = array<i32>} : memref<864x256xbf16, #tpu.memory_space<vmem>>, vector<32x256xbf16>,
    %c1 = arith.constant 1 : index
    %c0_173 = arith.constant 0 : index
    %c0_174 = arith.constant 0 : index
    %409 = vector.load %arg2[%c1, %c0_173, %c0_174] : memref<3x16x288xbf16, #tpu.memory_space<vmem>>, vector<1x16x288xbf16>
    %410 = vector.shape_cast %409 : vector<1x16x288xbf16> to vector<16x288xbf16>
    %c0_175 = arith.constant 0 : index
    %c0_176 = arith.constant 0 : index
    %411 = vector.load %arg13[%c0_175, %c0_176] : memref<864x256xbf16, #tpu.memory_space<vmem>>, vector<288x256xbf16>
    %cst_177 = arith.constant dense<0.000000e+00> : vector<16x256xf32>
    %412 = tpu.matmul %410, %411, %cst_177 {dimension_numbers = #tpu.dot_dimension_numbers<[1], [0], [0], [1], [0, 0, 1, 1], [], []>} : vector<16x288xbf16>, vector<288x256xbf16>, vector<16x256xf32> -> vector<16x256xf32>
    %c1_178 = arith.constant 1 : index
    %c0_179 = arith.constant 0 : index
    %c0_180 = arith.constant 0 : index
    %413 = vector.load %arg7[%c1_178, %c0_179, %c0_180] : memref<3x16x1xf32, #tpu.memory_space<vmem>>, vector<1x16x1xf32>
    %414 = vector.shape_cast %413 : vector<1x16x1xf32> to vector<16x1xf32>
    %415 = vector.broadcast %414 : vector<16x1xf32> to vector<16x256xf32>
    %416 = arith.addf %412, %415 : vector<16x256xf32>
    %cst_181 = arith.constant 2.000000e-01 : f32
    %417 = vector.broadcast %cst_181 : f32 to vector<16x256xf32>
    %418 = arith.mulf %417, %416 : vector<16x256xf32>
    %419 = arith.maximumf %416, %418 : vector<16x256xf32>
    %cst_182 = arith.constant 0.000000e+00 : f32
    %420 = vector.broadcast %cst_182 : f32 to vector<16x17xf32>
    %421 = vector.extract_strided_slice %419 {offsets = [0, 0], sizes = [16, 239], strides = [1, 1]} : vector<16x256xf32> to vector<16x239xf32>
    %422 = tpu.concatenate %420, %421 in 1 : vector<16x17xf32>, vector<16x239xf32> -> vector<16x256xf32>
    %423 = vector.broadcast %20 : vector<1x256xf32> to vector<16x256xf32>
    %424 = arith.mulf %422, %423 : vector<16x256xf32>
    %425 = arith.truncf %424 : vector<16x256xf32> to vector<16x256xbf16>
    %c288_183 = arith.constant 288 : index
    %c0_184 = arith.constant 0 : index
    %426 = vector.load %arg13[%c288_183, %c0_184] : memref<864x256xbf16, #tpu.memory_space<vmem>>, vector<16x256xbf16>
    tpu.vector_store %arg13[%c288_183, %c0_184], %425 {strides = array<i32>} : memref<864x256xbf16, #tpu.memory_space<vmem>>, vector<16x256xbf16>,
    %cst_185 = arith.constant 0.000000e+00 : f32
    %427 = vector.broadcast %cst_185 : f32 to vector<16x16xf32>
    %428 = vector.extract_strided_slice %419 {offsets = [0, 0], sizes = [16, 240], strides = [1, 1]} : vector<16x256xf32> to vector<16x240xf32>
    %429 = tpu.concatenate %427, %428 in 1 : vector<16x16xf32>, vector<16x240xf32> -> vector<16x256xf32>
    %430 = arith.truncf %429 : vector<16x256xf32> to vector<16x256xbf16>
    %c304_186 = arith.constant 304 : index
    %c0_187 = arith.constant 0 : index
    %431 = vector.load %arg13[%c304_186, %c0_187] : memref<864x256xbf16, #tpu.memory_space<vmem>>, vector<16x256xbf16>
    tpu.vector_store %arg13[%c304_186, %c0_187], %430 {strides = array<i32>} : memref<864x256xbf16, #tpu.memory_space<vmem>>, vector<16x256xbf16>,
    %cst_188 = arith.constant 0.000000e+00 : f32
    %432 = vector.broadcast %cst_188 : f32 to vector<16x15xf32>
    %433 = vector.extract_strided_slice %419 {offsets = [0, 0], sizes = [16, 241], strides = [1, 1]} : vector<16x256xf32> to vector<16x241xf32>
    %434 = tpu.concatenate %432, %433 in 1 : vector<16x15xf32>, vector<16x241xf32> -> vector<16x256xf32>
    %435 = vector.broadcast %24 : vector<1x256xf32> to vector<16x256xf32>
    %436 = arith.mulf %434, %435 : vector<16x256xf32>
    %437 = arith.truncf %436 : vector<16x256xf32> to vector<16x256xbf16>
    %c320_189 = arith.constant 320 : index
    %c0_190 = arith.constant 0 : index
    %438 = vector.load %arg13[%c320_189, %c0_190] : memref<864x256xbf16, #tpu.memory_space<vmem>>, vector<16x256xbf16>
    tpu.vector_store %arg13[%c320_189, %c0_190], %437 {strides = array<i32>} : memref<864x256xbf16, #tpu.memory_space<vmem>>, vector<16x256xbf16>,
    %cst_191 = arith.constant 0.000000e+00 : f32
    %439 = vector.broadcast %cst_191 : f32 to vector<16x1xf32>
    %440 = vector.extract_strided_slice %419 {offsets = [0, 0], sizes = [16, 255], strides = [1, 1]} : vector<16x256xf32> to vector<16x255xf32>
    %441 = tpu.concatenate %439, %440 in 1 : vector<16x1xf32>, vector<16x255xf32> -> vector<16x256xf32>
    %442 = vector.broadcast %20 : vector<1x256xf32> to vector<16x256xf32>
    %443 = arith.mulf %441, %442 : vector<16x256xf32>
    %444 = arith.truncf %443 : vector<16x256xf32> to vector<16x256xbf16>
    %c336_192 = arith.constant 336 : index
    %c0_193 = arith.constant 0 : index
    %445 = vector.load %arg13[%c336_192, %c0_193] : memref<864x256xbf16, #tpu.memory_space<vmem>>, vector<16x256xbf16>
    tpu.vector_store %arg13[%c336_192, %c0_193], %444 {strides = array<i32>} : memref<864x256xbf16, #tpu.memory_space<vmem>>, vector<16x256xbf16>,
    %446 = arith.truncf %419 : vector<16x256xf32> to vector<16x256xbf16>
    %c352_194 = arith.constant 352 : index
    %c0_195 = arith.constant 0 : index
    %447 = vector.load %arg13[%c352_194, %c0_195] : memref<864x256xbf16, #tpu.memory_space<vmem>>, vector<16x256xbf16>
    tpu.vector_store %arg13[%c352_194, %c0_195], %446 {strides = array<i32>} : memref<864x256xbf16, #tpu.memory_space<vmem>>, vector<16x256xbf16>,
    %448 = vector.extract_strided_slice %419 {offsets = [0, 1], sizes = [16, 255], strides = [1, 1]} : vector<16x256xf32> to vector<16x255xf32>
    %cst_196 = arith.constant 0.000000e+00 : f32
    %449 = vector.broadcast %cst_196 : f32 to vector<16x1xf32>
    %450 = tpu.concatenate %448, %449 in 1 : vector<16x255xf32>, vector<16x1xf32> -> vector<16x256xf32>
    %451 = vector.broadcast %24 : vector<1x256xf32> to vector<16x256xf32>
    %452 = arith.mulf %450, %451 : vector<16x256xf32>
    %453 = arith.truncf %452 : vector<16x256xf32> to vector<16x256xbf16>
    %c368_197 = arith.constant 368 : index
    %c0_198 = arith.constant 0 : index
    %454 = vector.load %arg13[%c368_197, %c0_198] : memref<864x256xbf16, #tpu.memory_space<vmem>>, vector<16x256xbf16>
    tpu.vector_store %arg13[%c368_197, %c0_198], %453 {strides = array<i32>} : memref<864x256xbf16, #tpu.memory_space<vmem>>, vector<16x256xbf16>,
    %455 = vector.extract_strided_slice %419 {offsets = [0, 15], sizes = [16, 241], strides = [1, 1]} : vector<16x256xf32> to vector<16x241xf32>
    %cst_199 = arith.constant 0.000000e+00 : f32
    %456 = vector.broadcast %cst_199 : f32 to vector<16x15xf32>
    %457 = tpu.concatenate %455, %456 in 1 : vector<16x241xf32>, vector<16x15xf32> -> vector<16x256xf32>
    %458 = vector.broadcast %20 : vector<1x256xf32> to vector<16x256xf32>
    %459 = arith.mulf %457, %458 : vector<16x256xf32>
    %460 = arith.truncf %459 : vector<16x256xf32> to vector<16x256xbf16>
    %c384_200 = arith.constant 384 : index
    %c0_201 = arith.constant 0 : index
    %461 = vector.load %arg13[%c384_200, %c0_201] : memref<864x256xbf16, #tpu.memory_space<vmem>>, vector<16x256xbf16>
    tpu.vector_store %arg13[%c384_200, %c0_201], %460 {strides = array<i32>} : memref<864x256xbf16, #tpu.memory_space<vmem>>, vector<16x256xbf16>,
    %462 = vector.extract_strided_slice %419 {offsets = [0, 16], sizes = [16, 240], strides = [1, 1]} : vector<16x256xf32> to vector<16x240xf32>
    %cst_202 = arith.constant 0.000000e+00 : f32
    %463 = vector.broadcast %cst_202 : f32 to vector<16x16xf32>
    %464 = tpu.concatenate %462, %463 in 1 : vector<16x240xf32>, vector<16x16xf32> -> vector<16x256xf32>
    %465 = arith.truncf %464 : vector<16x256xf32> to vector<16x256xbf16>
    %c400_203 = arith.constant 400 : index
    %c0_204 = arith.constant 0 : index
    %466 = vector.load %arg13[%c400_203, %c0_204] : memref<864x256xbf16, #tpu.memory_space<vmem>>, vector<16x256xbf16>
    tpu.vector_store %arg13[%c400_203, %c0_204], %465 {strides = array<i32>} : memref<864x256xbf16, #tpu.memory_space<vmem>>, vector<16x256xbf16>,
    %467 = vector.extract_strided_slice %419 {offsets = [0, 17], sizes = [16, 239], strides = [1, 1]} : vector<16x256xf32> to vector<16x239xf32>
    %cst_205 = arith.constant 0.000000e+00 : f32
    %468 = vector.broadcast %cst_205 : f32 to vector<16x17xf32>
    %469 = tpu.concatenate %467, %468 in 1 : vector<16x239xf32>, vector<16x17xf32> -> vector<16x256xf32>
    %470 = vector.broadcast %24 : vector<1x256xf32> to vector<16x256xf32>
    %471 = arith.mulf %469, %470 : vector<16x256xf32>
    %472 = arith.truncf %471 : vector<16x256xf32> to vector<16x256xbf16>
    %c416_206 = arith.constant 416 : index
    %c0_207 = arith.constant 0 : index
    %473 = vector.load %arg13[%c416_206, %c0_207] : memref<864x256xbf16, #tpu.memory_space<vmem>>, vector<16x256xbf16>
    tpu.vector_store %arg13[%c416_206, %c0_207], %472 {strides = array<i32>} : memref<864x256xbf16, #tpu.memory_space<vmem>>, vector<16x256xbf16>,
    %c1_208 = arith.constant 1 : index
    %c0_209 = arith.constant 0 : index
    %c0_210 = arith.constant 0 : index
    %474 = vector.load %arg3[%c1_208, %c0_209, %c0_210] : memref<3x16x432xbf16, #tpu.memory_space<vmem>>, vector<1x16x432xbf16>
    %475 = vector.shape_cast %474 : vector<1x16x432xbf16> to vector<16x432xbf16>
    %c0_211 = arith.constant 0 : index
    %c0_212 = arith.constant 0 : index
    %476 = vector.load %arg13[%c0_211, %c0_212] : memref<864x256xbf16, #tpu.memory_space<vmem>>, vector<432x256xbf16>
    %cst_213 = arith.constant dense<0.000000e+00> : vector<16x256xf32>
    %477 = tpu.matmul %475, %476, %cst_213 {dimension_numbers = #tpu.dot_dimension_numbers<[1], [0], [0], [1], [0, 0, 1, 1], [], []>} : vector<16x432xbf16>, vector<432x256xbf16>, vector<16x256xf32> -> vector<16x256xf32>
    %c1_214 = arith.constant 1 : index
    %c0_215 = arith.constant 0 : index
    %c0_216 = arith.constant 0 : index
    %478 = vector.load %arg8[%c1_214, %c0_215, %c0_216] : memref<3x16x1xf32, #tpu.memory_space<vmem>>, vector<1x16x1xf32>
    %479 = vector.shape_cast %478 : vector<1x16x1xf32> to vector<16x1xf32>
    %480 = vector.broadcast %479 : vector<16x1xf32> to vector<16x256xf32>
    %481 = arith.addf %477, %480 : vector<16x256xf32>
    %cst_217 = arith.constant 2.000000e-01 : f32
    %482 = vector.broadcast %cst_217 : f32 to vector<16x256xf32>
    %483 = arith.mulf %482, %481 : vector<16x256xf32>
    %484 = arith.maximumf %481, %483 : vector<16x256xf32>
    %cst_218 = arith.constant 0.000000e+00 : f32
    %485 = vector.broadcast %cst_218 : f32 to vector<16x17xf32>
    %486 = vector.extract_strided_slice %484 {offsets = [0, 0], sizes = [16, 239], strides = [1, 1]} : vector<16x256xf32> to vector<16x239xf32>
    %487 = tpu.concatenate %485, %486 in 1 : vector<16x17xf32>, vector<16x239xf32> -> vector<16x256xf32>
    %488 = vector.broadcast %20 : vector<1x256xf32> to vector<16x256xf32>
    %489 = arith.mulf %487, %488 : vector<16x256xf32>
    %490 = arith.truncf %489 : vector<16x256xf32> to vector<16x256xbf16>
    %c432_219 = arith.constant 432 : index
    %c0_220 = arith.constant 0 : index
    %491 = vector.load %arg13[%c432_219, %c0_220] : memref<864x256xbf16, #tpu.memory_space<vmem>>, vector<16x256xbf16>
    tpu.vector_store %arg13[%c432_219, %c0_220], %490 {strides = array<i32>} : memref<864x256xbf16, #tpu.memory_space<vmem>>, vector<16x256xbf16>,
    %cst_221 = arith.constant 0.000000e+00 : f32
    %492 = vector.broadcast %cst_221 : f32 to vector<16x16xf32>
    %493 = vector.extract_strided_slice %484 {offsets = [0, 0], sizes = [16, 240], strides = [1, 1]} : vector<16x256xf32> to vector<16x240xf32>
    %494 = tpu.concatenate %492, %493 in 1 : vector<16x16xf32>, vector<16x240xf32> -> vector<16x256xf32>
    %495 = arith.truncf %494 : vector<16x256xf32> to vector<16x256xbf16>
    %c448_222 = arith.constant 448 : index
    %c0_223 = arith.constant 0 : index
    %496 = vector.load %arg13[%c448_222, %c0_223] : memref<864x256xbf16, #tpu.memory_space<vmem>>, vector<16x256xbf16>
    tpu.vector_store %arg13[%c448_222, %c0_223], %495 {strides = array<i32>} : memref<864x256xbf16, #tpu.memory_space<vmem>>, vector<16x256xbf16>,
    %cst_224 = arith.constant 0.000000e+00 : f32
    %497 = vector.broadcast %cst_224 : f32 to vector<16x15xf32>
    %498 = vector.extract_strided_slice %484 {offsets = [0, 0], sizes = [16, 241], strides = [1, 1]} : vector<16x256xf32> to vector<16x241xf32>
    %499 = tpu.concatenate %497, %498 in 1 : vector<16x15xf32>, vector<16x241xf32> -> vector<16x256xf32>
    %500 = vector.broadcast %24 : vector<1x256xf32> to vector<16x256xf32>
    %501 = arith.mulf %499, %500 : vector<16x256xf32>
    %502 = arith.truncf %501 : vector<16x256xf32> to vector<16x256xbf16>
    %c464_225 = arith.constant 464 : index
    %c0_226 = arith.constant 0 : index
    %503 = vector.load %arg13[%c464_225, %c0_226] : memref<864x256xbf16, #tpu.memory_space<vmem>>, vector<16x256xbf16>
    tpu.vector_store %arg13[%c464_225, %c0_226], %502 {strides = array<i32>} : memref<864x256xbf16, #tpu.memory_space<vmem>>, vector<16x256xbf16>,
    %cst_227 = arith.constant 0.000000e+00 : f32
    %504 = vector.broadcast %cst_227 : f32 to vector<16x1xf32>
    %505 = vector.extract_strided_slice %484 {offsets = [0, 0], sizes = [16, 255], strides = [1, 1]} : vector<16x256xf32> to vector<16x255xf32>
    %506 = tpu.concatenate %504, %505 in 1 : vector<16x1xf32>, vector<16x255xf32> -> vector<16x256xf32>
    %507 = vector.broadcast %20 : vector<1x256xf32> to vector<16x256xf32>
    %508 = arith.mulf %506, %507 : vector<16x256xf32>
    %509 = arith.truncf %508 : vector<16x256xf32> to vector<16x256xbf16>
    %c480_228 = arith.constant 480 : index
    %c0_229 = arith.constant 0 : index
    %510 = vector.load %arg13[%c480_228, %c0_229] : memref<864x256xbf16, #tpu.memory_space<vmem>>, vector<16x256xbf16>
    tpu.vector_store %arg13[%c480_228, %c0_229], %509 {strides = array<i32>} : memref<864x256xbf16, #tpu.memory_space<vmem>>, vector<16x256xbf16>,
    %511 = arith.truncf %484 : vector<16x256xf32> to vector<16x256xbf16>
    %c496_230 = arith.constant 496 : index
    %c0_231 = arith.constant 0 : index
    %512 = vector.load %arg13[%c496_230, %c0_231] : memref<864x256xbf16, #tpu.memory_space<vmem>>, vector<16x256xbf16>
    tpu.vector_store %arg13[%c496_230, %c0_231], %511 {strides = array<i32>} : memref<864x256xbf16, #tpu.memory_space<vmem>>, vector<16x256xbf16>,
    %513 = vector.extract_strided_slice %484 {offsets = [0, 1], sizes = [16, 255], strides = [1, 1]} : vector<16x256xf32> to vector<16x255xf32>
    %cst_232 = arith.constant 0.000000e+00 : f32
    %514 = vector.broadcast %cst_232 : f32 to vector<16x1xf32>
    %515 = tpu.concatenate %513, %514 in 1 : vector<16x255xf32>, vector<16x1xf32> -> vector<16x256xf32>
    %516 = vector.broadcast %24 : vector<1x256xf32> to vector<16x256xf32>
    %517 = arith.mulf %515, %516 : vector<16x256xf32>
    %518 = arith.truncf %517 : vector<16x256xf32> to vector<16x256xbf16>
    %c512_233 = arith.constant 512 : index
    %c0_234 = arith.constant 0 : index
    %519 = vector.load %arg13[%c512_233, %c0_234] : memref<864x256xbf16, #tpu.memory_space<vmem>>, vector<16x256xbf16>
    tpu.vector_store %arg13[%c512_233, %c0_234], %518 {strides = array<i32>} : memref<864x256xbf16, #tpu.memory_space<vmem>>, vector<16x256xbf16>,
    %520 = vector.extract_strided_slice %484 {offsets = [0, 15], sizes = [16, 241], strides = [1, 1]} : vector<16x256xf32> to vector<16x241xf32>
    %cst_235 = arith.constant 0.000000e+00 : f32
    %521 = vector.broadcast %cst_235 : f32 to vector<16x15xf32>
    %522 = tpu.concatenate %520, %521 in 1 : vector<16x241xf32>, vector<16x15xf32> -> vector<16x256xf32>
    %523 = vector.broadcast %20 : vector<1x256xf32> to vector<16x256xf32>
    %524 = arith.mulf %522, %523 : vector<16x256xf32>
    %525 = arith.truncf %524 : vector<16x256xf32> to vector<16x256xbf16>
    %c528_236 = arith.constant 528 : index
    %c0_237 = arith.constant 0 : index
    %526 = vector.load %arg13[%c528_236, %c0_237] : memref<864x256xbf16, #tpu.memory_space<vmem>>, vector<16x256xbf16>
    tpu.vector_store %arg13[%c528_236, %c0_237], %525 {strides = array<i32>} : memref<864x256xbf16, #tpu.memory_space<vmem>>, vector<16x256xbf16>,
    %527 = vector.extract_strided_slice %484 {offsets = [0, 16], sizes = [16, 240], strides = [1, 1]} : vector<16x256xf32> to vector<16x240xf32>
    %cst_238 = arith.constant 0.000000e+00 : f32
    %528 = vector.broadcast %cst_238 : f32 to vector<16x16xf32>
    %529 = tpu.concatenate %527, %528 in 1 : vector<16x240xf32>, vector<16x16xf32> -> vector<16x256xf32>
    %530 = arith.truncf %529 : vector<16x256xf32> to vector<16x256xbf16>
    %c544_239 = arith.constant 544 : index
    %c0_240 = arith.constant 0 : index
    %531 = vector.load %arg13[%c544_239, %c0_240] : memref<864x256xbf16, #tpu.memory_space<vmem>>, vector<16x256xbf16>
    tpu.vector_store %arg13[%c544_239, %c0_240], %530 {strides = array<i32>} : memref<864x256xbf16, #tpu.memory_space<vmem>>, vector<16x256xbf16>,
    %532 = vector.extract_strided_slice %484 {offsets = [0, 17], sizes = [16, 239], strides = [1, 1]} : vector<16x256xf32> to vector<16x239xf32>
    %cst_241 = arith.constant 0.000000e+00 : f32
    %533 = vector.broadcast %cst_241 : f32 to vector<16x17xf32>
    %534 = tpu.concatenate %532, %533 in 1 : vector<16x239xf32>, vector<16x17xf32> -> vector<16x256xf32>
    %535 = vector.broadcast %24 : vector<1x256xf32> to vector<16x256xf32>
    %536 = arith.mulf %534, %535 : vector<16x256xf32>
    %537 = arith.truncf %536 : vector<16x256xf32> to vector<16x256xbf16>
    %c560_242 = arith.constant 560 : index
    %c0_243 = arith.constant 0 : index
    %538 = vector.load %arg13[%c560_242, %c0_243] : memref<864x256xbf16, #tpu.memory_space<vmem>>, vector<16x256xbf16>
    tpu.vector_store %arg13[%c560_242, %c0_243], %537 {strides = array<i32>} : memref<864x256xbf16, #tpu.memory_space<vmem>>, vector<16x256xbf16>,
    %c1_244 = arith.constant 1 : index
    %c0_245 = arith.constant 0 : index
    %c0_246 = arith.constant 0 : index
    %539 = vector.load %arg4[%c1_244, %c0_245, %c0_246] : memref<3x16x576xbf16, #tpu.memory_space<vmem>>, vector<1x16x576xbf16>
    %540 = vector.shape_cast %539 : vector<1x16x576xbf16> to vector<16x576xbf16>
    %c0_247 = arith.constant 0 : index
    %c0_248 = arith.constant 0 : index
    %541 = vector.load %arg13[%c0_247, %c0_248] : memref<864x256xbf16, #tpu.memory_space<vmem>>, vector<576x256xbf16>
    %cst_249 = arith.constant dense<0.000000e+00> : vector<16x256xf32>
    %542 = tpu.matmul %540, %541, %cst_249 {dimension_numbers = #tpu.dot_dimension_numbers<[1], [0], [0], [1], [0, 0, 1, 1], [], []>} : vector<16x576xbf16>, vector<576x256xbf16>, vector<16x256xf32> -> vector<16x256xf32>
    %c1_250 = arith.constant 1 : index
    %c0_251 = arith.constant 0 : index
    %c0_252 = arith.constant 0 : index
    %543 = vector.load %arg9[%c1_250, %c0_251, %c0_252] : memref<3x16x1xf32, #tpu.memory_space<vmem>>, vector<1x16x1xf32>
    %544 = vector.shape_cast %543 : vector<1x16x1xf32> to vector<16x1xf32>
    %545 = vector.broadcast %544 : vector<16x1xf32> to vector<16x256xf32>
    %546 = arith.addf %542, %545 : vector<16x256xf32>
    %cst_253 = arith.constant 2.000000e-01 : f32
    %547 = vector.broadcast %cst_253 : f32 to vector<16x256xf32>
    %548 = arith.mulf %547, %546 : vector<16x256xf32>
    %549 = arith.maximumf %546, %548 : vector<16x256xf32>
    %cst_254 = arith.constant 0.000000e+00 : f32
    %550 = vector.broadcast %cst_254 : f32 to vector<16x17xf32>
    %551 = vector.extract_strided_slice %549 {offsets = [0, 0], sizes = [16, 239], strides = [1, 1]} : vector<16x256xf32> to vector<16x239xf32>
    %552 = tpu.concatenate %550, %551 in 1 : vector<16x17xf32>, vector<16x239xf32> -> vector<16x256xf32>
    %553 = vector.broadcast %20 : vector<1x256xf32> to vector<16x256xf32>
    %554 = arith.mulf %552, %553 : vector<16x256xf32>
    %555 = arith.truncf %554 : vector<16x256xf32> to vector<16x256xbf16>
    %c576_255 = arith.constant 576 : index
    %c0_256 = arith.constant 0 : index
    %556 = vector.load %arg13[%c576_255, %c0_256] : memref<864x256xbf16, #tpu.memory_space<vmem>>, vector<16x256xbf16>
    tpu.vector_store %arg13[%c576_255, %c0_256], %555 {strides = array<i32>} : memref<864x256xbf16, #tpu.memory_space<vmem>>, vector<16x256xbf16>,
    %cst_257 = arith.constant 0.000000e+00 : f32
    %557 = vector.broadcast %cst_257 : f32 to vector<16x16xf32>
    %558 = vector.extract_strided_slice %549 {offsets = [0, 0], sizes = [16, 240], strides = [1, 1]} : vector<16x256xf32> to vector<16x240xf32>
    %559 = tpu.concatenate %557, %558 in 1 : vector<16x16xf32>, vector<16x240xf32> -> vector<16x256xf32>
    %560 = arith.truncf %559 : vector<16x256xf32> to vector<16x256xbf16>
    %c592_258 = arith.constant 592 : index
    %c0_259 = arith.constant 0 : index
    %561 = vector.load %arg13[%c592_258, %c0_259] : memref<864x256xbf16, #tpu.memory_space<vmem>>, vector<16x256xbf16>
    tpu.vector_store %arg13[%c592_258, %c0_259], %560 {strides = array<i32>} : memref<864x256xbf16, #tpu.memory_space<vmem>>, vector<16x256xbf16>,
    %cst_260 = arith.constant 0.000000e+00 : f32
    %562 = vector.broadcast %cst_260 : f32 to vector<16x15xf32>
    %563 = vector.extract_strided_slice %549 {offsets = [0, 0], sizes = [16, 241], strides = [1, 1]} : vector<16x256xf32> to vector<16x241xf32>
    %564 = tpu.concatenate %562, %563 in 1 : vector<16x15xf32>, vector<16x241xf32> -> vector<16x256xf32>
    %565 = vector.broadcast %24 : vector<1x256xf32> to vector<16x256xf32>
    %566 = arith.mulf %564, %565 : vector<16x256xf32>
    %567 = arith.truncf %566 : vector<16x256xf32> to vector<16x256xbf16>
    %c608_261 = arith.constant 608 : index
    %c0_262 = arith.constant 0 : index
    %568 = vector.load %arg13[%c608_261, %c0_262] : memref<864x256xbf16, #tpu.memory_space<vmem>>, vector<16x256xbf16>
    tpu.vector_store %arg13[%c608_261, %c0_262], %567 {strides = array<i32>} : memref<864x256xbf16, #tpu.memory_space<vmem>>, vector<16x256xbf16>,
    %cst_263 = arith.constant 0.000000e+00 : f32
    %569 = vector.broadcast %cst_263 : f32 to vector<16x1xf32>
    %570 = vector.extract_strided_slice %549 {offsets = [0, 0], sizes = [16, 255], strides = [1, 1]} : vector<16x256xf32> to vector<16x255xf32>
    %571 = tpu.concatenate %569, %570 in 1 : vector<16x1xf32>, vector<16x255xf32> -> vector<16x256xf32>
    %572 = vector.broadcast %20 : vector<1x256xf32> to vector<16x256xf32>
    %573 = arith.mulf %571, %572 : vector<16x256xf32>
    %574 = arith.truncf %573 : vector<16x256xf32> to vector<16x256xbf16>
    %c624_264 = arith.constant 624 : index
    %c0_265 = arith.constant 0 : index
    %575 = vector.load %arg13[%c624_264, %c0_265] : memref<864x256xbf16, #tpu.memory_space<vmem>>, vector<16x256xbf16>
    tpu.vector_store %arg13[%c624_264, %c0_265], %574 {strides = array<i32>} : memref<864x256xbf16, #tpu.memory_space<vmem>>, vector<16x256xbf16>,
    %576 = arith.truncf %549 : vector<16x256xf32> to vector<16x256xbf16>
    %c640_266 = arith.constant 640 : index
    %c0_267 = arith.constant 0 : index
    %577 = vector.load %arg13[%c640_266, %c0_267] : memref<864x256xbf16, #tpu.memory_space<vmem>>, vector<16x256xbf16>
    tpu.vector_store %arg13[%c640_266, %c0_267], %576 {strides = array<i32>} : memref<864x256xbf16, #tpu.memory_space<vmem>>, vector<16x256xbf16>,
    %578 = vector.extract_strided_slice %549 {offsets = [0, 1], sizes = [16, 255], strides = [1, 1]} : vector<16x256xf32> to vector<16x255xf32>
    %cst_268 = arith.constant 0.000000e+00 : f32
    %579 = vector.broadcast %cst_268 : f32 to vector<16x1xf32>
    %580 = tpu.concatenate %578, %579 in 1 : vector<16x255xf32>, vector<16x1xf32> -> vector<16x256xf32>
    %581 = vector.broadcast %24 : vector<1x256xf32> to vector<16x256xf32>
    %582 = arith.mulf %580, %581 : vector<16x256xf32>
    %583 = arith.truncf %582 : vector<16x256xf32> to vector<16x256xbf16>
    %c656_269 = arith.constant 656 : index
    %c0_270 = arith.constant 0 : index
    %584 = vector.load %arg13[%c656_269, %c0_270] : memref<864x256xbf16, #tpu.memory_space<vmem>>, vector<16x256xbf16>
    tpu.vector_store %arg13[%c656_269, %c0_270], %583 {strides = array<i32>} : memref<864x256xbf16, #tpu.memory_space<vmem>>, vector<16x256xbf16>,
    %585 = vector.extract_strided_slice %549 {offsets = [0, 15], sizes = [16, 241], strides = [1, 1]} : vector<16x256xf32> to vector<16x241xf32>
    %cst_271 = arith.constant 0.000000e+00 : f32
    %586 = vector.broadcast %cst_271 : f32 to vector<16x15xf32>
    %587 = tpu.concatenate %585, %586 in 1 : vector<16x241xf32>, vector<16x15xf32> -> vector<16x256xf32>
    %588 = vector.broadcast %20 : vector<1x256xf32> to vector<16x256xf32>
    %589 = arith.mulf %587, %588 : vector<16x256xf32>
    %590 = arith.truncf %589 : vector<16x256xf32> to vector<16x256xbf16>
    %c672_272 = arith.constant 672 : index
    %c0_273 = arith.constant 0 : index
    %591 = vector.load %arg13[%c672_272, %c0_273] : memref<864x256xbf16, #tpu.memory_space<vmem>>, vector<16x256xbf16>
    tpu.vector_store %arg13[%c672_272, %c0_273], %590 {strides = array<i32>} : memref<864x256xbf16, #tpu.memory_space<vmem>>, vector<16x256xbf16>,
    %592 = vector.extract_strided_slice %549 {offsets = [0, 16], sizes = [16, 240], strides = [1, 1]} : vector<16x256xf32> to vector<16x240xf32>
    %cst_274 = arith.constant 0.000000e+00 : f32
    %593 = vector.broadcast %cst_274 : f32 to vector<16x16xf32>
    %594 = tpu.concatenate %592, %593 in 1 : vector<16x240xf32>, vector<16x16xf32> -> vector<16x256xf32>
    %595 = arith.truncf %594 : vector<16x256xf32> to vector<16x256xbf16>
    %c688_275 = arith.constant 688 : index
    %c0_276 = arith.constant 0 : index
    %596 = vector.load %arg13[%c688_275, %c0_276] : memref<864x256xbf16, #tpu.memory_space<vmem>>, vector<16x256xbf16>
    tpu.vector_store %arg13[%c688_275, %c0_276], %595 {strides = array<i32>} : memref<864x256xbf16, #tpu.memory_space<vmem>>, vector<16x256xbf16>,
    %597 = vector.extract_strided_slice %549 {offsets = [0, 17], sizes = [16, 239], strides = [1, 1]} : vector<16x256xf32> to vector<16x239xf32>
    %cst_277 = arith.constant 0.000000e+00 : f32
    %598 = vector.broadcast %cst_277 : f32 to vector<16x17xf32>
    %599 = tpu.concatenate %597, %598 in 1 : vector<16x239xf32>, vector<16x17xf32> -> vector<16x256xf32>
    %600 = vector.broadcast %24 : vector<1x256xf32> to vector<16x256xf32>
    %601 = arith.mulf %599, %600 : vector<16x256xf32>
    %602 = arith.truncf %601 : vector<16x256xf32> to vector<16x256xbf16>
    %c704_278 = arith.constant 704 : index
    %c0_279 = arith.constant 0 : index
    %603 = vector.load %arg13[%c704_278, %c0_279] : memref<864x256xbf16, #tpu.memory_space<vmem>>, vector<16x256xbf16>
    tpu.vector_store %arg13[%c704_278, %c0_279], %602 {strides = array<i32>} : memref<864x256xbf16, #tpu.memory_space<vmem>>, vector<16x256xbf16>,
    %c1_280 = arith.constant 1 : index
    %c0_281 = arith.constant 0 : index
    %c0_282 = arith.constant 0 : index
    %604 = vector.load %arg5[%c1_280, %c0_281, %c0_282] : memref<3x16x720xbf16, #tpu.memory_space<vmem>>, vector<1x16x720xbf16>
    %605 = vector.shape_cast %604 : vector<1x16x720xbf16> to vector<16x720xbf16>
    %c0_283 = arith.constant 0 : index
    %c0_284 = arith.constant 0 : index
    %606 = vector.load %arg13[%c0_283, %c0_284] : memref<864x256xbf16, #tpu.memory_space<vmem>>, vector<720x256xbf16>
    %cst_285 = arith.constant dense<0.000000e+00> : vector<16x256xf32>
    %607 = tpu.matmul %605, %606, %cst_285 {dimension_numbers = #tpu.dot_dimension_numbers<[1], [0], [0], [1], [0, 0, 1, 1], [], []>} : vector<16x720xbf16>, vector<720x256xbf16>, vector<16x256xf32> -> vector<16x256xf32>
    %c1_286 = arith.constant 1 : index
    %c0_287 = arith.constant 0 : index
    %c0_288 = arith.constant 0 : index
    %608 = vector.load %arg10[%c1_286, %c0_287, %c0_288] : memref<3x16x1xf32, #tpu.memory_space<vmem>>, vector<1x16x1xf32>
    %609 = vector.shape_cast %608 : vector<1x16x1xf32> to vector<16x1xf32>
    %610 = vector.broadcast %609 : vector<16x1xf32> to vector<16x256xf32>
    %611 = arith.addf %607, %610 : vector<16x256xf32>
    %cst_289 = arith.constant 2.000000e-01 : f32
    %612 = vector.broadcast %cst_289 : f32 to vector<16x256xf32>
    %613 = arith.mulf %612, %611 : vector<16x256xf32>
    %614 = arith.maximumf %611, %613 : vector<16x256xf32>
    %cst_290 = arith.constant 0.000000e+00 : f32
    %615 = vector.broadcast %cst_290 : f32 to vector<16x17xf32>
    %616 = vector.extract_strided_slice %614 {offsets = [0, 0], sizes = [16, 239], strides = [1, 1]} : vector<16x256xf32> to vector<16x239xf32>
    %617 = tpu.concatenate %615, %616 in 1 : vector<16x17xf32>, vector<16x239xf32> -> vector<16x256xf32>
    %618 = vector.broadcast %20 : vector<1x256xf32> to vector<16x256xf32>
    %619 = arith.mulf %617, %618 : vector<16x256xf32>
    %620 = arith.truncf %619 : vector<16x256xf32> to vector<16x256xbf16>
    %c720_291 = arith.constant 720 : index
    %c0_292 = arith.constant 0 : index
    %621 = vector.load %arg13[%c720_291, %c0_292] : memref<864x256xbf16, #tpu.memory_space<vmem>>, vector<16x256xbf16>
    tpu.vector_store %arg13[%c720_291, %c0_292], %620 {strides = array<i32>} : memref<864x256xbf16, #tpu.memory_space<vmem>>, vector<16x256xbf16>,
    %cst_293 = arith.constant 0.000000e+00 : f32
    %622 = vector.broadcast %cst_293 : f32 to vector<16x16xf32>
    %623 = vector.extract_strided_slice %614 {offsets = [0, 0], sizes = [16, 240], strides = [1, 1]} : vector<16x256xf32> to vector<16x240xf32>
    %624 = tpu.concatenate %622, %623 in 1 : vector<16x16xf32>, vector<16x240xf32> -> vector<16x256xf32>
    %625 = arith.truncf %624 : vector<16x256xf32> to vector<16x256xbf16>
    %c736_294 = arith.constant 736 : index
    %c0_295 = arith.constant 0 : index
    %626 = vector.load %arg13[%c736_294, %c0_295] : memref<864x256xbf16, #tpu.memory_space<vmem>>, vector<16x256xbf16>
    tpu.vector_store %arg13[%c736_294, %c0_295], %625 {strides = array<i32>} : memref<864x256xbf16, #tpu.memory_space<vmem>>, vector<16x256xbf16>,
    %cst_296 = arith.constant 0.000000e+00 : f32
    %627 = vector.broadcast %cst_296 : f32 to vector<16x15xf32>
    %628 = vector.extract_strided_slice %614 {offsets = [0, 0], sizes = [16, 241], strides = [1, 1]} : vector<16x256xf32> to vector<16x241xf32>
    %629 = tpu.concatenate %627, %628 in 1 : vector<16x15xf32>, vector<16x241xf32> -> vector<16x256xf32>
    %630 = vector.broadcast %24 : vector<1x256xf32> to vector<16x256xf32>
    %631 = arith.mulf %629, %630 : vector<16x256xf32>
    %632 = arith.truncf %631 : vector<16x256xf32> to vector<16x256xbf16>
    %c752_297 = arith.constant 752 : index
    %c0_298 = arith.constant 0 : index
    %633 = vector.load %arg13[%c752_297, %c0_298] : memref<864x256xbf16, #tpu.memory_space<vmem>>, vector<16x256xbf16>
    tpu.vector_store %arg13[%c752_297, %c0_298], %632 {strides = array<i32>} : memref<864x256xbf16, #tpu.memory_space<vmem>>, vector<16x256xbf16>,
    %cst_299 = arith.constant 0.000000e+00 : f32
    %634 = vector.broadcast %cst_299 : f32 to vector<16x1xf32>
    %635 = vector.extract_strided_slice %614 {offsets = [0, 0], sizes = [16, 255], strides = [1, 1]} : vector<16x256xf32> to vector<16x255xf32>
    %636 = tpu.concatenate %634, %635 in 1 : vector<16x1xf32>, vector<16x255xf32> -> vector<16x256xf32>
    %637 = vector.broadcast %20 : vector<1x256xf32> to vector<16x256xf32>
    %638 = arith.mulf %636, %637 : vector<16x256xf32>
    %639 = arith.truncf %638 : vector<16x256xf32> to vector<16x256xbf16>
    %c768_300 = arith.constant 768 : index
    %c0_301 = arith.constant 0 : index
    %640 = vector.load %arg13[%c768_300, %c0_301] : memref<864x256xbf16, #tpu.memory_space<vmem>>, vector<16x256xbf16>
    tpu.vector_store %arg13[%c768_300, %c0_301], %639 {strides = array<i32>} : memref<864x256xbf16, #tpu.memory_space<vmem>>, vector<16x256xbf16>,
    %641 = arith.truncf %614 : vector<16x256xf32> to vector<16x256xbf16>
    %c784_302 = arith.constant 784 : index
    %c0_303 = arith.constant 0 : index
    %642 = vector.load %arg13[%c784_302, %c0_303] : memref<864x256xbf16, #tpu.memory_space<vmem>>, vector<16x256xbf16>
    tpu.vector_store %arg13[%c784_302, %c0_303], %641 {strides = array<i32>} : memref<864x256xbf16, #tpu.memory_space<vmem>>, vector<16x256xbf16>,
    %643 = vector.extract_strided_slice %614 {offsets = [0, 1], sizes = [16, 255], strides = [1, 1]} : vector<16x256xf32> to vector<16x255xf32>
    %cst_304 = arith.constant 0.000000e+00 : f32
    %644 = vector.broadcast %cst_304 : f32 to vector<16x1xf32>
    %645 = tpu.concatenate %643, %644 in 1 : vector<16x255xf32>, vector<16x1xf32> -> vector<16x256xf32>
    %646 = vector.broadcast %24 : vector<1x256xf32> to vector<16x256xf32>
    %647 = arith.mulf %645, %646 : vector<16x256xf32>
    %648 = arith.truncf %647 : vector<16x256xf32> to vector<16x256xbf16>
    %c800_305 = arith.constant 800 : index
    %c0_306 = arith.constant 0 : index
    %649 = vector.load %arg13[%c800_305, %c0_306] : memref<864x256xbf16, #tpu.memory_space<vmem>>, vector<16x256xbf16>
    tpu.vector_store %arg13[%c800_305, %c0_306], %648 {strides = array<i32>} : memref<864x256xbf16, #tpu.memory_space<vmem>>, vector<16x256xbf16>,
    %650 = vector.extract_strided_slice %614 {offsets = [0, 15], sizes = [16, 241], strides = [1, 1]} : vector<16x256xf32> to vector<16x241xf32>
    %cst_307 = arith.constant 0.000000e+00 : f32
    %651 = vector.broadcast %cst_307 : f32 to vector<16x15xf32>
    %652 = tpu.concatenate %650, %651 in 1 : vector<16x241xf32>, vector<16x15xf32> -> vector<16x256xf32>
    %653 = vector.broadcast %20 : vector<1x256xf32> to vector<16x256xf32>
    %654 = arith.mulf %652, %653 : vector<16x256xf32>
    %655 = arith.truncf %654 : vector<16x256xf32> to vector<16x256xbf16>
    %c816_308 = arith.constant 816 : index
    %c0_309 = arith.constant 0 : index
    %656 = vector.load %arg13[%c816_308, %c0_309] : memref<864x256xbf16, #tpu.memory_space<vmem>>, vector<16x256xbf16>
    tpu.vector_store %arg13[%c816_308, %c0_309], %655 {strides = array<i32>} : memref<864x256xbf16, #tpu.memory_space<vmem>>, vector<16x256xbf16>,
    %657 = vector.extract_strided_slice %614 {offsets = [0, 16], sizes = [16, 240], strides = [1, 1]} : vector<16x256xf32> to vector<16x240xf32>
    %cst_310 = arith.constant 0.000000e+00 : f32
    %658 = vector.broadcast %cst_310 : f32 to vector<16x16xf32>
    %659 = tpu.concatenate %657, %658 in 1 : vector<16x240xf32>, vector<16x16xf32> -> vector<16x256xf32>
    %660 = arith.truncf %659 : vector<16x256xf32> to vector<16x256xbf16>
    %c832_311 = arith.constant 832 : index
    %c0_312 = arith.constant 0 : index
    %661 = vector.load %arg13[%c832_311, %c0_312] : memref<864x256xbf16, #tpu.memory_space<vmem>>, vector<16x256xbf16>
    tpu.vector_store %arg13[%c832_311, %c0_312], %660 {strides = array<i32>} : memref<864x256xbf16, #tpu.memory_space<vmem>>, vector<16x256xbf16>,
    %662 = vector.extract_strided_slice %614 {offsets = [0, 17], sizes = [16, 239], strides = [1, 1]} : vector<16x256xf32> to vector<16x239xf32>
    %cst_313 = arith.constant 0.000000e+00 : f32
    %663 = vector.broadcast %cst_313 : f32 to vector<16x17xf32>
    %664 = tpu.concatenate %662, %663 in 1 : vector<16x239xf32>, vector<16x17xf32> -> vector<16x256xf32>
    %665 = vector.broadcast %24 : vector<1x256xf32> to vector<16x256xf32>
    %666 = arith.mulf %664, %665 : vector<16x256xf32>
    %667 = arith.truncf %666 : vector<16x256xf32> to vector<16x256xbf16>
    %c848_314 = arith.constant 848 : index
    %c0_315 = arith.constant 0 : index
    %668 = vector.load %arg13[%c848_314, %c0_315] : memref<864x256xbf16, #tpu.memory_space<vmem>>, vector<16x256xbf16>
    tpu.vector_store %arg13[%c848_314, %c0_315], %667 {strides = array<i32>} : memref<864x256xbf16, #tpu.memory_space<vmem>>, vector<16x256xbf16>,
    %c1_316 = arith.constant 1 : index
    %c0_317 = arith.constant 0 : index
    %c0_318 = arith.constant 0 : index
    %669 = vector.load %arg6[%c1_316, %c0_317, %c0_318] : memref<3x32x864xbf16, #tpu.memory_space<vmem>>, vector<1x32x864xbf16>
    %670 = vector.shape_cast %669 : vector<1x32x864xbf16> to vector<32x864xbf16>
    %c0_319 = arith.constant 0 : index
    %c0_320 = arith.constant 0 : index
    %671 = vector.load %arg13[%c0_319, %c0_320] : memref<864x256xbf16, #tpu.memory_space<vmem>>, vector<864x256xbf16>
    %cst_321 = arith.constant dense<0.000000e+00> : vector<32x256xf32>
    %672 = tpu.matmul %670, %671, %cst_321 {dimension_numbers = #tpu.dot_dimension_numbers<[1], [0], [0], [1], [0, 0, 1, 1], [], []>} : vector<32x864xbf16>, vector<864x256xbf16>, vector<32x256xf32> -> vector<32x256xf32>
    %c1_322 = arith.constant 1 : index
    %c0_323 = arith.constant 0 : index
    %c0_324 = arith.constant 0 : index
    %673 = vector.load %arg11[%c1_322, %c0_323, %c0_324] : memref<3x32x1xf32, #tpu.memory_space<vmem>>, vector<1x32x1xf32>
    %674 = vector.shape_cast %673 : vector<1x32x1xf32> to vector<32x1xf32>
    %675 = vector.broadcast %674 : vector<32x1xf32> to vector<32x256xf32>
    %676 = arith.addf %672, %675 : vector<32x256xf32>
    %cst_325 = arith.constant 2.000000e-01 : f32
    %677 = vector.broadcast %cst_325 : f32 to vector<32x256xf32>
    %678 = arith.mulf %676, %677 : vector<32x256xf32>
    %c0_326 = arith.constant 0 : index
    %c0_327 = arith.constant 0 : index
    %679 = vector.load %arg14[%c0_326, %c0_327] : memref<32x256xf32, #tpu.memory_space<vmem>>, vector<32x256xf32>
    %680 = arith.addf %678, %679 : vector<32x256xf32>
    %c0_328 = arith.constant 0 : index
    %c0_329 = arith.constant 0 : index
    %681 = vector.load %arg14[%c0_328, %c0_329] : memref<32x256xf32, #tpu.memory_space<vmem>>, vector<32x256xf32>
    tpu.vector_store %arg14[%c0_328, %c0_329], %680 {strides = array<i32>} : memref<32x256xf32, #tpu.memory_space<vmem>>, vector<32x256xf32>,
    %cst_330 = arith.constant 0.000000e+00 : f32
    %682 = vector.broadcast %cst_330 : f32 to vector<32x17xf32>
    %683 = vector.extract_strided_slice %680 {offsets = [0, 0], sizes = [32, 239], strides = [1, 1]} : vector<32x256xf32> to vector<32x239xf32>
    %684 = tpu.concatenate %682, %683 in 1 : vector<32x17xf32>, vector<32x239xf32> -> vector<32x256xf32>
    %685 = vector.broadcast %20 : vector<1x256xf32> to vector<32x256xf32>
    %686 = arith.mulf %684, %685 : vector<32x256xf32>
    %687 = arith.truncf %686 : vector<32x256xf32> to vector<32x256xbf16>
    %c0_331 = arith.constant 0 : index
    %c0_332 = arith.constant 0 : index
    %688 = vector.load %arg13[%c0_331, %c0_332] : memref<864x256xbf16, #tpu.memory_space<vmem>>, vector<32x256xbf16>
    tpu.vector_store %arg13[%c0_331, %c0_332], %687 {strides = array<i32>} : memref<864x256xbf16, #tpu.memory_space<vmem>>, vector<32x256xbf16>,
    %cst_333 = arith.constant 0.000000e+00 : f32
    %689 = vector.broadcast %cst_333 : f32 to vector<32x16xf32>
    %690 = vector.extract_strided_slice %680 {offsets = [0, 0], sizes = [32, 240], strides = [1, 1]} : vector<32x256xf32> to vector<32x240xf32>
    %691 = tpu.concatenate %689, %690 in 1 : vector<32x16xf32>, vector<32x240xf32> -> vector<32x256xf32>
    %692 = arith.truncf %691 : vector<32x256xf32> to vector<32x256xbf16>
    %c32_334 = arith.constant 32 : index
    %c0_335 = arith.constant 0 : index
    %693 = vector.load %arg13[%c32_334, %c0_335] : memref<864x256xbf16, #tpu.memory_space<vmem>>, vector<32x256xbf16>
    tpu.vector_store %arg13[%c32_334, %c0_335], %692 {strides = array<i32>} : memref<864x256xbf16, #tpu.memory_space<vmem>>, vector<32x256xbf16>,
    %cst_336 = arith.constant 0.000000e+00 : f32
    %694 = vector.broadcast %cst_336 : f32 to vector<32x15xf32>
    %695 = vector.extract_strided_slice %680 {offsets = [0, 0], sizes = [32, 241], strides = [1, 1]} : vector<32x256xf32> to vector<32x241xf32>
    %696 = tpu.concatenate %694, %695 in 1 : vector<32x15xf32>, vector<32x241xf32> -> vector<32x256xf32>
    %697 = vector.broadcast %24 : vector<1x256xf32> to vector<32x256xf32>
    %698 = arith.mulf %696, %697 : vector<32x256xf32>
    %699 = arith.truncf %698 : vector<32x256xf32> to vector<32x256xbf16>
    %c64_337 = arith.constant 64 : index
    %c0_338 = arith.constant 0 : index
    %700 = vector.load %arg13[%c64_337, %c0_338] : memref<864x256xbf16, #tpu.memory_space<vmem>>, vector<32x256xbf16>
    tpu.vector_store %arg13[%c64_337, %c0_338], %699 {strides = array<i32>} : memref<864x256xbf16, #tpu.memory_space<vmem>>, vector<32x256xbf16>,
    %cst_339 = arith.constant 0.000000e+00 : f32
    %701 = vector.broadcast %cst_339 : f32 to vector<32x1xf32>
    %702 = vector.extract_strided_slice %680 {offsets = [0, 0], sizes = [32, 255], strides = [1, 1]} : vector<32x256xf32> to vector<32x255xf32>
    %703 = tpu.concatenate %701, %702 in 1 : vector<32x1xf32>, vector<32x255xf32> -> vector<32x256xf32>
    %704 = vector.broadcast %20 : vector<1x256xf32> to vector<32x256xf32>
    %705 = arith.mulf %703, %704 : vector<32x256xf32>
    %706 = arith.truncf %705 : vector<32x256xf32> to vector<32x256xbf16>
    %c96_340 = arith.constant 96 : index
    %c0_341 = arith.constant 0 : index
    %707 = vector.load %arg13[%c96_340, %c0_341] : memref<864x256xbf16, #tpu.memory_space<vmem>>, vector<32x256xbf16>
    tpu.vector_store %arg13[%c96_340, %c0_341], %706 {strides = array<i32>} : memref<864x256xbf16, #tpu.memory_space<vmem>>, vector<32x256xbf16>,
    %708 = arith.truncf %680 : vector<32x256xf32> to vector<32x256xbf16>
    %c128_342 = arith.constant 128 : index
    %c0_343 = arith.constant 0 : index
    %709 = vector.load %arg13[%c128_342, %c0_343] : memref<864x256xbf16, #tpu.memory_space<vmem>>, vector<32x256xbf16>
    tpu.vector_store %arg13[%c128_342, %c0_343], %708 {strides = array<i32>} : memref<864x256xbf16, #tpu.memory_space<vmem>>, vector<32x256xbf16>,
    %710 = vector.extract_strided_slice %680 {offsets = [0, 1], sizes = [32, 255], strides = [1, 1]} : vector<32x256xf32> to vector<32x255xf32>
    %cst_344 = arith.constant 0.000000e+00 : f32
    %711 = vector.broadcast %cst_344 : f32 to vector<32x1xf32>
    %712 = tpu.concatenate %710, %711 in 1 : vector<32x255xf32>, vector<32x1xf32> -> vector<32x256xf32>
    %713 = vector.broadcast %24 : vector<1x256xf32> to vector<32x256xf32>
    %714 = arith.mulf %712, %713 : vector<32x256xf32>
    %715 = arith.truncf %714 : vector<32x256xf32> to vector<32x256xbf16>
    %c160_345 = arith.constant 160 : index
    %c0_346 = arith.constant 0 : index
    %716 = vector.load %arg13[%c160_345, %c0_346] : memref<864x256xbf16, #tpu.memory_space<vmem>>, vector<32x256xbf16>
    tpu.vector_store %arg13[%c160_345, %c0_346], %715 {strides = array<i32>} : memref<864x256xbf16, #tpu.memory_space<vmem>>, vector<32x256xbf16>,
    %717 = vector.extract_strided_slice %680 {offsets = [0, 15], sizes = [32, 241], strides = [1, 1]} : vector<32x256xf32> to vector<32x241xf32>
    %cst_347 = arith.constant 0.000000e+00 : f32
    %718 = vector.broadcast %cst_347 : f32 to vector<32x15xf32>
    %719 = tpu.concatenate %717, %718 in 1 : vector<32x241xf32>, vector<32x15xf32> -> vector<32x256xf32>
    %720 = vector.broadcast %20 : vector<1x256xf32> to vector<32x256xf32>
    %721 = arith.mulf %719, %720 : vector<32x256xf32>
    %722 = arith.truncf %721 : vector<32x256xf32> to vector<32x256xbf16>
    %c192_348 = arith.constant 192 : index
    %c0_349 = arith.constant 0 : index
    %723 = vector.load %arg13[%c192_348, %c0_349] : memref<864x256xbf16, #tpu.memory_space<vmem>>, vector<32x256xbf16>
    tpu.vector_store %arg13[%c192_348, %c0_349], %722 {strides = array<i32>} : memref<864x256xbf16, #tpu.memory_space<vmem>>, vector<32x256xbf16>,
    %724 = vector.extract_strided_slice %680 {offsets = [0, 16], sizes = [32, 240], strides = [1, 1]} : vector<32x256xf32> to vector<32x240xf32>
    %cst_350 = arith.constant 0.000000e+00 : f32
    %725 = vector.broadcast %cst_350 : f32 to vector<32x16xf32>
    %726 = tpu.concatenate %724, %725 in 1 : vector<32x240xf32>, vector<32x16xf32> -> vector<32x256xf32>
    %727 = arith.truncf %726 : vector<32x256xf32> to vector<32x256xbf16>
    %c224_351 = arith.constant 224 : index
    %c0_352 = arith.constant 0 : index
    %728 = vector.load %arg13[%c224_351, %c0_352] : memref<864x256xbf16, #tpu.memory_space<vmem>>, vector<32x256xbf16>
    tpu.vector_store %arg13[%c224_351, %c0_352], %727 {strides = array<i32>} : memref<864x256xbf16, #tpu.memory_space<vmem>>, vector<32x256xbf16>,
    %729 = vector.extract_strided_slice %680 {offsets = [0, 17], sizes = [32, 239], strides = [1, 1]} : vector<32x256xf32> to vector<32x239xf32>
    %cst_353 = arith.constant 0.000000e+00 : f32
    %730 = vector.broadcast %cst_353 : f32 to vector<32x17xf32>
    %731 = tpu.concatenate %729, %730 in 1 : vector<32x239xf32>, vector<32x17xf32> -> vector<32x256xf32>
    %732 = vector.broadcast %24 : vector<1x256xf32> to vector<32x256xf32>
    %733 = arith.mulf %731, %732 : vector<32x256xf32>
    %734 = arith.truncf %733 : vector<32x256xf32> to vector<32x256xbf16>
    %c256_354 = arith.constant 256 : index
    %c0_355 = arith.constant 0 : index
    %735 = vector.load %arg13[%c256_354, %c0_355] : memref<864x256xbf16, #tpu.memory_space<vmem>>, vector<32x256xbf16>
    tpu.vector_store %arg13[%c256_354, %c0_355], %734 {strides = array<i32>} : memref<864x256xbf16, #tpu.memory_space<vmem>>, vector<32x256xbf16>,
    %c2 = arith.constant 2 : index
    %c0_356 = arith.constant 0 : index
    %c0_357 = arith.constant 0 : index
    %736 = vector.load %arg2[%c2, %c0_356, %c0_357] : memref<3x16x288xbf16, #tpu.memory_space<vmem>>, vector<1x16x288xbf16>
    %737 = vector.shape_cast %736 : vector<1x16x288xbf16> to vector<16x288xbf16>
    %c0_358 = arith.constant 0 : index
    %c0_359 = arith.constant 0 : index
    %738 = vector.load %arg13[%c0_358, %c0_359] : memref<864x256xbf16, #tpu.memory_space<vmem>>, vector<288x256xbf16>
    %cst_360 = arith.constant dense<0.000000e+00> : vector<16x256xf32>
    %739 = tpu.matmul %737, %738, %cst_360 {dimension_numbers = #tpu.dot_dimension_numbers<[1], [0], [0], [1], [0, 0, 1, 1], [], []>} : vector<16x288xbf16>, vector<288x256xbf16>, vector<16x256xf32> -> vector<16x256xf32>
    %c2_361 = arith.constant 2 : index
    %c0_362 = arith.constant 0 : index
    %c0_363 = arith.constant 0 : index
    %740 = vector.load %arg7[%c2_361, %c0_362, %c0_363] : memref<3x16x1xf32, #tpu.memory_space<vmem>>, vector<1x16x1xf32>
    %741 = vector.shape_cast %740 : vector<1x16x1xf32> to vector<16x1xf32>
    %742 = vector.broadcast %741 : vector<16x1xf32> to vector<16x256xf32>
    %743 = arith.addf %739, %742 : vector<16x256xf32>
    %cst_364 = arith.constant 2.000000e-01 : f32
    %744 = vector.broadcast %cst_364 : f32 to vector<16x256xf32>
    %745 = arith.mulf %744, %743 : vector<16x256xf32>
    %746 = arith.maximumf %743, %745 : vector<16x256xf32>
    %cst_365 = arith.constant 0.000000e+00 : f32
    %747 = vector.broadcast %cst_365 : f32 to vector<16x17xf32>
    %748 = vector.extract_strided_slice %746 {offsets = [0, 0], sizes = [16, 239], strides = [1, 1]} : vector<16x256xf32> to vector<16x239xf32>
    %749 = tpu.concatenate %747, %748 in 1 : vector<16x17xf32>, vector<16x239xf32> -> vector<16x256xf32>
    %750 = vector.broadcast %20 : vector<1x256xf32> to vector<16x256xf32>
    %751 = arith.mulf %749, %750 : vector<16x256xf32>
    %752 = arith.truncf %751 : vector<16x256xf32> to vector<16x256xbf16>
    %c288_366 = arith.constant 288 : index
    %c0_367 = arith.constant 0 : index
    %753 = vector.load %arg13[%c288_366, %c0_367] : memref<864x256xbf16, #tpu.memory_space<vmem>>, vector<16x256xbf16>
    tpu.vector_store %arg13[%c288_366, %c0_367], %752 {strides = array<i32>} : memref<864x256xbf16, #tpu.memory_space<vmem>>, vector<16x256xbf16>,
    %cst_368 = arith.constant 0.000000e+00 : f32
    %754 = vector.broadcast %cst_368 : f32 to vector<16x16xf32>
    %755 = vector.extract_strided_slice %746 {offsets = [0, 0], sizes = [16, 240], strides = [1, 1]} : vector<16x256xf32> to vector<16x240xf32>
    %756 = tpu.concatenate %754, %755 in 1 : vector<16x16xf32>, vector<16x240xf32> -> vector<16x256xf32>
    %757 = arith.truncf %756 : vector<16x256xf32> to vector<16x256xbf16>
    %c304_369 = arith.constant 304 : index
    %c0_370 = arith.constant 0 : index
    %758 = vector.load %arg13[%c304_369, %c0_370] : memref<864x256xbf16, #tpu.memory_space<vmem>>, vector<16x256xbf16>
    tpu.vector_store %arg13[%c304_369, %c0_370], %757 {strides = array<i32>} : memref<864x256xbf16, #tpu.memory_space<vmem>>, vector<16x256xbf16>,
    %cst_371 = arith.constant 0.000000e+00 : f32
    %759 = vector.broadcast %cst_371 : f32 to vector<16x15xf32>
    %760 = vector.extract_strided_slice %746 {offsets = [0, 0], sizes = [16, 241], strides = [1, 1]} : vector<16x256xf32> to vector<16x241xf32>
    %761 = tpu.concatenate %759, %760 in 1 : vector<16x15xf32>, vector<16x241xf32> -> vector<16x256xf32>
    %762 = vector.broadcast %24 : vector<1x256xf32> to vector<16x256xf32>
    %763 = arith.mulf %761, %762 : vector<16x256xf32>
    %764 = arith.truncf %763 : vector<16x256xf32> to vector<16x256xbf16>
    %c320_372 = arith.constant 320 : index
    %c0_373 = arith.constant 0 : index
    %765 = vector.load %arg13[%c320_372, %c0_373] : memref<864x256xbf16, #tpu.memory_space<vmem>>, vector<16x256xbf16>
    tpu.vector_store %arg13[%c320_372, %c0_373], %764 {strides = array<i32>} : memref<864x256xbf16, #tpu.memory_space<vmem>>, vector<16x256xbf16>,
    %cst_374 = arith.constant 0.000000e+00 : f32
    %766 = vector.broadcast %cst_374 : f32 to vector<16x1xf32>
    %767 = vector.extract_strided_slice %746 {offsets = [0, 0], sizes = [16, 255], strides = [1, 1]} : vector<16x256xf32> to vector<16x255xf32>
    %768 = tpu.concatenate %766, %767 in 1 : vector<16x1xf32>, vector<16x255xf32> -> vector<16x256xf32>
    %769 = vector.broadcast %20 : vector<1x256xf32> to vector<16x256xf32>
    %770 = arith.mulf %768, %769 : vector<16x256xf32>
    %771 = arith.truncf %770 : vector<16x256xf32> to vector<16x256xbf16>
    %c336_375 = arith.constant 336 : index
    %c0_376 = arith.constant 0 : index
    %772 = vector.load %arg13[%c336_375, %c0_376] : memref<864x256xbf16, #tpu.memory_space<vmem>>, vector<16x256xbf16>
    tpu.vector_store %arg13[%c336_375, %c0_376], %771 {strides = array<i32>} : memref<864x256xbf16, #tpu.memory_space<vmem>>, vector<16x256xbf16>,
    %773 = arith.truncf %746 : vector<16x256xf32> to vector<16x256xbf16>
    %c352_377 = arith.constant 352 : index
    %c0_378 = arith.constant 0 : index
    %774 = vector.load %arg13[%c352_377, %c0_378] : memref<864x256xbf16, #tpu.memory_space<vmem>>, vector<16x256xbf16>
    tpu.vector_store %arg13[%c352_377, %c0_378], %773 {strides = array<i32>} : memref<864x256xbf16, #tpu.memory_space<vmem>>, vector<16x256xbf16>,
    %775 = vector.extract_strided_slice %746 {offsets = [0, 1], sizes = [16, 255], strides = [1, 1]} : vector<16x256xf32> to vector<16x255xf32>
    %cst_379 = arith.constant 0.000000e+00 : f32
    %776 = vector.broadcast %cst_379 : f32 to vector<16x1xf32>
    %777 = tpu.concatenate %775, %776 in 1 : vector<16x255xf32>, vector<16x1xf32> -> vector<16x256xf32>
    %778 = vector.broadcast %24 : vector<1x256xf32> to vector<16x256xf32>
    %779 = arith.mulf %777, %778 : vector<16x256xf32>
    %780 = arith.truncf %779 : vector<16x256xf32> to vector<16x256xbf16>
    %c368_380 = arith.constant 368 : index
    %c0_381 = arith.constant 0 : index
    %781 = vector.load %arg13[%c368_380, %c0_381] : memref<864x256xbf16, #tpu.memory_space<vmem>>, vector<16x256xbf16>
    tpu.vector_store %arg13[%c368_380, %c0_381], %780 {strides = array<i32>} : memref<864x256xbf16, #tpu.memory_space<vmem>>, vector<16x256xbf16>,
    %782 = vector.extract_strided_slice %746 {offsets = [0, 15], sizes = [16, 241], strides = [1, 1]} : vector<16x256xf32> to vector<16x241xf32>
    %cst_382 = arith.constant 0.000000e+00 : f32
    %783 = vector.broadcast %cst_382 : f32 to vector<16x15xf32>
    %784 = tpu.concatenate %782, %783 in 1 : vector<16x241xf32>, vector<16x15xf32> -> vector<16x256xf32>
    %785 = vector.broadcast %20 : vector<1x256xf32> to vector<16x256xf32>
    %786 = arith.mulf %784, %785 : vector<16x256xf32>
    %787 = arith.truncf %786 : vector<16x256xf32> to vector<16x256xbf16>
    %c384_383 = arith.constant 384 : index
    %c0_384 = arith.constant 0 : index
    %788 = vector.load %arg13[%c384_383, %c0_384] : memref<864x256xbf16, #tpu.memory_space<vmem>>, vector<16x256xbf16>
    tpu.vector_store %arg13[%c384_383, %c0_384], %787 {strides = array<i32>} : memref<864x256xbf16, #tpu.memory_space<vmem>>, vector<16x256xbf16>,
    %789 = vector.extract_strided_slice %746 {offsets = [0, 16], sizes = [16, 240], strides = [1, 1]} : vector<16x256xf32> to vector<16x240xf32>
    %cst_385 = arith.constant 0.000000e+00 : f32
    %790 = vector.broadcast %cst_385 : f32 to vector<16x16xf32>
    %791 = tpu.concatenate %789, %790 in 1 : vector<16x240xf32>, vector<16x16xf32> -> vector<16x256xf32>
    %792 = arith.truncf %791 : vector<16x256xf32> to vector<16x256xbf16>
    %c400_386 = arith.constant 400 : index
    %c0_387 = arith.constant 0 : index
    %793 = vector.load %arg13[%c400_386, %c0_387] : memref<864x256xbf16, #tpu.memory_space<vmem>>, vector<16x256xbf16>
    tpu.vector_store %arg13[%c400_386, %c0_387], %792 {strides = array<i32>} : memref<864x256xbf16, #tpu.memory_space<vmem>>, vector<16x256xbf16>,
    %794 = vector.extract_strided_slice %746 {offsets = [0, 17], sizes = [16, 239], strides = [1, 1]} : vector<16x256xf32> to vector<16x239xf32>
    %cst_388 = arith.constant 0.000000e+00 : f32
    %795 = vector.broadcast %cst_388 : f32 to vector<16x17xf32>
    %796 = tpu.concatenate %794, %795 in 1 : vector<16x239xf32>, vector<16x17xf32> -> vector<16x256xf32>
    %797 = vector.broadcast %24 : vector<1x256xf32> to vector<16x256xf32>
    %798 = arith.mulf %796, %797 : vector<16x256xf32>
    %799 = arith.truncf %798 : vector<16x256xf32> to vector<16x256xbf16>
    %c416_389 = arith.constant 416 : index
    %c0_390 = arith.constant 0 : index
    %800 = vector.load %arg13[%c416_389, %c0_390] : memref<864x256xbf16, #tpu.memory_space<vmem>>, vector<16x256xbf16>
    tpu.vector_store %arg13[%c416_389, %c0_390], %799 {strides = array<i32>} : memref<864x256xbf16, #tpu.memory_space<vmem>>, vector<16x256xbf16>,
    %c2_391 = arith.constant 2 : index
    %c0_392 = arith.constant 0 : index
    %c0_393 = arith.constant 0 : index
    %801 = vector.load %arg3[%c2_391, %c0_392, %c0_393] : memref<3x16x432xbf16, #tpu.memory_space<vmem>>, vector<1x16x432xbf16>
    %802 = vector.shape_cast %801 : vector<1x16x432xbf16> to vector<16x432xbf16>
    %c0_394 = arith.constant 0 : index
    %c0_395 = arith.constant 0 : index
    %803 = vector.load %arg13[%c0_394, %c0_395] : memref<864x256xbf16, #tpu.memory_space<vmem>>, vector<432x256xbf16>
    %cst_396 = arith.constant dense<0.000000e+00> : vector<16x256xf32>
    %804 = tpu.matmul %802, %803, %cst_396 {dimension_numbers = #tpu.dot_dimension_numbers<[1], [0], [0], [1], [0, 0, 1, 1], [], []>} : vector<16x432xbf16>, vector<432x256xbf16>, vector<16x256xf32> -> vector<16x256xf32>
    %c2_397 = arith.constant 2 : index
    %c0_398 = arith.constant 0 : index
    %c0_399 = arith.constant 0 : index
    %805 = vector.load %arg8[%c2_397, %c0_398, %c0_399] : memref<3x16x1xf32, #tpu.memory_space<vmem>>, vector<1x16x1xf32>
    %806 = vector.shape_cast %805 : vector<1x16x1xf32> to vector<16x1xf32>
    %807 = vector.broadcast %806 : vector<16x1xf32> to vector<16x256xf32>
    %808 = arith.addf %804, %807 : vector<16x256xf32>
    %cst_400 = arith.constant 2.000000e-01 : f32
    %809 = vector.broadcast %cst_400 : f32 to vector<16x256xf32>
    %810 = arith.mulf %809, %808 : vector<16x256xf32>
    %811 = arith.maximumf %808, %810 : vector<16x256xf32>
    %cst_401 = arith.constant 0.000000e+00 : f32
    %812 = vector.broadcast %cst_401 : f32 to vector<16x17xf32>
    %813 = vector.extract_strided_slice %811 {offsets = [0, 0], sizes = [16, 239], strides = [1, 1]} : vector<16x256xf32> to vector<16x239xf32>
    %814 = tpu.concatenate %812, %813 in 1 : vector<16x17xf32>, vector<16x239xf32> -> vector<16x256xf32>
    %815 = vector.broadcast %20 : vector<1x256xf32> to vector<16x256xf32>
    %816 = arith.mulf %814, %815 : vector<16x256xf32>
    %817 = arith.truncf %816 : vector<16x256xf32> to vector<16x256xbf16>
    %c432_402 = arith.constant 432 : index
    %c0_403 = arith.constant 0 : index
    %818 = vector.load %arg13[%c432_402, %c0_403] : memref<864x256xbf16, #tpu.memory_space<vmem>>, vector<16x256xbf16>
    tpu.vector_store %arg13[%c432_402, %c0_403], %817 {strides = array<i32>} : memref<864x256xbf16, #tpu.memory_space<vmem>>, vector<16x256xbf16>,
    %cst_404 = arith.constant 0.000000e+00 : f32
    %819 = vector.broadcast %cst_404 : f32 to vector<16x16xf32>
    %820 = vector.extract_strided_slice %811 {offsets = [0, 0], sizes = [16, 240], strides = [1, 1]} : vector<16x256xf32> to vector<16x240xf32>
    %821 = tpu.concatenate %819, %820 in 1 : vector<16x16xf32>, vector<16x240xf32> -> vector<16x256xf32>
    %822 = arith.truncf %821 : vector<16x256xf32> to vector<16x256xbf16>
    %c448_405 = arith.constant 448 : index
    %c0_406 = arith.constant 0 : index
    %823 = vector.load %arg13[%c448_405, %c0_406] : memref<864x256xbf16, #tpu.memory_space<vmem>>, vector<16x256xbf16>
    tpu.vector_store %arg13[%c448_405, %c0_406], %822 {strides = array<i32>} : memref<864x256xbf16, #tpu.memory_space<vmem>>, vector<16x256xbf16>,
    %cst_407 = arith.constant 0.000000e+00 : f32
    %824 = vector.broadcast %cst_407 : f32 to vector<16x15xf32>
    %825 = vector.extract_strided_slice %811 {offsets = [0, 0], sizes = [16, 241], strides = [1, 1]} : vector<16x256xf32> to vector<16x241xf32>
    %826 = tpu.concatenate %824, %825 in 1 : vector<16x15xf32>, vector<16x241xf32> -> vector<16x256xf32>
    %827 = vector.broadcast %24 : vector<1x256xf32> to vector<16x256xf32>
    %828 = arith.mulf %826, %827 : vector<16x256xf32>
    %829 = arith.truncf %828 : vector<16x256xf32> to vector<16x256xbf16>
    %c464_408 = arith.constant 464 : index
    %c0_409 = arith.constant 0 : index
    %830 = vector.load %arg13[%c464_408, %c0_409] : memref<864x256xbf16, #tpu.memory_space<vmem>>, vector<16x256xbf16>
    tpu.vector_store %arg13[%c464_408, %c0_409], %829 {strides = array<i32>} : memref<864x256xbf16, #tpu.memory_space<vmem>>, vector<16x256xbf16>,
    %cst_410 = arith.constant 0.000000e+00 : f32
    %831 = vector.broadcast %cst_410 : f32 to vector<16x1xf32>
    %832 = vector.extract_strided_slice %811 {offsets = [0, 0], sizes = [16, 255], strides = [1, 1]} : vector<16x256xf32> to vector<16x255xf32>
    %833 = tpu.concatenate %831, %832 in 1 : vector<16x1xf32>, vector<16x255xf32> -> vector<16x256xf32>
    %834 = vector.broadcast %20 : vector<1x256xf32> to vector<16x256xf32>
    %835 = arith.mulf %833, %834 : vector<16x256xf32>
    %836 = arith.truncf %835 : vector<16x256xf32> to vector<16x256xbf16>
    %c480_411 = arith.constant 480 : index
    %c0_412 = arith.constant 0 : index
    %837 = vector.load %arg13[%c480_411, %c0_412] : memref<864x256xbf16, #tpu.memory_space<vmem>>, vector<16x256xbf16>
    tpu.vector_store %arg13[%c480_411, %c0_412], %836 {strides = array<i32>} : memref<864x256xbf16, #tpu.memory_space<vmem>>, vector<16x256xbf16>,
    %838 = arith.truncf %811 : vector<16x256xf32> to vector<16x256xbf16>
    %c496_413 = arith.constant 496 : index
    %c0_414 = arith.constant 0 : index
    %839 = vector.load %arg13[%c496_413, %c0_414] : memref<864x256xbf16, #tpu.memory_space<vmem>>, vector<16x256xbf16>
    tpu.vector_store %arg13[%c496_413, %c0_414], %838 {strides = array<i32>} : memref<864x256xbf16, #tpu.memory_space<vmem>>, vector<16x256xbf16>,
    %840 = vector.extract_strided_slice %811 {offsets = [0, 1], sizes = [16, 255], strides = [1, 1]} : vector<16x256xf32> to vector<16x255xf32>
    %cst_415 = arith.constant 0.000000e+00 : f32
    %841 = vector.broadcast %cst_415 : f32 to vector<16x1xf32>
    %842 = tpu.concatenate %840, %841 in 1 : vector<16x255xf32>, vector<16x1xf32> -> vector<16x256xf32>
    %843 = vector.broadcast %24 : vector<1x256xf32> to vector<16x256xf32>
    %844 = arith.mulf %842, %843 : vector<16x256xf32>
    %845 = arith.truncf %844 : vector<16x256xf32> to vector<16x256xbf16>
    %c512_416 = arith.constant 512 : index
    %c0_417 = arith.constant 0 : index
    %846 = vector.load %arg13[%c512_416, %c0_417] : memref<864x256xbf16, #tpu.memory_space<vmem>>, vector<16x256xbf16>
    tpu.vector_store %arg13[%c512_416, %c0_417], %845 {strides = array<i32>} : memref<864x256xbf16, #tpu.memory_space<vmem>>, vector<16x256xbf16>,
    %847 = vector.extract_strided_slice %811 {offsets = [0, 15], sizes = [16, 241], strides = [1, 1]} : vector<16x256xf32> to vector<16x241xf32>
    %cst_418 = arith.constant 0.000000e+00 : f32
    %848 = vector.broadcast %cst_418 : f32 to vector<16x15xf32>
    %849 = tpu.concatenate %847, %848 in 1 : vector<16x241xf32>, vector<16x15xf32> -> vector<16x256xf32>
    %850 = vector.broadcast %20 : vector<1x256xf32> to vector<16x256xf32>
    %851 = arith.mulf %849, %850 : vector<16x256xf32>
    %852 = arith.truncf %851 : vector<16x256xf32> to vector<16x256xbf16>
    %c528_419 = arith.constant 528 : index
    %c0_420 = arith.constant 0 : index
    %853 = vector.load %arg13[%c528_419, %c0_420] : memref<864x256xbf16, #tpu.memory_space<vmem>>, vector<16x256xbf16>
    tpu.vector_store %arg13[%c528_419, %c0_420], %852 {strides = array<i32>} : memref<864x256xbf16, #tpu.memory_space<vmem>>, vector<16x256xbf16>,
    %854 = vector.extract_strided_slice %811 {offsets = [0, 16], sizes = [16, 240], strides = [1, 1]} : vector<16x256xf32> to vector<16x240xf32>
    %cst_421 = arith.constant 0.000000e+00 : f32
    %855 = vector.broadcast %cst_421 : f32 to vector<16x16xf32>
    %856 = tpu.concatenate %854, %855 in 1 : vector<16x240xf32>, vector<16x16xf32> -> vector<16x256xf32>
    %857 = arith.truncf %856 : vector<16x256xf32> to vector<16x256xbf16>
    %c544_422 = arith.constant 544 : index
    %c0_423 = arith.constant 0 : index
    %858 = vector.load %arg13[%c544_422, %c0_423] : memref<864x256xbf16, #tpu.memory_space<vmem>>, vector<16x256xbf16>
    tpu.vector_store %arg13[%c544_422, %c0_423], %857 {strides = array<i32>} : memref<864x256xbf16, #tpu.memory_space<vmem>>, vector<16x256xbf16>,
    %859 = vector.extract_strided_slice %811 {offsets = [0, 17], sizes = [16, 239], strides = [1, 1]} : vector<16x256xf32> to vector<16x239xf32>
    %cst_424 = arith.constant 0.000000e+00 : f32
    %860 = vector.broadcast %cst_424 : f32 to vector<16x17xf32>
    %861 = tpu.concatenate %859, %860 in 1 : vector<16x239xf32>, vector<16x17xf32> -> vector<16x256xf32>
    %862 = vector.broadcast %24 : vector<1x256xf32> to vector<16x256xf32>
    %863 = arith.mulf %861, %862 : vector<16x256xf32>
    %864 = arith.truncf %863 : vector<16x256xf32> to vector<16x256xbf16>
    %c560_425 = arith.constant 560 : index
    %c0_426 = arith.constant 0 : index
    %865 = vector.load %arg13[%c560_425, %c0_426] : memref<864x256xbf16, #tpu.memory_space<vmem>>, vector<16x256xbf16>
    tpu.vector_store %arg13[%c560_425, %c0_426], %864 {strides = array<i32>} : memref<864x256xbf16, #tpu.memory_space<vmem>>, vector<16x256xbf16>,
    %c2_427 = arith.constant 2 : index
    %c0_428 = arith.constant 0 : index
    %c0_429 = arith.constant 0 : index
    %866 = vector.load %arg4[%c2_427, %c0_428, %c0_429] : memref<3x16x576xbf16, #tpu.memory_space<vmem>>, vector<1x16x576xbf16>
    %867 = vector.shape_cast %866 : vector<1x16x576xbf16> to vector<16x576xbf16>
    %c0_430 = arith.constant 0 : index
    %c0_431 = arith.constant 0 : index
    %868 = vector.load %arg13[%c0_430, %c0_431] : memref<864x256xbf16, #tpu.memory_space<vmem>>, vector<576x256xbf16>
    %cst_432 = arith.constant dense<0.000000e+00> : vector<16x256xf32>
    %869 = tpu.matmul %867, %868, %cst_432 {dimension_numbers = #tpu.dot_dimension_numbers<[1], [0], [0], [1], [0, 0, 1, 1], [], []>} : vector<16x576xbf16>, vector<576x256xbf16>, vector<16x256xf32> -> vector<16x256xf32>
    %c2_433 = arith.constant 2 : index
    %c0_434 = arith.constant 0 : index
    %c0_435 = arith.constant 0 : index
    %870 = vector.load %arg9[%c2_433, %c0_434, %c0_435] : memref<3x16x1xf32, #tpu.memory_space<vmem>>, vector<1x16x1xf32>
    %871 = vector.shape_cast %870 : vector<1x16x1xf32> to vector<16x1xf32>
    %872 = vector.broadcast %871 : vector<16x1xf32> to vector<16x256xf32>
    %873 = arith.addf %869, %872 : vector<16x256xf32>
    %cst_436 = arith.constant 2.000000e-01 : f32
    %874 = vector.broadcast %cst_436 : f32 to vector<16x256xf32>
    %875 = arith.mulf %874, %873 : vector<16x256xf32>
    %876 = arith.maximumf %873, %875 : vector<16x256xf32>
    %cst_437 = arith.constant 0.000000e+00 : f32
    %877 = vector.broadcast %cst_437 : f32 to vector<16x17xf32>
    %878 = vector.extract_strided_slice %876 {offsets = [0, 0], sizes = [16, 239], strides = [1, 1]} : vector<16x256xf32> to vector<16x239xf32>
    %879 = tpu.concatenate %877, %878 in 1 : vector<16x17xf32>, vector<16x239xf32> -> vector<16x256xf32>
    %880 = vector.broadcast %20 : vector<1x256xf32> to vector<16x256xf32>
    %881 = arith.mulf %879, %880 : vector<16x256xf32>
    %882 = arith.truncf %881 : vector<16x256xf32> to vector<16x256xbf16>
    %c576_438 = arith.constant 576 : index
    %c0_439 = arith.constant 0 : index
    %883 = vector.load %arg13[%c576_438, %c0_439] : memref<864x256xbf16, #tpu.memory_space<vmem>>, vector<16x256xbf16>
    tpu.vector_store %arg13[%c576_438, %c0_439], %882 {strides = array<i32>} : memref<864x256xbf16, #tpu.memory_space<vmem>>, vector<16x256xbf16>,
    %cst_440 = arith.constant 0.000000e+00 : f32
    %884 = vector.broadcast %cst_440 : f32 to vector<16x16xf32>
    %885 = vector.extract_strided_slice %876 {offsets = [0, 0], sizes = [16, 240], strides = [1, 1]} : vector<16x256xf32> to vector<16x240xf32>
    %886 = tpu.concatenate %884, %885 in 1 : vector<16x16xf32>, vector<16x240xf32> -> vector<16x256xf32>
    %887 = arith.truncf %886 : vector<16x256xf32> to vector<16x256xbf16>
    %c592_441 = arith.constant 592 : index
    %c0_442 = arith.constant 0 : index
    %888 = vector.load %arg13[%c592_441, %c0_442] : memref<864x256xbf16, #tpu.memory_space<vmem>>, vector<16x256xbf16>
    tpu.vector_store %arg13[%c592_441, %c0_442], %887 {strides = array<i32>} : memref<864x256xbf16, #tpu.memory_space<vmem>>, vector<16x256xbf16>,
    %cst_443 = arith.constant 0.000000e+00 : f32
    %889 = vector.broadcast %cst_443 : f32 to vector<16x15xf32>
    %890 = vector.extract_strided_slice %876 {offsets = [0, 0], sizes = [16, 241], strides = [1, 1]} : vector<16x256xf32> to vector<16x241xf32>
    %891 = tpu.concatenate %889, %890 in 1 : vector<16x15xf32>, vector<16x241xf32> -> vector<16x256xf32>
    %892 = vector.broadcast %24 : vector<1x256xf32> to vector<16x256xf32>
    %893 = arith.mulf %891, %892 : vector<16x256xf32>
    %894 = arith.truncf %893 : vector<16x256xf32> to vector<16x256xbf16>
    %c608_444 = arith.constant 608 : index
    %c0_445 = arith.constant 0 : index
    %895 = vector.load %arg13[%c608_444, %c0_445] : memref<864x256xbf16, #tpu.memory_space<vmem>>, vector<16x256xbf16>
    tpu.vector_store %arg13[%c608_444, %c0_445], %894 {strides = array<i32>} : memref<864x256xbf16, #tpu.memory_space<vmem>>, vector<16x256xbf16>,
    %cst_446 = arith.constant 0.000000e+00 : f32
    %896 = vector.broadcast %cst_446 : f32 to vector<16x1xf32>
    %897 = vector.extract_strided_slice %876 {offsets = [0, 0], sizes = [16, 255], strides = [1, 1]} : vector<16x256xf32> to vector<16x255xf32>
    %898 = tpu.concatenate %896, %897 in 1 : vector<16x1xf32>, vector<16x255xf32> -> vector<16x256xf32>
    %899 = vector.broadcast %20 : vector<1x256xf32> to vector<16x256xf32>
    %900 = arith.mulf %898, %899 : vector<16x256xf32>
    %901 = arith.truncf %900 : vector<16x256xf32> to vector<16x256xbf16>
    %c624_447 = arith.constant 624 : index
    %c0_448 = arith.constant 0 : index
    %902 = vector.load %arg13[%c624_447, %c0_448] : memref<864x256xbf16, #tpu.memory_space<vmem>>, vector<16x256xbf16>
    tpu.vector_store %arg13[%c624_447, %c0_448], %901 {strides = array<i32>} : memref<864x256xbf16, #tpu.memory_space<vmem>>, vector<16x256xbf16>,
    %903 = arith.truncf %876 : vector<16x256xf32> to vector<16x256xbf16>
    %c640_449 = arith.constant 640 : index
    %c0_450 = arith.constant 0 : index
    %904 = vector.load %arg13[%c640_449, %c0_450] : memref<864x256xbf16, #tpu.memory_space<vmem>>, vector<16x256xbf16>
    tpu.vector_store %arg13[%c640_449, %c0_450], %903 {strides = array<i32>} : memref<864x256xbf16, #tpu.memory_space<vmem>>, vector<16x256xbf16>,
    %905 = vector.extract_strided_slice %876 {offsets = [0, 1], sizes = [16, 255], strides = [1, 1]} : vector<16x256xf32> to vector<16x255xf32>
    %cst_451 = arith.constant 0.000000e+00 : f32
    %906 = vector.broadcast %cst_451 : f32 to vector<16x1xf32>
    %907 = tpu.concatenate %905, %906 in 1 : vector<16x255xf32>, vector<16x1xf32> -> vector<16x256xf32>
    %908 = vector.broadcast %24 : vector<1x256xf32> to vector<16x256xf32>
    %909 = arith.mulf %907, %908 : vector<16x256xf32>
    %910 = arith.truncf %909 : vector<16x256xf32> to vector<16x256xbf16>
    %c656_452 = arith.constant 656 : index
    %c0_453 = arith.constant 0 : index
    %911 = vector.load %arg13[%c656_452, %c0_453] : memref<864x256xbf16, #tpu.memory_space<vmem>>, vector<16x256xbf16>
    tpu.vector_store %arg13[%c656_452, %c0_453], %910 {strides = array<i32>} : memref<864x256xbf16, #tpu.memory_space<vmem>>, vector<16x256xbf16>,
    %912 = vector.extract_strided_slice %876 {offsets = [0, 15], sizes = [16, 241], strides = [1, 1]} : vector<16x256xf32> to vector<16x241xf32>
    %cst_454 = arith.constant 0.000000e+00 : f32
    %913 = vector.broadcast %cst_454 : f32 to vector<16x15xf32>
    %914 = tpu.concatenate %912, %913 in 1 : vector<16x241xf32>, vector<16x15xf32> -> vector<16x256xf32>
    %915 = vector.broadcast %20 : vector<1x256xf32> to vector<16x256xf32>
    %916 = arith.mulf %914, %915 : vector<16x256xf32>
    %917 = arith.truncf %916 : vector<16x256xf32> to vector<16x256xbf16>
    %c672_455 = arith.constant 672 : index
    %c0_456 = arith.constant 0 : index
    %918 = vector.load %arg13[%c672_455, %c0_456] : memref<864x256xbf16, #tpu.memory_space<vmem>>, vector<16x256xbf16>
    tpu.vector_store %arg13[%c672_455, %c0_456], %917 {strides = array<i32>} : memref<864x256xbf16, #tpu.memory_space<vmem>>, vector<16x256xbf16>,
    %919 = vector.extract_strided_slice %876 {offsets = [0, 16], sizes = [16, 240], strides = [1, 1]} : vector<16x256xf32> to vector<16x240xf32>
    %cst_457 = arith.constant 0.000000e+00 : f32
    %920 = vector.broadcast %cst_457 : f32 to vector<16x16xf32>
    %921 = tpu.concatenate %919, %920 in 1 : vector<16x240xf32>, vector<16x16xf32> -> vector<16x256xf32>
    %922 = arith.truncf %921 : vector<16x256xf32> to vector<16x256xbf16>
    %c688_458 = arith.constant 688 : index
    %c0_459 = arith.constant 0 : index
    %923 = vector.load %arg13[%c688_458, %c0_459] : memref<864x256xbf16, #tpu.memory_space<vmem>>, vector<16x256xbf16>
    tpu.vector_store %arg13[%c688_458, %c0_459], %922 {strides = array<i32>} : memref<864x256xbf16, #tpu.memory_space<vmem>>, vector<16x256xbf16>,
    %924 = vector.extract_strided_slice %876 {offsets = [0, 17], sizes = [16, 239], strides = [1, 1]} : vector<16x256xf32> to vector<16x239xf32>
    %cst_460 = arith.constant 0.000000e+00 : f32
    %925 = vector.broadcast %cst_460 : f32 to vector<16x17xf32>
    %926 = tpu.concatenate %924, %925 in 1 : vector<16x239xf32>, vector<16x17xf32> -> vector<16x256xf32>
    %927 = vector.broadcast %24 : vector<1x256xf32> to vector<16x256xf32>
    %928 = arith.mulf %926, %927 : vector<16x256xf32>
    %929 = arith.truncf %928 : vector<16x256xf32> to vector<16x256xbf16>
    %c704_461 = arith.constant 704 : index
    %c0_462 = arith.constant 0 : index
    %930 = vector.load %arg13[%c704_461, %c0_462] : memref<864x256xbf16, #tpu.memory_space<vmem>>, vector<16x256xbf16>
    tpu.vector_store %arg13[%c704_461, %c0_462], %929 {strides = array<i32>} : memref<864x256xbf16, #tpu.memory_space<vmem>>, vector<16x256xbf16>,
    %c2_463 = arith.constant 2 : index
    %c0_464 = arith.constant 0 : index
    %c0_465 = arith.constant 0 : index
    %931 = vector.load %arg5[%c2_463, %c0_464, %c0_465] : memref<3x16x720xbf16, #tpu.memory_space<vmem>>, vector<1x16x720xbf16>
    %932 = vector.shape_cast %931 : vector<1x16x720xbf16> to vector<16x720xbf16>
    %c0_466 = arith.constant 0 : index
    %c0_467 = arith.constant 0 : index
    %933 = vector.load %arg13[%c0_466, %c0_467] : memref<864x256xbf16, #tpu.memory_space<vmem>>, vector<720x256xbf16>
    %cst_468 = arith.constant dense<0.000000e+00> : vector<16x256xf32>
    %934 = tpu.matmul %932, %933, %cst_468 {dimension_numbers = #tpu.dot_dimension_numbers<[1], [0], [0], [1], [0, 0, 1, 1], [], []>} : vector<16x720xbf16>, vector<720x256xbf16>, vector<16x256xf32> -> vector<16x256xf32>
    %c2_469 = arith.constant 2 : index
    %c0_470 = arith.constant 0 : index
    %c0_471 = arith.constant 0 : index
    %935 = vector.load %arg10[%c2_469, %c0_470, %c0_471] : memref<3x16x1xf32, #tpu.memory_space<vmem>>, vector<1x16x1xf32>
    %936 = vector.shape_cast %935 : vector<1x16x1xf32> to vector<16x1xf32>
    %937 = vector.broadcast %936 : vector<16x1xf32> to vector<16x256xf32>
    %938 = arith.addf %934, %937 : vector<16x256xf32>
    %cst_472 = arith.constant 2.000000e-01 : f32
    %939 = vector.broadcast %cst_472 : f32 to vector<16x256xf32>
    %940 = arith.mulf %939, %938 : vector<16x256xf32>
    %941 = arith.maximumf %938, %940 : vector<16x256xf32>
    %cst_473 = arith.constant 0.000000e+00 : f32
    %942 = vector.broadcast %cst_473 : f32 to vector<16x17xf32>
    %943 = vector.extract_strided_slice %941 {offsets = [0, 0], sizes = [16, 239], strides = [1, 1]} : vector<16x256xf32> to vector<16x239xf32>
    %944 = tpu.concatenate %942, %943 in 1 : vector<16x17xf32>, vector<16x239xf32> -> vector<16x256xf32>
    %945 = vector.broadcast %20 : vector<1x256xf32> to vector<16x256xf32>
    %946 = arith.mulf %944, %945 : vector<16x256xf32>
    %947 = arith.truncf %946 : vector<16x256xf32> to vector<16x256xbf16>
    %c720_474 = arith.constant 720 : index
    %c0_475 = arith.constant 0 : index
    %948 = vector.load %arg13[%c720_474, %c0_475] : memref<864x256xbf16, #tpu.memory_space<vmem>>, vector<16x256xbf16>
    tpu.vector_store %arg13[%c720_474, %c0_475], %947 {strides = array<i32>} : memref<864x256xbf16, #tpu.memory_space<vmem>>, vector<16x256xbf16>,
    %cst_476 = arith.constant 0.000000e+00 : f32
    %949 = vector.broadcast %cst_476 : f32 to vector<16x16xf32>
    %950 = vector.extract_strided_slice %941 {offsets = [0, 0], sizes = [16, 240], strides = [1, 1]} : vector<16x256xf32> to vector<16x240xf32>
    %951 = tpu.concatenate %949, %950 in 1 : vector<16x16xf32>, vector<16x240xf32> -> vector<16x256xf32>
    %952 = arith.truncf %951 : vector<16x256xf32> to vector<16x256xbf16>
    %c736_477 = arith.constant 736 : index
    %c0_478 = arith.constant 0 : index
    %953 = vector.load %arg13[%c736_477, %c0_478] : memref<864x256xbf16, #tpu.memory_space<vmem>>, vector<16x256xbf16>
    tpu.vector_store %arg13[%c736_477, %c0_478], %952 {strides = array<i32>} : memref<864x256xbf16, #tpu.memory_space<vmem>>, vector<16x256xbf16>,
    %cst_479 = arith.constant 0.000000e+00 : f32
    %954 = vector.broadcast %cst_479 : f32 to vector<16x15xf32>
    %955 = vector.extract_strided_slice %941 {offsets = [0, 0], sizes = [16, 241], strides = [1, 1]} : vector<16x256xf32> to vector<16x241xf32>
    %956 = tpu.concatenate %954, %955 in 1 : vector<16x15xf32>, vector<16x241xf32> -> vector<16x256xf32>
    %957 = vector.broadcast %24 : vector<1x256xf32> to vector<16x256xf32>
    %958 = arith.mulf %956, %957 : vector<16x256xf32>
    %959 = arith.truncf %958 : vector<16x256xf32> to vector<16x256xbf16>
    %c752_480 = arith.constant 752 : index
    %c0_481 = arith.constant 0 : index
    %960 = vector.load %arg13[%c752_480, %c0_481] : memref<864x256xbf16, #tpu.memory_space<vmem>>, vector<16x256xbf16>
    tpu.vector_store %arg13[%c752_480, %c0_481], %959 {strides = array<i32>} : memref<864x256xbf16, #tpu.memory_space<vmem>>, vector<16x256xbf16>,
    %cst_482 = arith.constant 0.000000e+00 : f32
    %961 = vector.broadcast %cst_482 : f32 to vector<16x1xf32>
    %962 = vector.extract_strided_slice %941 {offsets = [0, 0], sizes = [16, 255], strides = [1, 1]} : vector<16x256xf32> to vector<16x255xf32>
    %963 = tpu.concatenate %961, %962 in 1 : vector<16x1xf32>, vector<16x255xf32> -> vector<16x256xf32>
    %964 = vector.broadcast %20 : vector<1x256xf32> to vector<16x256xf32>
    %965 = arith.mulf %963, %964 : vector<16x256xf32>
    %966 = arith.truncf %965 : vector<16x256xf32> to vector<16x256xbf16>
    %c768_483 = arith.constant 768 : index
    %c0_484 = arith.constant 0 : index
    %967 = vector.load %arg13[%c768_483, %c0_484] : memref<864x256xbf16, #tpu.memory_space<vmem>>, vector<16x256xbf16>
    tpu.vector_store %arg13[%c768_483, %c0_484], %966 {strides = array<i32>} : memref<864x256xbf16, #tpu.memory_space<vmem>>, vector<16x256xbf16>,
    %968 = arith.truncf %941 : vector<16x256xf32> to vector<16x256xbf16>
    %c784_485 = arith.constant 784 : index
    %c0_486 = arith.constant 0 : index
    %969 = vector.load %arg13[%c784_485, %c0_486] : memref<864x256xbf16, #tpu.memory_space<vmem>>, vector<16x256xbf16>
    tpu.vector_store %arg13[%c784_485, %c0_486], %968 {strides = array<i32>} : memref<864x256xbf16, #tpu.memory_space<vmem>>, vector<16x256xbf16>,
    %970 = vector.extract_strided_slice %941 {offsets = [0, 1], sizes = [16, 255], strides = [1, 1]} : vector<16x256xf32> to vector<16x255xf32>
    %cst_487 = arith.constant 0.000000e+00 : f32
    %971 = vector.broadcast %cst_487 : f32 to vector<16x1xf32>
    %972 = tpu.concatenate %970, %971 in 1 : vector<16x255xf32>, vector<16x1xf32> -> vector<16x256xf32>
    %973 = vector.broadcast %24 : vector<1x256xf32> to vector<16x256xf32>
    %974 = arith.mulf %972, %973 : vector<16x256xf32>
    %975 = arith.truncf %974 : vector<16x256xf32> to vector<16x256xbf16>
    %c800_488 = arith.constant 800 : index
    %c0_489 = arith.constant 0 : index
    %976 = vector.load %arg13[%c800_488, %c0_489] : memref<864x256xbf16, #tpu.memory_space<vmem>>, vector<16x256xbf16>
    tpu.vector_store %arg13[%c800_488, %c0_489], %975 {strides = array<i32>} : memref<864x256xbf16, #tpu.memory_space<vmem>>, vector<16x256xbf16>,
    %977 = vector.extract_strided_slice %941 {offsets = [0, 15], sizes = [16, 241], strides = [1, 1]} : vector<16x256xf32> to vector<16x241xf32>
    %cst_490 = arith.constant 0.000000e+00 : f32
    %978 = vector.broadcast %cst_490 : f32 to vector<16x15xf32>
    %979 = tpu.concatenate %977, %978 in 1 : vector<16x241xf32>, vector<16x15xf32> -> vector<16x256xf32>
    %980 = vector.broadcast %20 : vector<1x256xf32> to vector<16x256xf32>
    %981 = arith.mulf %979, %980 : vector<16x256xf32>
    %982 = arith.truncf %981 : vector<16x256xf32> to vector<16x256xbf16>
    %c816_491 = arith.constant 816 : index
    %c0_492 = arith.constant 0 : index
    %983 = vector.load %arg13[%c816_491, %c0_492] : memref<864x256xbf16, #tpu.memory_space<vmem>>, vector<16x256xbf16>
    tpu.vector_store %arg13[%c816_491, %c0_492], %982 {strides = array<i32>} : memref<864x256xbf16, #tpu.memory_space<vmem>>, vector<16x256xbf16>,
    %984 = vector.extract_strided_slice %941 {offsets = [0, 16], sizes = [16, 240], strides = [1, 1]} : vector<16x256xf32> to vector<16x240xf32>
    %cst_493 = arith.constant 0.000000e+00 : f32
    %985 = vector.broadcast %cst_493 : f32 to vector<16x16xf32>
    %986 = tpu.concatenate %984, %985 in 1 : vector<16x240xf32>, vector<16x16xf32> -> vector<16x256xf32>
    %987 = arith.truncf %986 : vector<16x256xf32> to vector<16x256xbf16>
    %c832_494 = arith.constant 832 : index
    %c0_495 = arith.constant 0 : index
    %988 = vector.load %arg13[%c832_494, %c0_495] : memref<864x256xbf16, #tpu.memory_space<vmem>>, vector<16x256xbf16>
    tpu.vector_store %arg13[%c832_494, %c0_495], %987 {strides = array<i32>} : memref<864x256xbf16, #tpu.memory_space<vmem>>, vector<16x256xbf16>,
    %989 = vector.extract_strided_slice %941 {offsets = [0, 17], sizes = [16, 239], strides = [1, 1]} : vector<16x256xf32> to vector<16x239xf32>
    %cst_496 = arith.constant 0.000000e+00 : f32
    %990 = vector.broadcast %cst_496 : f32 to vector<16x17xf32>
    %991 = tpu.concatenate %989, %990 in 1 : vector<16x239xf32>, vector<16x17xf32> -> vector<16x256xf32>
    %992 = vector.broadcast %24 : vector<1x256xf32> to vector<16x256xf32>
    %993 = arith.mulf %991, %992 : vector<16x256xf32>
    %994 = arith.truncf %993 : vector<16x256xf32> to vector<16x256xbf16>
    %c848_497 = arith.constant 848 : index
    %c0_498 = arith.constant 0 : index
    %995 = vector.load %arg13[%c848_497, %c0_498] : memref<864x256xbf16, #tpu.memory_space<vmem>>, vector<16x256xbf16>
    tpu.vector_store %arg13[%c848_497, %c0_498], %994 {strides = array<i32>} : memref<864x256xbf16, #tpu.memory_space<vmem>>, vector<16x256xbf16>,
    %c2_499 = arith.constant 2 : index
    %c0_500 = arith.constant 0 : index
    %c0_501 = arith.constant 0 : index
    %996 = vector.load %arg6[%c2_499, %c0_500, %c0_501] : memref<3x32x864xbf16, #tpu.memory_space<vmem>>, vector<1x32x864xbf16>
    %997 = vector.shape_cast %996 : vector<1x32x864xbf16> to vector<32x864xbf16>
    %c0_502 = arith.constant 0 : index
    %c0_503 = arith.constant 0 : index
    %998 = vector.load %arg13[%c0_502, %c0_503] : memref<864x256xbf16, #tpu.memory_space<vmem>>, vector<864x256xbf16>
    %cst_504 = arith.constant dense<0.000000e+00> : vector<32x256xf32>
    %999 = tpu.matmul %997, %998, %cst_504 {dimension_numbers = #tpu.dot_dimension_numbers<[1], [0], [0], [1], [0, 0, 1, 1], [], []>} : vector<32x864xbf16>, vector<864x256xbf16>, vector<32x256xf32> -> vector<32x256xf32>
    %c2_505 = arith.constant 2 : index
    %c0_506 = arith.constant 0 : index
    %c0_507 = arith.constant 0 : index
    %1000 = vector.load %arg11[%c2_505, %c0_506, %c0_507] : memref<3x32x1xf32, #tpu.memory_space<vmem>>, vector<1x32x1xf32>
    %1001 = vector.shape_cast %1000 : vector<1x32x1xf32> to vector<32x1xf32>
    %1002 = vector.broadcast %1001 : vector<32x1xf32> to vector<32x256xf32>
    %1003 = arith.addf %999, %1002 : vector<32x256xf32>
    %cst_508 = arith.constant 2.000000e-01 : f32
    %1004 = vector.broadcast %cst_508 : f32 to vector<32x256xf32>
    %1005 = arith.mulf %1003, %1004 : vector<32x256xf32>
    %c0_509 = arith.constant 0 : index
    %c0_510 = arith.constant 0 : index
    %1006 = vector.load %arg14[%c0_509, %c0_510] : memref<32x256xf32, #tpu.memory_space<vmem>>, vector<32x256xf32>
    %1007 = arith.addf %1005, %1006 : vector<32x256xf32>
    %cst_511 = arith.constant 2.000000e-01 : f32
    %1008 = vector.broadcast %cst_511 : f32 to vector<32x256xf32>
    %1009 = arith.mulf %1007, %1008 : vector<32x256xf32>
    %c0_512 = arith.constant 0 : index
    %c0_513 = arith.constant 0 : index
    %c0_514 = arith.constant 0 : index
    %1010 = vector.load %arg1[%c0_512, %c0_513, %c0_514] : memref<1x32x256xf32, #tpu.memory_space<vmem>>, vector<1x32x256xf32>
    %1011 = vector.shape_cast %1010 : vector<1x32x256xf32> to vector<32x256xf32>
    %1012 = arith.addf %1009, %1011 : vector<32x256xf32>
    %c0_515 = arith.constant 0 : index
    %c0_516 = arith.constant 0 : index
    %c0_517 = arith.constant 0 : index
    %1013 = vector.load %arg12[%c0_515, %c0_516, %c0_517] : memref<1x32x256xf32, #tpu.memory_space<vmem>>, vector<1x32x256xf32>
    %1014 = vector.shape_cast %1013 : vector<1x32x256xf32> to vector<32x256xf32>
    %1015 = vector.shape_cast %1012 : vector<32x256xf32> to vector<1x32x256xf32>
    tpu.vector_store %arg12[%c0_515, %c0_516, %c0_517], %1015 {strides = array<i32>} : memref<1x32x256xf32, #tpu.memory_space<vmem>>, vector<1x32x256xf32>,
    return
  }
  func.func @transform_0(%arg0: i32) -> (i32, i32, i32) {
    %c0_i32 = arith.constant 0 : i32
    %c0_i32_0 = arith.constant 0 : i32
    %c0_i32_1 = arith.constant 0 : i32
    return %arg0, %c0_i32, %c0_i32_0 : i32, i32, i32
  }
  func.func @transform_1(%arg0: i32) -> (i32, i32, i32) {
    %c0_i32 = arith.constant 0 : i32
    %c0_i32_0 = arith.constant 0 : i32
    %c0_i32_1 = arith.constant 0 : i32
    %c0_i32_2 = arith.constant 0 : i32
    return %c0_i32, %c0_i32_0, %c0_i32_1 : i32, i32, i32
  }
  func.func @transform_2(%arg0: i32) -> (i32, i32, i32) {
    %c0_i32 = arith.constant 0 : i32
    %c0_i32_0 = arith.constant 0 : i32
    %c0_i32_1 = arith.constant 0 : i32
    %c0_i32_2 = arith.constant 0 : i32
    return %c0_i32, %c0_i32_0, %c0_i32_1 : i32, i32, i32
  }
  func.func @transform_3(%arg0: i32) -> (i32, i32, i32) {
    %c0_i32 = arith.constant 0 : i32
    %c0_i32_0 = arith.constant 0 : i32
    %c0_i32_1 = arith.constant 0 : i32
    %c0_i32_2 = arith.constant 0 : i32
    return %c0_i32, %c0_i32_0, %c0_i32_1 : i32, i32, i32
  }
  func.func @transform_4(%arg0: i32) -> (i32, i32, i32) {
    %c0_i32 = arith.constant 0 : i32
    %c0_i32_0 = arith.constant 0 : i32
    %c0_i32_1 = arith.constant 0 : i32
    %c0_i32_2 = arith.constant 0 : i32
    return %c0_i32, %c0_i32_0, %c0_i32_1 : i32, i32, i32
  }
  func.func @transform_5(%arg0: i32) -> (i32, i32, i32) {
    %c0_i32 = arith.constant 0 : i32
    %c0_i32_0 = arith.constant 0 : i32
    %c0_i32_1 = arith.constant 0 : i32
    %c0_i32_2 = arith.constant 0 : i32
    return %c0_i32, %c0_i32_0, %c0_i32_1 : i32, i32, i32
  }
  func.func @transform_6(%arg0: i32) -> (i32, i32, i32) {
    %c0_i32 = arith.constant 0 : i32
    %c0_i32_0 = arith.constant 0 : i32
    %c0_i32_1 = arith.constant 0 : i32
    %c0_i32_2 = arith.constant 0 : i32
    return %c0_i32, %c0_i32_0, %c0_i32_1 : i32, i32, i32
  }
  func.func @transform_7(%arg0: i32) -> (i32, i32, i32) {
    %c0_i32 = arith.constant 0 : i32
    %c0_i32_0 = arith.constant 0 : i32
    %c0_i32_1 = arith.constant 0 : i32
    %c0_i32_2 = arith.constant 0 : i32
    return %c0_i32, %c0_i32_0, %c0_i32_1 : i32, i32, i32
  }
  func.func @transform_8(%arg0: i32) -> (i32, i32, i32) {
    %c0_i32 = arith.constant 0 : i32
    %c0_i32_0 = arith.constant 0 : i32
    %c0_i32_1 = arith.constant 0 : i32
    %c0_i32_2 = arith.constant 0 : i32
    return %c0_i32, %c0_i32_0, %c0_i32_1 : i32, i32, i32
  }
  func.func @transform_9(%arg0: i32) -> (i32, i32, i32) {
    %c0_i32 = arith.constant 0 : i32
    %c0_i32_0 = arith.constant 0 : i32
    %c0_i32_1 = arith.constant 0 : i32
    %c0_i32_2 = arith.constant 0 : i32
    return %c0_i32, %c0_i32_0, %c0_i32_1 : i32, i32, i32
  }
  func.func @transform_10(%arg0: i32) -> (i32, i32, i32) {
    %c0_i32 = arith.constant 0 : i32
    %c0_i32_0 = arith.constant 0 : i32
    %c0_i32_1 = arith.constant 0 : i32
    %c0_i32_2 = arith.constant 0 : i32
    return %c0_i32, %c0_i32_0, %c0_i32_1 : i32, i32, i32
  }
  func.func @transform_11(%arg0: i32) -> (i32, i32, i32) {
    %c0_i32 = arith.constant 0 : i32
    %c0_i32_0 = arith.constant 0 : i32
    %c0_i32_1 = arith.constant 0 : i32
    return %arg0, %c0_i32, %c0_i32_0 : i32, i32, i32
  }
}

</mosaic_0001>

<bundles_post_ra>
// kernel: tpu_custom_call.1
= control target key start
LH: loop header
LB: loop body
LE: loop exit
PB: predicated region body
PF: predicated region fallthrough
CT: control target
= control target key end

     0   :  { %s13972_s0 = inlined_call_operand.vmem [shape: f32[2,32,256], index: 0, kind: input, shape index: {}]   ;;  %s13973_s1 = inlined_call_operand.hbm [shape: bf16[3,16,288], index: 1, kind: input, shape index: {}]   ;;  %s13974_s2 = inlined_call_operand.hbm [shape: bf16[3,16,432], index: 2, kind: input, shape index: {}]   ;;  %s13975_s3 = inlined_call_operand.hbm [shape: bf16[3,16,576], index: 3, kind: input, shape index: {}]   ;;  %s13976_s4 = inlined_call_operand.vmem [shape: bf16[3,16,720], index: 4, kind: input, shape index: {}]   ;;  %s13977_s5 = inlined_call_operand.hbm [shape: bf16[3,32,864], index: 5, kind: input, shape index: {}]   ;;  %s13978_s6 = inlined_call_operand.vmem [shape: f32[3,16,1], index: 6, kind: input, shape index: {}]   ;;  %s13979_s7 = inlined_call_operand.vmem [shape: f32[3,16,1], index: 7, kind: input, shape index: {}]   ;;  %s13980_s8 = inlined_call_operand.vmem [shape: f32[3,16,1], index: 8, kind: input, shape index: {}]   ;;  %s13981_s9 = inlined_call_operand.vmem [shape: f32[3,16,1], index: 9, kind: input, shape index: {}]   ;;  %s13982_s10 = inlined_call_operand.vmem [shape: f32[3,32,1], index: 10, kind: input, shape index: {}]   ;;  %s13983_s11 = inlined_call_operand.hbm [shape: f32[2,32,256], index: 11, kind: output, shape index: {}]  }
   0x1   :  { %14116 = sst [smem:[#allocation58_spill]] %s13974_s2 }
   0x2   :  { %16 = vsyncpa [#allocation5], 0 }
   0x3   :  { %17 = vsyncpa [#allocation8], 0 }
   0x4   :  { %18 = vsyncpa [#allocation11], 0 }
   0x5   :  { %19 = vsyncpa [#allocation6], 0 }
   0x6   :  { %21 = vsyncpa [#allocation6 + $0x1], 0  ;;  %s9931_s17 = smov 0   ;;  %s9933_s18 = smov 0  }
   0x7   :  { %s9935_s19 = smov 0   ;;  %s9937_s20 = smov 0  }
   0x8 LB: > { %14117 = sst [smem:[#allocation17_spill]] %s9833_s17  ;;  %s9952_s21 = sadd.s32 4294967295, %s9845_s20   ;;  %s9845_s20 = sphi %s9937_s20, %s14361_s20   ;;  %s9841_s19 = sphi %s9935_s19, %s14363_s19   ;;  %s9837_s18 = sphi %s9933_s18, %s14365_s18   ;;  %s9833_s17 = sphi %s9931_s17, %s14364_s17  }
   0x9   : > { %14118 = sst [smem:[#allocation18_spill]] %s9841_s19  ;;  %s8180_s22 = sadd.s32 4294967294, %s9845_s20  }
   0xa   : > { %14119 = sst [smem:[#allocation19_spill]] %s9845_s20  ;;  %s9956_s23 = sadd.s32 1, %s9845_s20  }
   0xb   : > { %14120 = sst [smem:[#allocation20_spill]] %s9956_s23  ;;  %s270_s24 = sadd.s32 1, %s9841_s19 }
   0xc   : > { %s267_s25 = ssub.s32 %s9845_s20, %s9956_s23  ;;  %p280_p0 = scmp.ne.s32.totalorder %s9841_s19, %s9837_s18 }
   0xd   : > { %p268_p1 = scmp.eq.s32.totalorder %s267_s25, 0  ;;  %p281_p2 = scmp.eq.s32.totalorder %s9952_s21, 1 }
   0xe   : > { %p286_p3 = scmp.ne.s32.totalorder %s9837_s18, %s9833_s17  ;;  %p287_p4 = scmp.eq.s32.totalorder %s8180_s22, 1 }
   0xf   : > { %s9967_s26 = scalar_select %p268_p1, %s9841_s19, %s270_s24  }
  0x10   : > { %p9969_p5 = por %p281_p2, %p280_p0  ;;  %p9973_p6 = por %p287_p4, %p286_p3 }
  0x11   : > { %14121 = sst [smem:[#allocation21_spill]] %s9967_s26  ;;  %p8181_p7 = scmp.ge.s32.totalorder %s9845_s20, 1 }
  0x12   : > { %s14122_s27 = scalar_select %p9969_p5, 1, 0 }
  0x13   : > { %s14123_s28 = scalar_select %p9973_p6, 1, 0 }
  0x14   : > { %p294_p8 = scmp.lt.s32.totalorder %s9845_s20, 3  ;;  %p13985_p9 = scmp.eq.s32.totalorder %s9952_s21, 0 }
  0x15   : > { %14124 = sst [smem:[#allocation22_spill]] %s14123_s28  ;;  %s9847_s30 = smov [#allocation7]  }
  0x16   : > { %p9980_p10 = pnand %p8181_p7, %p294_p8  ;;  %s319_s12 = sshll.u32 %s9847_s30, 4  ;;  %s320_s12 = int_to_ptr.vmem [resolvable:$true] %s319_s12 }
  0x17   : > { %s9848_s14 = smov [#allocation4]   ;;  %s14127_s2 = sld [smem:[#allocation58_spill]] }
  0x18   : > { %s14125_s29 = scalar_select %p9980_p10, 1, 0 }
  0x19   : > { %p9070_p11 = pneg %p9980_p10  ;;  %s306_s15 = sshll.u32 %s9848_s14, 4  ;;  %s9992_s15 = int_to_ptr.vmem [resolvable:$true] %s306_s15 }
  0x1b   : > { %p9988_p12 = pnand %p13985_p9, %p9070_p11 }
  0x1d   : > { %s9659_s24 = scalar_lea.hbm %s14127_s2, 1536  ;;  %p10002_p0 = pneg %p9988_p12 }
  0x1e   : > { %p9660_p13 = scmp.ne.s32.totalorder %s14127_s2, %s9659_s24  ;;  %p9666_p3 = scmp.lt.u32.totalorder %s9659_s24, %s14127_s2 }
  0x20   : > { %p9662_p1 = pnand %p10002_p0, %p9660_p13 }
  0x22   : > { %p9663_p2 = pneg %p9662_p1 }
  0x24   : > { %p9668_p4 = pnand %p9666_p3, %p9663_p2 }
  0x26   : > { %9671 = shalt.err (!%p9668_p4)
}
  0x27   : > { %s9672_s16 = scalar_lea.vmem %s320_s12, 1536  ;;  %p9680_p9 = scmp.lt.s32.totalorder %s320_s12, %s320_s12 }
  0x28   : > { %p9673_p7 = scmp.ne.s32.totalorder %s320_s12, %s9672_s16  ;;  %p9681_p6 = scmp.lt.s32.totalorder %s9672_s16, %s9672_s16 }
  0x2a   : > { %p9675_p8 = pnand %p9673_p7, %p10002_p0  ;;  %p9682_p5 = por %p9681_p6, %p9680_p9 }
  0x2c   : > { %p9676_p11 = pneg %p9675_p8 }
  0x2e   : > { %p9683_p10 = pnand %p9682_p5, %p9676_p11 }
  0x30   : > { %9686 = shalt.err (!%p9683_p10)
}
  0x31   : > { %s9849_s26 = smov 256   ;;  %s9850_s22 = smov 16  }
  0x32   : > { %9076 = dma.hbm_to_vmem [thread:$0]  (!%p9988_p12), %s14127_s2, 1536, %s320_s12, [#allocation8], %s9849_s26, %s9849_s26, %s9850_s22  }
  0x33   : > { %s9687_s23 = scalar_lea.hbm %s13973_s1, 1152 }
  0x34   : > { %p9688_p13 = scmp.ne.s32.totalorder %s13973_s1, %s9687_s23  ;;  %p9694_p9 = scmp.lt.u32.totalorder %s9687_s23, %s13973_s1 }
  0x36   : > { %p9690_p5 = pnand %p9688_p13, %p10002_p0 }
  0x38   : > { %p9691_p6 = pneg %p9690_p5 }
  0x3a   : > { %p9696_p10 = pnand %p9694_p9, %p9691_p6 }
  0x3c   : > { %9699 = shalt.err (!%p9696_p10)
}
  0x3d   : > { %s9700_s12 = scalar_lea.vmem %s9992_s15, 1152  ;;  %p9708_p4 = scmp.lt.s32.totalorder %s9992_s15, %s9992_s15 }
  0x3e   : > { %p9701_p1 = scmp.ne.s32.totalorder %s9992_s15, %s9700_s12  ;;  %p9709_p7 = scmp.lt.s32.totalorder %s9700_s12, %s9700_s12 }
  0x40   : > { %p9703_p2 = pnand %p9701_p1, %p10002_p0  ;;  %p9710_p8 = por %p9709_p7, %p9708_p4 }
  0x42   : > { %p9704_p3 = pneg %p9703_p2 }
  0x44   : > { %p9711_p11 = pnand %p9710_p8, %p9704_p3 }
  0x46   : > { %9714 = shalt.err (!%p9711_p11)
}
  0x47   : > { %s9851_s17 = smov 192   ;;  %s9852_s20 = smov 12  }
  0x48   : > { %9073 = dma.hbm_to_vmem [thread:$0]  (!%p9988_p12), %s13973_s1, 1152, %s9992_s15, [#allocation5], %s9851_s17, %s9851_s17, %s9852_s20  }
  0x49   : > { %s9853_s26 = smov [#allocation9]   ;;  %s9715_s25 = scalar_lea.hbm %s13975_s3, 1920 }
  0x4a   : > { %s332_s22 = sshll.u32 %s9853_s26, 4  ;;  %p9716_p13 = scmp.ne.s32.totalorder %s13975_s3, %s9715_s25  ;;  %s333_s22 = int_to_ptr.vmem [resolvable:$true] %s332_s22 }
  0x4b   : > { %p9722_p9 = scmp.lt.u32.totalorder %s9715_s25, %s13975_s3 }
  0x4c   : > { %p9718_p5 = pnand %p9716_p13, %p10002_p0 }
  0x4e   : > { %p9719_p6 = pneg %p9718_p5 }
  0x50   : > { %p9724_p10 = pnand %p9722_p9, %p9719_p6 }
  0x52   : > { %9727 = shalt.err (!%p9724_p10)
}
  0x53   : > { %s9728_s15 = scalar_lea.vmem %s333_s22, 1920  ;;  %p9736_p4 = scmp.lt.s32.totalorder %s333_s22, %s333_s22 }
  0x54   : > { %p9729_p1 = scmp.ne.s32.totalorder %s333_s22, %s9728_s15  ;;  %p9737_p7 = scmp.lt.s32.totalorder %s9728_s15, %s9728_s15 }
  0x56   : > { %p9731_p2 = pnand %p9729_p1, %p10002_p0  ;;  %p9738_p8 = por %p9737_p7, %p9736_p4 }
  0x58   : > { %p9732_p3 = pneg %p9731_p2 }
  0x5a   : > { %p9739_p11 = pnand %p9738_p8, %p9732_p3 }
  0x5c   : > { %9742 = shalt.err (!%p9739_p11)
}
  0x5d   : > { %s9854_s17 = smov 320   ;;  %s9855_s20 = smov 20  }
  0x5e   : > { %9079 = dma.hbm_to_vmem [thread:$0]  (!%p9988_p12), %s13975_s3, 1920, %s333_s22, [#allocation8], %s9854_s17, %s9854_s17, %s9855_s20  }
  0x5f   : > { %s9856_s28 = smov [#allocation10]   ;;  %s9743_s25 = scalar_lea.hbm %s13977_s5, 5376 }
  0x60   : > { %s348_s26 = sshll.u32 %s9856_s28, 4  ;;  %p9744_p13 = scmp.ne.s32.totalorder %s13977_s5, %s9743_s25  ;;  %s349_s26 = int_to_ptr.vmem [resolvable:$true] %s348_s26 }
  0x61   : > { %p9750_p9 = scmp.lt.u32.totalorder %s9743_s25, %s13977_s5 }
  0x62   : > { %p9746_p5 = pnand %p9744_p13, %p10002_p0 }
  0x64   : > { %p9747_p6 = pneg %p9746_p5 }
  0x66   : > { %p9752_p10 = pnand %p9750_p9, %p9747_p6 }
  0x68   : > { %9755 = shalt.err (!%p9752_p10)
}
  0x69   : > { %s9756_s22 = scalar_lea.vmem %s349_s26, 5376  ;;  %p9764_p4 = scmp.lt.s32.totalorder %s349_s26, %s349_s26 }
  0x6a   : > { %p9757_p1 = scmp.ne.s32.totalorder %s349_s26, %s9756_s22  ;;  %p9765_p7 = scmp.lt.s32.totalorder %s9756_s22, %s9756_s22 }
  0x6c   : > { %p9759_p2 = pnand %p9757_p1, %p10002_p0  ;;  %p9766_p8 = por %p9765_p7, %p9764_p4 }
  0x6e   : > { %p9760_p3 = pneg %p9759_p2 }
  0x70   : > { %p9767_p11 = pnand %p9766_p8, %p9760_p3 }
  0x72   : > { %9770 = shalt.err (!%p9767_p11)
}
  0x73   : > { %s9857_s17 = smov 448   ;;  %s9858_s20 = smov 28  }
  0x74   : > { %9082 = dma.hbm_to_vmem [thread:$0]  (!%p9988_p12), %s13977_s5, 5376, %s349_s26, [#allocation11], %s9857_s17, %s9857_s17, %s9858_s20  }
  0x75   : > { %p14129_p13 = scmp.ne.s32.totalorder %s14125_s29, 0 }
  0x77   : > { %387 = sbr.rel (%p14129_p13) target bundleno = 6252 (0x186c), region = 64 }
  0x7e   : > { %p14130_p5 = scmp.eq.s32.totalorder %s9952_s21, 0 }
  0x80   : > { %9816 = dma.done.wait (%p14130_p5), [#allocation5], 1152   ;;  %p14131_p0 = pmov %p14130_p5 }
  0x82   : > { %9818 = vsyncadd (%p14131_p0), [#allocation5], 4294966144  ;;  %p14132_p6 = pmov %p14131_p0 }
  0x83   : > { %p14133_p9 = pmov %p14131_p0 }
  0x84   : > { %9820 = dma.done.wait (%p14132_p6), [#allocation8], 3456  }
  0x85   : > { %9822 = vsyncadd (%p14133_p9), [#allocation8], 4294963840  ;;  %p14134_p10 = pmov %p14131_p0 }
  0x86   : > { %p14135_p12 = pmov %p14131_p0 }
  0x87   : > { %9824 = dma.done.wait (%p14134_p10), [#allocation11], 5376  }
  0x88   : > { %9826 = vsyncadd (%p14135_p12), [#allocation11], 4294961920  ;;  %p439_p1 = scmp.lt.s32.totalorder %s9952_s21, 1  ;;  %s9859_s19 = smov 17   ;;  %v9515_v12 = vld [vmem:[#allocation4 + $0x4] ss:$12 sps:$4 sm:$0xff]   ;;  %v445_v14 = vlaneseq }
  0x89   : > { %s9860_s24 = smov 16   ;;  %s9861_s25 = smov 15   ;;  %v9518_v13 = vld [vmem:[#allocation9 + $0x4] ss:$20 sps:$4 sm:$0xff]   ;;  %995 = vmatprep.mubr.bf16.mxu1 %v9515_v12  ;;  %v13993_v15 = vmov 0   ;;  %vm524_vm1 = vcmask 138240  }
  0x8a   : > { %s440_s29 = scalar_select %p439_p1, %s9952_s21, 1  ;;  %1779 = vmatprep.mubr.bf16.mxu0 %v9518_v13  ;;  %9191 = vset.pattern.permute.xlu0 %v13993_v15  ;;  %v10232_v16 = vand.u32 127, %v445_v14  ;;  %v9868_v22 = vmov 0.0   ;;  %vm573_vm3 = vcmask 130048   ;;  %vm614_vm8 = vcmask 121856  }
  0x8b   : > { %s9862_s14 = smov 1   ;;  %s9863_s16 = smov 127   ;;  %9192 = vset.pattern.permute.xlu1 %v13993_v15  ;;  %vm8356_vm4 = vmneg %vm573_vm3  ;;  %vm663_vm9 = vcmask 7168   ;;  %vm720_vm10 = vcmask 1039360   ;;  %vm769_vm11 = vcmask 924672   ;;  %vm818_vm12 = vcmask 916480  }
  0x8c   : > { %s8354_s13 = sshll.u32 %s440_s29, 6  ;;  %s9864_s12 = smov 113   ;;  %v10235_v17 = vadd.s32 128, %v10232_v16  ;;  %v452_v18 = vand.u32 15, %v10232_v16  ;;  %vm10292_vm5 = vmpackc.low %vm8356_vm4, %vm8356_vm4  ;;  %vm859_vm14 = vcmask 908288   ;;  %vm959_vm15 = vcmask 261120  }
  0x8d   : > { %s10096_s26 = scalar_lea.vmem %s13972_s0, %s8354_s13  ;;  %s9865_s15 = smov 112   ;;  %vm10488_vm13 = vmpackc.low %vm818_vm12, %vm818_vm12  ;;  %vm2213_vm4 = vcmask 654336  }
  0x8e   : > { %v10099_v0 = vld [vmem:[%s10096_s26 + $0x10] sm:$0xff]  ;;  %v10102_v1 = vld [vmem:[%s10096_s26] sm:$0xff]  ;;  %v10109_v2 = vld [vmem:[%s10096_s26 + $0x18] sm:$0xff]  ;;  %s9866_s22 = smov 111   ;;  %v459_v19 = vand.u32 15, %v10235_v17  ;;  %vm472_vm0 = vcmp.ne.s32.totalorder %v452_v18, 0 }
  0x8f   : > { %512 = vrot.lane.b32.xlu1 %v10099_v0, %s9859_s19  ;;  %508 = vrot.lane.b32.xlu0 %v10102_v1, %s9859_s19  ;;  %v10112_v3 = vld [vmem:[%s10096_s26 + $0x8] sm:$0xff]  ;;  %v10118_v5 = vld [vmem:[%s10096_s26 + $0x20] sm:$0xff]  ;;  %v9156_v8 = vpack.i.bf16 %v10109_v2, %v10099_v0  ;;  %v10248_v23 = vsel %vm472_vm0, 1.0, %v9868_v22  ;;  %vm478_vm6 = vcmp.ne.s32.totalorder %v452_v18, 15  ;;  %vm1338_vm0 = vcmask 392192   ;;  %s8355_s17 = sshll.u32 %s9952_s21, 10 }
  0x90   : > { %v10115_v4 = vld [vmem:[%s10096_s26 + $0x28] sm:$0xff]  ;;  %v10125_v6 = vld [vmem:[%s10096_s26 + $0x38] sm:$0xff]  ;;  %v10132_v7 = vld [vmem:[%s10096_s26 + $0x30] sm:$0xff]  ;;  %v9151_v9 = vpack.i.bf16 %v10112_v3, %v10102_v1  ;;  %vm473_vm2 = vcmp.ne.s32.totalorder %v459_v19, 0  ;;  %vm479_vm7 = vcmp.ne.s32.totalorder %v459_v19, 15  ;;  %p14356_p3 = scmp.ne.s32.totalorder %s14122_s27, 0 }
  0x91   : > { %v9166_v10 = vpack.i.bf16 %v10125_v6, %v10132_v7  ;;  %v9161_v11 = vpack.i.bf16 %v10115_v4, %v10118_v5  ;;  %v10253_v26 = vsel %vm473_vm2, 1.0, %v9868_v22  ;;  %vm1743_vm2 = vcmask 523264  }
  0x93   : > { %514 = vrot.lane.b32.xlu1 %v10109_v2, %s9859_s19  ;;  %510 = vrot.lane.b32.xlu0 %v10112_v3, %s9859_s19 }
  0x97   : > { %518 = vrot.lane.b32.xlu1 %v10115_v4, %s9859_s19  ;;  %516 = vrot.lane.b32.xlu0 %v10118_v5, %s9859_s19 }
  0x9b   : > { %522 = vrot.lane.b32.xlu1 %v10125_v6, %s9859_s19  ;;  %520 = vrot.lane.b32.xlu0 %v10132_v7, %s9859_s19 }
  0x9f   : > { %9157 = vrot.lane.b32.xlu1 %v9156_v8, %s9860_s24  ;;  %9152 = vrot.lane.b32.xlu0 %v9151_v9, %s9860_s24 }
  0xa3   : > { %9167 = vrot.lane.b32.xlu1 %v9166_v10, %s9860_s24  ;;  %9162 = vrot.lane.b32.xlu0 %v9161_v11, %s9860_s24 }
  0xa7   : > { %600 = vrot.lane.b32.xlu1 %v10112_v3, %s9861_s25  ;;  %598 = vrot.lane.b32.xlu0 %v10102_v1, %s9861_s25 }
  0xab   : > { %604 = vrot.lane.b32.xlu1 %v10109_v2, %s9861_s25  ;;  %602 = vrot.lane.b32.xlu0 %v10099_v0, %s9861_s25 }
  0xaf   : > { %608 = vrot.lane.b32.xlu1 %v10115_v4, %s9861_s25  ;;  %606 = vrot.lane.b32.xlu0 %v10118_v5, %s9861_s25 }
  0xb3   : > { %612 = vrot.lane.b32.xlu1 %v10125_v6, %s9861_s25  ;;  %610 = vrot.lane.b32.xlu0 %v10132_v7, %s9861_s25 }
  0xb7   : > { %649 = vrot.lane.b32.xlu1 %v10112_v3, %s9862_s14  ;;  %647 = vrot.lane.b32.xlu0 %v10102_v1, %s9862_s14 }
  0xbb   : > { %653 = vrot.lane.b32.xlu1 %v10109_v2, %s9862_s14  ;;  %651 = vrot.lane.b32.xlu0 %v10099_v0, %s9862_s14 }
  0xbf   : > { %657 = vrot.lane.b32.xlu1 %v10115_v4, %s9862_s14  ;;  %655 = vrot.lane.b32.xlu0 %v10118_v5, %s9862_s14 }
  0xc3   : > { %661 = vrot.lane.b32.xlu1 %v10125_v6, %s9862_s14  ;;  %659 = vrot.lane.b32.xlu0 %v10132_v7, %s9862_s14 }
  0xc7   : > { %710 = vrot.lane.b32.xlu1 %v10109_v2, %s9863_s16  ;;  %706 = vrot.lane.b32.xlu0 %v10112_v3, %s9863_s16 }
  0xcb   : > { %708 = vrot.lane.b32.xlu1 %v10099_v0, %s9863_s16  ;;  %704 = vrot.lane.b32.xlu0 %v10102_v1, %s9863_s16 }
  0xcf   : > { %718 = vrot.lane.b32.xlu1 %v10125_v6, %s9863_s16  ;;  %714 = vrot.lane.b32.xlu0 %v10115_v4, %s9863_s16 }
  0xd3   : > { %716 = vrot.lane.b32.xlu1 %v10132_v7, %s9863_s16  ;;  %712 = vrot.lane.b32.xlu0 %v10118_v5, %s9863_s16 }
  0xd7   : > { %759 = vrot.lane.b32.xlu1 %v10109_v2, %s9864_s12  ;;  %755 = vrot.lane.b32.xlu0 %v10112_v3, %s9864_s12 }
  0xdb   : > { %757 = vrot.lane.b32.xlu1 %v10099_v0, %s9864_s12  ;;  %753 = vrot.lane.b32.xlu0 %v10102_v1, %s9864_s12 }
  0xdf   : > { %767 = vrot.lane.b32.xlu1 %v10125_v6, %s9864_s12  ;;  %763 = vrot.lane.b32.xlu0 %v10115_v4, %s9864_s12 }
  0xe3   : > { %765 = vrot.lane.b32.xlu1 %v10132_v7, %s9864_s12  ;;  %761 = vrot.lane.b32.xlu0 %v10118_v5, %s9864_s12 }
  0xe7   : > { %9177 = vrot.lane.b32.xlu1 %v9156_v8, %s9865_s15  ;;  %9172 = vrot.lane.b32.xlu0 %v9151_v9, %s9865_s15 }
  0xeb   : > { %9187 = vrot.lane.b32.xlu1 %v9166_v10, %s9865_s15  ;;  %9182 = vrot.lane.b32.xlu0 %v9161_v11, %s9865_s15 }
  0xef   : > { %849 = vrot.lane.b32.xlu1 %v10109_v2, %s9866_s22  ;;  %845 = vrot.lane.b32.xlu0 %v10112_v3, %s9866_s22 }
  0xf3   : > { %847 = vrot.lane.b32.xlu1 %v10099_v0, %s9866_s22  ;;  %843 = vrot.lane.b32.xlu0 %v10102_v1, %s9866_s22 }
  0xf7   : > { %857 = vrot.lane.b32.xlu1 %v10125_v6, %s9866_s22  ;;  %853 = vrot.lane.b32.xlu0 %v10115_v4, %s9866_s22 }
  0xfb   : > { %855 = vrot.lane.b32.xlu1 %v10132_v7, %s9866_s22  ;;  %851 = vrot.lane.b32.xlu0 %v10118_v5, %s9866_s22 }
 0x101   : > { %v513_v20 = vpop.permute.xlu1 %512  ;;  %v509_v21 = vpop.permute.xlu0 %508 }
 0x102   : > { %v538_v24 = vsel %vm524_vm1, 0.0, %v513_v20  ;;  %v537_v25 = vsel %vm524_vm1, 0.0, %v509_v21 }
 0x103   : > { %v543_v29 = vmul.f32 %v10248_v23, %v538_v24  ;;  %v541_v30 = vmul.f32 %v10248_v23, %v537_v25  ;;  %v10317_v25 = vsel %vm478_vm6, 1.0, %v9868_v22  ;;  %vm2764_vm6 = vcmask 785408  }
 0x105   : > { %v515_v27 = vpop.permute.xlu1 %514  ;;  %v511_v28 = vpop.permute.xlu0 %510  ;;  %v10263_v38 = vpack.c.bf16 %v543_v29, %v541_v30 }
 0x106   : > { %v526_v31 = vsel %vm524_vm1, %v513_v20, %v515_v27  ;;  %v525_v32 = vsel %vm524_vm1, %v509_v21, %v511_v28  ;;  %v10320_v27 = vsel %vm479_vm7, 1.0, %v9868_v22 }
 0x107   : > { %v544_v33 = vmul.f32 %v10253_v26, %v526_v31  ;;  %v542_v34 = vmul.f32 %v10253_v26, %v525_v32  ;;  %14138 = vst [vmem:[#allocation23_spill] sm:$0xff] %v10320_v27 }
 0x109   : > { %v10261_v35 = vpack.c.bf16 %v544_v33, %v542_v34  ;;  %v519_v36 = vpop.permute.xlu1 %518  ;;  %v517_v37 = vpop.permute.xlu0 %516 }
 0x10a   : > { %v527_v39 = vsel %vm524_vm1, %v517_v37, %v519_v36  ;;  %v539_v40 = vsel %vm524_vm1, 0.0, %v517_v37 }
 0x10b   : > { %963 = vmatprep.subr.bf16.mxu1 %v10261_v35  ;;  %1747 = vmatprep.subr.bf16.mxu0 %v10261_v35  ;;  %v545_v45 = vmul.f32 %v10248_v23, %v539_v40  ;;  %v546_v46 = vmul.f32 %v10253_v26, %v527_v39 }
 0x10c   : > { %964 = vmatpush1.bf16.msra.mxu1 %v10263_v38  ;;  %1748 = vmatpush1.bf16.msra.mxu0 %v10263_v38 }
 0x10d   : > { %v523_v41 = vpop.permute.xlu1 %522  ;;  %v521_v42 = vpop.permute.xlu0 %520 }
 0x10e   : > { %v528_v43 = vsel %vm524_vm1, %v521_v42, %v523_v41  ;;  %v540_v44 = vsel %vm524_vm1, 0.0, %v521_v42 }
 0x10f   : > { %v547_v47 = vmul.f32 %v10248_v23, %v540_v44  ;;  %v548_v48 = vmul.f32 %v10253_v26, %v528_v43 }
 0x111   : > { %v10277_v49 = vpack.c.bf16 %v547_v47, %v545_v45  ;;  %v10279_v50 = vpack.c.bf16 %v548_v48, %v546_v46  ;;  %v9158_v51 = vpop.permute.xlu1 %9157  ;;  %v9153_v52 = vpop.permute.xlu0 %9152 }
 0x112   : > { %v9160_v53 = vunpack.i.h.bf16 %v9158_v51  ;;  %v9159_v54 = vunpack.i.l.bf16 %v9158_v51  ;;  %v9155_v55 = vunpack.i.h.bf16 %v9153_v52  ;;  %v9154_v56 = vunpack.i.l.bf16 %v9153_v52 }
 0x113   : > { %965 = vmatprep.subr.bf16.mxu1 %v10279_v50  ;;  %1749 = vmatprep.subr.bf16.mxu0 %v10279_v50 }
 0x114   : > { %v575_v57 = vsel %vm573_vm3, %v9159_v54, %v9160_v53  ;;  %v574_v58 = vsel %vm573_vm3, %v9154_v56, %v9155_v55  ;;  %966 = vmatpush1.bf16.msra.mxu1 %v10277_v49  ;;  %1750 = vmatpush1.bf16.msra.mxu0 %v10277_v49  ;;  %v10290_v60 = vpack.c.bf16 %v9159_v54, %v9154_v56 }
 0x115   : > { %v10288_v59 = vpack.c.bf16 %v575_v57, %v574_v58  ;;  %v9168_v61 = vpop.permute.xlu1 %9167  ;;  %v9163_v62 = vpop.permute.xlu0 %9162 }
 0x116   : > { %v9170_v8 = vunpack.i.h.bf16 %v9168_v61  ;;  %v9169_v9 = vunpack.i.l.bf16 %v9168_v61  ;;  %v9165_v10 = vunpack.i.h.bf16 %v9163_v62  ;;  %v9164_v11 = vunpack.i.l.bf16 %v9163_v62 }
 0x117   : > { %967 = vmatprep.subr.bf16.mxu1 %v10288_v59  ;;  %1751 = vmatprep.subr.bf16.mxu0 %v10288_v59 }
 0x118   : > { %v577_v12 = vsel %vm573_vm3, %v9169_v9, %v9170_v8  ;;  %v576_v13 = vsel %vm573_vm3, %v9164_v11, %v9165_v10  ;;  %8360 = vmatpush1.bf16.msk.msra.mxu1 %vm10292_vm5, %v10290_v60  ;;  %8400 = vmatpush1.bf16.msk.msra.mxu0 %vm10292_vm5, %v10290_v60  ;;  %v10312_v24 = vpack.c.bf16 %v9169_v9, %v9164_v11 }
 0x119   : > { %v10306_v14 = vpack.c.bf16 %v577_v12, %v576_v13  ;;  %v601_v20 = vpop.permute.xlu1 %600  ;;  %v599_v21 = vpop.permute.xlu0 %598 }
 0x11a   : > { %v615_v16 = vsel %vm614_vm8, %v599_v21, %v601_v20  ;;  %v627_v18 = vsel %vm614_vm8, 0.0, %v599_v21 }
 0x11b   : > { %969 = vmatprep.subr.bf16.mxu1 %v10306_v14  ;;  %1753 = vmatprep.subr.bf16.mxu0 %v10306_v14  ;;  %v631_v22 = vmul.f32 %v10317_v25, %v627_v18  ;;  %v632_v30 = vmul.f32 %v10320_v27, %v615_v16 }
 0x11c   : > { %8365 = vmatpush1.bf16.msk.msra.mxu1 %vm10292_vm5, %v10312_v24  ;;  %8405 = vmatpush1.bf16.msk.msra.mxu0 %vm10292_vm5, %v10312_v24 }
 0x11d   : > { %v605_v17 = vpop.permute.xlu1 %604  ;;  %v603_v19 = vpop.permute.xlu0 %602 }
 0x11e   : > { %v616_v28 = vsel %vm614_vm8, %v603_v19, %v605_v17  ;;  %v628_v29 = vsel %vm614_vm8, 0.0, %v603_v19 }
 0x11f   : > { %v633_v31 = vmul.f32 %v10317_v25, %v628_v29  ;;  %v634_v32 = vmul.f32 %v10320_v27, %v616_v28 }
 0x121   : > { %v10336_v33 = vpack.c.bf16 %v633_v31, %v631_v22  ;;  %v10338_v34 = vpack.c.bf16 %v634_v32, %v632_v30  ;;  %v609_v36 = vpop.permute.xlu1 %608  ;;  %v607_v37 = vpop.permute.xlu0 %606 }
 0x122   : > { %v617_v39 = vsel %vm614_vm8, %v607_v37, %v609_v36  ;;  %v629_v40 = vsel %vm614_vm8, 0.0, %v607_v37 }
 0x123   : > { %971 = vmatprep.subr.bf16.mxu1 %v10338_v34  ;;  %1755 = vmatprep.subr.bf16.mxu0 %v10338_v34  ;;  %v635_v45 = vmul.f32 %v10317_v25, %v629_v40  ;;  %v636_v46 = vmul.f32 %v10320_v27, %v617_v39 }
 0x124   : > { %972 = vmatpush1.bf16.msra.mxu1 %v10336_v33  ;;  %1756 = vmatpush1.bf16.msra.mxu0 %v10336_v33 }
 0x125   : > { %v613_v41 = vpop.permute.xlu1 %612  ;;  %v611_v42 = vpop.permute.xlu0 %610 }
 0x126   : > { %v618_v43 = vsel %vm614_vm8, %v611_v42, %v613_v41  ;;  %v630_v44 = vsel %vm614_vm8, 0.0, %v611_v42  ;;  %v10390_v41 = vpack.c.bf16 %v10109_v2, %v10112_v3  ;;  %v932_v42 = vld [vmem:[%s13978_s6] sm:$0xff]  ;;  %v10406_v2 = vpack.c.bf16 %v10099_v0, %v10102_v1 }
 0x127   : > { %v637_v47 = vmul.f32 %v10317_v25, %v630_v44  ;;  %v638_v48 = vmul.f32 %v10320_v27, %v618_v43  ;;  %v933_v43 = vld [vmem:[%s13978_s6 + $0x8] sm:$0xff]  ;;  %936 = vperm.xlu0 %9191, %v932_v42   ;;  %v10422_v1 = vpack.c.bf16 %v10132_v7, %v10118_v5 }
 0x128   : > { %941 = vperm.xlu1 %9192, %v933_v43  }
 0x129   : > { %v10352_v51 = vpack.c.bf16 %v637_v47, %v635_v45  ;;  %v10354_v52 = vpack.c.bf16 %v638_v48, %v636_v46  ;;  %v650_v53 = vpop.permute.xlu1 %649  ;;  %v648_v54 = vpop.permute.xlu0 %647  ;;  %v10412_v47 = vpack.c.bf16 %v10125_v6, %v10115_v4 }
 0x12a   : > { %v664_v55 = vsel %vm663_vm9, %v648_v54, %v650_v53  ;;  %v676_v56 = vsel %vm663_vm9, 0.0, %v648_v54 }
 0x12b   : > { %973 = vmatprep.subr.bf16.mxu1 %v10354_v52  ;;  %1757 = vmatprep.subr.bf16.mxu0 %v10354_v52  ;;  %v680_v8 = vmul.f32 %v10248_v23, %v676_v56  ;;  %v681_v9 = vmul.f32 %v10253_v26, %v664_v55 }
 0x12c   : > { %974 = vmatpush1.bf16.msra.mxu1 %v10352_v51  ;;  %1758 = vmatpush1.bf16.msra.mxu0 %v10352_v51 }
 0x12d   : > { %v654_v57 = vpop.permute.xlu1 %653  ;;  %v652_v58 = vpop.permute.xlu0 %651 }
 0x12e   : > { %v665_v61 = vsel %vm663_vm9, %v652_v58, %v654_v57  ;;  %v677_v62 = vsel %vm663_vm9, 0.0, %v652_v58 }
 0x12f   : > { %v682_v10 = vmul.f32 %v10248_v23, %v677_v62  ;;  %v683_v11 = vmul.f32 %v10253_v26, %v665_v61 }
 0x131   : > { %v10368_v12 = vpack.c.bf16 %v682_v10, %v680_v8  ;;  %v10370_v13 = vpack.c.bf16 %v683_v11, %v681_v9  ;;  %v658_v20 = vpop.permute.xlu1 %657  ;;  %v656_v21 = vpop.permute.xlu0 %655 }
 0x132   : > { %v666_v16 = vsel %vm663_vm9, %v656_v21, %v658_v20  ;;  %v678_v18 = vsel %vm663_vm9, 0.0, %v656_v21 }
 0x133   : > { %975 = vmatprep.subr.bf16.mxu1 %v10370_v13  ;;  %1759 = vmatprep.subr.bf16.mxu0 %v10370_v13  ;;  %v684_v22 = vmul.f32 %v10248_v23, %v678_v18  ;;  %v685_v30 = vmul.f32 %v10253_v26, %v666_v16 }
 0x134   : > { %976 = vmatpush1.bf16.msra.mxu1 %v10368_v12  ;;  %1760 = vmatpush1.bf16.msra.mxu0 %v10368_v12 }
 0x135   : > { %v662_v17 = vpop.permute.xlu1 %661  ;;  %v660_v19 = vpop.permute.xlu0 %659 }
 0x136   : > { %v667_v28 = vsel %vm663_vm9, %v660_v19, %v662_v17  ;;  %v679_v29 = vsel %vm663_vm9, 0.0, %v660_v19 }
 0x137   : > { %v686_v31 = vmul.f32 %v10248_v23, %v679_v29  ;;  %v687_v32 = vmul.f32 %v10253_v26, %v667_v28 }
 0x139   : > { %v10384_v36 = vpack.c.bf16 %v686_v31, %v684_v22  ;;  %v10386_v37 = vpack.c.bf16 %v687_v32, %v685_v30  ;;  %v711_v39 = vpop.permute.xlu1 %710  ;;  %v707_v40 = vpop.permute.xlu0 %706 }
 0x13a   : > { %v734_v44 = vsel %vm720_vm10, %v711_v39, 0.0  ;;  %v733_v45 = vsel %vm720_vm10, %v707_v40, 0.0 }
 0x13b   : > { %977 = vmatprep.subr.bf16.mxu1 %v10386_v37  ;;  %1761 = vmatprep.subr.bf16.mxu0 %v10386_v37  ;;  %v740_v48 = vmul.f32 %v10320_v27, %v734_v44  ;;  %v738_v53 = vmul.f32 %v10320_v27, %v733_v45 }
 0x13c   : > { %978 = vmatpush1.bf16.msra.mxu1 %v10384_v36  ;;  %1762 = vmatpush1.bf16.msra.mxu0 %v10384_v36 }
 0x13d   : > { %v709_v3 = vpop.permute.xlu1 %708  ;;  %v705_v46 = vpop.permute.xlu0 %704  ;;  %979 = vmatprep.subr.bf16.mxu1 %v10390_v41  ;;  %1763 = vmatprep.subr.bf16.mxu0 %v10390_v41  ;;  %v10430_v61 = vpack.c.bf16 %v740_v48, %v738_v53 }
 0x13e   : > { %v722_v54 = vsel %vm720_vm10, %v709_v3, %v711_v39  ;;  %v721_v0 = vsel %vm720_vm10, %v705_v46, %v707_v40 }
 0x13f   : > { %v739_v55 = vmul.f32 %v10317_v25, %v722_v54  ;;  %v737_v56 = vmul.f32 %v10317_v25, %v721_v0 }
 0x140   : > { %980 = vmatpush1.bf16.msra.mxu1 %v10406_v2  ;;  %1764 = vmatpush1.bf16.msra.mxu0 %v10406_v2 }
 0x141   : > { %v719_v4 = vpop.permute.xlu1 %718  ;;  %v715_v6 = vpop.permute.xlu0 %714  ;;  %981 = vmatprep.subr.bf16.mxu1 %v10412_v47  ;;  %1765 = vmatprep.subr.bf16.mxu0 %v10412_v47  ;;  %v10438_v9 = vpack.c.bf16 %v739_v55, %v737_v56 }
 0x142   : > { %v736_v57 = vsel %vm720_vm10, %v719_v4, 0.0  ;;  %v735_v58 = vsel %vm720_vm10, %v715_v6, 0.0 }
 0x143   : > { %v744_v62 = vmul.f32 %v10320_v27, %v736_v57  ;;  %v742_v5 = vmul.f32 %v10320_v27, %v735_v58 }
 0x144   : > { %982 = vmatpush1.bf16.msra.mxu1 %v10422_v1  ;;  %1766 = vmatpush1.bf16.msra.mxu0 %v10422_v1 }
 0x145   : > { %v717_v7 = vpop.permute.xlu1 %716  ;;  %v713_v8 = vpop.permute.xlu0 %712  ;;  %983 = vmatprep.subr.bf16.mxu1 %v10430_v61  ;;  %1767 = vmatprep.subr.bf16.mxu0 %v10430_v61  ;;  %v10442_v20 = vpack.c.bf16 %v744_v62, %v742_v5 }
 0x146   : > { %v724_v10 = vsel %vm720_vm10, %v717_v7, %v719_v4  ;;  %v723_v11 = vsel %vm720_vm10, %v713_v8, %v715_v6 }
 0x147   : > { %v743_v21 = vmul.f32 %v10317_v25, %v724_v10  ;;  %v741_v16 = vmul.f32 %v10317_v25, %v723_v11 }
 0x148   : > { %984 = vmatpush1.bf16.msra.mxu1 %v10438_v9  ;;  %1768 = vmatpush1.bf16.msra.mxu0 %v10438_v9 }
 0x149   : > { %v10448_v18 = vpack.c.bf16 %v743_v21, %v741_v16  ;;  %v760_v17 = vpop.permute.xlu1 %759  ;;  %v756_v19 = vpop.permute.xlu0 %755  ;;  %985 = vmatprep.subr.bf16.mxu1 %v10442_v20  ;;  %1769 = vmatprep.subr.bf16.mxu0 %v10442_v20 }
 0x14a   : > { %v783_v28 = vsel %vm769_vm11, %v760_v17, 0.0  ;;  %v782_v29 = vsel %vm769_vm11, %v756_v19, 0.0 }
 0x14b   : > { %v789_v22 = vmul.f32 %v10253_v26, %v783_v28  ;;  %v787_v30 = vmul.f32 %v10253_v26, %v782_v29 }
 0x14c   : > { %986 = vmatpush1.bf16.msra.mxu1 %v10448_v18  ;;  %1770 = vmatpush1.bf16.msra.mxu0 %v10448_v18 }
 0x14d   : > { %v10458_v31 = vpack.c.bf16 %v789_v22, %v787_v30  ;;  %v758_v32 = vpop.permute.xlu1 %757  ;;  %v754_v39 = vpop.permute.xlu0 %753 }
 0x14e   : > { %v771_v40 = vsel %vm769_vm11, %v758_v32, %v760_v17  ;;  %v770_v42 = vsel %vm769_vm11, %v754_v39, %v756_v19  ;;  %v9650_v17 = vld [vmem:[#allocation10 + $0x130] ss:$28 sps:$4 sm:$0xff]  }
 0x14f   : > { %v788_v43 = vmul.f32 %v10248_v23, %v771_v40  ;;  %v786_v44 = vmul.f32 %v10248_v23, %v770_v42  ;;  %987 = vmatprep.subr.bf16.mxu1 %v10458_v31  ;;  %1771 = vmatprep.subr.bf16.mxu0 %v10458_v31 }
 0x151   : > { %v10466_v45 = vpack.c.bf16 %v788_v43, %v786_v44  ;;  %v768_v3 = vpop.permute.xlu1 %767  ;;  %v764_v46 = vpop.permute.xlu0 %763 }
 0x152   : > { %v785_v48 = vsel %vm769_vm11, %v768_v3, 0.0  ;;  %v784_v53 = vsel %vm769_vm11, %v764_v46, 0.0 }
 0x153   : > { %v793_v54 = vmul.f32 %v10253_v26, %v785_v48  ;;  %v791_v0 = vmul.f32 %v10253_v26, %v784_v53  ;;  %988 = vmatpush1.bf16.msra.mxu1 %v10466_v45  ;;  %1772 = vmatpush1.bf16.msra.mxu0 %v10466_v45 }
 0x155   : > { %v10474_v4 = vpack.c.bf16 %v793_v54, %v791_v0  ;;  %v766_v6 = vpop.permute.xlu1 %765  ;;  %v762_v55 = vpop.permute.xlu0 %761 }
 0x156   : > { %v773_v56 = vsel %vm769_vm11, %v766_v6, %v768_v3  ;;  %v772_v57 = vsel %vm769_vm11, %v762_v55, %v764_v46  ;;  %v9513_v55 = vld [vmem:[#allocation4] ss:$12 sps:$4 sm:$0xff]  }
 0x157   : > { %v792_v58 = vmul.f32 %v10248_v23, %v773_v56  ;;  %v790_v62 = vmul.f32 %v10248_v23, %v772_v57  ;;  %989 = vmatprep.subr.bf16.mxu1 %v10474_v4  ;;  %1773 = vmatprep.subr.bf16.mxu0 %v10474_v4  ;;  %v9516_v56 = vld [vmem:[#allocation9] ss:$20 sps:$4 sm:$0xff]  }
 0x159   : > { %v10482_v5 = vpack.c.bf16 %v792_v58, %v790_v62  ;;  %v9178_v7 = vpop.permute.xlu1 %9177  ;;  %v9173_v8 = vpop.permute.xlu0 %9172 }
 0x15a   : > { %v9180_v10 = vunpack.i.h.bf16 %v9178_v7  ;;  %v9179_v11 = vunpack.i.l.bf16 %v9178_v7  ;;  %v9175_v21 = vunpack.i.h.bf16 %v9173_v8  ;;  %v9174_v16 = vunpack.i.l.bf16 %v9173_v8 }
 0x15b   : > { %990 = vmatpush1.bf16.msra.mxu1 %v10482_v5  ;;  %1774 = vmatpush1.bf16.msra.mxu0 %v10482_v5 }
 0x15c   : > { %v820_v19 = vsel %vm818_vm12, %v9179_v11, %v9180_v10  ;;  %v10493_v28 = vpack.c.bf16 %v9180_v10, %v9175_v21  ;;  %v819_v29 = vsel %vm818_vm12, %v9174_v16, %v9175_v21 }
 0x15d   : > { %v10496_v22 = vpack.c.bf16 %v820_v19, %v819_v29  ;;  %v9188_v30 = vpop.permute.xlu1 %9187  ;;  %v9183_v32 = vpop.permute.xlu0 %9182 }
 0x15e   : > { %v9190_v39 = vunpack.i.h.bf16 %v9188_v30  ;;  %v9189_v40 = vunpack.i.l.bf16 %v9188_v30  ;;  %v9185_v42 = vunpack.i.h.bf16 %v9183_v32  ;;  %v9184_v43 = vunpack.i.l.bf16 %v9183_v32  ;;  %8368 = vmatprep.subr.msk.bf16.mxu1 %vm10488_vm13, %v10493_v28  ;;  %8408 = vmatprep.subr.msk.bf16.mxu0 %vm10488_vm13, %v10493_v28 }
 0x15f   : > { %992 = vmatpush1.bf16.msra.mxu1 %v10496_v22  ;;  %1776 = vmatpush1.bf16.msra.mxu0 %v10496_v22 }
 0x160   : > { %v822_v44 = vsel %vm818_vm12, %v9189_v40, %v9190_v39  ;;  %v10507_v3 = vpack.c.bf16 %v9190_v39, %v9185_v42  ;;  %v821_v46 = vsel %vm818_vm12, %v9184_v43, %v9185_v42 }
 0x161   : > { %v10510_v48 = vpack.c.bf16 %v822_v44, %v821_v46  ;;  %v850_v53 = vpop.permute.xlu1 %849  ;;  %v846_v54 = vpop.permute.xlu0 %845 }
 0x162   : > { %v873_v0 = vsel %vm859_vm14, %v850_v53, 0.0  ;;  %v872_v6 = vsel %vm859_vm14, %v846_v54, 0.0  ;;  %8371 = vmatprep.subr.msk.bf16.mxu1 %vm10488_vm13, %v10507_v3  ;;  %8411 = vmatprep.subr.msk.bf16.mxu0 %vm10488_vm13, %v10507_v3 }
 0x163   : > { %v879_v57 = vmul.f32 %v10320_v27, %v873_v0  ;;  %v877_v58 = vmul.f32 %v10320_v27, %v872_v6  ;;  %994 = vmatpush1.bf16.msra.mxu1 %v10510_v48  ;;  %1778 = vmatpush1.bf16.msra.mxu0 %v10510_v48 }
 0x165   : > { %v10524_v62 = vpack.c.bf16 %v879_v57, %v877_v58  ;;  %v848_v7 = vpop.permute.xlu1 %847  ;;  %v844_v8 = vpop.permute.xlu0 %843  ;;  %v9522_v57 = vld [vmem:[#allocation7 + $0x4] ss:$16 sps:$4 sm:$0xff]   ;;  %v9520_v58 = vld [vmem:[#allocation7] ss:$16 sps:$4 sm:$0xff]  }
 0x166   : > { %v861_v10 = vsel %vm859_vm14, %v848_v7, %v850_v53  ;;  %v860_v11 = vsel %vm859_vm14, %v844_v8, %v846_v54  ;;  %996 = vmatmul.mubr.bf16.vlgmr.msra.gmra.mrb[0].mxu1 %v9513_v55  ;;  %1780 = vmatmul.mubr.bf16.vlgmr.msra.gmra.mrb[0].mxu0 %v9516_v56  ;;  %v9519_v56 = vld [vmem:[#allocation4 + $0x8] ss:$12 sps:$4 sm:$0xff]  }
 0x167   : > { %14141 = vst [vmem:[#allocation24_spill] sm:$0xff] %v10524_v62  ;;  %v878_v21 = vmul.f32 %v10317_v25, %v861_v10  ;;  %v876_v16 = vmul.f32 %v10317_v25, %v860_v11  ;;  %1006 = vmatprep.subr.bf16.mxu1 %v10524_v62  ;;  %1790 = vmatprep.subr.bf16.mxu0 %v10524_v62 }
 0x168   : > { %1038 = vmatprep.mubr.bf16.mxu1 %v13993_v15 }
 0x169   : > { %v10533_v19 = vpack.c.bf16 %v878_v21, %v876_v16  ;;  %v858_v29 = vpop.permute.xlu1 %857  ;;  %v854_v30 = vpop.permute.xlu0 %853 }
 0x16a   : > { %v875_v32 = vsel %vm859_vm14, %v858_v29, 0.0  ;;  %v874_v39 = vsel %vm859_vm14, %v854_v30, 0.0 }
 0x16b   : > { %14142 = vst [vmem:[#allocation25_spill] sm:$0xff] %v10533_v19  ;;  %v883_v40 = vmul.f32 %v10320_v27, %v875_v32  ;;  %v881_v42 = vmul.f32 %v10320_v27, %v874_v39  ;;  %1007 = vmatpush1.bf16.msra.mxu1 %v10533_v19  ;;  %1791 = vmatpush1.bf16.msra.mxu0 %v10533_v19 }
 0x16d   : > { %v10541_v43 = vpack.c.bf16 %v883_v40, %v881_v42  ;;  %v856_v44 = vpop.permute.xlu1 %855  ;;  %v852_v46 = vpop.permute.xlu0 %851 }
 0x16e   : > { %v863_v53 = vsel %vm859_vm14, %v856_v44, %v858_v29  ;;  %v862_v54 = vsel %vm859_vm14, %v852_v46, %v854_v30 }
 0x16f   : > { %14143 = vst [vmem:[#allocation26_spill] sm:$0xff] %v10541_v43  ;;  %v882_v0 = vmul.f32 %v10317_v25, %v863_v53  ;;  %v880_v6 = vmul.f32 %v10317_v25, %v862_v54  ;;  %1008 = vmatprep.subr.bf16.mxu1 %v10541_v43  ;;  %1792 = vmatprep.subr.bf16.mxu0 %v10541_v43 }
 0x171   : > { %v10549_v55 = vpack.c.bf16 %v882_v0, %v880_v6 }
 0x173   : > { %14144 = vst [vmem:[#allocation27_spill] sm:$0xff] %v10549_v55  ;;  %1009 = vmatpush1.bf16.msra.mxu1 %v10549_v55  ;;  %1793 = vmatpush1.bf16.msra.mxu0 %v10549_v55 }
 0x174   : > { %1342 = vmatprep.subr.bf16.mxu1 %v10261_v35 }
 0x176   : > { %8202 = vmatmul.mubr.msk.bf16.vlgmr.msra.gmra.mrb[0].mxu1 %vm959_vm15, %v9519_v56 }
 0x177   : > { %1343 = vmatpush1.bf16.msra.mxu1 %v10263_v38  ;;  %1374 = vmatprep.mubr.bf16.mxu1 %v9522_v57 }
 0x178   : > { %1344 = vmatprep.subr.bf16.mxu1 %v10279_v50 }
 0x17b   : > { %1345 = vmatpush1.bf16.msra.mxu1 %v10277_v49 }
 0x17c   : > { %1346 = vmatprep.subr.bf16.mxu1 %v10288_v59 }
 0x17f   : > { %8376 = vmatpush1.bf16.msk.msra.mxu1 %vm10292_vm5, %v10290_v60 }
 0x180   : > { %1348 = vmatprep.subr.bf16.mxu1 %v10306_v14 }
 0x183   : > { %8381 = vmatpush1.bf16.msk.msra.mxu1 %vm10292_vm5, %v10312_v24 }
 0x184   : > { %1350 = vmatprep.subr.bf16.mxu1 %v10338_v34 }
 0x187   : > { %1351 = vmatpush1.bf16.msra.mxu1 %v10336_v33 }
 0x188   : > { %1352 = vmatprep.subr.bf16.mxu1 %v10354_v52 }
 0x18b   : > { %1353 = vmatpush1.bf16.msra.mxu1 %v10352_v51 }
 0x18c   : > { %1354 = vmatprep.subr.bf16.mxu1 %v10370_v13 }
 0x18f   : > { %1355 = vmatpush1.bf16.msra.mxu1 %v10368_v12 }
 0x190   : > { %1356 = vmatprep.subr.bf16.mxu1 %v10386_v37 }
 0x193   : > { %1357 = vmatpush1.bf16.msra.mxu1 %v10384_v36 }
 0x194   : > { %1358 = vmatprep.subr.bf16.mxu1 %v10390_v41 }
 0x197   : > { %1359 = vmatpush1.bf16.msra.mxu1 %v10406_v2 }
 0x198   : > { %1360 = vmatprep.subr.bf16.mxu1 %v10412_v47 }
 0x19b   : > { %1361 = vmatpush1.bf16.msra.mxu1 %v10422_v1 }
 0x19c   : > { %1362 = vmatprep.subr.bf16.mxu1 %v10430_v61 }
 0x19f   : > { %1363 = vmatpush1.bf16.msra.mxu1 %v10438_v9 }
 0x1a0   : > { %1364 = vmatprep.subr.bf16.mxu1 %v10442_v20 }
 0x1a3   : > { %1365 = vmatpush1.bf16.msra.mxu1 %v10448_v18 }
 0x1a4   : > { %1366 = vmatprep.subr.bf16.mxu1 %v10458_v31 }
 0x1a6   : > { %v937_v7 = vpop.permute.xlu0 %936 }
 0x1a7   : > { %1367 = vmatpush1.bf16.msra.mxu1 %v10466_v45  ;;  %v942_v10 = vpop.permute.xlu1 %941 }
 0x1a8   : > { %1368 = vmatprep.subr.bf16.mxu1 %v10474_v4 }
 0x1ab   : > { %1369 = vmatpush1.bf16.msra.mxu1 %v10482_v5 }
 0x1ac   : > { %8384 = vmatprep.subr.msk.bf16.mxu1 %vm10488_vm13, %v10493_v28 }
 0x1af   : > { %1371 = vmatpush1.bf16.msra.mxu1 %v10496_v22 }
 0x1b0   : > { %8387 = vmatprep.subr.msk.bf16.mxu1 %vm10488_vm13, %v10507_v3 }
 0x1b3   : > { %1373 = vmatpush1.bf16.msra.mxu1 %v10510_v48 }
 0x1b4   : > { %1385 = vmatprep.subr.bf16.mxu1 %v10524_v62 }
 0x1b6   : > { %1375 = vmatmul.mubr.bf16.vlgmr.msra.gmra.mrb[4].mxu1 %v9520_v58 }
 0x1b7   : > { %1386 = vmatpush1.bf16.msra.mxu1 %v10533_v19 }
 0x1b8   : > { %1387 = vmatprep.subr.bf16.mxu1 %v10541_v43 }
 0x1bb   : > { %1388 = vmatpush1.bf16.msra.mxu1 %v10549_v55 }
 0x249   : > { %v1040_v8 = vpop.f32.mrb[0].mxu1 }
 0x24a   : > { %v8836_v11 = vadd.f32 %v1040_v8, %v937_v7  ;;  %v1042_v21 = vpop.f32.mrb[1].mxu1  ;;  %v9523_v8 = vld [vmem:[#allocation7 + $0xc] ss:$16 sps:$4 sm:$0xff]  }
 0x24b   : > { %v8837_v16 = vadd.f32 %v1042_v21, %v937_v7  ;;  %v1044_v29 = vpop.f32.mrb[2].mxu1  ;;  %8207 = vmatprep.mubr.msk.bf16.mxu1 %vm1338_vm0, %v9523_v8 }
 0x24c   : > { %v1049_v30 = vmul.f32 0.2, %v8836_v11  ;;  %v8838_v32 = vadd.f32 %v1044_v29, %v942_v10  ;;  %v1046_v39 = vpop.f32.mrb[3].mxu1 }
 0x24d   : > { %v1050_v40 = vmul.f32 0.2, %v8837_v16  ;;  %v8839_v42 = vadd.f32 %v1046_v39, %v942_v10  ;;  %v1307_v10 = vld [vmem:[%s13979_s7] sm:$0xff] }
 0x24e   : > { %v1053_v44 = vmax.f32 %v8836_v11, %v1049_v30  ;;  %v1051_v46 = vmul.f32 0.2, %v8838_v32  ;;  %v1308_v11 = vld [vmem:[%s13979_s7 + $0x8] sm:$0xff] }
 0x24f   : > { %v1054_v53 = vmax.f32 %v8837_v16, %v1050_v40  ;;  %v1052_v54 = vmul.f32 0.2, %v8839_v42 }
 0x250   : > { %v1055_v0 = vmax.f32 %v8838_v32, %v1051_v46  ;;  %1061 = vrot.lane.b32.xlu1 %v1053_v44, %s9859_s19 }
 0x251   : > { %v1056_v6 = vmax.f32 %v8839_v42, %v1052_v54  ;;  %1063 = vrot.lane.b32.xlu0 %v1054_v53, %s9859_s19  ;;  %v9193_v56 = vpack.i.bf16 %v1054_v53, %v1053_v44 }
 0x252   : > { %v10600_v57 = vpack.c.bf16 %v1055_v0, %v1053_v44 }
 0x253   : > { %v9198_v58 = vpack.i.bf16 %v1056_v6, %v1055_v0  ;;  %v10602_v7 = vpack.c.bf16 %v1056_v6, %v1054_v53 }
 0x254   : > { %14145 = vst [vmem:[#allocation28_spill] sm:$0xff] %v10600_v57  ;;  %1105 = vrot.lane.b32.xlu1 %v1053_v44, %s9861_s25 }
 0x255   : > { %14146 = vst [vmem:[#allocation29_spill] sm:$0xff] %v10602_v7  ;;  %1107 = vrot.lane.b32.xlu0 %v1054_v53, %s9861_s25 }
 0x258   : > { %1129 = vrot.lane.b32.xlu1 %v1053_v44, %s9862_s14 }
 0x259   : > { %1131 = vrot.lane.b32.xlu0 %v1054_v53, %s9862_s14 }
 0x25c   : > { %9194 = vrot.lane.b32.xlu1 %v9193_v56, %s9860_s24 }
 0x25d   : > { %1161 = vrot.lane.b32.xlu0 %v1055_v0, %s9863_s16 }
 0x260   : > { %1065 = vrot.lane.b32.xlu1 %v1055_v0, %s9859_s19 }
 0x261   : > { %1067 = vrot.lane.b32.xlu0 %v1056_v6, %s9859_s19 }
 0x264   : > { %1159 = vrot.lane.b32.xlu1 %v1054_v53, %s9863_s16 }
 0x265   : > { %9199 = vrot.lane.b32.xlu0 %v9198_v58, %s9860_s24 }
 0x268   : > { %1109 = vrot.lane.b32.xlu1 %v1055_v0, %s9861_s25 }
 0x269   : > { %1111 = vrot.lane.b32.xlu0 %v1056_v6, %s9861_s25 }
 0x26c   : > { %1133 = vrot.lane.b32.xlu1 %v1055_v0, %s9862_s14 }
 0x26d   : > { %1135 = vrot.lane.b32.xlu0 %v1056_v6, %s9862_s14 }
 0x270   : > { %1157 = vrot.lane.b32.xlu1 %v1053_v44, %s9863_s16 }
 0x271   : > { %1185 = vrot.lane.b32.xlu0 %v1055_v0, %s9864_s12 }
 0x274   : > { %1183 = vrot.lane.b32.xlu1 %v1054_v53, %s9864_s12 }
 0x275   : > { %1163 = vrot.lane.b32.xlu0 %v1056_v6, %s9863_s16 }
 0x278   : > { %1181 = vrot.lane.b32.xlu1 %v1053_v44, %s9864_s12 }
 0x279   : > { %1187 = vrot.lane.b32.xlu0 %v1056_v6, %s9864_s12 }
 0x27c   : > { %9204 = vrot.lane.b32.xlu1 %v9193_v56, %s9865_s15 }
 0x27d   : > { %9209 = vrot.lane.b32.xlu0 %v9198_v58, %s9865_s15 }
 0x280   : > { %1227 = vrot.lane.b32.xlu1 %v1054_v53, %s9866_s22 }
 0x281   : > { %1231 = vrot.lane.b32.xlu0 %v1056_v6, %s9866_s22 }
 0x284   : > { %1225 = vrot.lane.b32.xlu1 %v1053_v44, %s9866_s22 }
 0x285   : > { %1229 = vrot.lane.b32.xlu0 %v1055_v0, %s9866_s22 }
 0x288   : > { %1311 = vperm.xlu1 %9192, %v1307_v10  }
 0x289   : > { %1316 = vperm.xlu0 %9191, %v1308_v11  }
 0x2c2   : > { %v1062_v21 = vpop.permute.xlu1 %1061 }
 0x2c3   : > { %v1064_v16 = vpop.permute.xlu0 %1063  ;;  %v1075_v53 = vsel %vm524_vm1, 0.0, %v1062_v21 }
 0x2c4   : > { %v1069_v44 = vsel %vm524_vm1, %v1062_v21, %v1064_v16  ;;  %v1077_v10 = vmul.f32 %v10248_v23, %v1075_v53 }
 0x2c5   : > { %v1078_v58 = vmul.f32 %v10253_v26, %v1069_v44 }
 0x2c6   : > { %v1106_v29 = vpop.permute.xlu1 %1105 }
 0x2c7   : > { %v1108_v30 = vpop.permute.xlu0 %1107 }
 0x2c8   : > { %v1113_v44 = vsel %vm614_vm8, %v1106_v29, %v1108_v30 }
 0x2ca   : > { %v1130_v32 = vpop.permute.xlu1 %1129 }
 0x2cb   : > { %v1132_v39 = vpop.permute.xlu0 %1131 }
 0x2ce   : > { %v9195_v40 = vpop.permute.xlu1 %9194 }
 0x2cf   : > { %v10637_v42 = vpop.permute.xlu0 %1161  ;;  %v9197_v11 = vunpack.i.h.bf16 %v9195_v40  ;;  %v9196_v15 = vunpack.i.l.bf16 %v9195_v40 }
 0x2d2   : > { %v1066_v46 = vpop.permute.xlu1 %1065 }
 0x2d3   : > { %v1076_v54 = vsel %vm524_vm1, 0.0, %v1066_v46  ;;  %v1068_v0 = vpop.permute.xlu0 %1067 }
 0x2d4   : > { %v1079_v6 = vmul.f32 %v10248_v23, %v1076_v54  ;;  %v1070_v56 = vsel %vm524_vm1, %v1066_v46, %v1068_v0  ;;  %v1093_v46 = vsel %vm573_vm3, %v9196_v15, %v9197_v11  ;;  %v1119_v54 = vsel %vm614_vm8, 0.0, %v1106_v29 }
 0x2d5   : > { %v1080_v8 = vmul.f32 %v10253_v26, %v1070_v56  ;;  %v1121_v29 = vmul.f32 %v10317_v25, %v1119_v54 }
 0x2d6   : > { %v1160_v55 = vpop.permute.xlu1 %1159  ;;  %v10649_v21 = vpack.c.bf16 %v1079_v6, %v1077_v10  ;;  %v1137_v10 = vsel %vm663_vm9, %v1130_v32, %v1132_v39 }
 0x2d7   : > { %v10647_v16 = vpack.c.bf16 %v1080_v8, %v1078_v58  ;;  %v9200_v43 = vpop.permute.xlu0 %9199  ;;  %v1146_v54 = vmul.f32 %v10253_v26, %v1137_v10 }
 0x2d8   : > { %14148 = vst [vmem:[#allocation31_spill] sm:$0xff] %v10649_v21  ;;  %v9202_v19 = vunpack.i.h.bf16 %v9200_v43  ;;  %v9201_v62 = vunpack.i.l.bf16 %v9200_v43 }
 0x2d9   : > { %14147 = vst [vmem:[#allocation30_spill] sm:$0xff] %v10647_v16  ;;  %1389 = vmatprep.subr.bf16.mxu1 %v10647_v16  ;;  %1794 = vmatprep.subr.bf16.mxu0 %v10647_v16 }
 0x2da   : > { %v1094_v53 = vsel %vm573_vm3, %v9201_v62, %v9202_v19  ;;  %1390 = vmatpush1.bf16.msra.mxu1 %v10649_v21  ;;  %1795 = vmatpush1.bf16.msra.mxu0 %v10649_v21  ;;  %v1110_v40 = vpop.permute.xlu1 %1109  ;;  %v10662_v56 = vpack.c.bf16 %v9201_v62, %v9196_v15  ;;  %v1122_v19 = vmul.f32 %v10320_v27, %v1113_v44  ;;  %v1143_v15 = vsel %vm663_vm9, 0.0, %v1130_v32 }
 0x2db   : > { %v1120_v0 = vsel %vm614_vm8, 0.0, %v1110_v40  ;;  %v1112_v43 = vpop.permute.xlu0 %1111  ;;  %v10660_v6 = vpack.c.bf16 %v1094_v53, %v1093_v46  ;;  %v1145_v32 = vmul.f32 %v10248_v23, %v1143_v15 }
 0x2dc   : > { %14150 = vst [vmem:[#allocation33_spill] sm:$0xff] %v10662_v56  ;;  %v1123_v30 = vmul.f32 %v10317_v25, %v1120_v0  ;;  %v1114_v58 = vsel %vm614_vm8, %v1110_v40, %v1112_v43 }
 0x2dd   : > { %14149 = vst [vmem:[#allocation32_spill] sm:$0xff] %v10660_v6  ;;  %v1124_v8 = vmul.f32 %v10320_v27, %v1114_v58  ;;  %1391 = vmatprep.subr.bf16.mxu1 %v10660_v6  ;;  %1796 = vmatprep.subr.bf16.mxu0 %v10660_v6 }
 0x2de   : > { %v1134_v11 = vpop.permute.xlu1 %1133  ;;  %8392 = vmatpush1.bf16.msk.msra.mxu1 %vm10292_vm5, %v10662_v56  ;;  %8416 = vmatpush1.bf16.msk.msra.mxu0 %vm10292_vm5, %v10662_v56  ;;  %v10682_v53 = vpack.c.bf16 %v1123_v30, %v1121_v29 }
 0x2df   : > { %v10679_v62 = vpack.c.bf16 %v1124_v8, %v1122_v19  ;;  %v1144_v44 = vsel %vm663_vm9, 0.0, %v1134_v11  ;;  %v1136_v46 = vpop.permute.xlu0 %1135  ;;  %v1171_v8 = vsel %vm720_vm10, %v1160_v55, 0.0 }
 0x2e0   : > { %14152 = vst [vmem:[#allocation35_spill] sm:$0xff] %v10682_v53  ;;  %v1147_v39 = vmul.f32 %v10248_v23, %v1144_v44  ;;  %v1138_v40 = vsel %vm663_vm9, %v1134_v11, %v1136_v46  ;;  %v1174_v46 = vmul.f32 %v10320_v27, %v1171_v8 }
 0x2e1   : > { %14151 = vst [vmem:[#allocation34_spill] sm:$0xff] %v10679_v62  ;;  %v1148_v0 = vmul.f32 %v10253_v26, %v1138_v40  ;;  %1393 = vmatprep.subr.bf16.mxu1 %v10679_v62  ;;  %1798 = vmatprep.subr.bf16.mxu0 %v10679_v62 }
 0x2e2   : > { %v1158_v43 = vpop.permute.xlu1 %1157  ;;  %1394 = vmatpush1.bf16.msra.mxu1 %v10682_v53  ;;  %1799 = vmatpush1.bf16.msra.mxu0 %v10682_v53  ;;  %v10695_v19 = vpack.c.bf16 %v1147_v39, %v1145_v32 }
 0x2e3   : > { %v10693_v30 = vpack.c.bf16 %v1148_v0, %v1146_v54  ;;  %v1186_v58 = vpop.permute.xlu0 %1185  ;;  %v1165_v29 = vsel %vm720_vm10, %v1158_v43, %v1160_v55 }
 0x2e4   : > { %14154 = vst [vmem:[#allocation37_spill] sm:$0xff] %v10695_v19  ;;  %v1173_v39 = vmul.f32 %v10317_v25, %v1165_v29 }
 0x2e5   : > { %14153 = vst [vmem:[#allocation36_spill] sm:$0xff] %v10693_v30  ;;  %1395 = vmatprep.subr.bf16.mxu1 %v10693_v30  ;;  %1800 = vmatprep.subr.bf16.mxu0 %v10693_v30 }
 0x2e6   : > { %v1184_v10 = vpop.permute.xlu1 %1183  ;;  %1396 = vmatpush1.bf16.msra.mxu1 %v10695_v19  ;;  %1801 = vmatpush1.bf16.msra.mxu0 %v10695_v19 }
 0x2e7   : > { %v1164_v11 = vpop.permute.xlu0 %1163  ;;  %1397 = vmatprep.subr.bf16.mxu1 %v10602_v7  ;;  %1802 = vmatprep.subr.bf16.mxu0 %v10602_v7  ;;  %v1195_v54 = vsel %vm769_vm11, %v1184_v10, 0.0 }
 0x2e8   : > { %v1166_v15 = vsel %vm720_vm10, %v10637_v42, %v1164_v11  ;;  %v1172_v44 = vsel %vm720_vm10, %v1164_v11, 0.0 }
 0x2e9   : > { %v1175_v55 = vmul.f32 %v10317_v25, %v1166_v15  ;;  %v1176_v40 = vmul.f32 %v10320_v27, %v1172_v44  ;;  %v1198_v44 = vmul.f32 %v10253_v26, %v1195_v54 }
 0x2ea   : > { %v1182_v0 = vpop.permute.xlu1 %1181  ;;  %1398 = vmatpush1.bf16.msra.mxu1 %v10600_v57  ;;  %1803 = vmatpush1.bf16.msra.mxu0 %v10600_v57 }
 0x2eb   : > { %v10715_v32 = vpack.c.bf16 %v1175_v55, %v1173_v39  ;;  %v10717_v42 = vpack.c.bf16 %v1176_v40, %v1174_v46  ;;  %v1189_v43 = vsel %vm769_vm11, %v1182_v0, %v1184_v10  ;;  %v1188_v8 = vpop.permute.xlu0 %1187 }
 0x2ec   : > { %v1197_v29 = vmul.f32 %v10248_v23, %v1189_v43  ;;  %v1190_v11 = vsel %vm769_vm11, %v1186_v58, %v1188_v8  ;;  %v1196_v15 = vsel %vm769_vm11, %v1188_v8, 0.0 }
 0x2ed   : > { %14155 = vst [vmem:[#allocation38_spill] sm:$0xff] %v10715_v32  ;;  %14156 = vst [vmem:[#allocation39_spill] sm:$0xff] %v10717_v42  ;;  %v1199_v7 = vmul.f32 %v10248_v23, %v1190_v11  ;;  %v1200_v19 = vmul.f32 %v10253_v26, %v1196_v15  ;;  %1399 = vmatprep.subr.bf16.mxu1 %v10717_v42  ;;  %1804 = vmatprep.subr.bf16.mxu0 %v10717_v42 }
 0x2ee   : > { %v9205_v46 = vpop.permute.xlu1 %9204  ;;  %1400 = vmatpush1.bf16.msra.mxu1 %v10715_v32  ;;  %1805 = vmatpush1.bf16.msra.mxu0 %v10715_v32 }
 0x2ef   : > { %v10730_v10 = vpack.c.bf16 %v1199_v7, %v1197_v29  ;;  %v10732_v58 = vpack.c.bf16 %v1200_v19, %v1198_v44  ;;  %v9207_v39 = vunpack.i.h.bf16 %v9205_v46  ;;  %v9206_v55 = vunpack.i.l.bf16 %v9205_v46  ;;  %v9210_v40 = vpop.permute.xlu0 %9209 }
 0x2f0   : > { %v9212_v54 = vunpack.i.h.bf16 %v9210_v40  ;;  %v9211_v0 = vunpack.i.l.bf16 %v9210_v40 }
 0x2f1   : > { %14157 = vst [vmem:[#allocation40_spill] sm:$0xff] %v10730_v10  ;;  %14158 = vst [vmem:[#allocation41_spill] sm:$0xff] %v10732_v58  ;;  %v1213_v43 = vsel %vm818_vm12, %v9206_v55, %v9207_v39  ;;  %1401 = vmatprep.subr.bf16.mxu1 %v10732_v58  ;;  %1806 = vmatprep.subr.bf16.mxu0 %v10732_v58 }
 0x2f2   : > { %v1214_v8 = vsel %vm818_vm12, %v9211_v0, %v9212_v54  ;;  %v10738_v11 = vpack.c.bf16 %v9212_v54, %v9207_v39  ;;  %v1228_v15 = vpop.permute.xlu1 %1227  ;;  %1402 = vmatpush1.bf16.msra.mxu1 %v10730_v10  ;;  %1807 = vmatpush1.bf16.msra.mxu0 %v10730_v10 }
 0x2f3   : > { %v1239_v7 = vsel %vm859_vm14, %v1228_v15, 0.0  ;;  %v1232_v19 = vpop.permute.xlu0 %1231  ;;  %v10743_v29 = vpack.c.bf16 %v1214_v8, %v1213_v43 }
 0x2f4   : > { %14159 = vst [vmem:[#allocation42_spill] sm:$0xff] %v10738_v11  ;;  %v1242_v44 = vmul.f32 %v10320_v27, %v1239_v7  ;;  %v1240_v46 = vsel %vm859_vm14, %v1232_v19, 0.0  ;;  %8395 = vmatprep.subr.msk.bf16.mxu1 %vm10488_vm13, %v10738_v11  ;;  %8419 = vmatprep.subr.msk.bf16.mxu0 %vm10488_vm13, %v10738_v11 }
 0x2f5   : > { %14160 = vst [vmem:[#allocation43_spill] sm:$0xff] %v10743_v29  ;;  %v1244_v39 = vmul.f32 %v10320_v27, %v1240_v46  ;;  %v9525_v27 = vld [vmem:[#allocation7 + $0x8] ss:$16 sps:$4 sm:$0xff]  }
 0x2f6   : > { %v1226_v55 = vpop.permute.xlu1 %1225  ;;  %1404 = vmatpush1.bf16.msra.mxu1 %v10743_v29  ;;  %1809 = vmatpush1.bf16.msra.mxu0 %v10743_v29 }
 0x2f7   : > { %v10756_v40 = vpack.c.bf16 %v1244_v39, %v1242_v44  ;;  %v1233_v54 = vsel %vm859_vm14, %v1226_v55, %v1228_v15  ;;  %v1230_v0 = vpop.permute.xlu0 %1229  ;;  %v9528_v15 = vld [vmem:[%s13976_s4 + $0x4] ss:$24 sps:$4 sm:$0xff]   ;;  %v14165_v39 = vld [vmem:[#allocation26_spill] sm:$0xff]  ;;  %v14166_v55 = vld [vmem:[#allocation27_spill] sm:$0xff] }
 0x2f8   : > { %v1241_v43 = vmul.f32 %v10317_v25, %v1233_v54  ;;  %v1234_v8 = vsel %vm859_vm14, %v1230_v0, %v1232_v19  ;;  %v14163_v19 = vld [vmem:[#allocation24_spill] sm:$0xff]  ;;  %v14164_v44 = vld [vmem:[#allocation25_spill] sm:$0xff] }
 0x2f9   : > { %14161 = vst [vmem:[#allocation44_spill] sm:$0xff] %v10756_v40  ;;  %v1243_v7 = vmul.f32 %v10317_v25, %v1234_v8  ;;  %1405 = vmatprep.subr.bf16.mxu1 %v10756_v40  ;;  %1810 = vmatprep.subr.bf16.mxu0 %v10756_v40  ;;  %v14167_v54 = vld [vmem:[#allocation37_spill] sm:$0xff] }
 0x2fa   : > { %v14168_v0 = vld [vmem:[#allocation29_spill] sm:$0xff] }
 0x2fb   : > { %v10764_v46 = vpack.c.bf16 %v1243_v7, %v1241_v43 }
 0x2fd   : > { %14162 = vst [vmem:[#allocation45_spill] sm:$0xff] %v10764_v46  ;;  %1406 = vmatpush1.bf16.msra.mxu1 %v10764_v46  ;;  %1811 = vmatpush1.bf16.msra.mxu0 %v10764_v46 }
 0x2fe   : > { %2217 = vmatprep.subr.bf16.mxu1 %v10261_v35 }
 0x300   : > { %1418 = vmatmul.mubr.bf16.vlgmr.msra.gmra.mrb[4].mxu1 %v9525_v27  ;;  %v9526_v27 = vld [vmem:[%s13976_s4] ss:$24 sps:$4 sm:$0xff]  }
 0x301   : > { %2218 = vmatpush1.bf16.msra.mxu1 %v10263_v38  ;;  %2249 = vmatprep.mubr.bf16.mxu1 %v9528_v15 }
 0x302   : > { %2219 = vmatprep.subr.bf16.mxu1 %v10279_v50 }
 0x305   : > { %2220 = vmatpush1.bf16.msra.mxu1 %v10277_v49 }
 0x306   : > { %2221 = vmatprep.subr.bf16.mxu1 %v10288_v59 }
 0x307   : > { %v1312_v43 = vpop.permute.xlu1 %1311 }
 0x309   : > { %8432 = vmatpush1.bf16.msk.msra.mxu1 %vm10292_vm5, %v10290_v60 }
 0x30a   : > { %2223 = vmatprep.subr.bf16.mxu1 %v10306_v14 }
 0x30d   : > { %8437 = vmatpush1.bf16.msk.msra.mxu1 %vm10292_vm5, %v10312_v24 }
 0x30e   : > { %2225 = vmatprep.subr.bf16.mxu1 %v10338_v34 }
 0x311   : > { %2226 = vmatpush1.bf16.msra.mxu1 %v10336_v33 }
 0x312   : > { %2227 = vmatprep.subr.bf16.mxu1 %v10354_v52 }
 0x315   : > { %2228 = vmatpush1.bf16.msra.mxu1 %v10352_v51 }
 0x316   : > { %2229 = vmatprep.subr.bf16.mxu1 %v10370_v13 }
 0x319   : > { %2230 = vmatpush1.bf16.msra.mxu1 %v10368_v12 }
 0x31a   : > { %2231 = vmatprep.subr.bf16.mxu1 %v10386_v37 }
 0x31d   : > { %2232 = vmatpush1.bf16.msra.mxu1 %v10384_v36 }
 0x31e   : > { %2233 = vmatprep.subr.bf16.mxu1 %v10390_v41 }
 0x321   : > { %2234 = vmatpush1.bf16.msra.mxu1 %v10406_v2 }
 0x322   : > { %2235 = vmatprep.subr.bf16.mxu1 %v10412_v47 }
 0x325   : > { %2236 = vmatpush1.bf16.msra.mxu1 %v10422_v1 }
 0x326   : > { %2237 = vmatprep.subr.bf16.mxu1 %v10430_v61 }
 0x329   : > { %2238 = vmatpush1.bf16.msra.mxu1 %v10438_v9 }
 0x32a   : > { %2239 = vmatprep.subr.bf16.mxu1 %v10442_v20 }
 0x32d   : > { %2240 = vmatpush1.bf16.msra.mxu1 %v10448_v18 }
 0x32e   : > { %2241 = vmatprep.subr.bf16.mxu1 %v10458_v31 }
 0x331   : > { %2242 = vmatpush1.bf16.msra.mxu1 %v10466_v45 }
 0x332   : > { %2243 = vmatprep.subr.bf16.mxu1 %v10474_v4 }
 0x335   : > { %2244 = vmatpush1.bf16.msra.mxu1 %v10482_v5 }
 0x336   : > { %8440 = vmatprep.subr.msk.bf16.mxu1 %vm10488_vm13, %v10493_v28 }
 0x339   : > { %2246 = vmatpush1.bf16.msra.mxu1 %v10496_v22 }
 0x33a   : > { %8443 = vmatprep.subr.msk.bf16.mxu1 %vm10488_vm13, %v10507_v3 }
 0x33d   : > { %2248 = vmatpush1.bf16.msra.mxu1 %v10510_v48 }
 0x33e   : > { %2260 = vmatprep.subr.bf16.mxu1 %v14163_v19 }
 0x340   : > { %2250 = vmatmul.mubr.bf16.vlgmr.msra.gmra.mrb[8].mxu1 %v9526_v27  ;;  %v1317_v27 = vpop.permute.xlu0 %1316 }
 0x341   : > { %2261 = vmatpush1.bf16.msra.mxu1 %v14164_v44 }
 0x342   : > { %2262 = vmatprep.subr.bf16.mxu1 %v14165_v39 }
 0x345   : > { %2263 = vmatpush1.bf16.msra.mxu1 %v14166_v55 }
 0x346   : > { %2264 = vmatprep.subr.bf16.mxu1 %v10647_v16 }
 0x349   : > { %2265 = vmatpush1.bf16.msra.mxu1 %v10649_v21 }
 0x34a   : > { %2266 = vmatprep.subr.bf16.mxu1 %v10660_v6 }
 0x34d   : > { %8448 = vmatpush1.bf16.msk.msra.mxu1 %vm10292_vm5, %v10662_v56 }
 0x34e   : > { %2268 = vmatprep.subr.bf16.mxu1 %v10679_v62 }
 0x351   : > { %2269 = vmatpush1.bf16.msra.mxu1 %v10682_v53 }
 0x352   : > { %2270 = vmatprep.subr.bf16.mxu1 %v10693_v30 }
 0x355   : > { %2271 = vmatpush1.bf16.msra.mxu1 %v14167_v54 }
 0x356   : > { %2272 = vmatprep.subr.bf16.mxu1 %v14168_v0 }
 0x359   : > { %2273 = vmatpush1.bf16.msra.mxu1 %v10600_v57 }
 0x35a   : > { %2274 = vmatprep.subr.bf16.mxu1 %v10717_v42 }
 0x35d   : > { %2275 = vmatpush1.bf16.msra.mxu1 %v10715_v32 }
 0x35e   : > { %2276 = vmatprep.subr.bf16.mxu1 %v10732_v58 }
 0x361   : > { %2277 = vmatpush1.bf16.msra.mxu1 %v10730_v10 }
 0x362   : > { %8451 = vmatprep.subr.msk.bf16.mxu1 %vm10488_vm13, %v10738_v11 }
 0x365   : > { %2279 = vmatpush1.bf16.msra.mxu1 %v10743_v29 }
 0x366   : > { %2280 = vmatprep.subr.bf16.mxu1 %v10756_v40 }
 0x369   : > { %2281 = vmatpush1.bf16.msra.mxu1 %v10764_v46 }
 0x3d3   : > { %v1419_v8 = vpop.f32.mrb[4].mxu1 }
 0x3d4   : > { %v8840_v7 = vadd.f32 %v1419_v8, %v1312_v43  ;;  %v1421_v15 = vpop.f32.mrb[5].mxu1 }
 0x3d5   : > { %v8841_v32 = vadd.f32 %v1421_v15, %v1312_v43  ;;  %v1423_v42 = vpop.f32.mrb[6].mxu1 }
 0x3d6   : > { %v1428_v58 = vmul.f32 0.2, %v8840_v7  ;;  %v8842_v57 = vadd.f32 %v1423_v42, %v1317_v27  ;;  %v1425_v10 = vpop.f32.mrb[7].mxu1  ;;  %v1706_v42 = vld [vmem:[%s13980_s8] sm:$0xff] }
 0x3d7   : > { %v1429_v0 = vmul.f32 0.2, %v8841_v32  ;;  %v8843_v54 = vadd.f32 %v1425_v10, %v1317_v27  ;;  %v1707_v10 = vld [vmem:[%s13980_s8 + $0x8] sm:$0xff] }
 0x3d8   : > { %v1432_v30 = vmax.f32 %v8840_v7, %v1428_v58  ;;  %v1430_v11 = vmul.f32 0.2, %v8842_v57 }
 0x3d9   : > { %v1433_v53 = vmax.f32 %v8841_v32, %v1429_v0  ;;  %v1431_v29 = vmul.f32 0.2, %v8843_v54  ;;  %v9534_v32 = vld [vmem:[%s13976_s4 + $0xc] ss:$24 sps:$4 sm:$0xff]  }
 0x3da   : > { %v1434_v62 = vmax.f32 %v8842_v57, %v1430_v11  ;;  %1440 = vrot.lane.b32.xlu1 %v1432_v30, %s9859_s19  ;;  %v9531_v57 = vld [vmem:[#allocation9 + $0xc] ss:$20 sps:$4 sm:$0xff]   ;;  %2292 = vmatprep.mubr.bf16.mxu1 %v9534_v32 }
 0x3db   : > { %v1435_v46 = vmax.f32 %v8843_v54, %v1431_v29  ;;  %1442 = vrot.lane.b32.xlu0 %v1433_v53, %s9859_s19  ;;  %v9213_v8 = vpack.i.bf16 %v1433_v53, %v1432_v30  ;;  %1822 = vmatprep.mubr.bf16.mxu0 %v9531_v57 }
 0x3dc   : > { %v10842_v40 = vpack.c.bf16 %v1434_v62, %v1432_v30 }
 0x3dd   : > { %v9218_v43 = vpack.i.bf16 %v1435_v46, %v1434_v62  ;;  %v10844_v15 = vpack.c.bf16 %v1435_v46, %v1433_v53 }
 0x3de   : > { %14169 = vst [vmem:[#allocation24_spill] sm:$0xff] %v10842_v40  ;;  %1484 = vrot.lane.b32.xlu1 %v1432_v30, %s9861_s25 }
 0x3df   : > { %14170 = vst [vmem:[#allocation46_spill] sm:$0xff] %v10844_v15  ;;  %1486 = vrot.lane.b32.xlu0 %v1433_v53, %s9861_s25 }
 0x3e2   : > { %1508 = vrot.lane.b32.xlu1 %v1432_v30, %s9862_s14 }
 0x3e3   : > { %1510 = vrot.lane.b32.xlu0 %v1433_v53, %s9862_s14 }
 0x3e6   : > { %9214 = vrot.lane.b32.xlu1 %v9213_v8, %s9860_s24 }
 0x3e7   : > { %1540 = vrot.lane.b32.xlu0 %v1434_v62, %s9863_s16 }
 0x3ea   : > { %1444 = vrot.lane.b32.xlu1 %v1434_v62, %s9859_s19 }
 0x3eb   : > { %1446 = vrot.lane.b32.xlu0 %v1435_v46, %s9859_s19 }
 0x3ee   : > { %1538 = vrot.lane.b32.xlu1 %v1433_v53, %s9863_s16 }
 0x3ef   : > { %9219 = vrot.lane.b32.xlu0 %v9218_v43, %s9860_s24 }
 0x3f2   : > { %1488 = vrot.lane.b32.xlu1 %v1434_v62, %s9861_s25 }
 0x3f3   : > { %1490 = vrot.lane.b32.xlu0 %v1435_v46, %s9861_s25 }
 0x3f6   : > { %1512 = vrot.lane.b32.xlu1 %v1434_v62, %s9862_s14 }
 0x3f7   : > { %1514 = vrot.lane.b32.xlu0 %v1435_v46, %s9862_s14 }
 0x3fa   : > { %1536 = vrot.lane.b32.xlu1 %v1432_v30, %s9863_s16 }
 0x3fb   : > { %1564 = vrot.lane.b32.xlu0 %v1434_v62, %s9864_s12 }
 0x3fe   : > { %1562 = vrot.lane.b32.xlu1 %v1433_v53, %s9864_s12 }
 0x3ff   : > { %1542 = vrot.lane.b32.xlu0 %v1435_v46, %s9863_s16 }
 0x402   : > { %1560 = vrot.lane.b32.xlu1 %v1432_v30, %s9864_s12 }
 0x403   : > { %1566 = vrot.lane.b32.xlu0 %v1435_v46, %s9864_s12 }
 0x406   : > { %9224 = vrot.lane.b32.xlu1 %v9213_v8, %s9865_s15 }
 0x407   : > { %9229 = vrot.lane.b32.xlu0 %v9218_v43, %s9865_s15 }
 0x40a   : > { %1606 = vrot.lane.b32.xlu1 %v1433_v53, %s9866_s22 }
 0x40b   : > { %1610 = vrot.lane.b32.xlu0 %v1435_v46, %s9866_s22 }
 0x40e   : > { %1604 = vrot.lane.b32.xlu1 %v1432_v30, %s9866_s22 }
 0x40f   : > { %1608 = vrot.lane.b32.xlu0 %v1434_v62, %s9866_s22 }
 0x412   : > { %1710 = vperm.xlu1 %9192, %v1706_v42  }
 0x413   : > { %1715 = vperm.xlu0 %9191, %v1707_v10  }
 0x44c   : > { %v1441_v58 = vpop.permute.xlu1 %1440 }
 0x44d   : > { %v1443_v11 = vpop.permute.xlu0 %1442  ;;  %v1454_v27 = vsel %vm524_vm1, 0.0, %v1441_v58 }
 0x44e   : > { %v1448_v62 = vsel %vm524_vm1, %v1441_v58, %v1443_v11  ;;  %v1456_v56 = vmul.f32 %v10248_v23, %v1454_v27 }
 0x44f   : > { %v1457_v42 = vmul.f32 %v10253_v26, %v1448_v62 }
 0x450   : > { %v1485_v29 = vpop.permute.xlu1 %1484 }
 0x451   : > { %v1487_v53 = vpop.permute.xlu0 %1486 }
 0x452   : > { %v1492_v62 = vsel %vm614_vm8, %v1485_v29, %v1487_v53 }
 0x454   : > { %v1509_v54 = vpop.permute.xlu1 %1508 }
 0x455   : > { %v1511_v46 = vpop.permute.xlu0 %1510 }
 0x458   : > { %v9215_v0 = vpop.permute.xlu1 %9214 }
 0x459   : > { %v10881_v30 = vpop.permute.xlu0 %1540  ;;  %v9217_v6 = vunpack.i.h.bf16 %v9215_v0  ;;  %v9216_v21 = vunpack.i.l.bf16 %v9215_v0 }
 0x45b   : > { %v1472_v0 = vsel %vm573_vm3, %v9216_v21, %v9217_v6 }
 0x45c   : > { %v1445_v7 = vpop.permute.xlu1 %1444 }
 0x45d   : > { %v1455_v8 = vsel %vm524_vm1, 0.0, %v1445_v7  ;;  %v1447_v43 = vpop.permute.xlu0 %1446 }
 0x45e   : > { %v1458_v57 = vmul.f32 %v10248_v23, %v1455_v8  ;;  %v1449_v32 = vsel %vm524_vm1, %v1445_v7, %v1447_v43 }
 0x45f   : > { %v1459_v10 = vmul.f32 %v10253_v26, %v1449_v32 }
 0x460   : > { %v1539_v16 = vpop.permute.xlu1 %1538  ;;  %v10893_v58 = vpack.c.bf16 %v1458_v57, %v1456_v56  ;;  %v1498_v56 = vsel %vm614_vm8, 0.0, %v1485_v29 }
 0x461   : > { %v9220_v11 = vpop.permute.xlu0 %9219  ;;  %v10891_v55 = vpack.c.bf16 %v1459_v10, %v1457_v42  ;;  %v14172_v10 = vld [vmem:[#allocation23_spill] sm:$0xff]  ;;  %v1500_v6 = vmul.f32 %v10317_v25, %v1498_v56 }
 0x462   : > { %14171 = vst [vmem:[#allocation47_spill] sm:$0xff] %v10893_v58  ;;  %v9222_v39 = vunpack.i.h.bf16 %v9220_v11  ;;  %v9221_v44 = vunpack.i.l.bf16 %v9220_v11  ;;  %v1501_v11 = vmul.f32 %v14172_v10, %v1492_v62 }
 0x463   : > { %1812 = vmatprep.subr.bf16.mxu0 %v10891_v55  ;;  %2282 = vmatprep.subr.bf16.mxu1 %v10891_v55 }
 0x464   : > { %1813 = vmatpush1.bf16.msra.mxu0 %v10893_v58  ;;  %2283 = vmatpush1.bf16.msra.mxu1 %v10893_v58  ;;  %v1489_v7 = vpop.permute.xlu1 %1488  ;;  %v1473_v27 = vsel %vm573_vm3, %v9221_v44, %v9222_v39  ;;  %v10906_v32 = vpack.c.bf16 %v9221_v44, %v9216_v21  ;;  %v1516_v39 = vsel %vm663_vm9, %v1509_v54, %v1511_v46  ;;  %v1522_v21 = vsel %vm663_vm9, 0.0, %v1509_v54 }
 0x465   : > { %v1499_v8 = vsel %vm614_vm8, 0.0, %v1489_v7  ;;  %v1491_v43 = vpop.permute.xlu0 %1490  ;;  %v10904_v57 = vpack.c.bf16 %v1473_v27, %v1472_v0  ;;  %v1525_v56 = vmul.f32 %v10253_v26, %v1516_v39  ;;  %v1524_v54 = vmul.f32 %v10248_v23, %v1522_v21 }
 0x466   : > { %v1502_v53 = vmul.f32 %v10317_v25, %v1499_v8  ;;  %v1493_v42 = vsel %vm614_vm8, %v1489_v7, %v1491_v43 }
 0x467   : > { %v1503_v58 = vmul.f32 %v14172_v10, %v1493_v42  ;;  %1814 = vmatprep.subr.bf16.mxu0 %v10904_v57  ;;  %2284 = vmatprep.subr.bf16.mxu1 %v10904_v57 }
 0x468   : > { %v1513_v29 = vpop.permute.xlu1 %1512  ;;  %8424 = vmatpush1.bf16.msk.msra.mxu0 %vm10292_vm5, %v10906_v32  ;;  %8456 = vmatpush1.bf16.msk.msra.mxu1 %vm10292_vm5, %v10906_v32  ;;  %v10926_v0 = vpack.c.bf16 %v1502_v53, %v1500_v6 }
 0x469   : > { %v1523_v44 = vsel %vm663_vm9, 0.0, %v1513_v29  ;;  %v1515_v62 = vpop.permute.xlu0 %1514  ;;  %v10924_v7 = vpack.c.bf16 %v1503_v58, %v1501_v11  ;;  %v1550_v11 = vsel %vm720_vm10, %v1539_v16, 0.0 }
 0x46a   : > { %v1526_v46 = vmul.f32 %v10248_v23, %v1523_v44  ;;  %v1517_v27 = vsel %vm663_vm9, %v1513_v29, %v1515_v62  ;;  %v1553_v62 = vmul.f32 %v14172_v10, %v1550_v11 }
 0x46b   : > { %v1527_v8 = vmul.f32 %v10253_v26, %v1517_v27  ;;  %1816 = vmatprep.subr.bf16.mxu0 %v10924_v7  ;;  %2286 = vmatprep.subr.bf16.mxu1 %v10924_v7 }
 0x46c   : > { %v1537_v43 = vpop.permute.xlu1 %1536  ;;  %1817 = vmatpush1.bf16.msra.mxu0 %v10926_v0  ;;  %2287 = vmatpush1.bf16.msra.mxu1 %v10926_v0  ;;  %v10939_v42 = vpack.c.bf16 %v1526_v46, %v1524_v54  ;;  %v9529_v54 = vld [vmem:[#allocation9 + $0x8] ss:$20 sps:$4 sm:$0xff]  }
 0x46d   : > { %v1565_v58 = vpop.permute.xlu0 %1564  ;;  %v10937_v53 = vpack.c.bf16 %v1527_v8, %v1525_v56  ;;  %v1544_v6 = vsel %vm720_vm10, %v1537_v43, %v1539_v16 }
 0x46e   : > { %14174 = vst [vmem:[#allocation49_spill] sm:$0xff] %v10939_v42  ;;  %v1552_v46 = vmul.f32 %v10317_v25, %v1544_v6 }
 0x46f   : > { %14173 = vst [vmem:[#allocation48_spill] sm:$0xff] %v10937_v53  ;;  %1818 = vmatprep.subr.bf16.mxu0 %v10937_v53  ;;  %2288 = vmatprep.subr.bf16.mxu1 %v10937_v53 }
 0x470   : > { %v1563_v39 = vpop.permute.xlu1 %1562  ;;  %1819 = vmatpush1.bf16.msra.mxu0 %v10939_v42  ;;  %2289 = vmatpush1.bf16.msra.mxu1 %v10939_v42 }
 0x471   : > { %v1543_v29 = vpop.permute.xlu0 %1542  ;;  %1820 = vmatprep.subr.bf16.mxu0 %v10844_v15  ;;  %2290 = vmatprep.subr.bf16.mxu1 %v10844_v15  ;;  %v1574_v56 = vsel %vm769_vm11, %v1563_v39, 0.0 }
 0x472   : > { %v1545_v21 = vsel %vm720_vm10, %v10881_v30, %v1543_v29  ;;  %v1551_v44 = vsel %vm720_vm10, %v1543_v29, 0.0  ;;  %v9532_v30 = vld [vmem:[%s13976_s4 + $0x8] ss:$24 sps:$4 sm:$0xff]  }
 0x473   : > { %v1554_v16 = vmul.f32 %v10317_v25, %v1545_v21  ;;  %v1555_v27 = vmul.f32 %v14172_v10, %v1551_v44 }
 0x474   : > { %v1561_v8 = vpop.permute.xlu1 %1560  ;;  %1821 = vmatpush1.bf16.msra.mxu0 %v10842_v40  ;;  %2291 = vmatpush1.bf16.msra.mxu1 %v10842_v40  ;;  %v1577_v40 = vmul.f32 %v10253_v26, %v1574_v56 }
 0x475   : > { %v10962_v43 = vpack.c.bf16 %v1554_v16, %v1552_v46  ;;  %v1568_v11 = vsel %vm769_vm11, %v1561_v8, %v1563_v39  ;;  %v1567_v6 = vpop.permute.xlu0 %1566  ;;  %v10965_v29 = vpack.c.bf16 %v1555_v27, %v1553_v62  ;;  %v14175_v8 = vmov 0  }
 0x476   : > { %v1576_v21 = vmul.f32 %v10248_v23, %v1568_v11  ;;  %v1569_v44 = vsel %vm769_vm11, %v1565_v58, %v1567_v6  ;;  %v1575_v15 = vsel %vm769_vm11, %v1567_v6, 0.0 }
 0x477   : > { %v1578_v42 = vmul.f32 %v10248_v23, %v1569_v44  ;;  %v1579_v53 = vmul.f32 %v10253_v26, %v1575_v15  ;;  %1833 = vmatprep.subr.bf16.mxu0 %v10965_v29  ;;  %2303 = vmatprep.subr.bf16.mxu1 %v10965_v29 }
 0x478   : > { %v9225_v39 = vpop.permute.xlu1 %9224  ;;  %1823 = vmatmul.mubr.bf16.vlgmr.msra.gmra.mrb[0].mxu0 %v9529_v54  ;;  %2293 = vmatmul.mubr.bf16.vlgmr.msra.gmra.mrb[8].mxu1 %v9532_v30 }
 0x479   : > { %v10975_v62 = vpack.c.bf16 %v1578_v42, %v1576_v21  ;;  %v9227_v46 = vunpack.i.h.bf16 %v9225_v39  ;;  %v9226_v16 = vunpack.i.l.bf16 %v9225_v39  ;;  %1834 = vmatpush1.bf16.msra.mxu0 %v10962_v43  ;;  %2304 = vmatpush1.bf16.msra.mxu1 %v10962_v43  ;;  %v9230_v58 = vpop.permute.xlu0 %9229  ;;  %v10979_v27 = vpack.c.bf16 %v1579_v53, %v1577_v40 }
 0x47a   : > { %v9232_v56 = vunpack.i.h.bf16 %v9230_v58  ;;  %v9231_v15 = vunpack.i.l.bf16 %v9230_v58  ;;  %1865 = vmatprep.mubr.bf16.mxu0 %v14175_v8 }
 0x47b   : > { %v1592_v11 = vsel %vm818_vm12, %v9226_v16, %v9227_v46  ;;  %1835 = vmatprep.subr.bf16.mxu0 %v10979_v27  ;;  %2305 = vmatprep.subr.bf16.mxu1 %v10979_v27 }
 0x47c   : > { %v1593_v42 = vsel %vm818_vm12, %v9231_v15, %v9232_v56  ;;  %v10986_v54 = vpack.c.bf16 %v9232_v56, %v9227_v46  ;;  %v1607_v30 = vpop.permute.xlu1 %1606 }
 0x47d   : > { %v1618_v6 = vsel %vm859_vm14, %v1607_v30, 0.0  ;;  %1836 = vmatpush1.bf16.msra.mxu0 %v10975_v62  ;;  %2306 = vmatpush1.bf16.msra.mxu1 %v10975_v62  ;;  %v1611_v40 = vpop.permute.xlu0 %1610  ;;  %v10991_v53 = vpack.c.bf16 %v1593_v42, %v1592_v11 }
 0x47e   : > { %v1621_v21 = vmul.f32 %v14172_v10, %v1618_v6  ;;  %v1619_v44 = vsel %vm859_vm14, %v1611_v40, 0.0  ;;  %8427 = vmatprep.subr.msk.bf16.mxu0 %vm10488_vm13, %v10986_v54  ;;  %8459 = vmatprep.subr.msk.bf16.mxu1 %vm10488_vm13, %v10986_v54 }
 0x47f   : > { %v1623_v39 = vmul.f32 %v14172_v10, %v1619_v44 }
 0x480   : > { %v1605_v46 = vpop.permute.xlu1 %1604 }
 0x481   : > { %v1612_v16 = vsel %vm859_vm14, %v1605_v46, %v1607_v30  ;;  %1838 = vmatpush1.bf16.msra.mxu0 %v10991_v53  ;;  %2308 = vmatpush1.bf16.msra.mxu1 %v10991_v53  ;;  %v1609_v58 = vpop.permute.xlu0 %1608  ;;  %v11005_v56 = vpack.c.bf16 %v1623_v39, %v1621_v21  ;;  %v9535_v30 = vld [vmem:[#allocation9 + $0x10] ss:$20 sps:$4 sm:$0xff]   ;;  %v9538_v21 = vld [vmem:[#allocation10 + $0x4] ss:$28 sps:$4 sm:$0xff]  }
 0x482   : > { %v1620_v15 = vmul.f32 %v10317_v25, %v1612_v16  ;;  %v1613_v11 = vsel %vm859_vm14, %v1609_v58, %v1611_v40 }
 0x483   : > { %v1622_v42 = vmul.f32 %v10317_v25, %v1613_v11  ;;  %1839 = vmatprep.subr.bf16.mxu0 %v11005_v56  ;;  %2309 = vmatprep.subr.bf16.mxu1 %v11005_v56 }
 0x485   : > { %v11012_v6 = vpack.c.bf16 %v1622_v42, %v1620_v15  ;;  %v9545_v42 = vld [vmem:[%s13976_s4 + $0x14] ss:$24 sps:$4 sm:$0xff]  }
 0x486   : > { %8220 = vmatprep.mubr.msk.bf16.mxu1 %vm2213_vm4, %v9545_v42 }
 0x487   : > { %1840 = vmatpush1.bf16.msra.mxu0 %v11012_v6  ;;  %2310 = vmatpush1.bf16.msra.mxu1 %v11012_v6 }
 0x488   : > { %2771 = vmatprep.subr.bf16.mxu0 %v10261_v35  ;;  %v9536_v35 = vld [vmem:[#allocation10] ss:$28 sps:$4 sm:$0xff]  }
 0x48a   : > { %8213 = vmatmul.mubr.msk.bf16.vlgmr.msra.gmra.mrb[0].mxu0 %vm1743_vm2, %v9535_v30  ;;  %v2173_v30 = vld [vmem:[%s13981_s9 + $0x8] sm:$0xff] }
 0x48b   : > { %2772 = vmatpush1.bf16.msra.mxu0 %v10263_v38  ;;  %2803 = vmatprep.mubr.bf16.mxu0 %v9538_v21  ;;  %v9539_v38 = vld [vmem:[#allocation10 + $0x3c] ss:$28 sps:$4 sm:$0xff]  }
 0x48c   : > { %2773 = vmatprep.subr.bf16.mxu0 %v10279_v50  ;;  %v14177_v50 = vld [vmem:[#allocation26_spill] sm:$0xff] }
 0x48f   : > { %2774 = vmatpush1.bf16.msra.mxu0 %v10277_v49  ;;  %v14176_v49 = vld [vmem:[#allocation25_spill] sm:$0xff] }
 0x490   : > { %2775 = vmatprep.subr.bf16.mxu0 %v10288_v59  ;;  %v9541_v59 = vld [vmem:[#allocation10 + $0x38] ss:$28 sps:$4 sm:$0xff]  }
 0x493   : > { %8472 = vmatpush1.bf16.msk.msra.mxu0 %vm10292_vm5, %v10290_v60  ;;  %v14178_v60 = vld [vmem:[#allocation27_spill] sm:$0xff] }
 0x494   : > { %2777 = vmatprep.subr.bf16.mxu0 %v10306_v14  ;;  %v9544_v14 = vld [vmem:[#allocation10 + $0xc] ss:$28 sps:$4 sm:$0xff]  }
 0x497   : > { %8477 = vmatpush1.bf16.msk.msra.mxu0 %vm10292_vm5, %v10312_v24  ;;  %v14179_v24 = vld [vmem:[#allocation30_spill] sm:$0xff] }
 0x498   : > { %2779 = vmatprep.subr.bf16.mxu0 %v10338_v34  ;;  %v14181_v34 = vld [vmem:[#allocation32_spill] sm:$0xff] }
 0x49b   : > { %2780 = vmatpush1.bf16.msra.mxu0 %v10336_v33  ;;  %v14180_v33 = vld [vmem:[#allocation31_spill] sm:$0xff] }
 0x49c   : > { %2781 = vmatprep.subr.bf16.mxu0 %v10354_v52  ;;  %v14183_v52 = vld [vmem:[#allocation34_spill] sm:$0xff] }
 0x49f   : > { %2782 = vmatpush1.bf16.msra.mxu0 %v10352_v51  ;;  %v14182_v51 = vld [vmem:[#allocation33_spill] sm:$0xff] }
 0x4a0   : > { %2783 = vmatprep.subr.bf16.mxu0 %v10370_v13  ;;  %v14185_v13 = vld [vmem:[#allocation36_spill] sm:$0xff] }
 0x4a3   : > { %2784 = vmatpush1.bf16.msra.mxu0 %v10368_v12  ;;  %v14184_v12 = vld [vmem:[#allocation35_spill] sm:$0xff] }
 0x4a4   : > { %2785 = vmatprep.subr.bf16.mxu0 %v10386_v37  ;;  %v14187_v37 = vld [vmem:[#allocation29_spill] sm:$0xff] }
 0x4a7   : > { %2786 = vmatpush1.bf16.msra.mxu0 %v10384_v36  ;;  %v14186_v36 = vld [vmem:[#allocation37_spill] sm:$0xff] }
 0x4a8   : > { %2787 = vmatprep.subr.bf16.mxu0 %v10390_v41  ;;  %v14188_v41 = vld [vmem:[#allocation28_spill] sm:$0xff] }
 0x4ab   : > { %2788 = vmatpush1.bf16.msra.mxu0 %v10406_v2  ;;  %v14189_v2 = vld [vmem:[#allocation39_spill] sm:$0xff] }
 0x4ac   : > { %2789 = vmatprep.subr.bf16.mxu0 %v10412_v47  ;;  %v14190_v47 = vld [vmem:[#allocation38_spill] sm:$0xff] }
 0x4af   : > { %2790 = vmatpush1.bf16.msra.mxu0 %v10422_v1  ;;  %v14191_v1 = vld [vmem:[#allocation41_spill] sm:$0xff] }
 0x4b0   : > { %2791 = vmatprep.subr.bf16.mxu0 %v10430_v61  ;;  %v14192_v61 = vld [vmem:[#allocation40_spill] sm:$0xff] }
 0x4b3   : > { %2792 = vmatpush1.bf16.msra.mxu0 %v10438_v9  ;;  %v14193_v9 = vld [vmem:[#allocation42_spill] sm:$0xff] }
 0x4b4   : > { %2793 = vmatprep.subr.bf16.mxu0 %v10442_v20  ;;  %v14194_v20 = vld [vmem:[#allocation43_spill] sm:$0xff] }
 0x4b7   : > { %2794 = vmatpush1.bf16.msra.mxu0 %v10448_v18  ;;  %v14195_v18 = vld [vmem:[#allocation44_spill] sm:$0xff] }
 0x4b8   : > { %2795 = vmatprep.subr.bf16.mxu0 %v10458_v31  ;;  %v14196_v31 = vld [vmem:[#allocation45_spill] sm:$0xff] }
 0x4bb   : > { %2796 = vmatpush1.bf16.msra.mxu0 %v10466_v45  ;;  %v14197_v45 = vld [vmem:[#allocation47_spill] sm:$0xff] }
 0x4bc   : > { %2797 = vmatprep.subr.bf16.mxu0 %v10474_v4  ;;  %v14198_v4 = vld [vmem:[#allocation48_spill] sm:$0xff] }
 0x4bf   : > { %2798 = vmatpush1.bf16.msra.mxu0 %v10482_v5  ;;  %v14199_v5 = vld [vmem:[#allocation49_spill] sm:$0xff] }
 0x4c0   : > { %8480 = vmatprep.subr.msk.bf16.mxu0 %vm10488_vm13, %v10493_v28  ;;  %v14200_v28 = vld [vmem:[#allocation46_spill] sm:$0xff] }
 0x4c3   : > { %2800 = vmatpush1.bf16.msra.mxu0 %v10496_v22  ;;  %v9542_v22 = vld [vmem:[#allocation10 + $0x8] ss:$28 sps:$4 sm:$0xff]  }
 0x4c4   : > { %8483 = vmatprep.subr.msk.bf16.mxu0 %vm10488_vm13, %v10507_v3  ;;  %v14201_v3 = vld [vmem:[#allocation24_spill] sm:$0xff] }
 0x4c7   : > { %2802 = vmatpush1.bf16.msra.mxu0 %v10510_v48  ;;  %v1711_v48 = vpop.permute.xlu1 %1710 }
 0x4c8   : > { %2824 = vmatprep.subr.bf16.mxu0 %v14163_v19 }
 0x4ca   : > { %2804 = vmatmul.mubr.bf16.vlgmr.msra.gmra.mrb[4].mxu0 %v9536_v35 }
 0x4cb   : > { %2825 = vmatpush1.bf16.msra.mxu0 %v14176_v49  ;;  %2813 = vmatprep.mubr.bf16.mxu0 %v9539_v38 }
 0x4cc   : > { %2826 = vmatprep.subr.bf16.mxu0 %v14177_v50 }
 0x4cf   : > { %2827 = vmatpush1.bf16.msra.mxu0 %v14178_v60 }
 0x4d0   : > { %2828 = vmatprep.subr.bf16.mxu0 %v14179_v24 }
 0x4d2   : > { %2814 = vmatmul.mubr.bf16.gmra.mrb[8].mxu0 %v9541_v59 }
 0x4d3   : > { %2829 = vmatpush1.bf16.msra.mxu0 %v14180_v33  ;;  %2856 = vmatprep.mubr.bf16.mxu0 %v9544_v14 }
 0x4d4   : > { %2830 = vmatprep.subr.bf16.mxu0 %v14181_v34 }
 0x4d7   : > { %8488 = vmatpush1.bf16.msk.msra.mxu0 %vm10292_vm5, %v14182_v51 }
 0x4d8   : > { %2832 = vmatprep.subr.bf16.mxu0 %v14183_v52 }
 0x4db   : > { %2833 = vmatpush1.bf16.msra.mxu0 %v14184_v12 }
 0x4dc   : > { %2834 = vmatprep.subr.bf16.mxu0 %v14185_v13 }
 0x4df   : > { %2835 = vmatpush1.bf16.msra.mxu0 %v14186_v36 }
 0x4e0   : > { %2836 = vmatprep.subr.bf16.mxu0 %v14187_v37 }
 0x4e3   : > { %2837 = vmatpush1.bf16.msra.mxu0 %v14188_v41 }
 0x4e4   : > { %2838 = vmatprep.subr.bf16.mxu0 %v14189_v2 }
 0x4e7   : > { %2839 = vmatpush1.bf16.msra.mxu0 %v14190_v47 }
 0x4e8   : > { %2840 = vmatprep.subr.bf16.mxu0 %v14191_v1 }
 0x4eb   : > { %2841 = vmatpush1.bf16.msra.mxu0 %v14192_v61 }
 0x4ec   : > { %8491 = vmatprep.subr.msk.bf16.mxu0 %vm10488_vm13, %v14193_v9 }
 0x4ef   : > { %2843 = vmatpush1.bf16.msra.mxu0 %v14194_v20 }
 0x4f0   : > { %2844 = vmatprep.subr.bf16.mxu0 %v14195_v18 }
 0x4f3   : > { %2845 = vmatpush1.bf16.msra.mxu0 %v14196_v31 }
 0x4f4   : > { %2846 = vmatprep.subr.bf16.mxu0 %v10891_v55 }
 0x4f7   : > { %2847 = vmatpush1.bf16.msra.mxu0 %v14197_v45 }
 0x4f8   : > { %2848 = vmatprep.subr.bf16.mxu0 %v10904_v57 }
 0x4fb   : > { %8496 = vmatpush1.bf16.msk.msra.mxu0 %vm10292_vm5, %v10906_v32  ;;  %v1716_v32 = vpop.permute.xlu0 %1715 }
 0x4fc   : > { %2850 = vmatprep.subr.bf16.mxu0 %v10924_v7 }
 0x4ff   : > { %2851 = vmatpush1.bf16.msra.mxu0 %v10926_v0 }
 0x500   : > { %2852 = vmatprep.subr.bf16.mxu0 %v14198_v4 }
 0x503   : > { %2853 = vmatpush1.bf16.msra.mxu0 %v14199_v5 }
 0x504   : > { %2854 = vmatprep.subr.bf16.mxu0 %v14200_v28 }
 0x507   : > { %2855 = vmatpush1.bf16.msra.mxu0 %v14201_v3 }
 0x508   : > { %2877 = vmatprep.subr.bf16.mxu0 %v10965_v29 }
 0x50a   : > { %2857 = vmatmul.mubr.bf16.vlgmr.msra.gmra.mrb[4].mxu0 %v9542_v22 }
 0x50b   : > { %2878 = vmatpush1.bf16.msra.mxu0 %v10962_v43 }
 0x50c   : > { %2879 = vmatprep.subr.bf16.mxu0 %v10979_v27 }
 0x50f   : > { %2880 = vmatpush1.bf16.msra.mxu0 %v10975_v62 }
 0x510   : > { %8499 = vmatprep.subr.msk.bf16.mxu0 %vm10488_vm13, %v10986_v54 }
 0x513   : > { %2882 = vmatpush1.bf16.msra.mxu0 %v10991_v53 }
 0x514   : > { %2883 = vmatprep.subr.bf16.mxu0 %v11005_v56 }
 0x517   : > { %2884 = vmatpush1.bf16.msra.mxu0 %v11012_v6  ;;  %v2172_v6 = vld [vmem:[%s13981_s9] sm:$0xff] }
 0x55d   : > { %v1867_v19 = vpop.f32.mrb[0].mxu0 }
 0x55e   : > { %v8844_v55 = vadd.f32 %v1867_v19, %v1711_v48  ;;  %v1869_v57 = vpop.f32.mrb[1].mxu0 }
 0x55f   : > { %v8845_v7 = vadd.f32 %v1869_v57, %v1711_v48  ;;  %v1871_v0 = vpop.f32.mrb[2].mxu0 }
 0x560   : > { %v1876_v43 = vmul.f32 0.2, %v8844_v55  ;;  %v8846_v29 = vadd.f32 %v1871_v0, %v1716_v32  ;;  %v1873_v62 = vpop.f32.mrb[3].mxu0 }
 0x561   : > { %v1877_v27 = vmul.f32 0.2, %v8845_v7  ;;  %v8847_v40 = vadd.f32 %v1873_v62, %v1716_v32 }
 0x562   : > { %v1880_v44 = vmax.f32 %v8844_v55, %v1876_v43  ;;  %v1878_v54 = vmul.f32 0.2, %v8846_v29 }
 0x563   : > { %v1881_v39 = vmax.f32 %v8845_v7, %v1877_v27  ;;  %v1879_v53 = vmul.f32 0.2, %v8847_v40 }
 0x564   : > { %v1882_v46 = vmax.f32 %v8846_v29, %v1878_v54  ;;  %1888 = vrot.lane.b32.xlu1 %v1880_v44, %s9859_s19 }
 0x565   : > { %v1883_v16 = vmax.f32 %v8847_v40, %v1879_v53  ;;  %1890 = vrot.lane.b32.xlu0 %v1881_v39, %s9859_s19  ;;  %v9233_v58 = vpack.i.bf16 %v1881_v39, %v1880_v44 }
 0x566   : > { %v11107_v56 = vpack.c.bf16 %v1882_v46, %v1880_v44 }
 0x567   : > { %v9238_v15 = vpack.i.bf16 %v1883_v16, %v1882_v46  ;;  %v11109_v11 = vpack.c.bf16 %v1883_v16, %v1881_v39 }
 0x568   : > { %1932 = vrot.lane.b32.xlu1 %v1880_v44, %s9861_s25 }
 0x569   : > { %1934 = vrot.lane.b32.xlu0 %v1881_v39, %s9861_s25 }
 0x56c   : > { %1956 = vrot.lane.b32.xlu1 %v1880_v44, %s9862_s14 }
 0x56d   : > { %1958 = vrot.lane.b32.xlu0 %v1881_v39, %s9862_s14 }
 0x570   : > { %9234 = vrot.lane.b32.xlu1 %v9233_v58, %s9860_s24 }
 0x571   : > { %1988 = vrot.lane.b32.xlu0 %v1882_v46, %s9863_s16 }
 0x574   : > { %1892 = vrot.lane.b32.xlu1 %v1882_v46, %s9859_s19 }
 0x575   : > { %1894 = vrot.lane.b32.xlu0 %v1883_v16, %s9859_s19 }
 0x578   : > { %1986 = vrot.lane.b32.xlu1 %v1881_v39, %s9863_s16 }
 0x579   : > { %9239 = vrot.lane.b32.xlu0 %v9238_v15, %s9860_s24 }
 0x57c   : > { %1936 = vrot.lane.b32.xlu1 %v1882_v46, %s9861_s25 }
 0x57d   : > { %1938 = vrot.lane.b32.xlu0 %v1883_v16, %s9861_s25 }
 0x580   : > { %1960 = vrot.lane.b32.xlu1 %v1882_v46, %s9862_s14 }
 0x581   : > { %1962 = vrot.lane.b32.xlu0 %v1883_v16, %s9862_s14 }
 0x584   : > { %1984 = vrot.lane.b32.xlu1 %v1880_v44, %s9863_s16 }
 0x585   : > { %2012 = vrot.lane.b32.xlu0 %v1882_v46, %s9864_s12 }
 0x588   : > { %2010 = vrot.lane.b32.xlu1 %v1881_v39, %s9864_s12 }
 0x589   : > { %1990 = vrot.lane.b32.xlu0 %v1883_v16, %s9863_s16 }
 0x58c   : > { %2008 = vrot.lane.b32.xlu1 %v1880_v44, %s9864_s12 }
 0x58d   : > { %2014 = vrot.lane.b32.xlu0 %v1883_v16, %s9864_s12 }
 0x590   : > { %9244 = vrot.lane.b32.xlu1 %v9233_v58, %s9865_s15 }
 0x591   : > { %9249 = vrot.lane.b32.xlu0 %v9238_v15, %s9865_s15 }
 0x594   : > { %2054 = vrot.lane.b32.xlu1 %v1881_v39, %s9866_s22 }
 0x595   : > { %2058 = vrot.lane.b32.xlu0 %v1883_v16, %s9866_s22 }
 0x598   : > { %2052 = vrot.lane.b32.xlu1 %v1880_v44, %s9866_s22 }
 0x599   : > { %2056 = vrot.lane.b32.xlu0 %v1882_v46, %s9866_s22 }
 0x59c   : > { %2176 = vperm.xlu1 %9192, %v2172_v6  }
 0x59d   : > { %2181 = vperm.xlu0 %9191, %v2173_v30  }
 0x5d6   : > { %v1889_v21 = vpop.permute.xlu1 %1888 }
 0x5d7   : > { %v1891_v35 = vpop.permute.xlu0 %1890  ;;  %v1902_v34 = vsel %vm524_vm1, 0.0, %v1889_v21 }
 0x5d8   : > { %v1896_v24 = vsel %vm524_vm1, %v1889_v21, %v1891_v35  ;;  %v1904_v41 = vmul.f32 %v10248_v23, %v1902_v34 }
 0x5d9   : > { %v1905_v36 = vmul.f32 %v10253_v26, %v1896_v24 }
 0x5da   : > { %v1933_v38 = vpop.permute.xlu1 %1932 }
 0x5db   : > { %v1935_v49 = vpop.permute.xlu0 %1934  ;;  %v1946_v22 = vsel %vm614_vm8, 0.0, %v1933_v38 }
 0x5dc   : > { %v1940_v45 = vsel %vm614_vm8, %v1933_v38, %v1935_v49  ;;  %v1948_v43 = vmul.f32 %v10317_v25, %v1946_v22 }
 0x5dd   : > { %v1949_v7 = vmul.f32 %v14172_v10, %v1940_v45 }
 0x5de   : > { %v1957_v50 = vpop.permute.xlu1 %1956 }
 0x5df   : > { %v1959_v59 = vpop.permute.xlu0 %1958  ;;  %v1970_v27 = vsel %vm663_vm9, 0.0, %v1957_v50 }
 0x5e0   : > { %v1964_v29 = vsel %vm663_vm9, %v1957_v50, %v1959_v59  ;;  %v1972_v15 = vmul.f32 %v10248_v23, %v1970_v27 }
 0x5e1   : > { %v1973_v16 = vmul.f32 %v10253_v26, %v1964_v29 }
 0x5e2   : > { %v9235_v60 = vpop.permute.xlu1 %9234 }
 0x5e3   : > { %v11147_v14 = vpop.permute.xlu0 %1988  ;;  %v9237_v2 = vunpack.i.h.bf16 %v9235_v60  ;;  %v9236_v47 = vunpack.i.l.bf16 %v9235_v60 }
 0x5e5   : > { %v1920_v5 = vsel %vm573_vm3, %v9236_v47, %v9237_v2 }
 0x5e6   : > { %v1893_v33 = vpop.permute.xlu1 %1892 }
 0x5e7   : > { %v1903_v51 = vsel %vm524_vm1, 0.0, %v1893_v33  ;;  %v1895_v52 = vpop.permute.xlu0 %1894 }
 0x5e8   : > { %v1906_v12 = vmul.f32 %v10248_v23, %v1903_v51  ;;  %v1897_v13 = vsel %vm524_vm1, %v1893_v33, %v1895_v52 }
 0x5e9   : > { %v1907_v37 = vmul.f32 %v10253_v26, %v1897_v13 }
 0x5ea   : > { %v1987_v1 = vpop.permute.xlu1 %1986  ;;  %v1908_v20 = vpack.c.bf16 %v1906_v12, %v1904_v41 }
 0x5eb   : > { %v9240_v61 = vpop.permute.xlu0 %9239  ;;  %v1909_v9 = vpack.c.bf16 %v1907_v37, %v1905_v36  ;;  %v1998_v35 = vsel %vm720_vm10, %v1987_v1, 0.0 }
 0x5ec   : > { %v9242_v18 = vunpack.i.h.bf16 %v9240_v61  ;;  %v9241_v31 = vunpack.i.l.bf16 %v9240_v61  ;;  %v2001_v24 = vmul.f32 %v14172_v10, %v1998_v35 }
 0x5ed   : > { %2311 = vmatprep.subr.bf16.mxu1 %v1909_v9  ;;  %2885 = vmatprep.subr.bf16.mxu0 %v1909_v9 }
 0x5ee   : > { %2312 = vmatpush1.bf16.msra.mxu1 %v1908_v20  ;;  %2886 = vmatpush1.bf16.msra.mxu0 %v1908_v20  ;;  %v1937_v4 = vpop.permute.xlu1 %1936  ;;  %v1921_v28 = vsel %vm573_vm3, %v9241_v31, %v9242_v18  ;;  %v8463_v55 = vpack.c.bf16 %v9241_v31, %v9236_v47 }
 0x5ef   : > { %v1947_v3 = vsel %vm614_vm8, 0.0, %v1937_v4  ;;  %v1939_v48 = vpop.permute.xlu0 %1938  ;;  %v1929_v19 = vpack.c.bf16 %v1921_v28, %v1920_v5 }
 0x5f0   : > { %v1950_v57 = vmul.f32 %v10317_v25, %v1947_v3  ;;  %v1941_v32 = vsel %vm614_vm8, %v1937_v4, %v1939_v48 }
 0x5f1   : > { %v1951_v0 = vmul.f32 %v14172_v10, %v1941_v32  ;;  %2313 = vmatprep.subr.bf16.mxu1 %v1929_v19  ;;  %2887 = vmatprep.subr.bf16.mxu0 %v1929_v19 }
 0x5f2   : > { %v1961_v62 = vpop.permute.xlu1 %1960  ;;  %8464 = vmatpush1.bf16.msk.msra.mxu1 %vm10292_vm5, %v8463_v55  ;;  %8504 = vmatpush1.bf16.msk.msra.mxu0 %vm10292_vm5, %v8463_v55  ;;  %v1952_v39 = vpack.c.bf16 %v1950_v57, %v1948_v43 }
 0x5f3   : > { %v1971_v40 = vsel %vm663_vm9, 0.0, %v1961_v62  ;;  %v1963_v44 = vpop.permute.xlu0 %1962  ;;  %v1953_v54 = vpack.c.bf16 %v1951_v0, %v1949_v7 }
 0x5f4   : > { %v1974_v53 = vmul.f32 %v10248_v23, %v1971_v40  ;;  %v1965_v46 = vsel %vm663_vm9, %v1961_v62, %v1963_v44 }
 0x5f5   : > { %v1975_v58 = vmul.f32 %v10253_v26, %v1965_v46  ;;  %2315 = vmatprep.subr.bf16.mxu1 %v1953_v54  ;;  %2889 = vmatprep.subr.bf16.mxu0 %v1953_v54 }
 0x5f6   : > { %v1985_v42 = vpop.permute.xlu1 %1984  ;;  %2316 = vmatpush1.bf16.msra.mxu1 %v1952_v39  ;;  %2890 = vmatpush1.bf16.msra.mxu0 %v1952_v39  ;;  %v1976_v21 = vpack.c.bf16 %v1974_v53, %v1972_v15  ;;  %v9547_v53 = vld [vmem:[%s13976_s4 + $0x10] ss:$24 sps:$4 sm:$0xff]  }
 0x5f7   : > { %v2013_v6 = vpop.permute.xlu0 %2012  ;;  %v1977_v30 = vpack.c.bf16 %v1975_v58, %v1973_v16  ;;  %v1992_v38 = vsel %vm720_vm10, %v1985_v42, %v1987_v1 }
 0x5f8   : > { %v2000_v33 = vmul.f32 %v10317_v25, %v1992_v38 }
 0x5f9   : > { %2317 = vmatprep.subr.bf16.mxu1 %v1977_v30  ;;  %2891 = vmatprep.subr.bf16.mxu0 %v1977_v30 }
 0x5fa   : > { %v2011_v49 = vpop.permute.xlu1 %2010  ;;  %2318 = vmatpush1.bf16.msra.mxu1 %v1976_v21  ;;  %2892 = vmatpush1.bf16.msra.mxu0 %v1976_v21 }
 0x5fb   : > { %v1991_v50 = vpop.permute.xlu0 %1990  ;;  %2319 = vmatprep.subr.bf16.mxu1 %v11109_v11  ;;  %2893 = vmatprep.subr.bf16.mxu0 %v11109_v11  ;;  %v2022_v52 = vsel %vm769_vm11, %v2011_v49, 0.0 }
 0x5fc   : > { %v1993_v59 = vsel %vm720_vm10, %v11147_v14, %v1991_v50  ;;  %v1999_v60 = vsel %vm720_vm10, %v1991_v50, 0.0  ;;  %v2025_v47 = vmul.f32 %v10253_v26, %v2022_v52 }
 0x5fd   : > { %v2002_v34 = vmul.f32 %v10317_v25, %v1993_v59  ;;  %v2003_v51 = vmul.f32 %v14172_v10, %v1999_v60 }
 0x5fe   : > { %v2009_v12 = vpop.permute.xlu1 %2008  ;;  %2320 = vmatpush1.bf16.msra.mxu1 %v11107_v56  ;;  %2894 = vmatpush1.bf16.msra.mxu0 %v11107_v56 }
 0x5ff   : > { %v2004_v11 = vpack.c.bf16 %v2002_v34, %v2000_v33  ;;  %v2016_v14 = vsel %vm769_vm11, %v2009_v12, %v2011_v49  ;;  %v2015_v13 = vpop.permute.xlu0 %2014  ;;  %v2005_v36 = vpack.c.bf16 %v2003_v51, %v2001_v24 }
 0x600   : > { %v2024_v37 = vmul.f32 %v10248_v23, %v2016_v14  ;;  %v2017_v41 = vsel %vm769_vm11, %v2013_v6, %v2015_v13  ;;  %v2023_v2 = vsel %vm769_vm11, %v2015_v13, 0.0  ;;  %v9548_v13 = vld [vmem:[#allocation10 + $0x44] ss:$28 sps:$4 sm:$0xff]  }
 0x601   : > { %v2026_v1 = vmul.f32 %v10248_v23, %v2017_v41  ;;  %v2027_v61 = vmul.f32 %v10253_v26, %v2023_v2  ;;  %2321 = vmatprep.subr.bf16.mxu1 %v2005_v36  ;;  %2895 = vmatprep.subr.bf16.mxu0 %v2005_v36  ;;  %v9550_v36 = vld [vmem:[#allocation10 + $0x40] ss:$28 sps:$4 sm:$0xff]   ;;  %v2671_v2 = vld [vmem:[%s13982_s10 + $0x8] sm:$0xff] }
 0x602   : > { %v9245_v56 = vpop.permute.xlu1 %9244  ;;  %2322 = vmatpush1.bf16.msra.mxu1 %v2004_v11  ;;  %2896 = vmatpush1.bf16.msra.mxu0 %v2004_v11  ;;  %v2670_v41 = vld [vmem:[%s13982_s10] sm:$0xff] }
 0x603   : > { %v2028_v9 = vpack.c.bf16 %v2026_v1, %v2024_v37  ;;  %v9247_v20 = vunpack.i.h.bf16 %v9245_v56  ;;  %v9246_v18 = vunpack.i.l.bf16 %v9245_v56  ;;  %v9250_v31 = vpop.permute.xlu0 %9249  ;;  %v2029_v45 = vpack.c.bf16 %v2027_v61, %v2025_v47  ;;  %2866 = vmatprep.mubr.bf16.mxu0 %v9548_v13  ;;  %v9553_v37 = vld [vmem:[#allocation10 + $0x14] ss:$28 sps:$4 sm:$0xff]   ;;  %v2673_v1 = vld [vmem:[%s13982_s10 + $0x18] sm:$0xff] }
 0x604   : > { %v9252_v4 = vunpack.i.h.bf16 %v9250_v31  ;;  %v9251_v5 = vunpack.i.l.bf16 %v9250_v31  ;;  %2867 = vmatmul.mubr.bf16.gmra.mrb[8].mxu0 %v9550_v36  ;;  %v2672_v47 = vld [vmem:[%s13982_s10 + $0x10] sm:$0xff] }
 0x605   : > { %v2040_v28 = vsel %vm818_vm12, %v9246_v18, %v9247_v20  ;;  %2323 = vmatprep.subr.bf16.mxu1 %v2029_v45  ;;  %2897 = vmatprep.subr.bf16.mxu0 %v2029_v45 }
 0x606   : > { %v2041_v22 = vsel %vm818_vm12, %v9251_v5, %v9252_v4  ;;  %v8466_v3 = vpack.c.bf16 %v9252_v4, %v9247_v20  ;;  %v2055_v48 = vpop.permute.xlu1 %2054  ;;  %2324 = vmatpush1.bf16.msra.mxu1 %v2028_v9  ;;  %2898 = vmatpush1.bf16.msra.mxu0 %v2028_v9 }
 0x607   : > { %v2066_v19 = vsel %vm859_vm14, %v2055_v48, 0.0  ;;  %v2059_v55 = vpop.permute.xlu0 %2058  ;;  %v2048_v57 = vpack.c.bf16 %v2041_v22, %v2040_v28  ;;  %2909 = vmatprep.mubr.bf16.mxu0 %v9553_v37 }
 0x608   : > { %v2069_v32 = vmul.f32 %v14172_v10, %v2066_v19  ;;  %v2067_v7 = vsel %vm859_vm14, %v2059_v55, 0.0  ;;  %8467 = vmatprep.subr.msk.bf16.mxu1 %vm10488_vm13, %v8466_v3  ;;  %8507 = vmatprep.subr.msk.bf16.mxu0 %vm10488_vm13, %v8466_v3 }
 0x609   : > { %v2071_v0 = vmul.f32 %v14172_v10, %v2067_v7 }
 0x60a   : > { %v2053_v43 = vpop.permute.xlu1 %2052  ;;  %2326 = vmatpush1.bf16.msra.mxu1 %v2048_v57  ;;  %2900 = vmatpush1.bf16.msra.mxu0 %v2048_v57 }
 0x60b   : > { %v2060_v29 = vsel %vm859_vm14, %v2053_v43, %v2055_v48  ;;  %v2057_v62 = vpop.permute.xlu0 %2056  ;;  %v2073_v27 = vpack.c.bf16 %v2071_v0, %v2069_v32 }
 0x60c   : > { %v2068_v40 = vmul.f32 %v10317_v25, %v2060_v29  ;;  %v2061_v44 = vsel %vm859_vm14, %v2057_v62, %v2059_v55 }
 0x60d   : > { %v2070_v54 = vmul.f32 %v10317_v25, %v2061_v44  ;;  %2327 = vmatprep.subr.bf16.mxu1 %v2073_v27  ;;  %2901 = vmatprep.subr.bf16.mxu0 %v2073_v27 }
 0x60f   : > { %v2072_v39 = vpack.c.bf16 %v2070_v54, %v2068_v40 }
 0x611   : > { %2328 = vmatpush1.bf16.msra.mxu1 %v2072_v39  ;;  %2902 = vmatpush1.bf16.msra.mxu0 %v2072_v39 }
 0x614   : > { %2336 = vmatmul.mubr.bf16.vlgmr.msra.gmra.mrb[8].mxu1 %v9547_v53 }
 0x61b   : > { %v2177_v46 = vpop.permute.xlu1 %2176 }
 0x61c   : > { %v2182_v42 = vpop.permute.xlu0 %2181 }
 0x6e7   : > { %v2337_v16 = vpop.f32.mrb[8].mxu1 }
 0x6e8   : > { %v8848_v58 = vadd.f32 %v2337_v16, %v2177_v46  ;;  %v2339_v15 = vpop.f32.mrb[9].mxu1 }
 0x6e9   : > { %v8849_v6 = vadd.f32 %v2339_v15, %v2177_v46  ;;  %v2341_v30 = vpop.f32.mrb[10].mxu1 }
 0x6ea   : > { %v2346_v21 = vmul.f32 0.2, %v8848_v58  ;;  %v8850_v35 = vadd.f32 %v2341_v30, %v2182_v42  ;;  %v2343_v38 = vpop.f32.mrb[11].mxu1 }
 0x6eb   : > { %v2347_v49 = vmul.f32 0.2, %v8849_v6  ;;  %v8851_v50 = vadd.f32 %v2343_v38, %v2182_v42 }
 0x6ec   : > { %v11217_v59 = vmax.f32 %v8848_v58, %v2346_v21  ;;  %v2348_v60 = vmul.f32 0.2, %v8850_v35 }
 0x6ed   : > { %v11219_v24 = vmax.f32 %v8849_v6, %v2347_v49  ;;  %v2349_v33 = vmul.f32 0.2, %v8851_v50 }
 0x6ee   : > { %v11221_v34 = vmax.f32 %v8850_v35, %v2348_v60  ;;  %2358 = vrot.lane.b32.xlu1 %v11217_v59, %s9859_s19 }
 0x6ef   : > { %v11225_v51 = vmax.f32 %v8851_v50, %v2349_v33  ;;  %2360 = vrot.lane.b32.xlu0 %v11219_v24, %s9859_s19  ;;  %v9253_v52 = vpack.i.bf16 %v11219_v24, %v11217_v59 }
 0x6f0   : > { %v2450_v12 = vpack.c.bf16 %v11221_v34, %v11217_v59 }
 0x6f1   : > { %v9258_v11 = vpack.i.bf16 %v11225_v51, %v11221_v34  ;;  %v2451_v14 = vpack.c.bf16 %v11225_v51, %v11219_v24 }
 0x6f2   : > { %2402 = vrot.lane.b32.xlu1 %v11217_v59, %s9861_s25 }
 0x6f3   : > { %2404 = vrot.lane.b32.xlu0 %v11219_v24, %s9861_s25 }
 0x6f6   : > { %2426 = vrot.lane.b32.xlu1 %v11217_v59, %s9862_s14 }
 0x6f7   : > { %2428 = vrot.lane.b32.xlu0 %v11219_v24, %s9862_s14 }
 0x6fa   : > { %9254 = vrot.lane.b32.xlu1 %v9253_v52, %s9860_s24 }
 0x6fb   : > { %2458 = vrot.lane.b32.xlu0 %v11221_v34, %s9863_s16 }
 0x6fe   : > { %2362 = vrot.lane.b32.xlu1 %v11221_v34, %s9859_s19 }
 0x6ff   : > { %2364 = vrot.lane.b32.xlu0 %v11225_v51, %s9859_s19 }
 0x702   : > { %2456 = vrot.lane.b32.xlu1 %v11219_v24, %s9863_s16 }
 0x703   : > { %9259 = vrot.lane.b32.xlu0 %v9258_v11, %s9860_s24 }
 0x706   : > { %2406 = vrot.lane.b32.xlu1 %v11221_v34, %s9861_s25 }
 0x707   : > { %2408 = vrot.lane.b32.xlu0 %v11225_v51, %s9861_s25 }
 0x70a   : > { %2430 = vrot.lane.b32.xlu1 %v11221_v34, %s9862_s14 }
 0x70b   : > { %2432 = vrot.lane.b32.xlu0 %v11225_v51, %s9862_s14 }
 0x70e   : > { %2454 = vrot.lane.b32.xlu1 %v11217_v59, %s9863_s16 }
 0x70f   : > { %2482 = vrot.lane.b32.xlu0 %v11221_v34, %s9864_s12 }
 0x712   : > { %2480 = vrot.lane.b32.xlu1 %v11219_v24, %s9864_s12 }
 0x713   : > { %2460 = vrot.lane.b32.xlu0 %v11225_v51, %s9863_s16 }
 0x716   : > { %2478 = vrot.lane.b32.xlu1 %v11217_v59, %s9864_s12 }
 0x717   : > { %2484 = vrot.lane.b32.xlu0 %v11225_v51, %s9864_s12 }
 0x71a   : > { %9264 = vrot.lane.b32.xlu1 %v9253_v52, %s9865_s15 }
 0x71b   : > { %9269 = vrot.lane.b32.xlu0 %v9258_v11, %s9865_s15 }
 0x71e   : > { %2524 = vrot.lane.b32.xlu1 %v11219_v24, %s9866_s22 }
 0x71f   : > { %2528 = vrot.lane.b32.xlu0 %v11225_v51, %s9866_s22 }
 0x722   : > { %2522 = vrot.lane.b32.xlu1 %v11217_v59, %s9866_s22 }
 0x723   : > { %2526 = vrot.lane.b32.xlu0 %v11221_v34, %s9866_s22 }
 0x726   : > { %2676 = vperm.xlu1 %9192, %v2670_v41  }
 0x727   : > { %2681 = vperm.xlu0 %9191, %v2671_v2  }
 0x72a   : > { %2686 = vperm.xlu1 %9192, %v2672_v47  }
 0x72b   : > { %2691 = vperm.xlu0 %9191, %v2673_v1  }
 0x760   : > { %v2359_v61 = vpop.permute.xlu1 %2358 }
 0x761   : > { %v2361_v56 = vpop.permute.xlu0 %2360  ;;  %v2372_v22 = vsel %vm524_vm1, 0.0, %v2359_v61 }
 0x762   : > { %v2366_v5 = vsel %vm524_vm1, %v2359_v61, %v2361_v56  ;;  %v2374_v7 = vmul.f32 %v10248_v23, %v2372_v22  ;;  %v9551_v61 = vld [vmem:[#allocation10 + $0x10] ss:$28 sps:$4 sm:$0xff]  }
 0x763   : > { %v2375_v57 = vmul.f32 %v10253_v26, %v2366_v5 }
 0x764   : > { %v2403_v9 = vpop.permute.xlu1 %2402 }
 0x765   : > { %v2405_v20 = vpop.permute.xlu0 %2404  ;;  %v2416_v58 = vsel %vm614_vm8, 0.0, %v2403_v9 }
 0x766   : > { %v2410_v39 = vsel %vm614_vm8, %v2403_v9, %v2405_v20  ;;  %v2418_v50 = vmul.f32 %v10317_v25, %v2416_v58  ;;  %v9554_v20 = vld [vmem:[#allocation10 + $0x4c] ss:$28 sps:$4 sm:$0xff]  }
 0x767   : > { %v2419_v38 = vmul.f32 %v14172_v10, %v2410_v39 }
 0x768   : > { %v2427_v18 = vpop.permute.xlu1 %2426 }
 0x769   : > { %v2429_v31 = vpop.permute.xlu0 %2428  ;;  %v2440_v52 = vsel %vm663_vm9, 0.0, %v2427_v18 }
 0x76a   : > { %v2434_v60 = vsel %vm663_vm9, %v2427_v18, %v2429_v31  ;;  %v2442_v56 = vmul.f32 %v10248_v23, %v2440_v52 }
 0x76b   : > { %v2443_v47 = vmul.f32 %v10253_v26, %v2434_v60 }
 0x76c   : > { %v9255_v45 = vpop.permute.xlu1 %9254 }
 0x76d   : > { %v11297_v4 = vpop.permute.xlu0 %2458  ;;  %v9257_v0 = vunpack.i.h.bf16 %v9255_v45  ;;  %v9256_v43 = vunpack.i.l.bf16 %v9255_v45 }
 0x76f   : > { %v2390_v46 = vsel %vm573_vm3, %v9256_v43, %v9257_v0  ;;  %v9556_v0 = vld [vmem:[#allocation10 + $0x48] ss:$28 sps:$4 sm:$0xff]  }
 0x770   : > { %v2363_v28 = vpop.permute.xlu1 %2362 }
 0x771   : > { %v2373_v3 = vsel %vm524_vm1, 0.0, %v2363_v28  ;;  %v2365_v48 = vpop.permute.xlu0 %2364 }
 0x772   : > { %v2376_v19 = vmul.f32 %v10248_v23, %v2373_v3  ;;  %v2367_v55 = vsel %vm524_vm1, %v2363_v28, %v2365_v48 }
 0x773   : > { %v2377_v32 = vmul.f32 %v10253_v26, %v2367_v55 }
 0x774   : > { %v2457_v29 = vpop.permute.xlu1 %2456  ;;  %v2378_v40 = vpack.c.bf16 %v2376_v19, %v2374_v7 }
 0x775   : > { %v9260_v62 = vpop.permute.xlu0 %9259  ;;  %v2379_v27 = vpack.c.bf16 %v2377_v32, %v2375_v57  ;;  %v2468_v5 = vsel %vm720_vm10, %v2457_v29, 0.0 }
 0x776   : > { %v9262_v44 = vunpack.i.h.bf16 %v9260_v62  ;;  %v9261_v54 = vunpack.i.l.bf16 %v9260_v62  ;;  %v2471_v55 = vmul.f32 %v14172_v10, %v2468_v5 }
 0x777   : > { %2903 = vmatprep.subr.bf16.mxu0 %v2379_v27 }
 0x778   : > { %2904 = vmatpush1.bf16.msra.mxu0 %v2378_v40  ;;  %v2407_v53 = vpop.permute.xlu1 %2406  ;;  %v2391_v16 = vsel %vm573_vm3, %v9261_v54, %v9262_v44  ;;  %v8511_v30 = vpack.c.bf16 %v9261_v54, %v9256_v43 }
 0x779   : > { %v2417_v15 = vsel %vm614_vm8, 0.0, %v2407_v53  ;;  %v2409_v42 = vpop.permute.xlu0 %2408  ;;  %v2399_v6 = vpack.c.bf16 %v2391_v16, %v2390_v46 }
 0x77a   : > { %v2420_v21 = vmul.f32 %v10317_v25, %v2417_v15  ;;  %v2411_v35 = vsel %vm614_vm8, %v2407_v53, %v2409_v42 }
 0x77b   : > { %v2421_v49 = vmul.f32 %v14172_v10, %v2411_v35  ;;  %2905 = vmatprep.subr.bf16.mxu0 %v2399_v6 }
 0x77c   : > { %v2431_v33 = vpop.permute.xlu1 %2430  ;;  %8512 = vmatpush1.bf16.msk.msra.mxu0 %vm10292_vm5, %v8511_v30  ;;  %v2422_v37 = vpack.c.bf16 %v2420_v21, %v2418_v50 }
 0x77d   : > { %v2441_v11 = vsel %vm663_vm9, 0.0, %v2431_v33  ;;  %v2433_v13 = vpop.permute.xlu0 %2432  ;;  %v2423_v36 = vpack.c.bf16 %v2421_v49, %v2419_v38 }
 0x77e   : > { %v2444_v41 = vmul.f32 %v10248_v23, %v2441_v11  ;;  %v2435_v2 = vsel %vm663_vm9, %v2431_v33, %v2433_v13 }
 0x77f   : > { %v2445_v1 = vmul.f32 %v10253_v26, %v2435_v2  ;;  %2907 = vmatprep.subr.bf16.mxu0 %v2423_v36 }
 0x780   : > { %v2455_v9 = vpop.permute.xlu1 %2454  ;;  %2908 = vmatpush1.bf16.msra.mxu0 %v2422_v37  ;;  %v2446_v45 = vpack.c.bf16 %v2444_v41, %v2442_v56 }
 0x781   : > { %v2483_v18 = vpop.permute.xlu0 %2482  ;;  %v2447_v31 = vpack.c.bf16 %v2445_v1, %v2443_v47  ;;  %v2462_v28 = vsel %vm720_vm10, %v2455_v9, %v2457_v29  ;;  %v9557_v1 = vld [vmem:[#allocation10 + $0x18] ss:$28 sps:$4 sm:$0xff]  }
 0x782   : > { %v2470_v57 = vmul.f32 %v10317_v25, %v2462_v28 }
 0x783   : > { %2930 = vmatprep.subr.bf16.mxu0 %v2447_v31  ;;  %2910 = vmatmul.mubr.bf16.vlgmr.msra.gmra.mrb[4].mxu0 %v9551_v61  ;;  %v9558_v61 = vld [vmem:[#allocation10 + $0x50] ss:$28 sps:$4 sm:$0xff]  }
 0x784   : > { %v2481_v22 = vpop.permute.xlu1 %2480  ;;  %2931 = vmatpush1.bf16.msra.mxu0 %v2446_v45  ;;  %2919 = vmatprep.mubr.bf16.mxu0 %v9554_v20 }
 0x785   : > { %v2461_v3 = vpop.permute.xlu0 %2460  ;;  %2932 = vmatprep.subr.bf16.mxu0 %v2451_v14  ;;  %v2492_v43 = vsel %vm769_vm11, %v2481_v22, 0.0 }
 0x786   : > { %v2463_v48 = vsel %vm720_vm10, %v11297_v4, %v2461_v3  ;;  %v2469_v19 = vsel %vm720_vm10, %v2461_v3, 0.0  ;;  %v2495_v44 = vmul.f32 %v10253_v26, %v2492_v43  ;;  %v9651_v3 = vld [vmem:[%s10096_s26] sm:$0xff] }
 0x787   : > { %v2472_v32 = vmul.f32 %v10317_v25, %v2463_v48  ;;  %v2473_v7 = vmul.f32 %v14172_v10, %v2469_v19  ;;  %v9652_v19 = vld [vmem:[%s10096_s26 + $0x8] sm:$0xff] }
 0x788   : > { %v2479_v29 = vpop.permute.xlu1 %2478  ;;  %2933 = vmatpush1.bf16.msra.mxu0 %v2450_v12 }
 0x789   : > { %v2474_v24 = vpack.c.bf16 %v2472_v32, %v2470_v57  ;;  %v2486_v51 = vsel %vm769_vm11, %v2479_v29, %v2481_v22  ;;  %v2485_v14 = vpop.permute.xlu0 %2484  ;;  %v2475_v4 = vpack.c.bf16 %v2473_v7, %v2471_v55 }
 0x78a   : > { %v2494_v62 = vmul.f32 %v10248_v23, %v2486_v51  ;;  %v2487_v27 = vsel %vm769_vm11, %v2483_v18, %v2485_v14  ;;  %v2493_v40 = vsel %vm769_vm11, %v2485_v14, 0.0 }
 0x78b   : > { %v2496_v54 = vmul.f32 %v10248_v23, %v2487_v27  ;;  %v2497_v39 = vmul.f32 %v10253_v26, %v2493_v40  ;;  %2934 = vmatprep.subr.bf16.mxu0 %v2475_v4  ;;  %2920 = vmatmul.mubr.bf16.gmra.mrb[8].mxu0 %v9556_v0  ;;  %v9654_v40 = vld [vmem:[%s10096_s26 + $0x18] sm:$0xff] }
 0x78c   : > { %v9265_v59 = vpop.permute.xlu1 %9264  ;;  %2935 = vmatpush1.bf16.msra.mxu0 %v2474_v24  ;;  %2962 = vmatprep.mubr.bf16.mxu0 %v14175_v8 }
 0x78d   : > { %v2498_v34 = vpack.c.bf16 %v2496_v54, %v2494_v62  ;;  %v9267_v12 = vunpack.i.h.bf16 %v9265_v59  ;;  %v9266_v53 = vunpack.i.l.bf16 %v9265_v59  ;;  %v9270_v46 = vpop.permute.xlu0 %9269  ;;  %v2499_v16 = vpack.c.bf16 %v2497_v39, %v2495_v44  ;;  %v9653_v62 = vld [vmem:[%s10096_s26 + $0x10] sm:$0xff] }
 0x78e   : > { %v9272_v58 = vunpack.i.h.bf16 %v9270_v46  ;;  %v9271_v15 = vunpack.i.l.bf16 %v9270_v46  ;;  %v9655_v46 = vld [vmem:[%s10096_s26 + $0x20] sm:$0xff] }
 0x78f   : > { %v2510_v42 = vsel %vm818_vm12, %v9266_v53, %v9267_v12  ;;  %2936 = vmatprep.subr.bf16.mxu0 %v2499_v16 }
 0x790   : > { %v2511_v6 = vsel %vm818_vm12, %v9271_v15, %v9272_v58  ;;  %v8514_v30 = vpack.c.bf16 %v9272_v58, %v9267_v12  ;;  %v2525_v21 = vpop.permute.xlu1 %2524  ;;  %2937 = vmatpush1.bf16.msra.mxu0 %v2498_v34  ;;  %v9656_v58 = vld [vmem:[%s10096_s26 + $0x28] sm:$0xff] }
 0x791   : > { %v2536_v35 = vsel %vm859_vm14, %v2525_v21, 0.0  ;;  %v2529_v38 = vpop.permute.xlu0 %2528  ;;  %v2518_v49 = vpack.c.bf16 %v2511_v6, %v2510_v42 }
 0x792   : > { %v2539_v50 = vmul.f32 %v14172_v10, %v2536_v35  ;;  %v2537_v60 = vsel %vm859_vm14, %v2529_v38, 0.0  ;;  %8515 = vmatprep.subr.msk.bf16.mxu0 %vm10488_vm13, %v8514_v30 }
 0x793   : > { %v2541_v33 = vmul.f32 %v14172_v10, %v2537_v60  ;;  %v9658_v60 = vld [vmem:[%s10096_s26 + $0x38] sm:$0xff] }
 0x794   : > { %v2523_v52 = vpop.permute.xlu1 %2522  ;;  %2939 = vmatpush1.bf16.msra.mxu0 %v2518_v49  ;;  %v9657_v49 = vld [vmem:[%s10096_s26 + $0x30] sm:$0xff] }
 0x795   : > { %v2530_v11 = vsel %vm859_vm14, %v2523_v52, %v2525_v21  ;;  %v2527_v13 = vpop.permute.xlu0 %2526  ;;  %v2543_v36 = vpack.c.bf16 %v2541_v33, %v2539_v50 }
 0x796   : > { %v2538_v37 = vmul.f32 %v10317_v25, %v2530_v11  ;;  %v2531_v41 = vsel %vm859_vm14, %v2527_v13, %v2529_v38  ;;  %v9561_v11 = vld [vmem:[#allocation4 + $0x1c] ss:$12 sps:$4 sm:$0xff]  }
 0x797   : > { %v2540_v2 = vmul.f32 %v10317_v25, %v2531_v41  ;;  %2940 = vmatprep.subr.bf16.mxu0 %v2543_v36  ;;  %v9564_v13 = vld [vmem:[#allocation9 + $0x2c] ss:$20 sps:$4 sm:$0xff]   ;;  %3503 = vmatprep.mubr.bf16.mxu1 %v9561_v11 }
 0x798   : > { %v8237_v36 = vld [vmem:[%s13978_s6 + $0x10] sm:$0xff] }
 0x799   : > { %v2542_v47 = vpack.c.bf16 %v2540_v2, %v2538_v37  ;;  %v8238_v37 = vld [vmem:[%s13978_s6 + $0x18] sm:$0xff] }
 0x79b   : > { %2941 = vmatpush1.bf16.msra.mxu0 %v2542_v47 }
 0x79e   : > { %8235 = vmatmul.mubr.msk.bf16.vlgmr.msra.gmra.mrb[4].mxu0 %vm2764_vm6, %v9557_v1 }
 0x79f   : > { %2972 = vmatprep.mubr.bf16.mxu0 %v14175_v8 }
 0x7a5   : > { %v2677_v56 = vpop.permute.xlu1 %2676 }
 0x7a6   : > { %8236 = vmatmul.mubr.msk.bf16.gmra.mrb[8].mxu0 %vm2764_vm6, %v9558_v61  ;;  %v2682_v32 = vpop.permute.xlu0 %2681 }
 0x7a7   : > { %4289 = vmatprep.mubr.bf16.mxu0 %v9564_v13 }
 0x7a9   : > { %v2687_v54 = vpop.permute.xlu1 %2686 }
 0x7aa   : > { %v2692_v42 = vpop.permute.xlu0 %2691 }
 0x871   : > { %v2964_v9 = vpop.f32.mrb[4].mxu0 }
 0x872   : > { %v8852_v20 = vadd.f32 %v2964_v9, %v2677_v56  ;;  %v2966_v18 = vpop.f32.mrb[5].mxu0 }
 0x873   : > { %v8853_v31 = vadd.f32 %v2966_v18, %v2677_v56  ;;  %v2968_v45 = vpop.f32.mrb[6].mxu0 }
 0x874   : > { %v2983_v5 = vmul.f32 0.2, %v8852_v20  ;;  %v2970_v28 = vpop.f32.mrb[7].mxu0  ;;  %v8854_v0 = vadd.f32 %v2968_v45, %v2682_v32 }
 0x875   : > { %v2984_v22 = vmul.f32 0.2, %v8853_v31  ;;  %v8855_v43 = vadd.f32 %v2970_v28, %v2682_v32 }
 0x876   : > { %v11367_v48 = vadd.f32 %v9651_v3, %v2983_v5  ;;  %v2985_v51 = vmul.f32 0.2, %v8854_v0 }
 0x877   : > { %v11370_v55 = vadd.f32 %v9652_v19, %v2984_v22  ;;  %v2986_v14 = vmul.f32 0.2, %v8855_v43 }
 0x878   : > { %14202 = vst [vmem:[#allocation25_spill] sm:$0xff] %v11367_v48  ;;  %3023 = vrot.lane.b32.xlu1 %v11367_v48, %s9859_s19  ;;  %v11389_v27 = vadd.f32 %v9653_v62, %v2985_v51 }
 0x879   : > { %14203 = vst [vmem:[#allocation26_spill] sm:$0xff] %v11370_v55  ;;  %v2974_v57 = vpop.f32.mrb[8].mxu0  ;;  %3025 = vrot.lane.b32.xlu0 %v11370_v55, %s9859_s19  ;;  %v11386_v4 = vpack.i.bf16 %v11370_v55, %v11367_v48  ;;  %v11392_v44 = vadd.f32 %v9654_v40, %v2986_v14 }
 0x87a   : > { %v2976_v7 = vpop.f32.mrb[9].mxu0  ;;  %14204 = vst [vmem:[#allocation27_spill] sm:$0xff] %v11389_v27  ;;  %v8856_v39 = vadd.f32 %v2974_v57, %v2687_v54 }
 0x87b   : > { %v2978_v29 = vpop.f32.mrb[10].mxu0  ;;  %14205 = vst [vmem:[#allocation30_spill] sm:$0xff] %v11392_v44  ;;  %v8857_v59 = vadd.f32 %v2976_v7, %v2687_v54  ;;  %v9278_v34 = vpack.i.bf16 %v11392_v44, %v11389_v27 }
 0x87c   : > { %v2980_v24 = vpop.f32.mrb[11].mxu0  ;;  %3111 = vrot.lane.b32.xlu1 %v11367_v48, %s9861_s25  ;;  %v2987_v12 = vmul.f32 0.2, %v8856_v39  ;;  %v8858_v6 = vadd.f32 %v2978_v29, %v2692_v42 }
 0x87d   : > { %3113 = vrot.lane.b32.xlu0 %v11370_v55, %s9861_s25  ;;  %v2988_v53 = vmul.f32 0.2, %v8857_v59  ;;  %v8859_v30 = vadd.f32 %v2980_v24, %v2692_v42 }
 0x87e   : > { %v11408_v16 = vadd.f32 %v9655_v46, %v2987_v12  ;;  %v2989_v21 = vmul.f32 0.2, %v8858_v6 }
 0x87f   : > { %v11411_v15 = vadd.f32 %v9656_v58, %v2988_v53  ;;  %v2990_v38 = vmul.f32 0.2, %v8859_v30 }
 0x880   : > { %3159 = vrot.lane.b32.xlu1 %v11367_v48, %s9862_s14  ;;  %14206 = vst [vmem:[#allocation31_spill] sm:$0xff] %v11408_v16  ;;  %v11427_v50 = vadd.f32 %v9657_v49, %v2989_v21 }
 0x881   : > { %3161 = vrot.lane.b32.xlu0 %v11370_v55, %s9862_s14  ;;  %14207 = vst [vmem:[#allocation32_spill] sm:$0xff] %v11411_v15  ;;  %v9283_v35 = vpack.i.bf16 %v11411_v15, %v11408_v16  ;;  %v11430_v33 = vadd.f32 %v9658_v60, %v2990_v38 }
 0x882   : > { %14208 = vst [vmem:[#allocation33_spill] sm:$0xff] %v11427_v50 }
 0x883   : > { %14209 = vst [vmem:[#allocation34_spill] sm:$0xff] %v11430_v33  ;;  %v9288_v52 = vpack.i.bf16 %v11430_v33, %v11427_v50 }
 0x884   : > { %9274 = vrot.lane.b32.xlu1 %v11386_v4, %s9860_s24 }
 0x885   : > { %3029 = vrot.lane.b32.xlu0 %v11392_v44, %s9859_s19 }
 0x888   : > { %3027 = vrot.lane.b32.xlu1 %v11389_v27, %s9859_s19 }
 0x889   : > { %9279 = vrot.lane.b32.xlu0 %v9278_v34, %s9860_s24 }
 0x88c   : > { %3115 = vrot.lane.b32.xlu1 %v11389_v27, %s9861_s25 }
 0x88d   : > { %3117 = vrot.lane.b32.xlu0 %v11392_v44, %s9861_s25 }
 0x890   : > { %3031 = vrot.lane.b32.xlu1 %v11408_v16, %s9859_s19 }
 0x891   : > { %3033 = vrot.lane.b32.xlu0 %v11411_v15, %s9859_s19 }
 0x894   : > { %3119 = vrot.lane.b32.xlu1 %v11408_v16, %s9861_s25 }
 0x895   : > { %3121 = vrot.lane.b32.xlu0 %v11411_v15, %s9861_s25 }
 0x898   : > { %9284 = vrot.lane.b32.xlu1 %v9283_v35, %s9860_s24 }
 0x899   : > { %3165 = vrot.lane.b32.xlu0 %v11392_v44, %s9862_s14 }
 0x89c   : > { %3035 = vrot.lane.b32.xlu1 %v11427_v50, %s9859_s19 }
 0x89d   : > { %3037 = vrot.lane.b32.xlu0 %v11430_v33, %s9859_s19 }
 0x8a0   : > { %3163 = vrot.lane.b32.xlu1 %v11389_v27, %s9862_s14 }
 0x8a1   : > { %3169 = vrot.lane.b32.xlu0 %v11411_v15, %s9862_s14 }
 0x8a4   : > { %3167 = vrot.lane.b32.xlu1 %v11408_v16, %s9862_s14 }
 0x8a5   : > { %3221 = vrot.lane.b32.xlu0 %v11392_v44, %s9863_s16 }
 0x8a8   : > { %3123 = vrot.lane.b32.xlu1 %v11427_v50, %s9861_s25 }
 0x8a9   : > { %9289 = vrot.lane.b32.xlu0 %v9288_v52, %s9860_s24 }
 0x8ac   : > { %3171 = vrot.lane.b32.xlu1 %v11427_v50, %s9862_s14 }
 0x8ad   : > { %3125 = vrot.lane.b32.xlu0 %v11430_v33, %s9861_s25 }
 0x8b0   : > { %3217 = vrot.lane.b32.xlu1 %v11370_v55, %s9863_s16 }
 0x8b1   : > { %3219 = vrot.lane.b32.xlu0 %v11389_v27, %s9863_s16 }
 0x8b4   : > { %3215 = vrot.lane.b32.xlu1 %v11367_v48, %s9863_s16 }
 0x8b5   : > { %3173 = vrot.lane.b32.xlu0 %v11430_v33, %s9862_s14 }
 0x8b8   : > { %3225 = vrot.lane.b32.xlu1 %v11411_v15, %s9863_s16 }
 0x8b9   : > { %3227 = vrot.lane.b32.xlu0 %v11427_v50, %s9863_s16 }
 0x8bc   : > { %3223 = vrot.lane.b32.xlu1 %v11408_v16, %s9863_s16 }
 0x8bd   : > { %3269 = vrot.lane.b32.xlu0 %v11392_v44, %s9864_s12 }
 0x8c0   : > { %3265 = vrot.lane.b32.xlu1 %v11370_v55, %s9864_s12 }
 0x8c1   : > { %3267 = vrot.lane.b32.xlu0 %v11389_v27, %s9864_s12 }
 0x8c4   : > { %3263 = vrot.lane.b32.xlu1 %v11367_v48, %s9864_s12 }
 0x8c5   : > { %3229 = vrot.lane.b32.xlu0 %v11430_v33, %s9863_s16 }
 0x8c8   : > { %3273 = vrot.lane.b32.xlu1 %v11411_v15, %s9864_s12 }
 0x8c9   : > { %3275 = vrot.lane.b32.xlu0 %v11427_v50, %s9864_s12 }
 0x8cc   : > { %3271 = vrot.lane.b32.xlu1 %v11408_v16, %s9864_s12 }
 0x8cd   : > { %3277 = vrot.lane.b32.xlu0 %v11430_v33, %s9864_s12 }
 0x8d0   : > { %9294 = vrot.lane.b32.xlu1 %v11386_v4, %s9865_s15 }
 0x8d1   : > { %9299 = vrot.lane.b32.xlu0 %v9278_v34, %s9865_s15 }
 0x8d4   : > { %9304 = vrot.lane.b32.xlu1 %v9283_v35, %s9865_s15 }
 0x8d5   : > { %3357 = vrot.lane.b32.xlu0 %v11392_v44, %s9866_s22 }
 0x8d8   : > { %3353 = vrot.lane.b32.xlu1 %v11370_v55, %s9866_s22 }
 0x8d9   : > { %9309 = vrot.lane.b32.xlu0 %v9288_v52, %s9865_s15 }
 0x8dc   : > { %3351 = vrot.lane.b32.xlu1 %v11367_v48, %s9866_s22 }
 0x8dd   : > { %3355 = vrot.lane.b32.xlu0 %v11389_v27, %s9866_s22 }
 0x8e0   : > { %3361 = vrot.lane.b32.xlu1 %v11411_v15, %s9866_s22 }
 0x8e1   : > { %3365 = vrot.lane.b32.xlu0 %v11430_v33, %s9866_s22 }
 0x8e4   : > { %3359 = vrot.lane.b32.xlu1 %v11408_v16, %s9866_s22 }
 0x8e5   : > { %3363 = vrot.lane.b32.xlu0 %v11427_v50, %s9866_s22 }
 0x8e8   : > { %3445 = vperm.xlu1 %9192, %v8237_v36  }
 0x8e9   : > { %3450 = vperm.xlu0 %9191, %v8238_v37  }
 0x8ea   : > { %v3024_v41 = vpop.permute.xlu1 %3023 }
 0x8eb   : > { %v3026_v2 = vpop.permute.xlu0 %3025  ;;  %v3051_v18 = vsel %vm524_vm1, 0.0, %v3024_v41 }
 0x8ec   : > { %v3039_v31 = vsel %vm524_vm1, %v3024_v41, %v3026_v2  ;;  %v3055_v3 = vmul.f32 %v10248_v23, %v3051_v18 }
 0x8ed   : > { %v3056_v19 = vmul.f32 %v10253_v26, %v3039_v31 }
 0x8ee   : > { %v11512_v47 = vpop.permute.xlu1 %3111 }
 0x8ef   : > { %v11514_v1 = vpop.permute.xlu0 %3113 }
 0x8f2   : > { %v11516_v61 = vpop.permute.xlu1 %3159 }
 0x8f3   : > { %v11518_v56 = vpop.permute.xlu0 %3161 }
 0x8f6   : > { %v9275_v9 = vpop.permute.xlu1 %9274 }
 0x8f7   : > { %v3030_v20 = vpop.permute.xlu0 %3029  ;;  %v9277_v58 = vunpack.i.h.bf16 %v9275_v9  ;;  %v9276_v42 = vunpack.i.l.bf16 %v9275_v9 }
 0x8f9   : > { %v3087_v13 = vsel %vm573_vm3, %v9276_v42, %v9277_v58 }
 0x8fa   : > { %v3028_v45 = vpop.permute.xlu1 %3027 }
 0x8fb   : > { %v3040_v5 = vsel %vm524_vm1, %v3028_v45, %v3030_v20  ;;  %v3052_v28 = vsel %vm524_vm1, 0.0, %v3028_v45  ;;  %v9280_v22 = vpop.permute.xlu0 %9279 }
 0x8fc   : > { %v3057_v57 = vmul.f32 %v10248_v23, %v3052_v28  ;;  %v3058_v32 = vmul.f32 %v10253_v26, %v3040_v5  ;;  %v9282_v54 = vunpack.i.h.bf16 %v9280_v22  ;;  %v9281_v39 = vunpack.i.l.bf16 %v9280_v22 }
 0x8fd   : > { %v3127_v28 = vsel %vm614_vm8, %v11512_v47, %v11514_v1 }
 0x8fe   : > { %v11528_v7 = vpack.c.bf16 %v3057_v57, %v3055_v3  ;;  %v11530_v0 = vpack.c.bf16 %v3058_v32, %v3056_v19  ;;  %v3116_v43 = vpop.permute.xlu1 %3115  ;;  %v3088_v38 = vsel %vm573_vm3, %v9281_v39, %v9282_v54  ;;  %v11566_v9 = vpack.c.bf16 %v9281_v39, %v9276_v42 }
 0x8ff   : > { %v3118_v29 = vpop.permute.xlu0 %3117  ;;  %v11554_v37 = vpack.c.bf16 %v3088_v38, %v3087_v13  ;;  %v3140_v19 = vsel %vm614_vm8, 0.0, %v3116_v43 }
 0x900   : > { %3471 = vmatprep.subr.bf16.mxu1 %v11530_v0  ;;  %4257 = vmatprep.subr.bf16.mxu0 %v11530_v0  ;;  %v3128_v20 = vsel %vm614_vm8, %v3116_v43, %v3118_v29  ;;  %v3145_v1 = vmul.f32 %v10317_v25, %v3140_v19 }
 0x901   : > { %3472 = vmatpush1.bf16.msra.mxu1 %v11528_v7  ;;  %4258 = vmatpush1.bf16.msra.mxu0 %v11528_v7  ;;  %v3146_v57 = vmul.f32 %v14172_v10, %v3128_v20 }
 0x902   : > { %v3032_v24 = vpop.permute.xlu1 %3031 }
 0x903   : > { %v3034_v51 = vpop.permute.xlu0 %3033  ;;  %v3053_v12 = vsel %vm524_vm1, 0.0, %v3032_v24 }
 0x904   : > { %v3041_v59 = vsel %vm524_vm1, %v3032_v24, %v3034_v51  ;;  %v3059_v49 = vmul.f32 %v10248_v23, %v3053_v12  ;;  %v3139_v51 = vsel %vm614_vm8, 0.0, %v11512_v47 }
 0x905   : > { %v3060_v21 = vmul.f32 %v10253_v26, %v3041_v59 }
 0x906   : > { %v11536_v14 = vpop.permute.xlu1 %3119 }
 0x907   : > { %v3122_v4 = vpop.permute.xlu0 %3121 }
 0x908   : > { %v3129_v43 = vsel %vm614_vm8, %v11536_v14, %v3122_v4  ;;  %v3141_v4 = vsel %vm614_vm8, 0.0, %v11536_v14 }
 0x909   : > { %v3147_v13 = vmul.f32 %v10317_v25, %v3141_v4  ;;  %v11676_v4 = vpack.c.bf16 %v11389_v27, %v11367_v48 }
 0x90a   : > { %v9285_v62 = vpop.permute.xlu1 %9284 }
 0x90b   : > { %v3166_v40 = vpop.permute.xlu0 %3165  ;;  %v9287_v18 = vunpack.i.h.bf16 %v9285_v62  ;;  %v9286_v31 = vunpack.i.l.bf16 %v9285_v62  ;;  %v3144_v62 = vmul.f32 %v14172_v10, %v3127_v28 }
 0x90d   : > { %v3089_v32 = vsel %vm573_vm3, %v9286_v31, %v9287_v18  ;;  %v11593_v12 = vpack.c.bf16 %v3146_v57, %v3144_v62 }
 0x90e   : > { %v3036_v34 = vpop.permute.xlu1 %3035 }
 0x90f   : > { %v3054_v53 = vsel %vm524_vm1, 0.0, %v3036_v34  ;;  %v3038_v46 = vpop.permute.xlu0 %3037 }
 0x910   : > { %v3061_v6 = vmul.f32 %v10248_v23, %v3054_v53  ;;  %v3042_v30 = vsel %vm524_vm1, %v3036_v34, %v3038_v46  ;;  %v3143_v46 = vmul.f32 %v10317_v25, %v3139_v51 }
 0x911   : > { %v3062_v35 = vmul.f32 %v10253_v26, %v3042_v30 }
 0x912   : > { %v3164_v60 = vpop.permute.xlu1 %3163  ;;  %v11552_v36 = vpack.c.bf16 %v3061_v6, %v3059_v49  ;;  %v3148_v6 = vmul.f32 %v14172_v10, %v3129_v43 }
 0x913   : > { %v11547_v52 = vpack.c.bf16 %v3062_v35, %v3060_v21  ;;  %v11549_v11 = vpop.permute.xlu0 %3169  ;;  %v3176_v58 = vsel %vm663_vm9, %v3164_v60, %v3166_v40  ;;  %v3175_v40 = vsel %vm663_vm9, %v11516_v61, %v11518_v56  ;;  %v11617_v21 = vpack.c.bf16 %v3145_v1, %v3143_v46 }
 0x914   : > { %v3188_v38 = vsel %vm663_vm9, 0.0, %v3164_v60  ;;  %v3194_v14 = vmul.f32 %v10253_v26, %v3176_v58  ;;  %v3187_v56 = vsel %vm663_vm9, 0.0, %v11516_v61  ;;  %v3192_v18 = vmul.f32 %v10253_v26, %v3175_v40 }
 0x915   : > { %3473 = vmatprep.subr.bf16.mxu1 %v11547_v52  ;;  %4259 = vmatprep.subr.bf16.mxu0 %v11547_v52  ;;  %v3193_v60 = vmul.f32 %v10248_v23, %v3188_v38  ;;  %v3191_v19 = vmul.f32 %v10248_v23, %v3187_v56 }
 0x916   : > { %3474 = vmatpush1.bf16.msra.mxu1 %v11552_v36  ;;  %4260 = vmatpush1.bf16.msra.mxu0 %v11552_v36  ;;  %v11560_v41 = vpop.permute.xlu1 %3167 }
 0x917   : > { %v11562_v2 = vpop.permute.xlu0 %3221  ;;  %3475 = vmatprep.subr.bf16.mxu1 %v11554_v37  ;;  %4261 = vmatprep.subr.bf16.mxu0 %v11554_v37 }
 0x918   : > { %v3244_v58 = vsel %vm720_vm10, %v11562_v2, 0.0 }
 0x91a   : > { %v3124_v45 = vpop.permute.xlu1 %3123  ;;  %8520 = vmatpush1.bf16.msk.msra.mxu1 %vm10292_vm5, %v11566_v9  ;;  %8560 = vmatpush1.bf16.msk.msra.mxu0 %vm10292_vm5, %v11566_v9 }
 0x91b   : > { %v9290_v5 = vpop.permute.xlu0 %9289  ;;  %v3142_v53 = vsel %vm614_vm8, 0.0, %v3124_v45 }
 0x91c   : > { %v9292_v22 = vunpack.i.h.bf16 %v9290_v5  ;;  %v9291_v3 = vunpack.i.l.bf16 %v9290_v5  ;;  %v3149_v35 = vmul.f32 %v10317_v25, %v3142_v53 }
 0x91e   : > { %v3090_v29 = vsel %vm573_vm3, %v9291_v3, %v9292_v22  ;;  %v3172_v24 = vpop.permute.xlu1 %3171  ;;  %v11590_v59 = vpack.c.bf16 %v9291_v3, %v9286_v31  ;;  %v11636_v5 = vpack.c.bf16 %v3149_v35, %v3147_v13  ;;  %v11639_v22 = vpack.c.bf16 %v3194_v14, %v3192_v18 }
 0x91f   : > { %v11585_v54 = vpack.c.bf16 %v3090_v29, %v3089_v32  ;;  %v3126_v39 = vpop.permute.xlu0 %3125  ;;  %v3190_v61 = vsel %vm663_vm9, 0.0, %v3172_v24  ;;  %v11682_v35 = vpack.c.bf16 %v11430_v33, %v11411_v15  ;;  %v3250_v14 = vmul.f32 %v14172_v10, %v3244_v58 }
 0x920   : > { %v3130_v34 = vsel %vm614_vm8, %v3124_v45, %v3126_v39  ;;  %v3177_v45 = vsel %vm663_vm9, %v11560_v41, %v11549_v11  ;;  %v3189_v11 = vsel %vm663_vm9, 0.0, %v11560_v41  ;;  %v3197_v51 = vmul.f32 %v10248_v23, %v3190_v61 }
 0x921   : > { %v3150_v47 = vmul.f32 %v14172_v10, %v3130_v34  ;;  %3477 = vmatprep.subr.bf16.mxu1 %v11585_v54  ;;  %4263 = vmatprep.subr.bf16.mxu0 %v11585_v54  ;;  %v3196_v32 = vmul.f32 %v10253_v26, %v3177_v45  ;;  %v3195_v39 = vmul.f32 %v10248_v23, %v3189_v11 }
 0x922   : > { %v3218_v42 = vpop.permute.xlu1 %3217  ;;  %8525 = vmatpush1.bf16.msk.msra.mxu1 %vm10292_vm5, %v11590_v59  ;;  %8565 = vmatpush1.bf16.msk.msra.mxu0 %vm10292_vm5, %v11590_v59  ;;  %v11665_v34 = vpack.c.bf16 %v11392_v44, %v11370_v55 }
 0x923   : > { %v11610_v30 = vpop.permute.xlu0 %3219  ;;  %3479 = vmatprep.subr.bf16.mxu1 %v11593_v12  ;;  %4265 = vmatprep.subr.bf16.mxu0 %v11593_v12  ;;  %v11622_v49 = vpack.c.bf16 %v3150_v47, %v3148_v6  ;;  %v11661_v43 = vpack.c.bf16 %v3197_v51, %v3195_v39  ;;  %v3243_v53 = vsel %vm720_vm10, %v3218_v42, 0.0 }
 0x924   : > { %v3248_v6 = vmul.f32 %v14172_v10, %v3243_v53  ;;  %v3232_v13 = vsel %vm720_vm10, %v11610_v30, %v11562_v2 }
 0x925   : > { %v3249_v30 = vmul.f32 %v10317_v25, %v3232_v13 }
 0x926   : > { %v3216_v20 = vpop.permute.xlu1 %3215  ;;  %3480 = vmatpush1.bf16.msra.mxu1 %v11617_v21  ;;  %4266 = vmatpush1.bf16.msra.mxu0 %v11617_v21 }
 0x927   : > { %v3174_v31 = vpop.permute.xlu0 %3173  ;;  %3481 = vmatprep.subr.bf16.mxu1 %v11622_v49  ;;  %4267 = vmatprep.subr.bf16.mxu0 %v11622_v49  ;;  %v3231_v40 = vsel %vm720_vm10, %v3216_v20, %v3218_v42 }
 0x928   : > { %v3178_v28 = vsel %vm663_vm9, %v3172_v24, %v3174_v31  ;;  %v11651_v24 = vpack.c.bf16 %v3193_v60, %v3191_v19  ;;  %v3247_v42 = vmul.f32 %v10317_v25, %v3231_v40  ;;  %v11697_v31 = vpack.c.bf16 %v11427_v50, %v11408_v16 }
 0x929   : > { %v3198_v3 = vmul.f32 %v10253_v26, %v3178_v28  ;;  %v11699_v60 = vpack.c.bf16 %v3250_v14, %v3248_v6 }
 0x92a   : > { %v3226_v57 = vpop.permute.xlu1 %3225  ;;  %3482 = vmatpush1.bf16.msra.mxu1 %v11636_v5  ;;  %4268 = vmatpush1.bf16.msra.mxu0 %v11636_v5 }
 0x92b   : > { %v3228_v29 = vpop.permute.xlu0 %3227  ;;  %3483 = vmatprep.subr.bf16.mxu1 %v11639_v22  ;;  %4269 = vmatprep.subr.bf16.mxu0 %v11639_v22  ;;  %v11654_v62 = vpack.c.bf16 %v3198_v3, %v3196_v32  ;;  %v3245_v20 = vsel %vm720_vm10, %v3226_v57, 0.0  ;;  %v11711_v32 = vpack.c.bf16 %v3249_v30, %v3247_v42 }
 0x92c   : > { %v3252_v3 = vmul.f32 %v14172_v10, %v3245_v20 }
 0x92e   : > { %v3224_v1 = vpop.permute.xlu1 %3223  ;;  %3484 = vmatpush1.bf16.msra.mxu1 %v11651_v24  ;;  %4270 = vmatpush1.bf16.msra.mxu0 %v11651_v24 }
 0x92f   : > { %v3270_v41 = vpop.permute.xlu0 %3269  ;;  %3485 = vmatprep.subr.bf16.mxu1 %v11654_v62  ;;  %4271 = vmatprep.subr.bf16.mxu0 %v11654_v62  ;;  %v3233_v19 = vsel %vm720_vm10, %v3224_v1, %v3226_v57 }
 0x930   : > { %v3251_v6 = vmul.f32 %v10317_v25, %v3233_v19 }
 0x932   : > { %v3266_v47 = vpop.permute.xlu1 %3265  ;;  %3486 = vmatpush1.bf16.msra.mxu1 %v11661_v43  ;;  %4272 = vmatpush1.bf16.msra.mxu0 %v11661_v43 }
 0x933   : > { %v3268_v46 = vpop.permute.xlu0 %3267  ;;  %3487 = vmatprep.subr.bf16.mxu1 %v11665_v34  ;;  %4273 = vmatprep.subr.bf16.mxu0 %v11665_v34  ;;  %v3291_v28 = vsel %vm769_vm11, %v3266_v47, 0.0 }
 0x934   : > { %v3296_v39 = vmul.f32 %v10253_v26, %v3291_v28  ;;  %v3280_v40 = vsel %vm769_vm11, %v3268_v46, %v3270_v41 }
 0x935   : > { %v3297_v46 = vmul.f32 %v10248_v23, %v3280_v40 }
 0x936   : > { %v3264_v38 = vpop.permute.xlu1 %3263  ;;  %3488 = vmatpush1.bf16.msra.mxu1 %v11676_v4  ;;  %4274 = vmatpush1.bf16.msra.mxu0 %v11676_v4 }
 0x937   : > { %v3230_v56 = vpop.permute.xlu0 %3229  ;;  %3489 = vmatprep.subr.bf16.mxu1 %v11682_v35  ;;  %4275 = vmatprep.subr.bf16.mxu0 %v11682_v35  ;;  %v3279_v53 = vsel %vm769_vm11, %v3264_v38, %v3266_v47 }
 0x938   : > { %v3246_v18 = vsel %vm720_vm10, %v3230_v56, 0.0  ;;  %v3234_v45 = vsel %vm720_vm10, %v3228_v29, %v3230_v56  ;;  %v3292_v29 = vsel %vm769_vm11, %v3270_v41, 0.0  ;;  %v3295_v47 = vmul.f32 %v10248_v23, %v3279_v53 }
 0x939   : > { %v3254_v2 = vmul.f32 %v14172_v10, %v3246_v18  ;;  %v3253_v51 = vmul.f32 %v10317_v25, %v3234_v45  ;;  %v3298_v1 = vmul.f32 %v10253_v26, %v3292_v29 }
 0x93a   : > { %v3274_v61 = vpop.permute.xlu1 %3273  ;;  %3490 = vmatpush1.bf16.msra.mxu1 %v11697_v31  ;;  %4276 = vmatpush1.bf16.msra.mxu0 %v11697_v31  ;;  %v11742_v28 = vpack.c.bf16 %v3297_v46, %v3295_v47 }
 0x93b   : > { %v3276_v11 = vpop.permute.xlu0 %3275  ;;  %3491 = vmatprep.subr.bf16.mxu1 %v11699_v60  ;;  %4277 = vmatprep.subr.bf16.mxu0 %v11699_v60  ;;  %v11717_v58 = vpack.c.bf16 %v3254_v2, %v3252_v3  ;;  %v3293_v14 = vsel %vm769_vm11, %v3274_v61, 0.0  ;;  %v11728_v38 = vpack.c.bf16 %v3253_v51, %v3251_v6  ;;  %v11731_v42 = vpack.c.bf16 %v3298_v1, %v3296_v39 }
 0x93c   : > { %v3300_v45 = vmul.f32 %v10253_v26, %v3293_v14 }
 0x93e   : > { %v3272_v57 = vpop.permute.xlu1 %3271  ;;  %3492 = vmatpush1.bf16.msra.mxu1 %v11711_v32  ;;  %4278 = vmatpush1.bf16.msra.mxu0 %v11711_v32 }
 0x93f   : > { %v3278_v13 = vpop.permute.xlu0 %3277  ;;  %3493 = vmatprep.subr.bf16.mxu1 %v11717_v58  ;;  %4279 = vmatprep.subr.bf16.mxu0 %v11717_v58  ;;  %v3281_v20 = vsel %vm769_vm11, %v3272_v57, %v3274_v61 }
 0x940   : > { %v3294_v56 = vsel %vm769_vm11, %v3278_v13, 0.0  ;;  %v3282_v18 = vsel %vm769_vm11, %v3276_v11, %v3278_v13  ;;  %v3299_v61 = vmul.f32 %v10248_v23, %v3281_v20 }
 0x941   : > { %v3302_v41 = vmul.f32 %v10253_v26, %v3294_v56  ;;  %v3301_v3 = vmul.f32 %v10248_v23, %v3282_v18 }
 0x942   : > { %v9295_v2 = vpop.permute.xlu1 %9294  ;;  %3494 = vmatpush1.bf16.msra.mxu1 %v11728_v38  ;;  %4280 = vmatpush1.bf16.msra.mxu0 %v11728_v38 }
 0x943   : > { %v9300_v30 = vpop.permute.xlu0 %9299  ;;  %3495 = vmatprep.subr.bf16.mxu1 %v11731_v42  ;;  %4281 = vmatprep.subr.bf16.mxu0 %v11731_v42  ;;  %v11746_v19 = vpack.c.bf16 %v3302_v41, %v3300_v45  ;;  %v9297_v11 = vunpack.i.h.bf16 %v9295_v2  ;;  %v9296_v29 = vunpack.i.l.bf16 %v9295_v2  ;;  %v11752_v57 = vpack.c.bf16 %v3301_v3, %v3299_v61 }
 0x944   : > { %v9302_v51 = vunpack.i.h.bf16 %v9300_v30  ;;  %v9301_v39 = vunpack.i.l.bf16 %v9300_v30 }
 0x945   : > { %v3327_v1 = vsel %vm818_vm12, %v9296_v29, %v9297_v11 }
 0x946   : > { %v9305_v53 = vpop.permute.xlu1 %9304  ;;  %3496 = vmatpush1.bf16.msra.mxu1 %v11742_v28  ;;  %4282 = vmatpush1.bf16.msra.mxu0 %v11742_v28  ;;  %v3328_v40 = vsel %vm818_vm12, %v9301_v39, %v9302_v51  ;;  %v11756_v14 = vpack.c.bf16 %v9302_v51, %v9297_v11 }
 0x947   : > { %v3358_v6 = vpop.permute.xlu0 %3357  ;;  %3497 = vmatprep.subr.bf16.mxu1 %v11746_v19  ;;  %4283 = vmatprep.subr.bf16.mxu0 %v11746_v19  ;;  %v9307_v13 = vunpack.i.h.bf16 %v9305_v53  ;;  %v9306_v47 = vunpack.i.l.bf16 %v9305_v53  ;;  %v11767_v41 = vpack.c.bf16 %v3328_v40, %v3327_v1 }
 0x948   : > { %v3380_v46 = vsel %vm859_vm14, %v3358_v6, 0.0 }
 0x949   : > { %v3329_v61 = vsel %vm818_vm12, %v9306_v47, %v9307_v13  ;;  %v3386_v51 = vmul.f32 %v14172_v10, %v3380_v46  ;;  %v9562_v46 = vld [vmem:[#allocation9 + $0x28] ss:$20 sps:$4 sm:$0xff]  }
 0x94a   : > { %v3354_v56 = vpop.permute.xlu1 %3353  ;;  %3498 = vmatpush1.bf16.msra.mxu1 %v11752_v57  ;;  %4284 = vmatpush1.bf16.msra.mxu0 %v11752_v57 }
 0x94b   : > { %v3379_v20 = vsel %vm859_vm14, %v3354_v56, 0.0  ;;  %v9310_v18 = vpop.permute.xlu0 %9309  ;;  %8528 = vmatprep.subr.msk.bf16.mxu1 %vm10488_vm13, %v11756_v14  ;;  %8568 = vmatprep.subr.msk.bf16.mxu0 %vm10488_vm13, %v11756_v14 }
 0x94c   : > { %v9312_v45 = vunpack.i.h.bf16 %v9310_v18  ;;  %v9311_v2 = vunpack.i.l.bf16 %v9310_v18  ;;  %v3384_v30 = vmul.f32 %v14172_v10, %v3379_v20  ;;  %v9559_v18 = vld [vmem:[#allocation4 + $0x18] ss:$12 sps:$4 sm:$0xff]  }
 0x94e   : > { %v3330_v3 = vsel %vm818_vm12, %v9311_v2, %v9312_v45  ;;  %v11773_v11 = vpack.c.bf16 %v9312_v45, %v9307_v13  ;;  %v3352_v29 = vpop.permute.xlu1 %3351  ;;  %3500 = vmatpush1.bf16.msra.mxu1 %v11767_v41  ;;  %4286 = vmatpush1.bf16.msra.mxu0 %v11767_v41  ;;  %v11789_v13 = vpack.c.bf16 %v3386_v51, %v3384_v30 }
 0x94f   : > { %v11778_v39 = vpack.c.bf16 %v3330_v3, %v3329_v61  ;;  %v3367_v53 = vsel %vm859_vm14, %v3352_v29, %v3354_v56  ;;  %v3356_v1 = vpop.permute.xlu0 %3355 }
 0x950   : > { %v3383_v40 = vmul.f32 %v10317_v25, %v3367_v53  ;;  %v3368_v47 = vsel %vm859_vm14, %v3356_v1, %v3358_v6  ;;  %8531 = vmatprep.subr.msk.bf16.mxu1 %vm10488_vm13, %v11773_v11  ;;  %8571 = vmatprep.subr.msk.bf16.mxu0 %vm10488_vm13, %v11773_v11  ;;  %14210 = vst [vmem:[#allocation35_spill] sm:$0xff] %v11789_v13 }
 0x951   : > { %v3385_v20 = vmul.f32 %v10317_v25, %v3368_v47 }
 0x952   : > { %v3362_v56 = vpop.permute.xlu1 %3361  ;;  %3502 = vmatpush1.bf16.msra.mxu1 %v11778_v39  ;;  %4288 = vmatpush1.bf16.msra.mxu0 %v11778_v39 }
 0x953   : > { %v11794_v6 = vpack.c.bf16 %v3385_v20, %v3383_v40  ;;  %v3381_v45 = vsel %vm859_vm14, %v3362_v56, 0.0  ;;  %v3366_v2 = vpop.permute.xlu0 %3365  ;;  %3514 = vmatprep.subr.bf16.mxu1 %v11789_v13  ;;  %4300 = vmatprep.subr.bf16.mxu0 %v11789_v13 }
 0x954   : > { %v3388_v30 = vmul.f32 %v14172_v10, %v3381_v45  ;;  %v3382_v61 = vsel %vm859_vm14, %v3366_v2, 0.0  ;;  %v9566_v45 = vld [vmem:[#allocation7 + $0x20] ss:$16 sps:$4 sm:$0xff]  }
 0x955   : > { %14211 = vst [vmem:[#allocation36_spill] sm:$0xff] %v11794_v6  ;;  %v3390_v3 = vmul.f32 %v14172_v10, %v3382_v61  ;;  %3504 = vmatmul.mubr.bf16.vlgmr.msra.gmra.mrb[12].mxu1 %v9559_v18  ;;  %4290 = vmatmul.mubr.bf16.vlgmr.msra.gmra.mrb[12].mxu0 %v9562_v46  ;;  %v9565_v46 = vld [vmem:[#allocation4 + $0x20] ss:$12 sps:$4 sm:$0xff]  }
 0x956   : > { %v3360_v29 = vpop.permute.xlu1 %3359  ;;  %3515 = vmatpush1.bf16.msra.mxu1 %v11794_v6  ;;  %4301 = vmatpush1.bf16.msra.mxu0 %v11794_v6 }
 0x957   : > { %v11804_v51 = vpack.c.bf16 %v3390_v3, %v3388_v30  ;;  %v3369_v53 = vsel %vm859_vm14, %v3360_v29, %v3362_v56  ;;  %v3364_v1 = vpop.permute.xlu0 %3363  ;;  %3546 = vmatprep.mubr.bf16.mxu1 %v14175_v8  ;;  %v9568_v56 = vld [vmem:[#allocation7 + $0x24] ss:$16 sps:$4 sm:$0xff]  }
 0x958   : > { %v3387_v40 = vmul.f32 %v10317_v25, %v3369_v53  ;;  %v3370_v47 = vsel %vm859_vm14, %v3364_v1, %v3366_v2 }
 0x959   : > { %14212 = vst [vmem:[#allocation37_spill] sm:$0xff] %v11804_v51  ;;  %v3389_v20 = vmul.f32 %v10317_v25, %v3370_v47  ;;  %3516 = vmatprep.subr.bf16.mxu1 %v11804_v51  ;;  %4302 = vmatprep.subr.bf16.mxu0 %v11804_v51 }
 0x95b   : > { %v11813_v18 = vpack.c.bf16 %v3389_v20, %v3387_v40 }
 0x95d   : > { %14213 = vst [vmem:[#allocation29_spill] sm:$0xff] %v11813_v18  ;;  %3517 = vmatpush1.bf16.msra.mxu1 %v11813_v18  ;;  %4303 = vmatpush1.bf16.msra.mxu0 %v11813_v18 }
 0x95e   : > { %3851 = vmatprep.subr.bf16.mxu1 %v11530_v0 }
 0x961   : > { %8242 = vmatmul.mubr.msk.bf16.vlgmr.msra.gmra.mrb[12].mxu1 %vm959_vm15, %v9565_v46 }
 0x962   : > { %3852 = vmatpush1.bf16.msra.mxu1 %v11528_v7  ;;  %3883 = vmatprep.mubr.bf16.mxu1 %v9568_v56 }
 0x963   : > { %3853 = vmatprep.subr.bf16.mxu1 %v11547_v52 }
 0x966   : > { %3854 = vmatpush1.bf16.msra.mxu1 %v11552_v36 }
 0x967   : > { %3855 = vmatprep.subr.bf16.mxu1 %v11554_v37  ;;  %v3446_v2 = vpop.permute.xlu1 %3445 }
 0x968   : > { %v3451_v29 = vpop.permute.xlu0 %3450 }
 0x96a   : > { %8536 = vmatpush1.bf16.msk.msra.mxu1 %vm10292_vm5, %v11566_v9 }
 0x96b   : > { %3857 = vmatprep.subr.bf16.mxu1 %v11585_v54 }
 0x96e   : > { %8541 = vmatpush1.bf16.msk.msra.mxu1 %vm10292_vm5, %v11590_v59 }
 0x96f   : > { %3859 = vmatprep.subr.bf16.mxu1 %v11593_v12 }
 0x972   : > { %3860 = vmatpush1.bf16.msra.mxu1 %v11617_v21 }
 0x973   : > { %3861 = vmatprep.subr.bf16.mxu1 %v11622_v49 }
 0x976   : > { %3862 = vmatpush1.bf16.msra.mxu1 %v11636_v5 }
 0x977   : > { %3863 = vmatprep.subr.bf16.mxu1 %v11639_v22 }
 0x97a   : > { %3864 = vmatpush1.bf16.msra.mxu1 %v11651_v24 }
 0x97b   : > { %3865 = vmatprep.subr.bf16.mxu1 %v11654_v62 }
 0x97e   : > { %3866 = vmatpush1.bf16.msra.mxu1 %v11661_v43 }
 0x97f   : > { %3867 = vmatprep.subr.bf16.mxu1 %v11665_v34 }
 0x982   : > { %3868 = vmatpush1.bf16.msra.mxu1 %v11676_v4 }
 0x983   : > { %3869 = vmatprep.subr.bf16.mxu1 %v11682_v35 }
 0x986   : > { %3870 = vmatpush1.bf16.msra.mxu1 %v11697_v31 }
 0x987   : > { %3871 = vmatprep.subr.bf16.mxu1 %v11699_v60 }
 0x98a   : > { %3872 = vmatpush1.bf16.msra.mxu1 %v11711_v32 }
 0x98b   : > { %3873 = vmatprep.subr.bf16.mxu1 %v11717_v58 }
 0x98e   : > { %3874 = vmatpush1.bf16.msra.mxu1 %v11728_v38 }
 0x98f   : > { %3875 = vmatprep.subr.bf16.mxu1 %v11731_v42 }
 0x992   : > { %3876 = vmatpush1.bf16.msra.mxu1 %v11742_v28 }
 0x993   : > { %3877 = vmatprep.subr.bf16.mxu1 %v11746_v19 }
 0x996   : > { %3878 = vmatpush1.bf16.msra.mxu1 %v11752_v57 }
 0x997   : > { %8544 = vmatprep.subr.msk.bf16.mxu1 %vm10488_vm13, %v11756_v14 }
 0x99a   : > { %3880 = vmatpush1.bf16.msra.mxu1 %v11767_v41 }
 0x99b   : > { %8547 = vmatprep.subr.msk.bf16.mxu1 %vm10488_vm13, %v11773_v11 }
 0x99e   : > { %3882 = vmatpush1.bf16.msra.mxu1 %v11778_v39 }
 0x99f   : > { %3894 = vmatprep.subr.bf16.mxu1 %v11789_v13 }
 0x9a1   : > { %3884 = vmatmul.mubr.bf16.vlgmr.msra.gmra.mrb[16].mxu1 %v9566_v45 }
 0x9a2   : > { %3895 = vmatpush1.bf16.msra.mxu1 %v11794_v6 }
 0x9a3   : > { %3896 = vmatprep.subr.bf16.mxu1 %v11804_v51 }
 0x9a6   : > { %3897 = vmatpush1.bf16.msra.mxu1 %v11813_v18 }
 0xa34   : > { %v3548_v30 = vpop.f32.mrb[12].mxu1 }
 0xa35   : > { %v8860_v61 = vadd.f32 %v3548_v30, %v3446_v2  ;;  %v3550_v3 = vpop.f32.mrb[13].mxu1 }
 0xa36   : > { %v8861_v53 = vadd.f32 %v3550_v3, %v3446_v2  ;;  %v3552_v1 = vpop.f32.mrb[14].mxu1 }
 0xa37   : > { %v3557_v40 = vmul.f32 0.2, %v8860_v61  ;;  %v8862_v47 = vadd.f32 %v3552_v1, %v3451_v29  ;;  %v3554_v20 = vpop.f32.mrb[15].mxu1 }
 0xa38   : > { %v3558_v46 = vmul.f32 0.2, %v8861_v53  ;;  %v8863_v56 = vadd.f32 %v3554_v20, %v3451_v29  ;;  %v8244_v29 = vld [vmem:[%s13979_s7 + $0x18] sm:$0xff] }
 0xa39   : > { %v3561_v33 = vmax.f32 %v8860_v61, %v3557_v40  ;;  %v3559_v45 = vmul.f32 0.2, %v8862_v47  ;;  %v8243_v61 = vld [vmem:[%s13979_s7 + $0x10] sm:$0xff] }
 0xa3a   : > { %v3562_v50 = vmax.f32 %v8861_v53, %v3558_v46  ;;  %v3560_v15 = vmul.f32 0.2, %v8863_v56 }
 0xa3b   : > { %v3563_v16 = vmax.f32 %v8862_v47, %v3559_v45  ;;  %3569 = vrot.lane.b32.xlu1 %v3561_v33, %s9859_s19 }
 0xa3c   : > { %v3564_v44 = vmax.f32 %v8863_v56, %v3560_v15  ;;  %3571 = vrot.lane.b32.xlu0 %v3562_v50, %s9859_s19  ;;  %v9313_v30 = vpack.i.bf16 %v3562_v50, %v3561_v33  ;;  %v9569_v15 = vld [vmem:[#allocation7 + $0x2c] ss:$16 sps:$4 sm:$0xff]  }
 0xa3d   : > { %v11864_v27 = vpack.c.bf16 %v3563_v16, %v3561_v33  ;;  %8249 = vmatprep.mubr.msk.bf16.mxu1 %vm1338_vm0, %v9569_v15 }
 0xa3e   : > { %v9318_v2 = vpack.i.bf16 %v3564_v44, %v3563_v16  ;;  %v11866_v3 = vpack.c.bf16 %v3564_v44, %v3562_v50 }
 0xa3f   : > { %14214 = vst [vmem:[#allocation28_spill] sm:$0xff] %v11864_v27  ;;  %3613 = vrot.lane.b32.xlu1 %v3561_v33, %s9861_s25 }
 0xa40   : > { %14215 = vst [vmem:[#allocation39_spill] sm:$0xff] %v11866_v3  ;;  %3615 = vrot.lane.b32.xlu0 %v3562_v50, %s9861_s25 }
 0xa43   : > { %3637 = vrot.lane.b32.xlu1 %v3561_v33, %s9862_s14 }
 0xa44   : > { %3639 = vrot.lane.b32.xlu0 %v3562_v50, %s9862_s14 }
 0xa47   : > { %9314 = vrot.lane.b32.xlu1 %v9313_v30, %s9860_s24 }
 0xa48   : > { %3669 = vrot.lane.b32.xlu0 %v3563_v16, %s9863_s16 }
 0xa4b   : > { %3573 = vrot.lane.b32.xlu1 %v3563_v16, %s9859_s19 }
 0xa4c   : > { %3575 = vrot.lane.b32.xlu0 %v3564_v44, %s9859_s19 }
 0xa4f   : > { %3667 = vrot.lane.b32.xlu1 %v3562_v50, %s9863_s16 }
 0xa50   : > { %9319 = vrot.lane.b32.xlu0 %v9318_v2, %s9860_s24 }
 0xa53   : > { %3617 = vrot.lane.b32.xlu1 %v3563_v16, %s9861_s25 }
 0xa54   : > { %3619 = vrot.lane.b32.xlu0 %v3564_v44, %s9861_s25 }
 0xa57   : > { %3641 = vrot.lane.b32.xlu1 %v3563_v16, %s9862_s14 }
 0xa58   : > { %3643 = vrot.lane.b32.xlu0 %v3564_v44, %s9862_s14 }
 0xa5b   : > { %3665 = vrot.lane.b32.xlu1 %v3561_v33, %s9863_s16 }
 0xa5c   : > { %3693 = vrot.lane.b32.xlu0 %v3563_v16, %s9864_s12 }
 0xa5f   : > { %3691 = vrot.lane.b32.xlu1 %v3562_v50, %s9864_s12 }
 0xa60   : > { %3671 = vrot.lane.b32.xlu0 %v3564_v44, %s9863_s16 }
 0xa63   : > { %3689 = vrot.lane.b32.xlu1 %v3561_v33, %s9864_s12 }
 0xa64   : > { %3695 = vrot.lane.b32.xlu0 %v3564_v44, %s9864_s12 }
 0xa67   : > { %9324 = vrot.lane.b32.xlu1 %v9313_v30, %s9865_s15 }
 0xa68   : > { %9329 = vrot.lane.b32.xlu0 %v9318_v2, %s9865_s15 }
 0xa6b   : > { %3735 = vrot.lane.b32.xlu1 %v3562_v50, %s9866_s22 }
 0xa6c   : > { %3739 = vrot.lane.b32.xlu0 %v3564_v44, %s9866_s22 }
 0xa6f   : > { %3733 = vrot.lane.b32.xlu1 %v3561_v33, %s9866_s22 }
 0xa70   : > { %3737 = vrot.lane.b32.xlu0 %v3563_v16, %s9866_s22 }
 0xa73   : > { %3821 = vperm.xlu1 %9192, %v8243_v61  }
 0xa74   : > { %3826 = vperm.xlu0 %9191, %v8244_v29  }
 0xaad   : > { %v3570_v53 = vpop.permute.xlu1 %3569 }
 0xaae   : > { %v3572_v50 = vpop.permute.xlu0 %3571  ;;  %v3583_v56 = vsel %vm524_vm1, 0.0, %v3570_v53 }
 0xaaf   : > { %v3577_v16 = vsel %vm524_vm1, %v3570_v53, %v3572_v50  ;;  %v3585_v55 = vmul.f32 %v10248_v23, %v3583_v56 }
 0xab0   : > { %v3586_v61 = vmul.f32 %v10253_v26, %v3577_v16 }
 0xab1   : > { %v3614_v1 = vpop.permute.xlu1 %3613 }
 0xab2   : > { %v3616_v40 = vpop.permute.xlu0 %3615 }
 0xab3   : > { %v3621_v16 = vsel %vm614_vm8, %v3614_v1, %v3616_v40 }
 0xab5   : > { %v3638_v47 = vpop.permute.xlu1 %3637 }
 0xab6   : > { %v3640_v44 = vpop.permute.xlu0 %3639 }
 0xab9   : > { %v9315_v20 = vpop.permute.xlu1 %9314 }
 0xaba   : > { %v11901_v33 = vpop.permute.xlu0 %3669  ;;  %v9317_v48 = vunpack.i.h.bf16 %v9315_v20  ;;  %v9316_v8 = vunpack.i.l.bf16 %v9315_v20 }
 0xabd   : > { %v3574_v46 = vpop.permute.xlu1 %3573 }
 0xabe   : > { %v3584_v45 = vsel %vm524_vm1, 0.0, %v3574_v46  ;;  %v3576_v30 = vpop.permute.xlu0 %3575 }
 0xabf   : > { %v3587_v2 = vmul.f32 %v10248_v23, %v3584_v45  ;;  %v3578_v15 = vsel %vm524_vm1, %v3574_v46, %v3576_v30  ;;  %v3601_v46 = vsel %vm573_vm3, %v9316_v8, %v9317_v48 }
 0xac0   : > { %v3588_v29 = vmul.f32 %v10253_v26, %v3578_v15 }
 0xac1   : > { %v3668_v18 = vpop.permute.xlu1 %3667  ;;  %v11913_v53 = vpack.c.bf16 %v3587_v2, %v3585_v55  ;;  %v3627_v55 = vsel %vm614_vm8, 0.0, %v3614_v1 }
 0xac2   : > { %v11911_v50 = vpack.c.bf16 %v3588_v29, %v3586_v61  ;;  %v9320_v51 = vpop.permute.xlu0 %9319  ;;  %v3629_v1 = vmul.f32 %v10317_v25, %v3627_v55  ;;  %v3645_v61 = vsel %vm663_vm9, %v3638_v47, %v3640_v44 }
 0xac3   : > { %14217 = vst [vmem:[#allocation41_spill] sm:$0xff] %v11913_v53  ;;  %v9322_v6 = vunpack.i.h.bf16 %v9320_v51  ;;  %v9321_v13 = vunpack.i.l.bf16 %v9320_v51  ;;  %v3654_v55 = vmul.f32 %v10253_v26, %v3645_v61 }
 0xac4   : > { %14216 = vst [vmem:[#allocation38_spill] sm:$0xff] %v11911_v50  ;;  %3898 = vmatprep.subr.bf16.mxu1 %v11911_v50  ;;  %4304 = vmatprep.subr.bf16.mxu0 %v11911_v50 }
 0xac5   : > { %v3602_v56 = vsel %vm573_vm3, %v9321_v13, %v9322_v6  ;;  %3899 = vmatpush1.bf16.msra.mxu1 %v11913_v53  ;;  %4305 = vmatpush1.bf16.msra.mxu0 %v11913_v53  ;;  %v3618_v20 = vpop.permute.xlu1 %3617  ;;  %v11926_v2 = vpack.c.bf16 %v9321_v13, %v9316_v8  ;;  %v3630_v6 = vmul.f32 %v14172_v10, %v3621_v16  ;;  %v3651_v8 = vsel %vm663_vm9, 0.0, %v3638_v47 }
 0xac6   : > { %v3628_v45 = vsel %vm614_vm8, 0.0, %v3618_v20  ;;  %v3620_v51 = vpop.permute.xlu0 %3619  ;;  %v11924_v30 = vpack.c.bf16 %v3602_v56, %v3601_v46  ;;  %v3653_v47 = vmul.f32 %v10248_v23, %v3651_v8 }
 0xac7   : > { %14219 = vst [vmem:[#allocation42_spill] sm:$0xff] %v11926_v2  ;;  %v3631_v40 = vmul.f32 %v10317_v25, %v3628_v45  ;;  %v3622_v48 = vsel %vm614_vm8, %v3618_v20, %v3620_v51 }
 0xac8   : > { %14218 = vst [vmem:[#allocation40_spill] sm:$0xff] %v11924_v30  ;;  %v3632_v15 = vmul.f32 %v14172_v10, %v3622_v48  ;;  %3900 = vmatprep.subr.bf16.mxu1 %v11924_v30  ;;  %4306 = vmatprep.subr.bf16.mxu0 %v11924_v30 }
 0xac9   : > { %v3642_v29 = vpop.permute.xlu1 %3641  ;;  %8552 = vmatpush1.bf16.msk.msra.mxu1 %vm10292_vm5, %v11926_v2  ;;  %8576 = vmatpush1.bf16.msk.msra.mxu0 %vm10292_vm5, %v11926_v2  ;;  %v11946_v56 = vpack.c.bf16 %v3631_v40, %v3629_v1 }
 0xaca   : > { %v11943_v13 = vpack.c.bf16 %v3632_v15, %v3630_v6  ;;  %v3652_v16 = vsel %vm663_vm9, 0.0, %v3642_v29  ;;  %v3644_v46 = vpop.permute.xlu0 %3643  ;;  %v3679_v15 = vsel %vm720_vm10, %v3668_v18, 0.0 }
 0xacb   : > { %14221 = vst [vmem:[#allocation44_spill] sm:$0xff] %v11946_v56  ;;  %v3655_v44 = vmul.f32 %v10248_v23, %v3652_v16  ;;  %v3646_v20 = vsel %vm663_vm9, %v3642_v29, %v3644_v46  ;;  %v3682_v46 = vmul.f32 %v14172_v10, %v3679_v15 }
 0xacc   : > { %14220 = vst [vmem:[#allocation43_spill] sm:$0xff] %v11943_v13  ;;  %v3656_v45 = vmul.f32 %v10253_v26, %v3646_v20  ;;  %3902 = vmatprep.subr.bf16.mxu1 %v11943_v13  ;;  %4308 = vmatprep.subr.bf16.mxu0 %v11943_v13 }
 0xacd   : > { %v3666_v51 = vpop.permute.xlu1 %3665  ;;  %3903 = vmatpush1.bf16.msra.mxu1 %v11946_v56  ;;  %4309 = vmatpush1.bf16.msra.mxu0 %v11946_v56  ;;  %v11959_v6 = vpack.c.bf16 %v3655_v44, %v3653_v47 }
 0xace   : > { %v11957_v40 = vpack.c.bf16 %v3656_v45, %v3654_v55  ;;  %v3694_v48 = vpop.permute.xlu0 %3693  ;;  %v3673_v1 = vsel %vm720_vm10, %v3666_v51, %v3668_v18 }
 0xacf   : > { %14223 = vst [vmem:[#allocation47_spill] sm:$0xff] %v11959_v6  ;;  %v3681_v44 = vmul.f32 %v10317_v25, %v3673_v1 }
 0xad0   : > { %14222 = vst [vmem:[#allocation45_spill] sm:$0xff] %v11957_v40  ;;  %3904 = vmatprep.subr.bf16.mxu1 %v11957_v40  ;;  %4310 = vmatprep.subr.bf16.mxu0 %v11957_v40 }
 0xad1   : > { %v3692_v61 = vpop.permute.xlu1 %3691  ;;  %3905 = vmatpush1.bf16.msra.mxu1 %v11959_v6  ;;  %4311 = vmatpush1.bf16.msra.mxu0 %v11959_v6 }
 0xad2   : > { %v3672_v29 = vpop.permute.xlu0 %3671  ;;  %3906 = vmatprep.subr.bf16.mxu1 %v11866_v3  ;;  %4312 = vmatprep.subr.bf16.mxu0 %v11866_v3  ;;  %v3703_v55 = vsel %vm769_vm11, %v3692_v61, 0.0 }
 0xad3   : > { %v3674_v8 = vsel %vm720_vm10, %v11901_v33, %v3672_v29  ;;  %v3680_v16 = vsel %vm720_vm10, %v3672_v29, 0.0 }
 0xad4   : > { %v3683_v18 = vmul.f32 %v10317_v25, %v3674_v8  ;;  %v3684_v20 = vmul.f32 %v14172_v10, %v3680_v16  ;;  %v3706_v16 = vmul.f32 %v10253_v26, %v3703_v55 }
 0xad5   : > { %v3690_v45 = vpop.permute.xlu1 %3689  ;;  %3907 = vmatpush1.bf16.msra.mxu1 %v11864_v27  ;;  %4313 = vmatpush1.bf16.msra.mxu0 %v11864_v27 }
 0xad6   : > { %v11979_v47 = vpack.c.bf16 %v3683_v18, %v3681_v44  ;;  %v11981_v33 = vpack.c.bf16 %v3684_v20, %v3682_v46  ;;  %v3697_v51 = vsel %vm769_vm11, %v3690_v45, %v3692_v61  ;;  %v3696_v15 = vpop.permute.xlu0 %3695 }
 0xad7   : > { %v3705_v1 = vmul.f32 %v10248_v23, %v3697_v51  ;;  %v3698_v29 = vsel %vm769_vm11, %v3694_v48, %v3696_v15  ;;  %v3704_v8 = vsel %vm769_vm11, %v3696_v15, 0.0 }
 0xad8   : > { %14224 = vst [vmem:[#allocation48_spill] sm:$0xff] %v11979_v47  ;;  %14225 = vst [vmem:[#allocation49_spill] sm:$0xff] %v11981_v33  ;;  %v3707_v3 = vmul.f32 %v10248_v23, %v3698_v29  ;;  %v3708_v6 = vmul.f32 %v10253_v26, %v3704_v8  ;;  %3908 = vmatprep.subr.bf16.mxu1 %v11981_v33  ;;  %4314 = vmatprep.subr.bf16.mxu0 %v11981_v33 }
 0xad9   : > { %v9325_v46 = vpop.permute.xlu1 %9324  ;;  %3909 = vmatpush1.bf16.msra.mxu1 %v11979_v47  ;;  %4315 = vmatpush1.bf16.msra.mxu0 %v11979_v47 }
 0xada   : > { %v11994_v61 = vpack.c.bf16 %v3707_v3, %v3705_v1  ;;  %v11996_v48 = vpack.c.bf16 %v3708_v6, %v3706_v16  ;;  %v9327_v44 = vunpack.i.h.bf16 %v9325_v46  ;;  %v9326_v18 = vunpack.i.l.bf16 %v9325_v46  ;;  %v9330_v20 = vpop.permute.xlu0 %9329 }
 0xadb   : > { %v9332_v55 = vunpack.i.h.bf16 %v9330_v20  ;;  %v9331_v45 = vunpack.i.l.bf16 %v9330_v20 }
 0xadc   : > { %14226 = vst [vmem:[#allocation46_spill] sm:$0xff] %v11994_v61  ;;  %14227 = vst [vmem:[#allocation24_spill] sm:$0xff] %v11996_v48  ;;  %v3721_v51 = vsel %vm818_vm12, %v9326_v18, %v9327_v44  ;;  %3910 = vmatprep.subr.bf16.mxu1 %v11996_v48  ;;  %4316 = vmatprep.subr.bf16.mxu0 %v11996_v48 }
 0xadd   : > { %v3722_v15 = vsel %vm818_vm12, %v9331_v45, %v9332_v55  ;;  %v12002_v29 = vpack.c.bf16 %v9332_v55, %v9327_v44  ;;  %v3736_v8 = vpop.permute.xlu1 %3735  ;;  %3911 = vmatpush1.bf16.msra.mxu1 %v11994_v61  ;;  %4317 = vmatpush1.bf16.msra.mxu0 %v11994_v61 }
 0xade   : > { %v3747_v3 = vsel %vm859_vm14, %v3736_v8, 0.0  ;;  %v3740_v6 = vpop.permute.xlu0 %3739  ;;  %v12007_v1 = vpack.c.bf16 %v3722_v15, %v3721_v51 }
 0xadf   : > { %14228 = vst [vmem:[#allocation50_spill] sm:$0xff] %v12002_v29  ;;  %v3750_v16 = vmul.f32 %v14172_v10, %v3747_v3  ;;  %v3748_v46 = vsel %vm859_vm14, %v3740_v6, 0.0  ;;  %8555 = vmatprep.subr.msk.bf16.mxu1 %vm10488_vm13, %v12002_v29  ;;  %8579 = vmatprep.subr.msk.bf16.mxu0 %vm10488_vm13, %v12002_v29 }
 0xae0   : > { %14229 = vst [vmem:[#allocation51_spill] sm:$0xff] %v12007_v1  ;;  %v3752_v44 = vmul.f32 %v14172_v10, %v3748_v46  ;;  %v9571_v10 = vld [vmem:[#allocation7 + $0x28] ss:$16 sps:$4 sm:$0xff]  }
 0xae1   : > { %v3734_v18 = vpop.permute.xlu1 %3733  ;;  %3913 = vmatpush1.bf16.msra.mxu1 %v12007_v1  ;;  %4319 = vmatpush1.bf16.msra.mxu0 %v12007_v1 }
 0xae2   : > { %v12020_v20 = vpack.c.bf16 %v3752_v44, %v3750_v16  ;;  %v3741_v55 = vsel %vm859_vm14, %v3734_v18, %v3736_v8  ;;  %v3738_v45 = vpop.permute.xlu0 %3737  ;;  %v9574_v8 = vld [vmem:[%s13976_s4 + $0x34] ss:$24 sps:$4 sm:$0xff]   ;;  %v14233_v16 = vld [vmem:[#allocation36_spill] sm:$0xff]  ;;  %v14234_v44 = vld [vmem:[#allocation37_spill] sm:$0xff] }
 0xae3   : > { %v3749_v51 = vmul.f32 %v10317_v25, %v3741_v55  ;;  %v3742_v15 = vsel %vm859_vm14, %v3738_v45, %v3740_v6  ;;  %v14232_v6 = vld [vmem:[#allocation35_spill] sm:$0xff]  ;;  %v14235_v18 = vld [vmem:[#allocation29_spill] sm:$0xff] }
 0xae4   : > { %14230 = vst [vmem:[#allocation52_spill] sm:$0xff] %v12020_v20  ;;  %v3751_v3 = vmul.f32 %v10317_v25, %v3742_v15  ;;  %3914 = vmatprep.subr.bf16.mxu1 %v12020_v20  ;;  %4320 = vmatprep.subr.bf16.mxu0 %v12020_v20  ;;  %v14236_v55 = vld [vmem:[#allocation47_spill] sm:$0xff] }
 0xae5   : > { %v14237_v45 = vld [vmem:[#allocation39_spill] sm:$0xff] }
 0xae6   : > { %v12028_v46 = vpack.c.bf16 %v3751_v3, %v3749_v51 }
 0xae8   : > { %14231 = vst [vmem:[#allocation53_spill] sm:$0xff] %v12028_v46  ;;  %3915 = vmatpush1.bf16.msra.mxu1 %v12028_v46  ;;  %4321 = vmatpush1.bf16.msra.mxu0 %v12028_v46 }
 0xae9   : > { %4728 = vmatprep.subr.bf16.mxu1 %v11530_v0 }
 0xaeb   : > { %3927 = vmatmul.mubr.bf16.vlgmr.msra.gmra.mrb[16].mxu1 %v9571_v10  ;;  %v9572_v10 = vld [vmem:[%s13976_s4 + $0x30] ss:$24 sps:$4 sm:$0xff]  }
 0xaec   : > { %4729 = vmatpush1.bf16.msra.mxu1 %v11528_v7  ;;  %4760 = vmatprep.mubr.bf16.mxu1 %v9574_v8 }
 0xaed   : > { %4730 = vmatprep.subr.bf16.mxu1 %v11547_v52 }
 0xaf0   : > { %4731 = vmatpush1.bf16.msra.mxu1 %v11552_v36 }
 0xaf1   : > { %4732 = vmatprep.subr.bf16.mxu1 %v11554_v37 }
 0xaf2   : > { %v3822_v51 = vpop.permute.xlu1 %3821 }
 0xaf4   : > { %8592 = vmatpush1.bf16.msk.msra.mxu1 %vm10292_vm5, %v11566_v9 }
 0xaf5   : > { %4734 = vmatprep.subr.bf16.mxu1 %v11585_v54 }
 0xaf8   : > { %8597 = vmatpush1.bf16.msk.msra.mxu1 %vm10292_vm5, %v11590_v59 }
 0xaf9   : > { %4736 = vmatprep.subr.bf16.mxu1 %v11593_v12 }
 0xafc   : > { %4737 = vmatpush1.bf16.msra.mxu1 %v11617_v21 }
 0xafd   : > { %4738 = vmatprep.subr.bf16.mxu1 %v11622_v49 }
 0xb00   : > { %4739 = vmatpush1.bf16.msra.mxu1 %v11636_v5 }
 0xb01   : > { %4740 = vmatprep.subr.bf16.mxu1 %v11639_v22 }
 0xb04   : > { %4741 = vmatpush1.bf16.msra.mxu1 %v11651_v24 }
 0xb05   : > { %4742 = vmatprep.subr.bf16.mxu1 %v11654_v62 }
 0xb08   : > { %4743 = vmatpush1.bf16.msra.mxu1 %v11661_v43 }
 0xb09   : > { %4744 = vmatprep.subr.bf16.mxu1 %v11665_v34 }
 0xb0c   : > { %4745 = vmatpush1.bf16.msra.mxu1 %v11676_v4 }
 0xb0d   : > { %4746 = vmatprep.subr.bf16.mxu1 %v11682_v35 }
 0xb10   : > { %4747 = vmatpush1.bf16.msra.mxu1 %v11697_v31 }
 0xb11   : > { %4748 = vmatprep.subr.bf16.mxu1 %v11699_v60 }
 0xb14   : > { %4749 = vmatpush1.bf16.msra.mxu1 %v11711_v32 }
 0xb15   : > { %4750 = vmatprep.subr.bf16.mxu1 %v11717_v58 }
 0xb18   : > { %4751 = vmatpush1.bf16.msra.mxu1 %v11728_v38 }
 0xb19   : > { %4752 = vmatprep.subr.bf16.mxu1 %v11731_v42 }
 0xb1c   : > { %4753 = vmatpush1.bf16.msra.mxu1 %v11742_v28 }
 0xb1d   : > { %4754 = vmatprep.subr.bf16.mxu1 %v11746_v19 }
 0xb20   : > { %4755 = vmatpush1.bf16.msra.mxu1 %v11752_v57 }
 0xb21   : > { %8600 = vmatprep.subr.msk.bf16.mxu1 %vm10488_vm13, %v11756_v14 }
 0xb24   : > { %4757 = vmatpush1.bf16.msra.mxu1 %v11767_v41 }
 0xb25   : > { %8603 = vmatprep.subr.msk.bf16.mxu1 %vm10488_vm13, %v11773_v11 }
 0xb28   : > { %4759 = vmatpush1.bf16.msra.mxu1 %v11778_v39 }
 0xb29   : > { %4771 = vmatprep.subr.bf16.mxu1 %v14232_v6 }
 0xb2b   : > { %4761 = vmatmul.mubr.bf16.vlgmr.msra.gmra.mrb[20].mxu1 %v9572_v10  ;;  %v3827_v10 = vpop.permute.xlu0 %3826 }
 0xb2c   : > { %4772 = vmatpush1.bf16.msra.mxu1 %v14233_v16 }
 0xb2d   : > { %4773 = vmatprep.subr.bf16.mxu1 %v14234_v44 }
 0xb30   : > { %4774 = vmatpush1.bf16.msra.mxu1 %v14235_v18 }
 0xb31   : > { %4775 = vmatprep.subr.bf16.mxu1 %v11911_v50 }
 0xb34   : > { %4776 = vmatpush1.bf16.msra.mxu1 %v11913_v53 }
 0xb35   : > { %4777 = vmatprep.subr.bf16.mxu1 %v11924_v30 }
 0xb38   : > { %8608 = vmatpush1.bf16.msk.msra.mxu1 %vm10292_vm5, %v11926_v2 }
 0xb39   : > { %4779 = vmatprep.subr.bf16.mxu1 %v11943_v13 }
 0xb3c   : > { %4780 = vmatpush1.bf16.msra.mxu1 %v11946_v56 }
 0xb3d   : > { %4781 = vmatprep.subr.bf16.mxu1 %v11957_v40 }
 0xb40   : > { %4782 = vmatpush1.bf16.msra.mxu1 %v14236_v55 }
 0xb41   : > { %4783 = vmatprep.subr.bf16.mxu1 %v14237_v45 }
 0xb44   : > { %4784 = vmatpush1.bf16.msra.mxu1 %v11864_v27 }
 0xb45   : > { %4785 = vmatprep.subr.bf16.mxu1 %v11981_v33 }
 0xb48   : > { %4786 = vmatpush1.bf16.msra.mxu1 %v11979_v47 }
 0xb49   : > { %4787 = vmatprep.subr.bf16.mxu1 %v11996_v48 }
 0xb4c   : > { %4788 = vmatpush1.bf16.msra.mxu1 %v11994_v61 }
 0xb4d   : > { %8611 = vmatprep.subr.msk.bf16.mxu1 %vm10488_vm13, %v12002_v29 }
 0xb50   : > { %4790 = vmatpush1.bf16.msra.mxu1 %v12007_v1 }
 0xb51   : > { %4791 = vmatprep.subr.bf16.mxu1 %v12020_v20 }
 0xb54   : > { %4792 = vmatpush1.bf16.msra.mxu1 %v12028_v46 }
 0xbbe   : > { %v3928_v15 = vpop.f32.mrb[16].mxu1 }
 0xbbf   : > { %v8864_v3 = vadd.f32 %v3928_v15, %v3822_v51  ;;  %v3930_v8 = vpop.f32.mrb[17].mxu1 }
 0xbc0   : > { %v8865_v47 = vadd.f32 %v3930_v8, %v3822_v51  ;;  %v3932_v33 = vpop.f32.mrb[18].mxu1 }
 0xbc1   : > { %v3937_v48 = vmul.f32 0.2, %v8864_v3  ;;  %v8866_v27 = vadd.f32 %v3932_v33, %v3827_v10  ;;  %v3934_v61 = vpop.f32.mrb[19].mxu1  ;;  %v8250_v33 = vld [vmem:[%s13980_s8 + $0x10] sm:$0xff] }
 0xbc2   : > { %v3938_v45 = vmul.f32 0.2, %v8865_v47  ;;  %v8867_v55 = vadd.f32 %v3934_v61, %v3827_v10  ;;  %v8251_v61 = vld [vmem:[%s13980_s8 + $0x18] sm:$0xff] }
 0xbc3   : > { %v3941_v40 = vmax.f32 %v8864_v3, %v3937_v48  ;;  %v3939_v29 = vmul.f32 0.2, %v8866_v27 }
 0xbc4   : > { %v3942_v56 = vmax.f32 %v8865_v47, %v3938_v45  ;;  %v3940_v1 = vmul.f32 0.2, %v8867_v55  ;;  %v9580_v47 = vld [vmem:[%s13976_s4 + $0x3c] ss:$24 sps:$4 sm:$0xff]  }
 0xbc5   : > { %v3943_v13 = vmax.f32 %v8866_v27, %v3939_v29  ;;  %3949 = vrot.lane.b32.xlu1 %v3941_v40, %s9859_s19  ;;  %v9577_v27 = vld [vmem:[#allocation9 + $0x34] ss:$20 sps:$4 sm:$0xff]   ;;  %4803 = vmatprep.mubr.bf16.mxu1 %v9580_v47 }
 0xbc6   : > { %v3944_v46 = vmax.f32 %v8867_v55, %v3940_v1  ;;  %3951 = vrot.lane.b32.xlu0 %v3942_v56, %s9859_s19  ;;  %v9333_v15 = vpack.i.bf16 %v3942_v56, %v3941_v40  ;;  %4332 = vmatprep.mubr.bf16.mxu0 %v9577_v27 }
 0xbc7   : > { %v12106_v20 = vpack.c.bf16 %v3943_v13, %v3941_v40 }
 0xbc8   : > { %v9338_v51 = vpack.i.bf16 %v3944_v46, %v3943_v13  ;;  %v12108_v8 = vpack.c.bf16 %v3944_v46, %v3942_v56 }
 0xbc9   : > { %14238 = vst [vmem:[#allocation35_spill] sm:$0xff] %v12106_v20  ;;  %3993 = vrot.lane.b32.xlu1 %v3941_v40, %s9861_s25 }
 0xbca   : > { %14239 = vst [vmem:[#allocation54_spill] sm:$0xff] %v12108_v8  ;;  %3995 = vrot.lane.b32.xlu0 %v3942_v56, %s9861_s25 }
 0xbcd   : > { %4017 = vrot.lane.b32.xlu1 %v3941_v40, %s9862_s14 }
 0xbce   : > { %4019 = vrot.lane.b32.xlu0 %v3942_v56, %s9862_s14 }
 0xbd1   : > { %9334 = vrot.lane.b32.xlu1 %v9333_v15, %s9860_s24 }
 0xbd2   : > { %4049 = vrot.lane.b32.xlu0 %v3943_v13, %s9863_s16 }
 0xbd5   : > { %3953 = vrot.lane.b32.xlu1 %v3943_v13, %s9859_s19 }
 0xbd6   : > { %3955 = vrot.lane.b32.xlu0 %v3944_v46, %s9859_s19 }
 0xbd9   : > { %4047 = vrot.lane.b32.xlu1 %v3942_v56, %s9863_s16 }
 0xbda   : > { %9339 = vrot.lane.b32.xlu0 %v9338_v51, %s9860_s24 }
 0xbdd   : > { %3997 = vrot.lane.b32.xlu1 %v3943_v13, %s9861_s25 }
 0xbde   : > { %3999 = vrot.lane.b32.xlu0 %v3944_v46, %s9861_s25 }
 0xbe1   : > { %4021 = vrot.lane.b32.xlu1 %v3943_v13, %s9862_s14 }
 0xbe2   : > { %4023 = vrot.lane.b32.xlu0 %v3944_v46, %s9862_s14 }
 0xbe5   : > { %4045 = vrot.lane.b32.xlu1 %v3941_v40, %s9863_s16 }
 0xbe6   : > { %4073 = vrot.lane.b32.xlu0 %v3943_v13, %s9864_s12 }
 0xbe9   : > { %4071 = vrot.lane.b32.xlu1 %v3942_v56, %s9864_s12 }
 0xbea   : > { %4051 = vrot.lane.b32.xlu0 %v3944_v46, %s9863_s16 }
 0xbed   : > { %4069 = vrot.lane.b32.xlu1 %v3941_v40, %s9864_s12 }
 0xbee   : > { %4075 = vrot.lane.b32.xlu0 %v3944_v46, %s9864_s12 }
 0xbf1   : > { %9344 = vrot.lane.b32.xlu1 %v9333_v15, %s9865_s15 }
 0xbf2   : > { %9349 = vrot.lane.b32.xlu0 %v9338_v51, %s9865_s15 }
 0xbf5   : > { %4115 = vrot.lane.b32.xlu1 %v3942_v56, %s9866_s22 }
 0xbf6   : > { %4119 = vrot.lane.b32.xlu0 %v3944_v46, %s9866_s22 }
 0xbf9   : > { %4113 = vrot.lane.b32.xlu1 %v3941_v40, %s9866_s22 }
 0xbfa   : > { %4117 = vrot.lane.b32.xlu0 %v3943_v13, %s9866_s22 }
 0xbfd   : > { %4221 = vperm.xlu1 %9192, %v8250_v33  }
 0xbfe   : > { %4226 = vperm.xlu0 %9191, %v8251_v61  }
 0xc37   : > { %v3950_v48 = vpop.permute.xlu1 %3949 }
 0xc38   : > { %v3952_v29 = vpop.permute.xlu0 %3951  ;;  %v3963_v10 = vsel %vm524_vm1, 0.0, %v3950_v48 }
 0xc39   : > { %v3957_v13 = vsel %vm524_vm1, %v3950_v48, %v3952_v29  ;;  %v3965_v2 = vmul.f32 %v10248_v23, %v3963_v10 }
 0xc3a   : > { %v3966_v33 = vmul.f32 %v10253_v26, %v3957_v13 }
 0xc3b   : > { %v3994_v1 = vpop.permute.xlu1 %3993 }
 0xc3c   : > { %v3996_v56 = vpop.permute.xlu0 %3995 }
 0xc3d   : > { %v4001_v13 = vsel %vm614_vm8, %v3994_v1, %v3996_v56 }
 0xc3f   : > { %v4018_v55 = vpop.permute.xlu1 %4017 }
 0xc40   : > { %v4020_v46 = vpop.permute.xlu0 %4019 }
 0xc43   : > { %v9335_v45 = vpop.permute.xlu1 %9334 }
 0xc44   : > { %v12145_v40 = vpop.permute.xlu0 %4049  ;;  %v9337_v30 = vunpack.i.h.bf16 %v9335_v45  ;;  %v9336_v53 = vunpack.i.l.bf16 %v9335_v45 }
 0xc46   : > { %v3981_v45 = vsel %vm573_vm3, %v9336_v53, %v9337_v30 }
 0xc47   : > { %v3954_v3 = vpop.permute.xlu1 %3953 }
 0xc48   : > { %v3964_v15 = vsel %vm524_vm1, 0.0, %v3954_v3  ;;  %v3956_v51 = vpop.permute.xlu0 %3955 }
 0xc49   : > { %v3967_v27 = vmul.f32 %v10248_v23, %v3964_v15  ;;  %v3958_v47 = vsel %vm524_vm1, %v3954_v3, %v3956_v51 }
 0xc4a   : > { %v3968_v61 = vmul.f32 %v10253_v26, %v3958_v47 }
 0xc4b   : > { %v4048_v50 = vpop.permute.xlu1 %4047  ;;  %v12157_v48 = vpack.c.bf16 %v3967_v27, %v3965_v2  ;;  %v4007_v2 = vsel %vm614_vm8, 0.0, %v3994_v1 }
 0xc4c   : > { %v9340_v29 = vpop.permute.xlu0 %9339  ;;  %v12155_v18 = vpack.c.bf16 %v3968_v61, %v3966_v33  ;;  %v14241_v61 = vld [vmem:[#allocation23_spill] sm:$0xff]  ;;  %v4009_v30 = vmul.f32 %v10317_v25, %v4007_v2 }
 0xc4d   : > { %14240 = vst [vmem:[#allocation55_spill] sm:$0xff] %v12157_v48  ;;  %v9342_v44 = vunpack.i.h.bf16 %v9340_v29  ;;  %v9341_v16 = vunpack.i.l.bf16 %v9340_v29  ;;  %v4010_v29 = vmul.f32 %v14241_v61, %v4001_v13 }
 0xc4e   : > { %4322 = vmatprep.subr.bf16.mxu0 %v12155_v18  ;;  %4793 = vmatprep.subr.bf16.mxu1 %v12155_v18 }
 0xc4f   : > { %4323 = vmatpush1.bf16.msra.mxu0 %v12157_v48  ;;  %4794 = vmatpush1.bf16.msra.mxu1 %v12157_v48  ;;  %v3998_v3 = vpop.permute.xlu1 %3997  ;;  %v3982_v10 = vsel %vm573_vm3, %v9341_v16, %v9342_v44  ;;  %v12170_v47 = vpack.c.bf16 %v9341_v16, %v9336_v53  ;;  %v4025_v44 = vsel %vm663_vm9, %v4018_v55, %v4020_v46  ;;  %v4031_v53 = vsel %vm663_vm9, 0.0, %v4018_v55 }
 0xc50   : > { %v4008_v15 = vsel %vm614_vm8, 0.0, %v3998_v3  ;;  %v4000_v51 = vpop.permute.xlu0 %3999  ;;  %v12168_v27 = vpack.c.bf16 %v3982_v10, %v3981_v45  ;;  %v4034_v2 = vmul.f32 %v10253_v26, %v4025_v44  ;;  %v4033_v55 = vmul.f32 %v10248_v23, %v4031_v53 }
 0xc51   : > { %v4011_v56 = vmul.f32 %v10317_v25, %v4008_v15  ;;  %v4002_v33 = vsel %vm614_vm8, %v3998_v3, %v4000_v51 }
 0xc52   : > { %v4012_v48 = vmul.f32 %v14241_v61, %v4002_v33  ;;  %4324 = vmatprep.subr.bf16.mxu0 %v12168_v27  ;;  %4795 = vmatprep.subr.bf16.mxu1 %v12168_v27 }
 0xc53   : > { %v4022_v1 = vpop.permute.xlu1 %4021  ;;  %8584 = vmatpush1.bf16.msk.msra.mxu0 %vm10292_vm5, %v12170_v47  ;;  %8616 = vmatpush1.bf16.msk.msra.mxu1 %vm10292_vm5, %v12170_v47  ;;  %v12190_v45 = vpack.c.bf16 %v4011_v56, %v4009_v30 }
 0xc54   : > { %v4032_v16 = vsel %vm663_vm9, 0.0, %v4022_v1  ;;  %v4024_v13 = vpop.permute.xlu0 %4023  ;;  %v12188_v3 = vpack.c.bf16 %v4012_v48, %v4010_v29  ;;  %v4059_v29 = vsel %vm720_vm10, %v4048_v50, 0.0 }
 0xc55   : > { %v4035_v46 = vmul.f32 %v10248_v23, %v4032_v16  ;;  %v4026_v10 = vsel %vm663_vm9, %v4022_v1, %v4024_v13  ;;  %v4062_v13 = vmul.f32 %v14241_v61, %v4059_v29 }
 0xc56   : > { %v4036_v15 = vmul.f32 %v10253_v26, %v4026_v10  ;;  %4326 = vmatprep.subr.bf16.mxu0 %v12188_v3  ;;  %4797 = vmatprep.subr.bf16.mxu1 %v12188_v3 }
 0xc57   : > { %v4046_v51 = vpop.permute.xlu1 %4045  ;;  %4327 = vmatpush1.bf16.msra.mxu0 %v12190_v45  ;;  %4798 = vmatpush1.bf16.msra.mxu1 %v12190_v45  ;;  %v12203_v33 = vpack.c.bf16 %v4035_v46, %v4033_v55  ;;  %v9575_v55 = vld [vmem:[#allocation9 + $0x30] ss:$20 sps:$4 sm:$0xff]  }
 0xc58   : > { %v4074_v48 = vpop.permute.xlu0 %4073  ;;  %v12201_v56 = vpack.c.bf16 %v4036_v15, %v4034_v2  ;;  %v4053_v30 = vsel %vm720_vm10, %v4046_v51, %v4048_v50 }
 0xc59   : > { %14243 = vst [vmem:[#allocation57_spill] sm:$0xff] %v12203_v33  ;;  %v4061_v46 = vmul.f32 %v10317_v25, %v4053_v30 }
 0xc5a   : > { %14242 = vst [vmem:[#allocation56_spill] sm:$0xff] %v12201_v56  ;;  %4328 = vmatprep.subr.bf16.mxu0 %v12201_v56  ;;  %4799 = vmatprep.subr.bf16.mxu1 %v12201_v56 }
 0xc5b   : > { %v4072_v44 = vpop.permute.xlu1 %4071  ;;  %4329 = vmatpush1.bf16.msra.mxu0 %v12203_v33  ;;  %4800 = vmatpush1.bf16.msra.mxu1 %v12203_v33 }
 0xc5c   : > { %v4052_v1 = vpop.permute.xlu0 %4051  ;;  %4330 = vmatprep.subr.bf16.mxu0 %v12108_v8  ;;  %4801 = vmatprep.subr.bf16.mxu1 %v12108_v8  ;;  %v4083_v2 = vsel %vm769_vm11, %v4072_v44, 0.0 }
 0xc5d   : > { %v4054_v53 = vsel %vm720_vm10, %v12145_v40, %v4052_v1  ;;  %v4060_v16 = vsel %vm720_vm10, %v4052_v1, 0.0  ;;  %v9578_v40 = vld [vmem:[%s13976_s4 + $0x38] ss:$24 sps:$4 sm:$0xff]  }
 0xc5e   : > { %v4063_v50 = vmul.f32 %v10317_v25, %v4054_v53  ;;  %v4064_v10 = vmul.f32 %v14241_v61, %v4060_v16 }
 0xc5f   : > { %v4070_v15 = vpop.permute.xlu1 %4069  ;;  %4331 = vmatpush1.bf16.msra.mxu0 %v12106_v20  ;;  %4802 = vmatpush1.bf16.msra.mxu1 %v12106_v20  ;;  %v4086_v20 = vmul.f32 %v10253_v26, %v4083_v2 }
 0xc60   : > { %v12226_v51 = vpack.c.bf16 %v4063_v50, %v4061_v46  ;;  %v4077_v29 = vsel %vm769_vm11, %v4070_v15, %v4072_v44  ;;  %v4076_v30 = vpop.permute.xlu0 %4075  ;;  %v12229_v1 = vpack.c.bf16 %v4064_v10, %v4062_v13  ;;  %v14244_v15 = vmov 0  }
 0xc61   : > { %v4085_v53 = vmul.f32 %v10248_v23, %v4077_v29  ;;  %v4078_v16 = vsel %vm769_vm11, %v4074_v48, %v4076_v30  ;;  %v4084_v8 = vsel %vm769_vm11, %v4076_v30, 0.0 }
 0xc62   : > { %v4087_v33 = vmul.f32 %v10248_v23, %v4078_v16  ;;  %v4088_v56 = vmul.f32 %v10253_v26, %v4084_v8  ;;  %4343 = vmatprep.subr.bf16.mxu0 %v12229_v1  ;;  %4814 = vmatprep.subr.bf16.mxu1 %v12229_v1 }
 0xc63   : > { %v9345_v44 = vpop.permute.xlu1 %9344  ;;  %4333 = vmatmul.mubr.bf16.vlgmr.msra.gmra.mrb[12].mxu0 %v9575_v55  ;;  %4804 = vmatmul.mubr.bf16.vlgmr.msra.gmra.mrb[20].mxu1 %v9578_v40 }
 0xc64   : > { %v12239_v13 = vpack.c.bf16 %v4087_v33, %v4085_v53  ;;  %v9347_v46 = vunpack.i.h.bf16 %v9345_v44  ;;  %v9346_v50 = vunpack.i.l.bf16 %v9345_v44  ;;  %4344 = vmatpush1.bf16.msra.mxu0 %v12226_v51  ;;  %4815 = vmatpush1.bf16.msra.mxu1 %v12226_v51  ;;  %v9350_v48 = vpop.permute.xlu0 %9349  ;;  %v12243_v10 = vpack.c.bf16 %v4088_v56, %v4086_v20 }
 0xc65   : > { %v9352_v2 = vunpack.i.h.bf16 %v9350_v48  ;;  %v9351_v8 = vunpack.i.l.bf16 %v9350_v48  ;;  %4375 = vmatprep.mubr.bf16.mxu0 %v14244_v15 }
 0xc66   : > { %v4101_v29 = vsel %vm818_vm12, %v9346_v50, %v9347_v46  ;;  %4345 = vmatprep.subr.bf16.mxu0 %v12243_v10  ;;  %4816 = vmatprep.subr.bf16.mxu1 %v12243_v10 }
 0xc67   : > { %v4102_v33 = vsel %vm818_vm12, %v9351_v8, %v9352_v2  ;;  %v12250_v55 = vpack.c.bf16 %v9352_v2, %v9347_v46  ;;  %v4116_v40 = vpop.permute.xlu1 %4115 }
 0xc68   : > { %v4127_v30 = vsel %vm859_vm14, %v4116_v40, 0.0  ;;  %4346 = vmatpush1.bf16.msra.mxu0 %v12239_v13  ;;  %4817 = vmatpush1.bf16.msra.mxu1 %v12239_v13  ;;  %v4120_v20 = vpop.permute.xlu0 %4119  ;;  %v12255_v56 = vpack.c.bf16 %v4102_v33, %v4101_v29 }
 0xc69   : > { %v4130_v53 = vmul.f32 %v14241_v61, %v4127_v30  ;;  %v4128_v16 = vsel %vm859_vm14, %v4120_v20, 0.0  ;;  %8587 = vmatprep.subr.msk.bf16.mxu0 %vm10488_vm13, %v12250_v55  ;;  %8619 = vmatprep.subr.msk.bf16.mxu1 %vm10488_vm13, %v12250_v55 }
 0xc6a   : > { %v4132_v44 = vmul.f32 %v14241_v61, %v4128_v16  ;;  %v9584_v16 = vld [vmem:[#allocation10 + $0x74] ss:$28 sps:$4 sm:$0xff]  }
 0xc6b   : > { %v4114_v46 = vpop.permute.xlu1 %4113 }
 0xc6c   : > { %v4121_v50 = vsel %vm859_vm14, %v4114_v46, %v4116_v40  ;;  %4348 = vmatpush1.bf16.msra.mxu0 %v12255_v56  ;;  %4819 = vmatpush1.bf16.msra.mxu1 %v12255_v56  ;;  %v4118_v48 = vpop.permute.xlu0 %4117  ;;  %v12269_v2 = vpack.c.bf16 %v4132_v44, %v4130_v53  ;;  %v9581_v40 = vld [vmem:[#allocation9 + $0x38] ss:$20 sps:$4 sm:$0xff]  }
 0xc6d   : > { %v4129_v8 = vmul.f32 %v10317_v25, %v4121_v50  ;;  %v4122_v29 = vsel %vm859_vm14, %v4118_v48, %v4120_v20 }
 0xc6e   : > { %v4131_v33 = vmul.f32 %v10317_v25, %v4122_v29  ;;  %4349 = vmatprep.subr.bf16.mxu0 %v12269_v2  ;;  %4820 = vmatprep.subr.bf16.mxu1 %v12269_v2 }
 0xc70   : > { %v12276_v30 = vpack.c.bf16 %v4131_v33, %v4129_v8  ;;  %v9591_v33 = vld [vmem:[%s13976_s4 + $0x44] ss:$24 sps:$4 sm:$0xff]  }
 0xc71   : > { %8272 = vmatprep.mubr.msk.bf16.mxu1 %vm2213_vm4, %v9591_v33 }
 0xc72   : > { %4350 = vmatpush1.bf16.msra.mxu0 %v12276_v30  ;;  %4821 = vmatpush1.bf16.msra.mxu1 %v12276_v30 }
 0xc73   : > { %5283 = vmatprep.subr.bf16.mxu0 %v11530_v0  ;;  %v9585_v0 = vld [vmem:[#allocation10 + $0xac] ss:$28 sps:$4 sm:$0xff]  }
 0xc75   : > { %8257 = vmatmul.mubr.msk.bf16.vlgmr.msra.gmra.mrb[12].mxu0 %vm1743_vm2, %v9581_v40  ;;  %v8265_v40 = vld [vmem:[%s13981_s9 + $0x18] sm:$0xff] }
 0xc76   : > { %5284 = vmatpush1.bf16.msra.mxu0 %v11528_v7  ;;  %5315 = vmatprep.mubr.bf16.mxu0 %v9584_v16  ;;  %v9582_v7 = vld [vmem:[#allocation10 + $0x70] ss:$28 sps:$4 sm:$0xff]  }
 0xc77   : > { %5285 = vmatprep.subr.bf16.mxu0 %v11547_v52  ;;  %v14245_v52 = vld [vmem:[#allocation36_spill] sm:$0xff] }
 0xc7a   : > { %5286 = vmatpush1.bf16.msra.mxu0 %v11552_v36  ;;  %v14246_v36 = vld [vmem:[#allocation37_spill] sm:$0xff] }
 0xc7b   : > { %5287 = vmatprep.subr.bf16.mxu0 %v11554_v37  ;;  %v9587_v37 = vld [vmem:[#allocation10 + $0xa8] ss:$28 sps:$4 sm:$0xff]  }
 0xc7e   : > { %8632 = vmatpush1.bf16.msk.msra.mxu0 %vm10292_vm5, %v11566_v9  ;;  %v14247_v9 = vld [vmem:[#allocation29_spill] sm:$0xff] }
 0xc7f   : > { %5289 = vmatprep.subr.bf16.mxu0 %v11585_v54  ;;  %v9590_v54 = vld [vmem:[#allocation10 + $0x7c] ss:$28 sps:$4 sm:$0xff]  }
 0xc82   : > { %8637 = vmatpush1.bf16.msk.msra.mxu0 %vm10292_vm5, %v11590_v59  ;;  %v14248_v59 = vld [vmem:[#allocation38_spill] sm:$0xff] }
 0xc83   : > { %5291 = vmatprep.subr.bf16.mxu0 %v11593_v12  ;;  %v14249_v12 = vld [vmem:[#allocation41_spill] sm:$0xff] }
 0xc86   : > { %5292 = vmatpush1.bf16.msra.mxu0 %v11617_v21  ;;  %v14250_v21 = vld [vmem:[#allocation40_spill] sm:$0xff] }
 0xc87   : > { %5293 = vmatprep.subr.bf16.mxu0 %v11622_v49  ;;  %v14251_v49 = vld [vmem:[#allocation42_spill] sm:$0xff] }
 0xc8a   : > { %5294 = vmatpush1.bf16.msra.mxu0 %v11636_v5  ;;  %v14252_v5 = vld [vmem:[#allocation43_spill] sm:$0xff] }
 0xc8b   : > { %5295 = vmatprep.subr.bf16.mxu0 %v11639_v22  ;;  %v14253_v22 = vld [vmem:[#allocation44_spill] sm:$0xff] }
 0xc8e   : > { %5296 = vmatpush1.bf16.msra.mxu0 %v11651_v24  ;;  %v14254_v24 = vld [vmem:[#allocation45_spill] sm:$0xff] }
 0xc8f   : > { %5297 = vmatprep.subr.bf16.mxu0 %v11654_v62  ;;  %v14255_v62 = vld [vmem:[#allocation47_spill] sm:$0xff] }
 0xc92   : > { %5298 = vmatpush1.bf16.msra.mxu0 %v11661_v43  ;;  %v14256_v43 = vld [vmem:[#allocation39_spill] sm:$0xff] }
 0xc93   : > { %5299 = vmatprep.subr.bf16.mxu0 %v11665_v34  ;;  %v14257_v34 = vld [vmem:[#allocation28_spill] sm:$0xff] }
 0xc96   : > { %5300 = vmatpush1.bf16.msra.mxu0 %v11676_v4  ;;  %v14258_v4 = vld [vmem:[#allocation49_spill] sm:$0xff] }
 0xc97   : > { %5301 = vmatprep.subr.bf16.mxu0 %v11682_v35  ;;  %v14259_v35 = vld [vmem:[#allocation48_spill] sm:$0xff] }
 0xc9a   : > { %5302 = vmatpush1.bf16.msra.mxu0 %v11697_v31  ;;  %v14260_v31 = vld [vmem:[#allocation24_spill] sm:$0xff] }
 0xc9b   : > { %5303 = vmatprep.subr.bf16.mxu0 %v11699_v60  ;;  %v14261_v60 = vld [vmem:[#allocation46_spill] sm:$0xff] }
 0xc9e   : > { %5304 = vmatpush1.bf16.msra.mxu0 %v11711_v32  ;;  %v14262_v32 = vld [vmem:[#allocation50_spill] sm:$0xff] }
 0xc9f   : > { %5305 = vmatprep.subr.bf16.mxu0 %v11717_v58  ;;  %v14263_v58 = vld [vmem:[#allocation51_spill] sm:$0xff] }
 0xca2   : > { %5306 = vmatpush1.bf16.msra.mxu0 %v11728_v38  ;;  %v14264_v38 = vld [vmem:[#allocation52_spill] sm:$0xff] }
 0xca3   : > { %5307 = vmatprep.subr.bf16.mxu0 %v11731_v42  ;;  %v14265_v42 = vld [vmem:[#allocation53_spill] sm:$0xff] }
 0xca6   : > { %5308 = vmatpush1.bf16.msra.mxu0 %v11742_v28  ;;  %v14266_v28 = vld [vmem:[#allocation55_spill] sm:$0xff] }
 0xca7   : > { %5309 = vmatprep.subr.bf16.mxu0 %v11746_v19  ;;  %v14267_v19 = vld [vmem:[#allocation56_spill] sm:$0xff] }
 0xcaa   : > { %5310 = vmatpush1.bf16.msra.mxu0 %v11752_v57  ;;  %v14268_v57 = vld [vmem:[#allocation57_spill] sm:$0xff] }
 0xcab   : > { %8640 = vmatprep.subr.msk.bf16.mxu0 %vm10488_vm13, %v11756_v14  ;;  %v14269_v14 = vld [vmem:[#allocation54_spill] sm:$0xff] }
 0xcae   : > { %5312 = vmatpush1.bf16.msra.mxu0 %v11767_v41  ;;  %v9588_v41 = vld [vmem:[#allocation10 + $0x78] ss:$28 sps:$4 sm:$0xff]  }
 0xcaf   : > { %8643 = vmatprep.subr.msk.bf16.mxu0 %vm10488_vm13, %v11773_v11  ;;  %v14270_v11 = vld [vmem:[#allocation35_spill] sm:$0xff] }
 0xcb2   : > { %5314 = vmatpush1.bf16.msra.mxu0 %v11778_v39  ;;  %v4222_v39 = vpop.permute.xlu1 %4221 }
 0xcb3   : > { %5336 = vmatprep.subr.bf16.mxu0 %v14232_v6 }
 0xcb5   : > { %5316 = vmatmul.mubr.bf16.vlgmr.msra.gmra.mrb[16].mxu0 %v9582_v7 }
 0xcb6   : > { %5337 = vmatpush1.bf16.msra.mxu0 %v14245_v52  ;;  %5325 = vmatprep.mubr.bf16.mxu0 %v9585_v0 }
 0xcb7   : > { %5338 = vmatprep.subr.bf16.mxu0 %v14246_v36 }
 0xcba   : > { %5339 = vmatpush1.bf16.msra.mxu0 %v14247_v9 }
 0xcbb   : > { %5340 = vmatprep.subr.bf16.mxu0 %v14248_v59 }
 0xcbd   : > { %5326 = vmatmul.mubr.bf16.gmra.mrb[20].mxu0 %v9587_v37 }
 0xcbe   : > { %5341 = vmatpush1.bf16.msra.mxu0 %v14249_v12  ;;  %5368 = vmatprep.mubr.bf16.mxu0 %v9590_v54 }
 0xcbf   : > { %5342 = vmatprep.subr.bf16.mxu0 %v14250_v21 }
 0xcc2   : > { %8648 = vmatpush1.bf16.msk.msra.mxu0 %vm10292_vm5, %v14251_v49 }
 0xcc3   : > { %5344 = vmatprep.subr.bf16.mxu0 %v14252_v5 }
 0xcc6   : > { %5345 = vmatpush1.bf16.msra.mxu0 %v14253_v22 }
 0xcc7   : > { %5346 = vmatprep.subr.bf16.mxu0 %v14254_v24 }
 0xcca   : > { %5347 = vmatpush1.bf16.msra.mxu0 %v14255_v62 }
 0xccb   : > { %5348 = vmatprep.subr.bf16.mxu0 %v14256_v43 }
 0xcce   : > { %5349 = vmatpush1.bf16.msra.mxu0 %v14257_v34 }
 0xccf   : > { %5350 = vmatprep.subr.bf16.mxu0 %v14258_v4 }
 0xcd2   : > { %5351 = vmatpush1.bf16.msra.mxu0 %v14259_v35 }
 0xcd3   : > { %5352 = vmatprep.subr.bf16.mxu0 %v14260_v31 }
 0xcd6   : > { %5353 = vmatpush1.bf16.msra.mxu0 %v14261_v60 }
 0xcd7   : > { %8651 = vmatprep.subr.msk.bf16.mxu0 %vm10488_vm13, %v14262_v32 }
 0xcda   : > { %5355 = vmatpush1.bf16.msra.mxu0 %v14263_v58 }
 0xcdb   : > { %5356 = vmatprep.subr.bf16.mxu0 %v14264_v38 }
 0xcde   : > { %5357 = vmatpush1.bf16.msra.mxu0 %v14265_v42 }
 0xcdf   : > { %5358 = vmatprep.subr.bf16.mxu0 %v12155_v18 }
 0xce2   : > { %5359 = vmatpush1.bf16.msra.mxu0 %v14266_v28 }
 0xce3   : > { %5360 = vmatprep.subr.bf16.mxu0 %v12168_v27 }
 0xce6   : > { %8656 = vmatpush1.bf16.msk.msra.mxu0 %vm10292_vm5, %v12170_v47  ;;  %v4227_v47 = vpop.permute.xlu0 %4226 }
 0xce7   : > { %5362 = vmatprep.subr.bf16.mxu0 %v12188_v3 }
 0xcea   : > { %5363 = vmatpush1.bf16.msra.mxu0 %v12190_v45 }
 0xceb   : > { %5364 = vmatprep.subr.bf16.mxu0 %v14267_v19 }
 0xcee   : > { %5365 = vmatpush1.bf16.msra.mxu0 %v14268_v57 }
 0xcef   : > { %5366 = vmatprep.subr.bf16.mxu0 %v14269_v14 }
 0xcf2   : > { %5367 = vmatpush1.bf16.msra.mxu0 %v14270_v11 }
 0xcf3   : > { %5389 = vmatprep.subr.bf16.mxu0 %v12229_v1 }
 0xcf5   : > { %5369 = vmatmul.mubr.bf16.vlgmr.msra.gmra.mrb[16].mxu0 %v9588_v41 }
 0xcf6   : > { %5390 = vmatpush1.bf16.msra.mxu0 %v12226_v51 }
 0xcf7   : > { %5391 = vmatprep.subr.bf16.mxu0 %v12243_v10 }
 0xcfa   : > { %5392 = vmatpush1.bf16.msra.mxu0 %v12239_v13 }
 0xcfb   : > { %8659 = vmatprep.subr.msk.bf16.mxu0 %vm10488_vm13, %v12250_v55 }
 0xcfe   : > { %5394 = vmatpush1.bf16.msra.mxu0 %v12255_v56 }
 0xcff   : > { %5395 = vmatprep.subr.bf16.mxu0 %v12269_v2 }
 0xd02   : > { %5396 = vmatpush1.bf16.msra.mxu0 %v12276_v30  ;;  %v8264_v30 = vld [vmem:[%s13981_s9 + $0x10] sm:$0xff] }
 0xd48   : > { %v4377_v6 = vpop.f32.mrb[12].mxu0 }
 0xd49   : > { %v8868_v18 = vadd.f32 %v4377_v6, %v4222_v39  ;;  %v4379_v27 = vpop.f32.mrb[13].mxu0 }
 0xd4a   : > { %v8869_v3 = vadd.f32 %v4379_v27, %v4222_v39  ;;  %v4381_v45 = vpop.f32.mrb[14].mxu0 }
 0xd4b   : > { %v4386_v51 = vmul.f32 0.2, %v8868_v18  ;;  %v8870_v1 = vadd.f32 %v4381_v45, %v4227_v47  ;;  %v4383_v13 = vpop.f32.mrb[15].mxu0 }
 0xd4c   : > { %v4387_v10 = vmul.f32 0.2, %v8869_v3  ;;  %v8871_v20 = vadd.f32 %v4383_v13, %v4227_v47 }
 0xd4d   : > { %v4390_v53 = vmax.f32 %v8868_v18, %v4386_v51  ;;  %v4388_v55 = vmul.f32 0.2, %v8870_v1 }
 0xd4e   : > { %v4391_v44 = vmax.f32 %v8869_v3, %v4387_v10  ;;  %v4389_v56 = vmul.f32 0.2, %v8871_v20 }
 0xd4f   : > { %v4392_v46 = vmax.f32 %v8870_v1, %v4388_v55  ;;  %4398 = vrot.lane.b32.xlu1 %v4390_v53, %s9859_s19 }
 0xd50   : > { %v4393_v50 = vmax.f32 %v8871_v20, %v4389_v56  ;;  %4400 = vrot.lane.b32.xlu0 %v4391_v44, %s9859_s19  ;;  %v9353_v48 = vpack.i.bf16 %v4391_v44, %v4390_v53 }
 0xd51   : > { %v12371_v2 = vpack.c.bf16 %v4392_v46, %v4390_v53 }
 0xd52   : > { %v9358_v8 = vpack.i.bf16 %v4393_v50, %v4392_v46  ;;  %v12373_v29 = vpack.c.bf16 %v4393_v50, %v4391_v44 }
 0xd53   : > { %4442 = vrot.lane.b32.xlu1 %v4390_v53, %s9861_s25 }
 0xd54   : > { %4444 = vrot.lane.b32.xlu0 %v4391_v44, %s9861_s25 }
 0xd57   : > { %4466 = vrot.lane.b32.xlu1 %v4390_v53, %s9862_s14 }
 0xd58   : > { %4468 = vrot.lane.b32.xlu0 %v4391_v44, %s9862_s14 }
 0xd5b   : > { %9354 = vrot.lane.b32.xlu1 %v9353_v48, %s9860_s24 }
 0xd5c   : > { %4498 = vrot.lane.b32.xlu0 %v4392_v46, %s9863_s16 }
 0xd5f   : > { %4402 = vrot.lane.b32.xlu1 %v4392_v46, %s9859_s19 }
 0xd60   : > { %4404 = vrot.lane.b32.xlu0 %v4393_v50, %s9859_s19 }
 0xd63   : > { %4496 = vrot.lane.b32.xlu1 %v4391_v44, %s9863_s16 }
 0xd64   : > { %9359 = vrot.lane.b32.xlu0 %v9358_v8, %s9860_s24 }
 0xd67   : > { %4446 = vrot.lane.b32.xlu1 %v4392_v46, %s9861_s25 }
 0xd68   : > { %4448 = vrot.lane.b32.xlu0 %v4393_v50, %s9861_s25 }
 0xd6b   : > { %4470 = vrot.lane.b32.xlu1 %v4392_v46, %s9862_s14 }
 0xd6c   : > { %4472 = vrot.lane.b32.xlu0 %v4393_v50, %s9862_s14 }
 0xd6f   : > { %4494 = vrot.lane.b32.xlu1 %v4390_v53, %s9863_s16 }
 0xd70   : > { %4522 = vrot.lane.b32.xlu0 %v4392_v46, %s9864_s12 }
 0xd73   : > { %4520 = vrot.lane.b32.xlu1 %v4391_v44, %s9864_s12 }
 0xd74   : > { %4500 = vrot.lane.b32.xlu0 %v4393_v50, %s9863_s16 }
 0xd77   : > { %4518 = vrot.lane.b32.xlu1 %v4390_v53, %s9864_s12 }
 0xd78   : > { %4524 = vrot.lane.b32.xlu0 %v4393_v50, %s9864_s12 }
 0xd7b   : > { %9364 = vrot.lane.b32.xlu1 %v9353_v48, %s9865_s15 }
 0xd7c   : > { %9369 = vrot.lane.b32.xlu0 %v9358_v8, %s9865_s15 }
 0xd7f   : > { %4564 = vrot.lane.b32.xlu1 %v4391_v44, %s9866_s22 }
 0xd80   : > { %4568 = vrot.lane.b32.xlu0 %v4393_v50, %s9866_s22 }
 0xd83   : > { %4562 = vrot.lane.b32.xlu1 %v4390_v53, %s9866_s22 }
 0xd84   : > { %4566 = vrot.lane.b32.xlu0 %v4392_v46, %s9866_s22 }
 0xd87   : > { %4688 = vperm.xlu1 %9192, %v8264_v30  }
 0xd88   : > { %4693 = vperm.xlu0 %9191, %v8265_v40  }
 0xdc1   : > { %v4399_v16 = vpop.permute.xlu1 %4398 }
 0xdc2   : > { %v4401_v7 = vpop.permute.xlu0 %4400  ;;  %v4412_v21 = vsel %vm524_vm1, 0.0, %v4399_v16 }
 0xdc3   : > { %v4406_v59 = vsel %vm524_vm1, %v4399_v16, %v4401_v7  ;;  %v4414_v34 = vmul.f32 %v10248_v23, %v4412_v21 }
 0xdc4   : > { %v4415_v62 = vmul.f32 %v10253_v26, %v4406_v59 }
 0xdc5   : > { %v4443_v0 = vpop.permute.xlu1 %4442 }
 0xdc6   : > { %v4445_v52 = vpop.permute.xlu0 %4444  ;;  %v4456_v41 = vsel %vm614_vm8, 0.0, %v4443_v0 }
 0xdc7   : > { %v4450_v28 = vsel %vm614_vm8, %v4443_v0, %v4445_v52  ;;  %v4458_v51 = vmul.f32 %v10317_v25, %v4456_v41 }
 0xdc8   : > { %v4459_v3 = vmul.f32 %v14241_v61, %v4450_v28 }
 0xdc9   : > { %v4467_v36 = vpop.permute.xlu1 %4466 }
 0xdca   : > { %v4469_v37 = vpop.permute.xlu0 %4468  ;;  %v4480_v10 = vsel %vm663_vm9, 0.0, %v4467_v36 }
 0xdcb   : > { %v4474_v1 = vsel %vm663_vm9, %v4467_v36, %v4469_v37  ;;  %v4482_v8 = vmul.f32 %v10248_v23, %v4480_v10 }
 0xdcc   : > { %v4483_v50 = vmul.f32 %v10253_v26, %v4474_v1 }
 0xdcd   : > { %v9355_v9 = vpop.permute.xlu1 %9354 }
 0xdce   : > { %v12411_v54 = vpop.permute.xlu0 %4498  ;;  %v9357_v4 = vunpack.i.h.bf16 %v9355_v9  ;;  %v9356_v35 = vunpack.i.l.bf16 %v9355_v9 }
 0xdd0   : > { %v4430_v57 = vsel %vm573_vm3, %v9356_v35, %v9357_v4 }
 0xdd1   : > { %v4403_v12 = vpop.permute.xlu1 %4402 }
 0xdd2   : > { %v4413_v49 = vsel %vm524_vm1, 0.0, %v4403_v12  ;;  %v4405_v5 = vpop.permute.xlu0 %4404 }
 0xdd3   : > { %v4416_v22 = vmul.f32 %v10248_v23, %v4413_v49  ;;  %v4407_v24 = vsel %vm524_vm1, %v4403_v12, %v4405_v5 }
 0xdd4   : > { %v4417_v43 = vmul.f32 %v10253_v26, %v4407_v24 }
 0xdd5   : > { %v4497_v31 = vpop.permute.xlu1 %4496  ;;  %v4418_v58 = vpack.c.bf16 %v4416_v22, %v4414_v34 }
 0xdd6   : > { %v9360_v60 = vpop.permute.xlu0 %9359  ;;  %v4419_v32 = vpack.c.bf16 %v4417_v43, %v4415_v62  ;;  %v4508_v7 = vsel %vm720_vm10, %v4497_v31, 0.0 }
 0xdd7   : > { %v9362_v38 = vunpack.i.h.bf16 %v9360_v60  ;;  %v9361_v42 = vunpack.i.l.bf16 %v9360_v60  ;;  %v4511_v59 = vmul.f32 %v14241_v61, %v4508_v7 }
 0xdd8   : > { %4822 = vmatprep.subr.bf16.mxu1 %v4419_v32  ;;  %5397 = vmatprep.subr.bf16.mxu0 %v4419_v32 }
 0xdd9   : > { %4823 = vmatpush1.bf16.msra.mxu1 %v4418_v58  ;;  %5398 = vmatpush1.bf16.msra.mxu0 %v4418_v58  ;;  %v4447_v19 = vpop.permute.xlu1 %4446  ;;  %v4431_v14 = vsel %vm573_vm3, %v9361_v42, %v9362_v38  ;;  %v8623_v18 = vpack.c.bf16 %v9361_v42, %v9356_v35 }
 0xdda   : > { %v4457_v11 = vsel %vm614_vm8, 0.0, %v4447_v19  ;;  %v4449_v39 = vpop.permute.xlu0 %4448  ;;  %v4439_v6 = vpack.c.bf16 %v4431_v14, %v4430_v57 }
 0xddb   : > { %v4460_v27 = vmul.f32 %v10317_v25, %v4457_v11  ;;  %v4451_v47 = vsel %vm614_vm8, %v4447_v19, %v4449_v39 }
 0xddc   : > { %v4461_v45 = vmul.f32 %v14241_v61, %v4451_v47  ;;  %4824 = vmatprep.subr.bf16.mxu1 %v4439_v6  ;;  %5399 = vmatprep.subr.bf16.mxu0 %v4439_v6 }
 0xddd   : > { %v4471_v13 = vpop.permute.xlu1 %4470  ;;  %8624 = vmatpush1.bf16.msk.msra.mxu1 %vm10292_vm5, %v8623_v18  ;;  %8664 = vmatpush1.bf16.msk.msra.mxu0 %vm10292_vm5, %v8623_v18  ;;  %v4462_v44 = vpack.c.bf16 %v4460_v27, %v4458_v51 }
 0xdde   : > { %v4481_v20 = vsel %vm663_vm9, 0.0, %v4471_v13  ;;  %v4473_v53 = vpop.permute.xlu0 %4472  ;;  %v4463_v55 = vpack.c.bf16 %v4461_v45, %v4459_v3 }
 0xddf   : > { %v4484_v56 = vmul.f32 %v10248_v23, %v4481_v20  ;;  %v4475_v46 = vsel %vm663_vm9, %v4471_v13, %v4473_v53 }
 0xde0   : > { %v4485_v48 = vmul.f32 %v10253_v26, %v4475_v46  ;;  %4826 = vmatprep.subr.bf16.mxu1 %v4463_v55  ;;  %5401 = vmatprep.subr.bf16.mxu0 %v4463_v55 }
 0xde1   : > { %v4495_v33 = vpop.permute.xlu1 %4494  ;;  %4827 = vmatpush1.bf16.msra.mxu1 %v4462_v44  ;;  %5402 = vmatpush1.bf16.msra.mxu0 %v4462_v44  ;;  %v4486_v16 = vpack.c.bf16 %v4484_v56, %v4482_v8  ;;  %v9593_v56 = vld [vmem:[%s13976_s4 + $0x40] ss:$24 sps:$4 sm:$0xff]  }
 0xde2   : > { %v4523_v30 = vpop.permute.xlu0 %4522  ;;  %v4487_v40 = vpack.c.bf16 %v4485_v48, %v4483_v50  ;;  %v4502_v0 = vsel %vm720_vm10, %v4495_v33, %v4497_v31 }
 0xde3   : > { %v4510_v12 = vmul.f32 %v10317_v25, %v4502_v0 }
 0xde4   : > { %4828 = vmatprep.subr.bf16.mxu1 %v4487_v40  ;;  %5403 = vmatprep.subr.bf16.mxu0 %v4487_v40 }
 0xde5   : > { %v4521_v52 = vpop.permute.xlu1 %4520  ;;  %4829 = vmatpush1.bf16.msra.mxu1 %v4486_v16  ;;  %5404 = vmatpush1.bf16.msra.mxu0 %v4486_v16 }
 0xde6   : > { %v4501_v36 = vpop.permute.xlu0 %4500  ;;  %4830 = vmatprep.subr.bf16.mxu1 %v12373_v29  ;;  %5405 = vmatprep.subr.bf16.mxu0 %v12373_v29  ;;  %v4532_v5 = vsel %vm769_vm11, %v4521_v52, 0.0 }
 0xde7   : > { %v4503_v37 = vsel %vm720_vm10, %v12411_v54, %v4501_v36  ;;  %v4509_v9 = vsel %vm720_vm10, %v4501_v36, 0.0  ;;  %v4535_v35 = vmul.f32 %v10253_v26, %v4532_v5 }
 0xde8   : > { %v4512_v21 = vmul.f32 %v10317_v25, %v4503_v37  ;;  %v4513_v49 = vmul.f32 %v14241_v61, %v4509_v9 }
 0xde9   : > { %v4519_v22 = vpop.permute.xlu1 %4518  ;;  %4831 = vmatpush1.bf16.msra.mxu1 %v12371_v2  ;;  %5406 = vmatpush1.bf16.msra.mxu0 %v12371_v2 }
 0xdea   : > { %v4514_v29 = vpack.c.bf16 %v4512_v21, %v4510_v12  ;;  %v4526_v54 = vsel %vm769_vm11, %v4519_v22, %v4521_v52  ;;  %v4525_v24 = vpop.permute.xlu0 %4524  ;;  %v4515_v62 = vpack.c.bf16 %v4513_v49, %v4511_v59 }
 0xdeb   : > { %v4534_v43 = vmul.f32 %v10248_v23, %v4526_v54  ;;  %v4527_v34 = vsel %vm769_vm11, %v4523_v30, %v4525_v24  ;;  %v4533_v4 = vsel %vm769_vm11, %v4525_v24, 0.0  ;;  %v9594_v24 = vld [vmem:[#allocation10 + $0xb4] ss:$28 sps:$4 sm:$0xff]  }
 0xdec   : > { %v4536_v31 = vmul.f32 %v10248_v23, %v4527_v34  ;;  %v4537_v60 = vmul.f32 %v10253_v26, %v4533_v4  ;;  %4832 = vmatprep.subr.bf16.mxu1 %v4515_v62  ;;  %5407 = vmatprep.subr.bf16.mxu0 %v4515_v62  ;;  %v9596_v62 = vld [vmem:[#allocation10 + $0xb0] ss:$28 sps:$4 sm:$0xff]   ;;  %v8273_v34 = vld [vmem:[%s13982_s10 + $0x20] sm:$0xff] }
 0xded   : > { %v9365_v2 = vpop.permute.xlu1 %9364  ;;  %4833 = vmatpush1.bf16.msra.mxu1 %v4514_v29  ;;  %5408 = vmatpush1.bf16.msra.mxu0 %v4514_v29  ;;  %v8274_v4 = vld [vmem:[%s13982_s10 + $0x28] sm:$0xff] }
 0xdee   : > { %v4538_v32 = vpack.c.bf16 %v4536_v31, %v4534_v43  ;;  %v9367_v58 = vunpack.i.h.bf16 %v9365_v2  ;;  %v9366_v38 = vunpack.i.l.bf16 %v9365_v2  ;;  %v9370_v42 = vpop.permute.xlu0 %9369  ;;  %v4539_v28 = vpack.c.bf16 %v4537_v60, %v4535_v35  ;;  %5378 = vmatprep.mubr.bf16.mxu0 %v9594_v24  ;;  %v9599_v43 = vld [vmem:[#allocation10 + $0x84] ss:$28 sps:$4 sm:$0xff]   ;;  %v8275_v35 = vld [vmem:[%s13982_s10 + $0x30] sm:$0xff]  ;;  %v8276_v31 = vld [vmem:[%s13982_s10 + $0x38] sm:$0xff] }
 0xdef   : > { %v9372_v19 = vunpack.i.h.bf16 %v9370_v42  ;;  %v9371_v57 = vunpack.i.l.bf16 %v9370_v42  ;;  %5379 = vmatmul.mubr.bf16.gmra.mrb[20].mxu0 %v9596_v62 }
 0xdf0   : > { %v4550_v14 = vsel %vm818_vm12, %v9366_v38, %v9367_v58  ;;  %4834 = vmatprep.subr.bf16.mxu1 %v4539_v28  ;;  %5409 = vmatprep.subr.bf16.mxu0 %v4539_v28 }
 0xdf1   : > { %v4551_v41 = vsel %vm818_vm12, %v9371_v57, %v9372_v19  ;;  %v8626_v11 = vpack.c.bf16 %v9372_v19, %v9367_v58  ;;  %v4565_v39 = vpop.permute.xlu1 %4564  ;;  %4835 = vmatpush1.bf16.msra.mxu1 %v4538_v32  ;;  %5410 = vmatpush1.bf16.msra.mxu0 %v4538_v32 }
 0xdf2   : > { %v4576_v6 = vsel %vm859_vm14, %v4565_v39, 0.0  ;;  %v4569_v18 = vpop.permute.xlu0 %4568  ;;  %v4558_v27 = vpack.c.bf16 %v4551_v41, %v4550_v14  ;;  %5421 = vmatprep.mubr.bf16.mxu0 %v9599_v43 }
 0xdf3   : > { %v4579_v47 = vmul.f32 %v14241_v61, %v4576_v6  ;;  %v4577_v3 = vsel %vm859_vm14, %v4569_v18, 0.0  ;;  %8627 = vmatprep.subr.msk.bf16.mxu1 %vm10488_vm13, %v8626_v11  ;;  %8667 = vmatprep.subr.msk.bf16.mxu0 %vm10488_vm13, %v8626_v11 }
 0xdf4   : > { %v4581_v45 = vmul.f32 %v14241_v61, %v4577_v3 }
 0xdf5   : > { %v4563_v51 = vpop.permute.xlu1 %4562  ;;  %4837 = vmatpush1.bf16.msra.mxu1 %v4558_v27  ;;  %5412 = vmatpush1.bf16.msra.mxu0 %v4558_v27 }
 0xdf6   : > { %v4570_v1 = vsel %vm859_vm14, %v4563_v51, %v4565_v39  ;;  %v4567_v13 = vpop.permute.xlu0 %4566  ;;  %v4583_v10 = vpack.c.bf16 %v4581_v45, %v4579_v47 }
 0xdf7   : > { %v4578_v20 = vmul.f32 %v10317_v25, %v4570_v1  ;;  %v4571_v53 = vsel %vm859_vm14, %v4567_v13, %v4569_v18 }
 0xdf8   : > { %v4580_v55 = vmul.f32 %v10317_v25, %v4571_v53  ;;  %4838 = vmatprep.subr.bf16.mxu1 %v4583_v10  ;;  %5413 = vmatprep.subr.bf16.mxu0 %v4583_v10 }
 0xdfa   : > { %v4582_v44 = vpack.c.bf16 %v4580_v55, %v4578_v20 }
 0xdfc   : > { %4839 = vmatpush1.bf16.msra.mxu1 %v4582_v44  ;;  %5414 = vmatpush1.bf16.msra.mxu0 %v4582_v44 }
 0xdff   : > { %4847 = vmatmul.mubr.bf16.vlgmr.msra.gmra.mrb[20].mxu1 %v9593_v56 }
 0xe06   : > { %v4689_v46 = vpop.permute.xlu1 %4688 }
 0xe07   : > { %v4694_v33 = vpop.permute.xlu0 %4693 }
 0xed2   : > { %v4848_v50 = vpop.f32.mrb[20].mxu1 }
 0xed3   : > { %v8872_v48 = vadd.f32 %v4848_v50, %v4689_v46  ;;  %v4850_v8 = vpop.f32.mrb[21].mxu1 }
 0xed4   : > { %v8873_v30 = vadd.f32 %v4850_v8, %v4689_v46  ;;  %v4852_v40 = vpop.f32.mrb[22].mxu1 }
 0xed5   : > { %v4857_v16 = vmul.f32 0.2, %v8872_v48  ;;  %v8874_v7 = vadd.f32 %v4852_v40, %v4694_v33  ;;  %v4854_v0 = vpop.f32.mrb[23].mxu1 }
 0xed6   : > { %v4858_v52 = vmul.f32 0.2, %v8873_v30  ;;  %v8875_v36 = vadd.f32 %v4854_v0, %v4694_v33 }
 0xed7   : > { %v12481_v37 = vmax.f32 %v8872_v48, %v4857_v16  ;;  %v4859_v9 = vmul.f32 0.2, %v8874_v7 }
 0xed8   : > { %v12483_v59 = vmax.f32 %v8873_v30, %v4858_v52  ;;  %v4860_v12 = vmul.f32 0.2, %v8875_v36 }
 0xed9   : > { %v12485_v21 = vmax.f32 %v8874_v7, %v4859_v9  ;;  %4869 = vrot.lane.b32.xlu1 %v12481_v37, %s9859_s19 }
 0xeda   : > { %v12489_v49 = vmax.f32 %v8875_v36, %v4860_v12  ;;  %4871 = vrot.lane.b32.xlu0 %v12483_v59, %s9859_s19  ;;  %v9373_v5 = vpack.i.bf16 %v12483_v59, %v12481_v37 }
 0xedb   : > { %v4961_v22 = vpack.c.bf16 %v12485_v21, %v12481_v37 }
 0xedc   : > { %v9378_v29 = vpack.i.bf16 %v12489_v49, %v12485_v21  ;;  %v4962_v54 = vpack.c.bf16 %v12489_v49, %v12483_v59 }
 0xedd   : > { %4913 = vrot.lane.b32.xlu1 %v12481_v37, %s9861_s25 }
 0xede   : > { %4915 = vrot.lane.b32.xlu0 %v12483_v59, %s9861_s25 }
 0xee1   : > { %4937 = vrot.lane.b32.xlu1 %v12481_v37, %s9862_s14 }
 0xee2   : > { %4939 = vrot.lane.b32.xlu0 %v12483_v59, %s9862_s14 }
 0xee5   : > { %9374 = vrot.lane.b32.xlu1 %v9373_v5, %s9860_s24 }
 0xee6   : > { %4969 = vrot.lane.b32.xlu0 %v12485_v21, %s9863_s16 }
 0xee9   : > { %4873 = vrot.lane.b32.xlu1 %v12485_v21, %s9859_s19 }
 0xeea   : > { %4875 = vrot.lane.b32.xlu0 %v12489_v49, %s9859_s19 }
 0xeed   : > { %4967 = vrot.lane.b32.xlu1 %v12483_v59, %s9863_s16 }
 0xeee   : > { %9379 = vrot.lane.b32.xlu0 %v9378_v29, %s9860_s24 }
 0xef1   : > { %4917 = vrot.lane.b32.xlu1 %v12485_v21, %s9861_s25 }
 0xef2   : > { %4919 = vrot.lane.b32.xlu0 %v12489_v49, %s9861_s25 }
 0xef5   : > { %4941 = vrot.lane.b32.xlu1 %v12485_v21, %s9862_s14 }
 0xef6   : > { %4943 = vrot.lane.b32.xlu0 %v12489_v49, %s9862_s14 }
 0xef9   : > { %4965 = vrot.lane.b32.xlu1 %v12481_v37, %s9863_s16 }
 0xefa   : > { %4993 = vrot.lane.b32.xlu0 %v12485_v21, %s9864_s12 }
 0xefd   : > { %4991 = vrot.lane.b32.xlu1 %v12483_v59, %s9864_s12 }
 0xefe   : > { %4971 = vrot.lane.b32.xlu0 %v12489_v49, %s9863_s16 }
 0xf01   : > { %4989 = vrot.lane.b32.xlu1 %v12481_v37, %s9864_s12 }
 0xf02   : > { %4995 = vrot.lane.b32.xlu0 %v12489_v49, %s9864_s12 }
 0xf05   : > { %9384 = vrot.lane.b32.xlu1 %v9373_v5, %s9865_s15 }
 0xf06   : > { %9389 = vrot.lane.b32.xlu0 %v9378_v29, %s9865_s15 }
 0xf09   : > { %5035 = vrot.lane.b32.xlu1 %v12483_v59, %s9866_s22 }
 0xf0a   : > { %5039 = vrot.lane.b32.xlu0 %v12489_v49, %s9866_s22 }
 0xf0d   : > { %5033 = vrot.lane.b32.xlu1 %v12481_v37, %s9866_s22 }
 0xf0e   : > { %5037 = vrot.lane.b32.xlu0 %v12485_v21, %s9866_s22 }
 0xf11   : > { %5189 = vperm.xlu1 %9192, %v8273_v34  }
 0xf12   : > { %5194 = vperm.xlu0 %9191, %v8274_v4  }
 0xf15   : > { %5199 = vperm.xlu1 %9192, %v8275_v35  }
 0xf16   : > { %5204 = vperm.xlu0 %9191, %v8276_v31  }
 0xf4b   : > { %v4870_v60 = vpop.permute.xlu1 %4869 }
 0xf4c   : > { %v4872_v2 = vpop.permute.xlu0 %4871  ;;  %v4883_v41 = vsel %vm524_vm1, 0.0, %v4870_v60 }
 0xf4d   : > { %v4877_v57 = vsel %vm524_vm1, %v4870_v60, %v4872_v2  ;;  %v4885_v3 = vmul.f32 %v10248_v23, %v4883_v41  ;;  %v9597_v60 = vld [vmem:[#allocation10 + $0x80] ss:$28 sps:$4 sm:$0xff]  }
 0xf4e   : > { %v4886_v27 = vmul.f32 %v10253_v26, %v4877_v57 }
 0xf4f   : > { %v4914_v32 = vpop.permute.xlu1 %4913 }
 0xf50   : > { %v4916_v58 = vpop.permute.xlu0 %4915  ;;  %v4927_v48 = vsel %vm614_vm8, 0.0, %v4914_v32 }
 0xf51   : > { %v4921_v44 = vsel %vm614_vm8, %v4914_v32, %v4916_v58  ;;  %v4929_v36 = vmul.f32 %v10317_v25, %v4927_v48  ;;  %v9600_v58 = vld [vmem:[#allocation10 + $0xbc] ss:$28 sps:$4 sm:$0xff]  }
 0xf52   : > { %v4930_v0 = vmul.f32 %v14241_v61, %v4921_v44 }
 0xf53   : > { %v4938_v38 = vpop.permute.xlu1 %4937 }
 0xf54   : > { %v4940_v42 = vpop.permute.xlu0 %4939  ;;  %v4951_v5 = vsel %vm663_vm9, 0.0, %v4938_v38 }
 0xf55   : > { %v4945_v9 = vsel %vm663_vm9, %v4938_v38, %v4940_v42  ;;  %v4953_v2 = vmul.f32 %v10248_v23, %v4951_v5 }
 0xf56   : > { %v4954_v35 = vmul.f32 %v10253_v26, %v4945_v9 }
 0xf57   : > { %v9375_v28 = vpop.permute.xlu1 %9374 }
 0xf58   : > { %v12561_v19 = vpop.permute.xlu0 %4969  ;;  %v9377_v45 = vunpack.i.h.bf16 %v9375_v28  ;;  %v9376_v51 = vunpack.i.l.bf16 %v9375_v28 }
 0xf5a   : > { %v4901_v46 = vsel %vm573_vm3, %v9376_v51, %v9377_v45  ;;  %v9602_v45 = vld [vmem:[#allocation10 + $0xb8] ss:$28 sps:$4 sm:$0xff]  }
 0xf5b   : > { %v4874_v14 = vpop.permute.xlu1 %4873 }
 0xf5c   : > { %v4884_v11 = vsel %vm524_vm1, 0.0, %v4874_v14  ;;  %v4876_v39 = vpop.permute.xlu0 %4875 }
 0xf5d   : > { %v4887_v6 = vmul.f32 %v10248_v23, %v4884_v11  ;;  %v4878_v18 = vsel %vm524_vm1, %v4874_v14, %v4876_v39 }
 0xf5e   : > { %v4888_v47 = vmul.f32 %v10253_v26, %v4878_v18 }
 0xf5f   : > { %v4968_v1 = vpop.permute.xlu1 %4967  ;;  %v4889_v20 = vpack.c.bf16 %v4887_v6, %v4885_v3 }
 0xf60   : > { %v9380_v13 = vpop.permute.xlu0 %9379  ;;  %v4890_v10 = vpack.c.bf16 %v4888_v47, %v4886_v27  ;;  %v4979_v57 = vsel %vm720_vm10, %v4968_v1, 0.0 }
 0xf61   : > { %v9382_v53 = vunpack.i.h.bf16 %v9380_v13  ;;  %v9381_v55 = vunpack.i.l.bf16 %v9380_v13  ;;  %v4982_v18 = vmul.f32 %v14241_v61, %v4979_v57 }
 0xf62   : > { %5415 = vmatprep.subr.bf16.mxu0 %v4890_v10 }
 0xf63   : > { %5416 = vmatpush1.bf16.msra.mxu0 %v4889_v20  ;;  %v4918_v56 = vpop.permute.xlu1 %4917  ;;  %v4902_v50 = vsel %vm573_vm3, %v9381_v55, %v9382_v53  ;;  %v8671_v40 = vpack.c.bf16 %v9381_v55, %v9376_v51 }
 0xf64   : > { %v4928_v8 = vsel %vm614_vm8, 0.0, %v4918_v56  ;;  %v4920_v33 = vpop.permute.xlu0 %4919  ;;  %v4910_v30 = vpack.c.bf16 %v4902_v50, %v4901_v46 }
 0xf65   : > { %v4931_v16 = vmul.f32 %v10317_v25, %v4928_v8  ;;  %v4922_v7 = vsel %vm614_vm8, %v4918_v56, %v4920_v33 }
 0xf66   : > { %v4932_v52 = vmul.f32 %v14241_v61, %v4922_v7  ;;  %5417 = vmatprep.subr.bf16.mxu0 %v4910_v30 }
 0xf67   : > { %v4942_v12 = vpop.permute.xlu1 %4941  ;;  %8672 = vmatpush1.bf16.msk.msra.mxu0 %vm10292_vm5, %v8671_v40  ;;  %v4933_v43 = vpack.c.bf16 %v4931_v16, %v4929_v36 }
 0xf68   : > { %v4952_v29 = vsel %vm663_vm9, 0.0, %v4942_v12  ;;  %v4944_v24 = vpop.permute.xlu0 %4943  ;;  %v4934_v62 = vpack.c.bf16 %v4932_v52, %v4930_v0 }
 0xf69   : > { %v4955_v34 = vmul.f32 %v10248_v23, %v4952_v29  ;;  %v4946_v4 = vsel %vm663_vm9, %v4942_v12, %v4944_v24 }
 0xf6a   : > { %v4956_v31 = vmul.f32 %v10253_v26, %v4946_v4  ;;  %5419 = vmatprep.subr.bf16.mxu0 %v4934_v62 }
 0xf6b   : > { %v4966_v32 = vpop.permute.xlu1 %4965  ;;  %5420 = vmatpush1.bf16.msra.mxu0 %v4933_v43  ;;  %v4957_v28 = vpack.c.bf16 %v4955_v34, %v4953_v2 }
 0xf6c   : > { %v4994_v38 = vpop.permute.xlu0 %4993  ;;  %v4958_v42 = vpack.c.bf16 %v4956_v31, %v4954_v35  ;;  %v4973_v14 = vsel %vm720_vm10, %v4966_v32, %v4968_v1  ;;  %v9603_v31 = vld [vmem:[#allocation10 + $0x88] ss:$28 sps:$4 sm:$0xff]  }
 0xf6d   : > { %v4981_v27 = vmul.f32 %v10317_v25, %v4973_v14 }
 0xf6e   : > { %5442 = vmatprep.subr.bf16.mxu0 %v4958_v42  ;;  %5422 = vmatmul.mubr.bf16.vlgmr.msra.gmra.mrb[16].mxu0 %v9597_v60  ;;  %v9604_v60 = vld [vmem:[#allocation10 + $0xc0] ss:$28 sps:$4 sm:$0xff]  }
 0xf6f   : > { %v4992_v41 = vpop.permute.xlu1 %4991  ;;  %5443 = vmatpush1.bf16.msra.mxu0 %v4957_v28  ;;  %5431 = vmatprep.mubr.bf16.mxu0 %v9600_v58 }
 0xf70   : > { %v4972_v11 = vpop.permute.xlu0 %4971  ;;  %5444 = vmatprep.subr.bf16.mxu0 %v4962_v54  ;;  %v5003_v51 = vsel %vm769_vm11, %v4992_v41, 0.0 }
 0xf71   : > { %v4974_v39 = vsel %vm720_vm10, %v12561_v19, %v4972_v11  ;;  %v4980_v6 = vsel %vm720_vm10, %v4972_v11, 0.0  ;;  %v5006_v53 = vmul.f32 %v10253_v26, %v5003_v51  ;;  %v14271_v11 = vld [vmem:[#allocation25_spill] sm:$0xff] }
 0xf72   : > { %v4983_v47 = vmul.f32 %v10317_v25, %v4974_v39  ;;  %v4984_v3 = vmul.f32 %v14241_v61, %v4980_v6  ;;  %v14273_v6 = vld [vmem:[#allocation26_spill] sm:$0xff] }
 0xf73   : > { %v4990_v1 = vpop.permute.xlu1 %4989  ;;  %5445 = vmatpush1.bf16.msra.mxu0 %v4961_v22 }
 0xf74   : > { %v4985_v59 = vpack.c.bf16 %v4983_v47, %v4981_v27  ;;  %v4997_v49 = vsel %vm769_vm11, %v4990_v1, %v4992_v41  ;;  %v4996_v54 = vpop.permute.xlu0 %4995  ;;  %v4986_v19 = vpack.c.bf16 %v4984_v3, %v4982_v18 }
 0xf75   : > { %v5005_v13 = vmul.f32 %v10248_v23, %v4997_v49  ;;  %v4998_v10 = vsel %vm769_vm11, %v4994_v38, %v4996_v54  ;;  %v5004_v20 = vsel %vm769_vm11, %v4996_v54, 0.0 }
 0xf76   : > { %v5007_v55 = vmul.f32 %v10248_v23, %v4998_v10  ;;  %v5008_v44 = vmul.f32 %v10253_v26, %v5004_v20  ;;  %5446 = vmatprep.subr.bf16.mxu0 %v4986_v19  ;;  %5432 = vmatmul.mubr.bf16.gmra.mrb[20].mxu0 %v9602_v45  ;;  %v14277_v20 = vld [vmem:[#allocation30_spill] sm:$0xff] }
 0xf77   : > { %v9385_v37 = vpop.permute.xlu1 %9384  ;;  %5447 = vmatpush1.bf16.msra.mxu0 %v4985_v59  ;;  %5474 = vmatprep.mubr.bf16.mxu0 %v14244_v15 }
 0xf78   : > { %v5009_v21 = vpack.c.bf16 %v5007_v55, %v5005_v13  ;;  %v9387_v22 = vunpack.i.h.bf16 %v9385_v37  ;;  %v9386_v56 = vunpack.i.l.bf16 %v9385_v37  ;;  %v9390_v46 = vpop.permute.xlu0 %9389  ;;  %v5010_v50 = vpack.c.bf16 %v5008_v44, %v5006_v53  ;;  %v14275_v13 = vld [vmem:[#allocation27_spill] sm:$0xff] }
 0xf79   : > { %v9392_v48 = vunpack.i.h.bf16 %v9390_v46  ;;  %v9391_v8 = vunpack.i.l.bf16 %v9390_v46  ;;  %v14279_v46 = vld [vmem:[#allocation31_spill] sm:$0xff] }
 0xf7a   : > { %v5021_v33 = vsel %vm818_vm12, %v9386_v56, %v9387_v22  ;;  %5448 = vmatprep.subr.bf16.mxu0 %v5010_v50 }
 0xf7b   : > { %v5022_v30 = vsel %vm818_vm12, %v9391_v8, %v9392_v48  ;;  %v8674_v40 = vpack.c.bf16 %v9392_v48, %v9387_v22  ;;  %v5036_v16 = vpop.permute.xlu1 %5035  ;;  %5449 = vmatpush1.bf16.msra.mxu0 %v5009_v21  ;;  %v14281_v48 = vld [vmem:[#allocation32_spill] sm:$0xff] }
 0xf7c   : > { %v5047_v7 = vsel %vm859_vm14, %v5036_v16, 0.0  ;;  %v5040_v0 = vpop.permute.xlu0 %5039  ;;  %v5029_v52 = vpack.c.bf16 %v5022_v30, %v5021_v33 }
 0xf7d   : > { %v5050_v36 = vmul.f32 %v14241_v61, %v5047_v7  ;;  %v5048_v9 = vsel %vm859_vm14, %v5040_v0, 0.0  ;;  %8675 = vmatprep.subr.msk.bf16.mxu0 %vm10488_vm13, %v8674_v40 }
 0xf7e   : > { %v5052_v12 = vmul.f32 %v14241_v61, %v5048_v9  ;;  %v14285_v9 = vld [vmem:[#allocation34_spill] sm:$0xff] }
 0xf7f   : > { %v5034_v5 = vpop.permute.xlu1 %5033  ;;  %5451 = vmatpush1.bf16.msra.mxu0 %v5029_v52  ;;  %v14283_v52 = vld [vmem:[#allocation33_spill] sm:$0xff] }
 0xf80   : > { %v5041_v29 = vsel %vm859_vm14, %v5034_v5, %v5036_v16  ;;  %v5038_v24 = vpop.permute.xlu0 %5037  ;;  %v5054_v62 = vpack.c.bf16 %v5052_v12, %v5050_v36 }
 0xf81   : > { %v5049_v43 = vmul.f32 %v10317_v25, %v5041_v29  ;;  %v5042_v34 = vsel %vm859_vm14, %v5038_v24, %v5040_v0  ;;  %v9607_v29 = vld [vmem:[#allocation4 + $0x34] ss:$12 sps:$4 sm:$0xff]   ;;  %v9610_v24 = vld [vmem:[#allocation9 + $0x54] ss:$20 sps:$4 sm:$0xff]  }
 0xf82   : > { %v5051_v4 = vmul.f32 %v10317_v25, %v5042_v34  ;;  %5452 = vmatprep.subr.bf16.mxu0 %v5054_v62  ;;  %6015 = vmatprep.mubr.bf16.mxu1 %v9607_v29  ;;  %v8293_v62 = vld [vmem:[%s13978_s6 + $0x20] sm:$0xff] }
 0xf84   : > { %v5053_v35 = vpack.c.bf16 %v5051_v4, %v5049_v43  ;;  %v8294_v43 = vld [vmem:[%s13978_s6 + $0x28] sm:$0xff] }
 0xf86   : > { %5453 = vmatpush1.bf16.msra.mxu0 %v5053_v35 }
 0xf89   : > { %8291 = vmatmul.mubr.msk.bf16.vlgmr.msra.gmra.mrb[16].mxu0 %vm2764_vm6, %v9603_v31 }
 0xf8a   : > { %5484 = vmatprep.mubr.bf16.mxu0 %v14244_v15 }
 0xf90   : > { %v5190_v2 = vpop.permute.xlu1 %5189 }
 0xf91   : > { %8292 = vmatmul.mubr.msk.bf16.gmra.mrb[20].mxu0 %vm2764_vm6, %v9604_v60  ;;  %v5195_v47 = vpop.permute.xlu0 %5194 }
 0xf92   : > { %6801 = vmatprep.mubr.bf16.mxu0 %v9610_v24 }
 0xf94   : > { %v5200_v55 = vpop.permute.xlu1 %5199 }
 0xf95   : > { %v5205_v33 = vpop.permute.xlu0 %5204 }
0x105c   : > { %v5476_v32 = vpop.f32.mrb[16].mxu0 }
0x105d   : > { %v8876_v58 = vadd.f32 %v5476_v32, %v5190_v2  ;;  %v5478_v38 = vpop.f32.mrb[17].mxu0 }
0x105e   : > { %v8877_v42 = vadd.f32 %v5478_v38, %v5190_v2  ;;  %v5480_v28 = vpop.f32.mrb[18].mxu0 }
0x105f   : > { %v5495_v57 = vmul.f32 0.2, %v8876_v58  ;;  %v5482_v14 = vpop.f32.mrb[19].mxu0  ;;  %v8878_v45 = vadd.f32 %v5480_v28, %v5195_v47 }
0x1060   : > { %v5496_v41 = vmul.f32 0.2, %v8877_v42  ;;  %v8879_v51 = vadd.f32 %v5482_v14, %v5195_v47 }
0x1061   : > { %v12631_v39 = vadd.f32 %v5495_v57, %v14271_v11  ;;  %v5497_v49 = vmul.f32 0.2, %v8878_v45 }
0x1062   : > { %v12634_v18 = vadd.f32 %v5496_v41, %v14273_v6  ;;  %v5498_v54 = vmul.f32 0.2, %v8879_v51 }
0x1063   : > { %14272 = vst [vmem:[#allocation36_spill] sm:$0xff] %v12631_v39  ;;  %5535 = vrot.lane.b32.xlu1 %v12631_v39, %s9859_s19  ;;  %v12651_v10 = vadd.f32 %v5497_v49, %v14275_v13 }
0x1064   : > { %14274 = vst [vmem:[#allocation37_spill] sm:$0xff] %v12634_v18  ;;  %v5486_v27 = vpop.f32.mrb[20].mxu0  ;;  %5537 = vrot.lane.b32.xlu0 %v12634_v18, %s9859_s19  ;;  %v9393_v19 = vpack.i.bf16 %v12634_v18, %v12631_v39  ;;  %v12654_v53 = vadd.f32 %v5498_v54, %v14277_v20 }
0x1065   : > { %v5488_v3 = vpop.f32.mrb[21].mxu0  ;;  %14276 = vst [vmem:[#allocation29_spill] sm:$0xff] %v12651_v10  ;;  %v8880_v44 = vadd.f32 %v5486_v27, %v5200_v55 }
0x1066   : > { %v5490_v1 = vpop.f32.mrb[22].mxu0  ;;  %14278 = vst [vmem:[#allocation38_spill] sm:$0xff] %v12654_v53  ;;  %v8881_v37 = vadd.f32 %v5488_v3, %v5200_v55  ;;  %v9398_v21 = vpack.i.bf16 %v12654_v53, %v12651_v10 }
0x1067   : > { %v5492_v59 = vpop.f32.mrb[23].mxu0  ;;  %5623 = vrot.lane.b32.xlu1 %v12631_v39, %s9861_s25  ;;  %v5499_v22 = vmul.f32 0.2, %v8880_v44  ;;  %v8882_v30 = vadd.f32 %v5490_v1, %v5205_v33 }
0x1068   : > { %5625 = vrot.lane.b32.xlu0 %v12634_v18, %s9861_s25  ;;  %v5500_v56 = vmul.f32 0.2, %v8881_v37  ;;  %v8883_v40 = vadd.f32 %v5492_v59, %v5205_v33 }
0x1069   : > { %v12669_v50 = vadd.f32 %v5499_v22, %v14279_v46  ;;  %v5501_v16 = vmul.f32 0.2, %v8882_v30 }
0x106a   : > { %v12672_v8 = vadd.f32 %v5500_v56, %v14281_v48  ;;  %v5502_v0 = vmul.f32 0.2, %v8883_v40 }
0x106b   : > { %5671 = vrot.lane.b32.xlu1 %v12631_v39, %s9862_s14  ;;  %14280 = vst [vmem:[#allocation41_spill] sm:$0xff] %v12669_v50  ;;  %v12688_v36 = vadd.f32 %v5501_v16, %v14283_v52 }
0x106c   : > { %5673 = vrot.lane.b32.xlu0 %v12634_v18, %s9862_s14  ;;  %14282 = vst [vmem:[#allocation40_spill] sm:$0xff] %v12672_v8  ;;  %v9403_v7 = vpack.i.bf16 %v12672_v8, %v12669_v50  ;;  %v12691_v12 = vadd.f32 %v5502_v0, %v14285_v9 }
0x106d   : > { %14284 = vst [vmem:[#allocation42_spill] sm:$0xff] %v12688_v36 }
0x106e   : > { %14286 = vst [vmem:[#allocation43_spill] sm:$0xff] %v12691_v12  ;;  %v9408_v5 = vpack.i.bf16 %v12691_v12, %v12688_v36 }
0x106f   : > { %9394 = vrot.lane.b32.xlu1 %v9393_v19, %s9860_s24 }
0x1070   : > { %5541 = vrot.lane.b32.xlu0 %v12654_v53, %s9859_s19 }
0x1073   : > { %5539 = vrot.lane.b32.xlu1 %v12651_v10, %s9859_s19 }
0x1074   : > { %9399 = vrot.lane.b32.xlu0 %v9398_v21, %s9860_s24 }
0x1077   : > { %5627 = vrot.lane.b32.xlu1 %v12651_v10, %s9861_s25 }
0x1078   : > { %5629 = vrot.lane.b32.xlu0 %v12654_v53, %s9861_s25 }
0x107b   : > { %5543 = vrot.lane.b32.xlu1 %v12669_v50, %s9859_s19 }
0x107c   : > { %5545 = vrot.lane.b32.xlu0 %v12672_v8, %s9859_s19 }
0x107f   : > { %5631 = vrot.lane.b32.xlu1 %v12669_v50, %s9861_s25 }
0x1080   : > { %5633 = vrot.lane.b32.xlu0 %v12672_v8, %s9861_s25 }
0x1083   : > { %9404 = vrot.lane.b32.xlu1 %v9403_v7, %s9860_s24 }
0x1084   : > { %5677 = vrot.lane.b32.xlu0 %v12654_v53, %s9862_s14 }
0x1087   : > { %5547 = vrot.lane.b32.xlu1 %v12688_v36, %s9859_s19 }
0x1088   : > { %5549 = vrot.lane.b32.xlu0 %v12691_v12, %s9859_s19 }
0x108b   : > { %5675 = vrot.lane.b32.xlu1 %v12651_v10, %s9862_s14 }
0x108c   : > { %5681 = vrot.lane.b32.xlu0 %v12672_v8, %s9862_s14 }
0x108f   : > { %5679 = vrot.lane.b32.xlu1 %v12669_v50, %s9862_s14 }
0x1090   : > { %5733 = vrot.lane.b32.xlu0 %v12654_v53, %s9863_s16 }
0x1093   : > { %5635 = vrot.lane.b32.xlu1 %v12688_v36, %s9861_s25 }
0x1094   : > { %9409 = vrot.lane.b32.xlu0 %v9408_v5, %s9860_s24 }
0x1097   : > { %5683 = vrot.lane.b32.xlu1 %v12688_v36, %s9862_s14 }
0x1098   : > { %5637 = vrot.lane.b32.xlu0 %v12691_v12, %s9861_s25 }
0x109b   : > { %5729 = vrot.lane.b32.xlu1 %v12634_v18, %s9863_s16 }
0x109c   : > { %5731 = vrot.lane.b32.xlu0 %v12651_v10, %s9863_s16 }
0x109f   : > { %5727 = vrot.lane.b32.xlu1 %v12631_v39, %s9863_s16 }
0x10a0   : > { %5685 = vrot.lane.b32.xlu0 %v12691_v12, %s9862_s14 }
0x10a3   : > { %5737 = vrot.lane.b32.xlu1 %v12672_v8, %s9863_s16 }
0x10a4   : > { %5739 = vrot.lane.b32.xlu0 %v12688_v36, %s9863_s16 }
0x10a7   : > { %5735 = vrot.lane.b32.xlu1 %v12669_v50, %s9863_s16 }
0x10a8   : > { %5781 = vrot.lane.b32.xlu0 %v12654_v53, %s9864_s12 }
0x10ab   : > { %5777 = vrot.lane.b32.xlu1 %v12634_v18, %s9864_s12 }
0x10ac   : > { %5779 = vrot.lane.b32.xlu0 %v12651_v10, %s9864_s12 }
0x10af   : > { %5775 = vrot.lane.b32.xlu1 %v12631_v39, %s9864_s12 }
0x10b0   : > { %5741 = vrot.lane.b32.xlu0 %v12691_v12, %s9863_s16 }
0x10b3   : > { %5785 = vrot.lane.b32.xlu1 %v12672_v8, %s9864_s12 }
0x10b4   : > { %5787 = vrot.lane.b32.xlu0 %v12688_v36, %s9864_s12 }
0x10b7   : > { %5783 = vrot.lane.b32.xlu1 %v12669_v50, %s9864_s12 }
0x10b8   : > { %5789 = vrot.lane.b32.xlu0 %v12691_v12, %s9864_s12 }
0x10bb   : > { %9414 = vrot.lane.b32.xlu1 %v9393_v19, %s9865_s15 }
0x10bc   : > { %9419 = vrot.lane.b32.xlu0 %v9398_v21, %s9865_s15 }
0x10bf   : > { %9424 = vrot.lane.b32.xlu1 %v9403_v7, %s9865_s15 }
0x10c0   : > { %5869 = vrot.lane.b32.xlu0 %v12654_v53, %s9866_s22 }
0x10c3   : > { %5865 = vrot.lane.b32.xlu1 %v12634_v18, %s9866_s22 }
0x10c4   : > { %9429 = vrot.lane.b32.xlu0 %v9408_v5, %s9865_s15 }
0x10c7   : > { %5863 = vrot.lane.b32.xlu1 %v12631_v39, %s9866_s22 }
0x10c8   : > { %5867 = vrot.lane.b32.xlu0 %v12651_v10, %s9866_s22 }
0x10cb   : > { %5873 = vrot.lane.b32.xlu1 %v12672_v8, %s9866_s22 }
0x10cc   : > { %5877 = vrot.lane.b32.xlu0 %v12691_v12, %s9866_s22 }
0x10cf   : > { %5871 = vrot.lane.b32.xlu1 %v12669_v50, %s9866_s22 }
0x10d0   : > { %5875 = vrot.lane.b32.xlu0 %v12688_v36, %s9866_s22 }
0x10d3   : > { %5957 = vperm.xlu1 %9192, %v8293_v62  }
0x10d4   : > { %5962 = vperm.xlu0 %9191, %v8294_v43  }
0x10d5   : > { %v5536_v34 = vpop.permute.xlu1 %5535 }
0x10d6   : > { %v5538_v4 = vpop.permute.xlu0 %5537  ;;  %v5563_v38 = vsel %vm524_vm1, 0.0, %v5536_v34 }
0x10d7   : > { %v5551_v42 = vsel %vm524_vm1, %v5536_v34, %v5538_v4  ;;  %v5567_v11 = vmul.f32 %v10248_v23, %v5563_v38 }
0x10d8   : > { %v5568_v6 = vmul.f32 %v10253_v26, %v5551_v42 }
0x10d9   : > { %v12772_v35 = vpop.permute.xlu1 %5623 }
0x10da   : > { %v12774_v31 = vpop.permute.xlu0 %5625 }
0x10dd   : > { %v12776_v60 = vpop.permute.xlu1 %5671 }
0x10de   : > { %v12778_v2 = vpop.permute.xlu0 %5673 }
0x10e1   : > { %v9395_v32 = vpop.permute.xlu1 %9394 }
0x10e2   : > { %v5542_v58 = vpop.permute.xlu0 %5541  ;;  %v9397_v48 = vunpack.i.h.bf16 %v9395_v32  ;;  %v9396_v33 = vunpack.i.l.bf16 %v9395_v32 }
0x10e4   : > { %v5599_v24 = vsel %vm573_vm3, %v9396_v33, %v9397_v48 }
0x10e5   : > { %v5540_v28 = vpop.permute.xlu1 %5539 }
0x10e6   : > { %v5552_v57 = vsel %vm524_vm1, %v5540_v28, %v5542_v58  ;;  %v5564_v14 = vsel %vm524_vm1, 0.0, %v5540_v28  ;;  %v9400_v41 = vpop.permute.xlu0 %9399 }
0x10e7   : > { %v5569_v27 = vmul.f32 %v10248_v23, %v5564_v14  ;;  %v5570_v47 = vmul.f32 %v10253_v26, %v5552_v57  ;;  %v9402_v55 = vunpack.i.h.bf16 %v9400_v41  ;;  %v9401_v44 = vunpack.i.l.bf16 %v9400_v41 }
0x10e8   : > { %v5639_v14 = vsel %vm614_vm8, %v12772_v35, %v12774_v31 }
0x10e9   : > { %v12788_v3 = vpack.c.bf16 %v5569_v27, %v5567_v11  ;;  %v12790_v45 = vpack.c.bf16 %v5570_v47, %v5568_v6  ;;  %v5628_v51 = vpop.permute.xlu1 %5627  ;;  %v5600_v0 = vsel %vm573_vm3, %v9401_v44, %v9402_v55  ;;  %v12826_v32 = vpack.c.bf16 %v9401_v44, %v9396_v33 }
0x10ea   : > { %v5630_v1 = vpop.permute.xlu0 %5629  ;;  %v12814_v43 = vpack.c.bf16 %v5600_v0, %v5599_v24  ;;  %v5652_v6 = vsel %vm614_vm8, 0.0, %v5628_v51 }
0x10eb   : > { %5983 = vmatprep.subr.bf16.mxu1 %v12790_v45  ;;  %6769 = vmatprep.subr.bf16.mxu0 %v12790_v45  ;;  %v5640_v58 = vsel %vm614_vm8, %v5628_v51, %v5630_v1  ;;  %v5657_v31 = vmul.f32 %v10317_v25, %v5652_v6 }
0x10ec   : > { %5984 = vmatpush1.bf16.msra.mxu1 %v12788_v3  ;;  %6770 = vmatpush1.bf16.msra.mxu0 %v12788_v3  ;;  %v5658_v27 = vmul.f32 %v14241_v61, %v5640_v58 }
0x10ed   : > { %v5544_v59 = vpop.permute.xlu1 %5543 }
0x10ee   : > { %v5546_v49 = vpop.permute.xlu0 %5545  ;;  %v5565_v22 = vsel %vm524_vm1, 0.0, %v5544_v59 }
0x10ef   : > { %v5553_v37 = vsel %vm524_vm1, %v5544_v59, %v5546_v49  ;;  %v5571_v52 = vmul.f32 %v10248_v23, %v5565_v22  ;;  %v5651_v49 = vsel %vm614_vm8, 0.0, %v12772_v35 }
0x10f0   : > { %v5572_v16 = vmul.f32 %v10253_v26, %v5553_v37 }
0x10f1   : > { %v12796_v54 = vpop.permute.xlu1 %5631 }
0x10f2   : > { %v5634_v19 = vpop.permute.xlu0 %5633 }
0x10f3   : > { %v5641_v51 = vsel %vm614_vm8, %v12796_v54, %v5634_v19  ;;  %v5653_v19 = vsel %vm614_vm8, 0.0, %v12796_v54 }
0x10f4   : > { %v5659_v24 = vmul.f32 %v10317_v25, %v5653_v19  ;;  %v12936_v19 = vpack.c.bf16 %v12651_v10, %v12631_v39 }
0x10f5   : > { %v9405_v13 = vpop.permute.xlu1 %9404 }
0x10f6   : > { %v5678_v20 = vpop.permute.xlu0 %5677  ;;  %v9407_v38 = vunpack.i.h.bf16 %v9405_v13  ;;  %v9406_v42 = vunpack.i.l.bf16 %v9405_v13  ;;  %v5656_v13 = vmul.f32 %v14241_v61, %v5639_v14 }
0x10f8   : > { %v5601_v47 = vsel %vm573_vm3, %v9406_v42, %v9407_v38  ;;  %v12853_v22 = vpack.c.bf16 %v5658_v27, %v5656_v13 }
0x10f9   : > { %v5548_v21 = vpop.permute.xlu1 %5547 }
0x10fa   : > { %v5566_v56 = vsel %vm524_vm1, 0.0, %v5548_v21  ;;  %v5550_v46 = vpop.permute.xlu0 %5549 }
0x10fb   : > { %v5573_v30 = vmul.f32 %v10248_v23, %v5566_v56  ;;  %v5554_v40 = vsel %vm524_vm1, %v5548_v21, %v5550_v46  ;;  %v5655_v46 = vmul.f32 %v10317_v25, %v5651_v49 }
0x10fc   : > { %v5574_v7 = vmul.f32 %v10253_v26, %v5554_v40 }
0x10fd   : > { %v5676_v9 = vpop.permute.xlu1 %5675  ;;  %v12812_v62 = vpack.c.bf16 %v5573_v30, %v5571_v52  ;;  %v5660_v30 = vmul.f32 %v14241_v61, %v5641_v51 }
0x10fe   : > { %v12807_v5 = vpack.c.bf16 %v5574_v7, %v5572_v16  ;;  %v12809_v29 = vpop.permute.xlu0 %5681  ;;  %v5688_v48 = vsel %vm663_vm9, %v5676_v9, %v5678_v20  ;;  %v5687_v20 = vsel %vm663_vm9, %v12776_v60, %v12778_v2  ;;  %v12877_v16 = vpack.c.bf16 %v5657_v31, %v5655_v46 }
0x10ff   : > { %v5700_v0 = vsel %vm663_vm9, 0.0, %v5676_v9  ;;  %v5706_v54 = vmul.f32 %v10253_v26, %v5688_v48  ;;  %v5699_v2 = vsel %vm663_vm9, 0.0, %v12776_v60  ;;  %v5704_v38 = vmul.f32 %v10253_v26, %v5687_v20 }
0x1100   : > { %5985 = vmatprep.subr.bf16.mxu1 %v12807_v5  ;;  %6771 = vmatprep.subr.bf16.mxu0 %v12807_v5  ;;  %v5705_v9 = vmul.f32 %v10248_v23, %v5700_v0  ;;  %v5703_v6 = vmul.f32 %v10248_v23, %v5699_v2 }
0x1101   : > { %5986 = vmatpush1.bf16.msra.mxu1 %v12812_v62  ;;  %6772 = vmatpush1.bf16.msra.mxu0 %v12812_v62  ;;  %v12820_v34 = vpop.permute.xlu1 %5679 }
0x1102   : > { %v12822_v4 = vpop.permute.xlu0 %5733  ;;  %5987 = vmatprep.subr.bf16.mxu1 %v12814_v43  ;;  %6773 = vmatprep.subr.bf16.mxu0 %v12814_v43 }
0x1103   : > { %v5756_v48 = vsel %vm720_vm10, %v12822_v4, 0.0 }
0x1105   : > { %v5636_v28 = vpop.permute.xlu1 %5635  ;;  %8680 = vmatpush1.bf16.msk.msra.mxu1 %vm10292_vm5, %v12826_v32  ;;  %8720 = vmatpush1.bf16.msk.msra.mxu0 %vm10292_vm5, %v12826_v32 }
0x1106   : > { %v9410_v57 = vpop.permute.xlu0 %9409  ;;  %v5654_v56 = vsel %vm614_vm8, 0.0, %v5636_v28 }
0x1107   : > { %v9412_v41 = vunpack.i.h.bf16 %v9410_v57  ;;  %v9411_v11 = vunpack.i.l.bf16 %v9410_v57  ;;  %v5661_v7 = vmul.f32 %v10317_v25, %v5654_v56 }
0x1109   : > { %v5602_v1 = vsel %vm573_vm3, %v9411_v11, %v9412_v41  ;;  %v5684_v59 = vpop.permute.xlu1 %5683  ;;  %v12850_v37 = vpack.c.bf16 %v9411_v11, %v9406_v42  ;;  %v12896_v57 = vpack.c.bf16 %v5661_v7, %v5659_v24  ;;  %v12899_v41 = vpack.c.bf16 %v5706_v54, %v5704_v38 }
0x110a   : > { %v12845_v55 = vpack.c.bf16 %v5602_v1, %v5601_v47  ;;  %v5638_v44 = vpop.permute.xlu0 %5637  ;;  %v5702_v60 = vsel %vm663_vm9, 0.0, %v5684_v59  ;;  %v12942_v7 = vpack.c.bf16 %v12691_v12, %v12672_v8  ;;  %v5762_v54 = vmul.f32 %v14241_v61, %v5756_v48 }
0x110b   : > { %v5642_v21 = vsel %vm614_vm8, %v5636_v28, %v5638_v44  ;;  %v5689_v28 = vsel %vm663_vm9, %v12820_v34, %v12809_v29  ;;  %v5701_v29 = vsel %vm663_vm9, 0.0, %v12820_v34  ;;  %v5709_v49 = vmul.f32 %v10248_v23, %v5702_v60 }
0x110c   : > { %v5662_v35 = vmul.f32 %v14241_v61, %v5642_v21  ;;  %5989 = vmatprep.subr.bf16.mxu1 %v12845_v55  ;;  %6775 = vmatprep.subr.bf16.mxu0 %v12845_v55  ;;  %v5708_v47 = vmul.f32 %v10253_v26, %v5689_v28  ;;  %v5707_v44 = vmul.f32 %v10248_v23, %v5701_v29 }
0x110d   : > { %v5730_v33 = vpop.permute.xlu1 %5729  ;;  %8685 = vmatpush1.bf16.msk.msra.mxu1 %vm10292_vm5, %v12850_v37  ;;  %8725 = vmatpush1.bf16.msk.msra.mxu0 %vm10292_vm5, %v12850_v37  ;;  %v12925_v21 = vpack.c.bf16 %v12654_v53, %v12634_v18 }
0x110e   : > { %v12870_v40 = vpop.permute.xlu0 %5731  ;;  %5991 = vmatprep.subr.bf16.mxu1 %v12853_v22  ;;  %6777 = vmatprep.subr.bf16.mxu0 %v12853_v22  ;;  %v12882_v52 = vpack.c.bf16 %v5662_v35, %v5660_v30  ;;  %v12921_v51 = vpack.c.bf16 %v5709_v49, %v5707_v44  ;;  %v5755_v56 = vsel %vm720_vm10, %v5730_v33, 0.0 }
0x110f   : > { %v5760_v30 = vmul.f32 %v14241_v61, %v5755_v56  ;;  %v5744_v24 = vsel %vm720_vm10, %v12870_v40, %v12822_v4 }
0x1110   : > { %v5761_v40 = vmul.f32 %v10317_v25, %v5744_v24 }
0x1111   : > { %v5728_v58 = vpop.permute.xlu1 %5727  ;;  %5992 = vmatpush1.bf16.msra.mxu1 %v12877_v16  ;;  %6778 = vmatpush1.bf16.msra.mxu0 %v12877_v16 }
0x1112   : > { %v5686_v42 = vpop.permute.xlu0 %5685  ;;  %5993 = vmatprep.subr.bf16.mxu1 %v12882_v52  ;;  %6779 = vmatprep.subr.bf16.mxu0 %v12882_v52  ;;  %v5743_v20 = vsel %vm720_vm10, %v5728_v58, %v5730_v33 }
0x1113   : > { %v5690_v14 = vsel %vm663_vm9, %v5684_v59, %v5686_v42  ;;  %v12911_v59 = vpack.c.bf16 %v5705_v9, %v5703_v6  ;;  %v5759_v33 = vmul.f32 %v10317_v25, %v5743_v20  ;;  %v12957_v42 = vpack.c.bf16 %v12688_v36, %v12669_v50 }
0x1114   : > { %v5710_v11 = vmul.f32 %v10253_v26, %v5690_v14  ;;  %v12959_v9 = vpack.c.bf16 %v5762_v54, %v5760_v30 }
0x1115   : > { %v5738_v27 = vpop.permute.xlu1 %5737  ;;  %5994 = vmatpush1.bf16.msra.mxu1 %v12896_v57  ;;  %6780 = vmatpush1.bf16.msra.mxu0 %v12896_v57 }
0x1116   : > { %v5740_v1 = vpop.permute.xlu0 %5739  ;;  %5995 = vmatprep.subr.bf16.mxu1 %v12899_v41  ;;  %6781 = vmatprep.subr.bf16.mxu0 %v12899_v41  ;;  %v12914_v13 = vpack.c.bf16 %v5710_v11, %v5708_v47  ;;  %v5757_v58 = vsel %vm720_vm10, %v5738_v27, 0.0  ;;  %v12971_v47 = vpack.c.bf16 %v5761_v40, %v5759_v33 }
0x1117   : > { %v5764_v11 = vmul.f32 %v14241_v61, %v5757_v58 }
0x1119   : > { %v5736_v31 = vpop.permute.xlu1 %5735  ;;  %5996 = vmatpush1.bf16.msra.mxu1 %v12911_v59  ;;  %6782 = vmatpush1.bf16.msra.mxu0 %v12911_v59 }
0x111a   : > { %v5782_v34 = vpop.permute.xlu0 %5781  ;;  %5997 = vmatprep.subr.bf16.mxu1 %v12914_v13  ;;  %6783 = vmatprep.subr.bf16.mxu0 %v12914_v13  ;;  %v5745_v6 = vsel %vm720_vm10, %v5736_v31, %v5738_v27 }
0x111b   : > { %v5763_v30 = vmul.f32 %v10317_v25, %v5745_v6 }
0x111d   : > { %v5778_v35 = vpop.permute.xlu1 %5777  ;;  %5998 = vmatpush1.bf16.msra.mxu1 %v12921_v51  ;;  %6784 = vmatpush1.bf16.msra.mxu0 %v12921_v51 }
0x111e   : > { %v5780_v46 = vpop.permute.xlu0 %5779  ;;  %5999 = vmatprep.subr.bf16.mxu1 %v12925_v21  ;;  %6785 = vmatprep.subr.bf16.mxu0 %v12925_v21  ;;  %v5803_v14 = vsel %vm769_vm11, %v5778_v35, 0.0 }
0x111f   : > { %v5808_v44 = vmul.f32 %v10253_v26, %v5803_v14  ;;  %v5792_v20 = vsel %vm769_vm11, %v5780_v46, %v5782_v34 }
0x1120   : > { %v5809_v46 = vmul.f32 %v10248_v23, %v5792_v20 }
0x1121   : > { %v5776_v0 = vpop.permute.xlu1 %5775  ;;  %6000 = vmatpush1.bf16.msra.mxu1 %v12936_v19  ;;  %6786 = vmatpush1.bf16.msra.mxu0 %v12936_v19 }
0x1122   : > { %v5742_v2 = vpop.permute.xlu0 %5741  ;;  %6001 = vmatprep.subr.bf16.mxu1 %v12942_v7  ;;  %6787 = vmatprep.subr.bf16.mxu0 %v12942_v7  ;;  %v5791_v56 = vsel %vm769_vm11, %v5776_v0, %v5778_v35 }
0x1123   : > { %v5758_v38 = vsel %vm720_vm10, %v5742_v2, 0.0  ;;  %v5746_v28 = vsel %vm720_vm10, %v5740_v1, %v5742_v2  ;;  %v5804_v1 = vsel %vm769_vm11, %v5782_v34, 0.0  ;;  %v5807_v35 = vmul.f32 %v10248_v23, %v5791_v56 }
0x1124   : > { %v5766_v4 = vmul.f32 %v14241_v61, %v5758_v38  ;;  %v5765_v49 = vmul.f32 %v10317_v25, %v5746_v28  ;;  %v5810_v31 = vmul.f32 %v10253_v26, %v5804_v1 }
0x1125   : > { %v5786_v60 = vpop.permute.xlu1 %5785  ;;  %6002 = vmatpush1.bf16.msra.mxu1 %v12957_v42  ;;  %6788 = vmatpush1.bf16.msra.mxu0 %v12957_v42  ;;  %v13002_v14 = vpack.c.bf16 %v5809_v46, %v5807_v35 }
0x1126   : > { %v5788_v29 = vpop.permute.xlu0 %5787  ;;  %6003 = vmatprep.subr.bf16.mxu1 %v12959_v9  ;;  %6789 = vmatprep.subr.bf16.mxu0 %v12959_v9  ;;  %v12977_v48 = vpack.c.bf16 %v5766_v4, %v5764_v11  ;;  %v5805_v54 = vsel %vm769_vm11, %v5786_v60, 0.0  ;;  %v12988_v0 = vpack.c.bf16 %v5765_v49, %v5763_v30  ;;  %v12991_v33 = vpack.c.bf16 %v5810_v31, %v5808_v44 }
0x1127   : > { %v5812_v28 = vmul.f32 %v10253_v26, %v5805_v54 }
0x1129   : > { %v5784_v27 = vpop.permute.xlu1 %5783  ;;  %6004 = vmatpush1.bf16.msra.mxu1 %v12971_v47  ;;  %6790 = vmatpush1.bf16.msra.mxu0 %v12971_v47 }
0x112a   : > { %v5790_v24 = vpop.permute.xlu0 %5789  ;;  %6005 = vmatprep.subr.bf16.mxu1 %v12977_v48  ;;  %6791 = vmatprep.subr.bf16.mxu0 %v12977_v48  ;;  %v5793_v58 = vsel %vm769_vm11, %v5784_v27, %v5786_v60 }
0x112b   : > { %v5806_v2 = vsel %vm769_vm11, %v5790_v24, 0.0  ;;  %v5794_v38 = vsel %vm769_vm11, %v5788_v29, %v5790_v24  ;;  %v5811_v60 = vmul.f32 %v10248_v23, %v5793_v58 }
0x112c   : > { %v5814_v34 = vmul.f32 %v10253_v26, %v5806_v2  ;;  %v5813_v11 = vmul.f32 %v10248_v23, %v5794_v38 }
0x112d   : > { %v9415_v4 = vpop.permute.xlu1 %9414  ;;  %6006 = vmatpush1.bf16.msra.mxu1 %v12988_v0  ;;  %6792 = vmatpush1.bf16.msra.mxu0 %v12988_v0 }
0x112e   : > { %v9420_v40 = vpop.permute.xlu0 %9419  ;;  %6007 = vmatprep.subr.bf16.mxu1 %v12991_v33  ;;  %6793 = vmatprep.subr.bf16.mxu0 %v12991_v33  ;;  %v13006_v6 = vpack.c.bf16 %v5814_v34, %v5812_v28  ;;  %v9417_v29 = vunpack.i.h.bf16 %v9415_v4  ;;  %v9416_v1 = vunpack.i.l.bf16 %v9415_v4  ;;  %v13012_v27 = vpack.c.bf16 %v5813_v11, %v5811_v60 }
0x112f   : > { %v9422_v49 = vunpack.i.h.bf16 %v9420_v40  ;;  %v9421_v44 = vunpack.i.l.bf16 %v9420_v40 }
0x1130   : > { %v5839_v31 = vsel %vm818_vm12, %v9416_v1, %v9417_v29 }
0x1131   : > { %v9425_v56 = vpop.permute.xlu1 %9424  ;;  %6008 = vmatpush1.bf16.msra.mxu1 %v13002_v14  ;;  %6794 = vmatpush1.bf16.msra.mxu0 %v13002_v14  ;;  %v5840_v20 = vsel %vm818_vm12, %v9421_v44, %v9422_v49  ;;  %v13016_v54 = vpack.c.bf16 %v9422_v49, %v9417_v29 }
0x1132   : > { %v5870_v30 = vpop.permute.xlu0 %5869  ;;  %6009 = vmatprep.subr.bf16.mxu1 %v13006_v6  ;;  %6795 = vmatprep.subr.bf16.mxu0 %v13006_v6  ;;  %v9427_v24 = vunpack.i.h.bf16 %v9425_v56  ;;  %v9426_v35 = vunpack.i.l.bf16 %v9425_v56  ;;  %v13027_v34 = vpack.c.bf16 %v5840_v20, %v5839_v31 }
0x1133   : > { %v5892_v46 = vsel %vm859_vm14, %v5870_v30, 0.0 }
0x1134   : > { %v5841_v60 = vsel %vm818_vm12, %v9426_v35, %v9427_v24  ;;  %v5898_v49 = vmul.f32 %v14241_v61, %v5892_v46  ;;  %v9608_v46 = vld [vmem:[#allocation9 + $0x50] ss:$20 sps:$4 sm:$0xff]  }
0x1135   : > { %v5866_v2 = vpop.permute.xlu1 %5865  ;;  %6010 = vmatpush1.bf16.msra.mxu1 %v13012_v27  ;;  %6796 = vmatpush1.bf16.msra.mxu0 %v13012_v27 }
0x1136   : > { %v5891_v58 = vsel %vm859_vm14, %v5866_v2, 0.0  ;;  %v9430_v38 = vpop.permute.xlu0 %9429  ;;  %8688 = vmatprep.subr.msk.bf16.mxu1 %vm10488_vm13, %v13016_v54  ;;  %8728 = vmatprep.subr.msk.bf16.mxu0 %vm10488_vm13, %v13016_v54 }
0x1137   : > { %v9432_v28 = vunpack.i.h.bf16 %v9430_v38  ;;  %v9431_v4 = vunpack.i.l.bf16 %v9430_v38  ;;  %v5896_v40 = vmul.f32 %v14241_v61, %v5891_v58  ;;  %v9605_v38 = vld [vmem:[#allocation4 + $0x30] ss:$12 sps:$4 sm:$0xff]  }
0x1139   : > { %v5842_v11 = vsel %vm818_vm12, %v9431_v4, %v9432_v28  ;;  %v13033_v29 = vpack.c.bf16 %v9432_v28, %v9427_v24  ;;  %v5864_v1 = vpop.permute.xlu1 %5863  ;;  %6012 = vmatpush1.bf16.msra.mxu1 %v13027_v34  ;;  %6798 = vmatpush1.bf16.msra.mxu0 %v13027_v34  ;;  %v13049_v24 = vpack.c.bf16 %v5898_v49, %v5896_v40 }
0x113a   : > { %v13038_v44 = vpack.c.bf16 %v5842_v11, %v5841_v60  ;;  %v5879_v56 = vsel %vm859_vm14, %v5864_v1, %v5866_v2  ;;  %v5868_v31 = vpop.permute.xlu0 %5867 }
0x113b   : > { %v5895_v20 = vmul.f32 %v10317_v25, %v5879_v56  ;;  %v5880_v35 = vsel %vm859_vm14, %v5868_v31, %v5870_v30  ;;  %8691 = vmatprep.subr.msk.bf16.mxu1 %vm10488_vm13, %v13033_v29  ;;  %8731 = vmatprep.subr.msk.bf16.mxu0 %vm10488_vm13, %v13033_v29  ;;  %14287 = vst [vmem:[#allocation44_spill] sm:$0xff] %v13049_v24 }
0x113c   : > { %v5897_v58 = vmul.f32 %v10317_v25, %v5880_v35 }
0x113d   : > { %v5874_v2 = vpop.permute.xlu1 %5873  ;;  %6014 = vmatpush1.bf16.msra.mxu1 %v13038_v44  ;;  %6800 = vmatpush1.bf16.msra.mxu0 %v13038_v44 }
0x113e   : > { %v13054_v30 = vpack.c.bf16 %v5897_v58, %v5895_v20  ;;  %v5893_v28 = vsel %vm859_vm14, %v5874_v2, 0.0  ;;  %v5878_v4 = vpop.permute.xlu0 %5877  ;;  %6026 = vmatprep.subr.bf16.mxu1 %v13049_v24  ;;  %6812 = vmatprep.subr.bf16.mxu0 %v13049_v24 }
0x113f   : > { %v5900_v40 = vmul.f32 %v14241_v61, %v5893_v28  ;;  %v5894_v60 = vsel %vm859_vm14, %v5878_v4, 0.0  ;;  %v9612_v28 = vld [vmem:[#allocation7 + $0x40] ss:$16 sps:$4 sm:$0xff]  }
0x1140   : > { %14288 = vst [vmem:[#allocation45_spill] sm:$0xff] %v13054_v30  ;;  %v5902_v11 = vmul.f32 %v14241_v61, %v5894_v60  ;;  %6016 = vmatmul.mubr.bf16.vlgmr.msra.gmra.mrb[24].mxu1 %v9605_v38  ;;  %6802 = vmatmul.mubr.bf16.vlgmr.msra.gmra.mrb[24].mxu0 %v9608_v46  ;;  %v9611_v46 = vld [vmem:[#allocation4 + $0x38] ss:$12 sps:$4 sm:$0xff]  }
0x1141   : > { %v5872_v1 = vpop.permute.xlu1 %5871  ;;  %6027 = vmatpush1.bf16.msra.mxu1 %v13054_v30  ;;  %6813 = vmatpush1.bf16.msra.mxu0 %v13054_v30 }
0x1142   : > { %v13064_v49 = vpack.c.bf16 %v5902_v11, %v5900_v40  ;;  %v5881_v56 = vsel %vm859_vm14, %v5872_v1, %v5874_v2  ;;  %v5876_v31 = vpop.permute.xlu0 %5875  ;;  %6058 = vmatprep.mubr.bf16.mxu1 %v14244_v15  ;;  %v9614_v2 = vld [vmem:[#allocation7 + $0x44] ss:$16 sps:$4 sm:$0xff]  }
0x1143   : > { %v5899_v20 = vmul.f32 %v10317_v25, %v5881_v56  ;;  %v5882_v35 = vsel %vm859_vm14, %v5876_v31, %v5878_v4 }
0x1144   : > { %14289 = vst [vmem:[#allocation47_spill] sm:$0xff] %v13064_v49  ;;  %v5901_v58 = vmul.f32 %v10317_v25, %v5882_v35  ;;  %6028 = vmatprep.subr.bf16.mxu1 %v13064_v49  ;;  %6814 = vmatprep.subr.bf16.mxu0 %v13064_v49 }
0x1146   : > { %v13073_v38 = vpack.c.bf16 %v5901_v58, %v5899_v20 }
0x1148   : > { %14290 = vst [vmem:[#allocation39_spill] sm:$0xff] %v13073_v38  ;;  %6029 = vmatpush1.bf16.msra.mxu1 %v13073_v38  ;;  %6815 = vmatpush1.bf16.msra.mxu0 %v13073_v38 }
0x1149   : > { %6363 = vmatprep.subr.bf16.mxu1 %v12790_v45 }
0x114c   : > { %8298 = vmatmul.mubr.msk.bf16.vlgmr.msra.gmra.mrb[24].mxu1 %vm959_vm15, %v9611_v46 }
0x114d   : > { %6364 = vmatpush1.bf16.msra.mxu1 %v12788_v3  ;;  %6395 = vmatprep.mubr.bf16.mxu1 %v9614_v2 }
0x114e   : > { %6365 = vmatprep.subr.bf16.mxu1 %v12807_v5 }
0x1151   : > { %6366 = vmatpush1.bf16.msra.mxu1 %v12812_v62 }
0x1152   : > { %6367 = vmatprep.subr.bf16.mxu1 %v12814_v43  ;;  %v5958_v4 = vpop.permute.xlu1 %5957 }
0x1153   : > { %v5963_v1 = vpop.permute.xlu0 %5962 }
0x1155   : > { %8696 = vmatpush1.bf16.msk.msra.mxu1 %vm10292_vm5, %v12826_v32 }
0x1156   : > { %6369 = vmatprep.subr.bf16.mxu1 %v12845_v55 }
0x1159   : > { %8701 = vmatpush1.bf16.msk.msra.mxu1 %vm10292_vm5, %v12850_v37 }
0x115a   : > { %6371 = vmatprep.subr.bf16.mxu1 %v12853_v22 }
0x115d   : > { %6372 = vmatpush1.bf16.msra.mxu1 %v12877_v16 }
0x115e   : > { %6373 = vmatprep.subr.bf16.mxu1 %v12882_v52 }
0x1161   : > { %6374 = vmatpush1.bf16.msra.mxu1 %v12896_v57 }
0x1162   : > { %6375 = vmatprep.subr.bf16.mxu1 %v12899_v41 }
0x1165   : > { %6376 = vmatpush1.bf16.msra.mxu1 %v12911_v59 }
0x1166   : > { %6377 = vmatprep.subr.bf16.mxu1 %v12914_v13 }
0x1169   : > { %6378 = vmatpush1.bf16.msra.mxu1 %v12921_v51 }
0x116a   : > { %6379 = vmatprep.subr.bf16.mxu1 %v12925_v21 }
0x116d   : > { %6380 = vmatpush1.bf16.msra.mxu1 %v12936_v19 }
0x116e   : > { %6381 = vmatprep.subr.bf16.mxu1 %v12942_v7 }
0x1171   : > { %6382 = vmatpush1.bf16.msra.mxu1 %v12957_v42 }
0x1172   : > { %6383 = vmatprep.subr.bf16.mxu1 %v12959_v9 }
0x1175   : > { %6384 = vmatpush1.bf16.msra.mxu1 %v12971_v47 }
0x1176   : > { %6385 = vmatprep.subr.bf16.mxu1 %v12977_v48 }
0x1179   : > { %6386 = vmatpush1.bf16.msra.mxu1 %v12988_v0 }
0x117a   : > { %6387 = vmatprep.subr.bf16.mxu1 %v12991_v33 }
0x117d   : > { %6388 = vmatpush1.bf16.msra.mxu1 %v13002_v14 }
0x117e   : > { %6389 = vmatprep.subr.bf16.mxu1 %v13006_v6 }
0x1181   : > { %6390 = vmatpush1.bf16.msra.mxu1 %v13012_v27 }
0x1182   : > { %8704 = vmatprep.subr.msk.bf16.mxu1 %vm10488_vm13, %v13016_v54 }
0x1185   : > { %6392 = vmatpush1.bf16.msra.mxu1 %v13027_v34 }
0x1186   : > { %8707 = vmatprep.subr.msk.bf16.mxu1 %vm10488_vm13, %v13033_v29 }
0x1189   : > { %6394 = vmatpush1.bf16.msra.mxu1 %v13038_v44 }
0x118a   : > { %6406 = vmatprep.subr.bf16.mxu1 %v13049_v24 }
0x118c   : > { %6396 = vmatmul.mubr.bf16.vlgmr.msra.gmra.mrb[28].mxu1 %v9612_v28 }
0x118d   : > { %6407 = vmatpush1.bf16.msra.mxu1 %v13054_v30 }
0x118e   : > { %6408 = vmatprep.subr.bf16.mxu1 %v13064_v49 }
0x1191   : > { %6409 = vmatpush1.bf16.msra.mxu1 %v13073_v38 }
0x121f   : > { %v6060_v40 = vpop.f32.mrb[24].mxu1 }
0x1220   : > { %v8884_v60 = vadd.f32 %v6060_v40, %v5958_v4  ;;  %v6062_v11 = vpop.f32.mrb[25].mxu1 }
0x1221   : > { %v8885_v56 = vadd.f32 %v6062_v11, %v5958_v4  ;;  %v6064_v31 = vpop.f32.mrb[26].mxu1 }
0x1222   : > { %v6069_v20 = vmul.f32 0.2, %v8884_v60  ;;  %v8886_v35 = vadd.f32 %v6064_v31, %v5963_v1  ;;  %v6066_v58 = vpop.f32.mrb[27].mxu1 }
0x1223   : > { %v6070_v46 = vmul.f32 0.2, %v8885_v56  ;;  %v8887_v2 = vadd.f32 %v6066_v58, %v5963_v1  ;;  %v8300_v1 = vld [vmem:[%s13979_s7 + $0x28] sm:$0xff] }
0x1224   : > { %v6073_v12 = vmax.f32 %v8884_v60, %v6069_v20  ;;  %v6071_v28 = vmul.f32 0.2, %v8886_v35  ;;  %v8299_v60 = vld [vmem:[%s13979_s7 + $0x20] sm:$0xff] }
0x1225   : > { %v6074_v36 = vmax.f32 %v8885_v56, %v6070_v46  ;;  %v6072_v8 = vmul.f32 0.2, %v8887_v2 }
0x1226   : > { %v6075_v50 = vmax.f32 %v8886_v35, %v6071_v28  ;;  %6081 = vrot.lane.b32.xlu1 %v6073_v12, %s9859_s19 }
0x1227   : > { %v6076_v53 = vmax.f32 %v8887_v2, %v6072_v8  ;;  %6083 = vrot.lane.b32.xlu0 %v6074_v36, %s9859_s19  ;;  %v9433_v40 = vpack.i.bf16 %v6074_v36, %v6073_v12  ;;  %v9615_v8 = vld [vmem:[#allocation7 + $0x4c] ss:$16 sps:$4 sm:$0xff]  }
0x1228   : > { %v13124_v10 = vpack.c.bf16 %v6075_v50, %v6073_v12  ;;  %8305 = vmatprep.mubr.msk.bf16.mxu1 %vm1338_vm0, %v9615_v8 }
0x1229   : > { %v9438_v4 = vpack.i.bf16 %v6076_v53, %v6075_v50  ;;  %v13126_v11 = vpack.c.bf16 %v6076_v53, %v6074_v36 }
0x122a   : > { %14291 = vst [vmem:[#allocation28_spill] sm:$0xff] %v13124_v10  ;;  %6125 = vrot.lane.b32.xlu1 %v6073_v12, %s9861_s25 }
0x122b   : > { %14292 = vst [vmem:[#allocation49_spill] sm:$0xff] %v13126_v11  ;;  %6127 = vrot.lane.b32.xlu0 %v6074_v36, %s9861_s25 }
0x122e   : > { %6149 = vrot.lane.b32.xlu1 %v6073_v12, %s9862_s14 }
0x122f   : > { %6151 = vrot.lane.b32.xlu0 %v6074_v36, %s9862_s14 }
0x1232   : > { %9434 = vrot.lane.b32.xlu1 %v9433_v40, %s9860_s24 }
0x1233   : > { %6181 = vrot.lane.b32.xlu0 %v6075_v50, %s9863_s16 }
0x1236   : > { %6085 = vrot.lane.b32.xlu1 %v6075_v50, %s9859_s19 }
0x1237   : > { %6087 = vrot.lane.b32.xlu0 %v6076_v53, %s9859_s19 }
0x123a   : > { %6179 = vrot.lane.b32.xlu1 %v6074_v36, %s9863_s16 }
0x123b   : > { %9439 = vrot.lane.b32.xlu0 %v9438_v4, %s9860_s24 }
0x123e   : > { %6129 = vrot.lane.b32.xlu1 %v6075_v50, %s9861_s25 }
0x123f   : > { %6131 = vrot.lane.b32.xlu0 %v6076_v53, %s9861_s25 }
0x1242   : > { %6153 = vrot.lane.b32.xlu1 %v6075_v50, %s9862_s14 }
0x1243   : > { %6155 = vrot.lane.b32.xlu0 %v6076_v53, %s9862_s14 }
0x1246   : > { %6177 = vrot.lane.b32.xlu1 %v6073_v12, %s9863_s16 }
0x1247   : > { %6205 = vrot.lane.b32.xlu0 %v6075_v50, %s9864_s12 }
0x124a   : > { %6203 = vrot.lane.b32.xlu1 %v6074_v36, %s9864_s12 }
0x124b   : > { %6183 = vrot.lane.b32.xlu0 %v6076_v53, %s9863_s16 }
0x124e   : > { %6201 = vrot.lane.b32.xlu1 %v6073_v12, %s9864_s12 }
0x124f   : > { %6207 = vrot.lane.b32.xlu0 %v6076_v53, %s9864_s12 }
0x1252   : > { %9444 = vrot.lane.b32.xlu1 %v9433_v40, %s9865_s15 }
0x1253   : > { %9449 = vrot.lane.b32.xlu0 %v9438_v4, %s9865_s15 }
0x1256   : > { %6247 = vrot.lane.b32.xlu1 %v6074_v36, %s9866_s22 }
0x1257   : > { %6251 = vrot.lane.b32.xlu0 %v6076_v53, %s9866_s22 }
0x125a   : > { %6245 = vrot.lane.b32.xlu1 %v6073_v12, %s9866_s22 }
0x125b   : > { %6249 = vrot.lane.b32.xlu0 %v6075_v50, %s9866_s22 }
0x125e   : > { %6333 = vperm.xlu1 %9192, %v8299_v60  }
0x125f   : > { %6338 = vperm.xlu0 %9191, %v8300_v1  }
0x1298   : > { %v6082_v56 = vpop.permute.xlu1 %6081 }
0x1299   : > { %v6084_v36 = vpop.permute.xlu0 %6083  ;;  %v6095_v2 = vsel %vm524_vm1, 0.0, %v6082_v56 }
0x129a   : > { %v6089_v50 = vsel %vm524_vm1, %v6082_v56, %v6084_v36  ;;  %v6097_v18 = vmul.f32 %v10248_v23, %v6095_v2 }
0x129b   : > { %v6098_v60 = vmul.f32 %v10253_v26, %v6089_v50 }
0x129c   : > { %v6126_v31 = vpop.permute.xlu1 %6125 }
0x129d   : > { %v6128_v20 = vpop.permute.xlu0 %6127 }
0x129e   : > { %v6133_v50 = vsel %vm614_vm8, %v6126_v31, %v6128_v20 }
0x12a0   : > { %v6150_v35 = vpop.permute.xlu1 %6149 }
0x12a1   : > { %v6152_v53 = vpop.permute.xlu0 %6151 }
0x12a4   : > { %v9435_v58 = vpop.permute.xlu1 %9434 }
0x12a5   : > { %v13161_v12 = vpop.permute.xlu0 %6181  ;;  %v9437_v39 = vunpack.i.h.bf16 %v9435_v58  ;;  %v9436_v15 = vunpack.i.l.bf16 %v9435_v58 }
0x12a8   : > { %v6086_v46 = vpop.permute.xlu1 %6085 }
0x12a9   : > { %v6096_v28 = vsel %vm524_vm1, 0.0, %v6086_v46  ;;  %v6088_v40 = vpop.permute.xlu0 %6087 }
0x12aa   : > { %v6099_v4 = vmul.f32 %v10248_v23, %v6096_v28  ;;  %v6090_v8 = vsel %vm524_vm1, %v6086_v46, %v6088_v40  ;;  %v6113_v46 = vsel %vm573_vm3, %v9436_v15, %v9437_v39 }
0x12ab   : > { %v6100_v1 = vmul.f32 %v10253_v26, %v6090_v8 }
0x12ac   : > { %v6180_v38 = vpop.permute.xlu1 %6179  ;;  %v13173_v56 = vpack.c.bf16 %v6099_v4, %v6097_v18  ;;  %v6139_v18 = vsel %vm614_vm8, 0.0, %v6126_v31 }
0x12ad   : > { %v13171_v36 = vpack.c.bf16 %v6100_v1, %v6098_v60  ;;  %v9440_v49 = vpop.permute.xlu0 %9439  ;;  %v6141_v31 = vmul.f32 %v10317_v25, %v6139_v18  ;;  %v6157_v60 = vsel %vm663_vm9, %v6150_v35, %v6152_v53 }
0x12ae   : > { %14294 = vst [vmem:[#allocation24_spill] sm:$0xff] %v13173_v56  ;;  %v9442_v30 = vunpack.i.h.bf16 %v9440_v49  ;;  %v9441_v24 = vunpack.i.l.bf16 %v9440_v49  ;;  %v6166_v18 = vmul.f32 %v10253_v26, %v6157_v60 }
0x12af   : > { %14293 = vst [vmem:[#allocation48_spill] sm:$0xff] %v13171_v36  ;;  %6410 = vmatprep.subr.bf16.mxu1 %v13171_v36  ;;  %6816 = vmatprep.subr.bf16.mxu0 %v13171_v36 }
0x12b0   : > { %v6114_v2 = vsel %vm573_vm3, %v9441_v24, %v9442_v30  ;;  %6411 = vmatpush1.bf16.msra.mxu1 %v13173_v56  ;;  %6817 = vmatpush1.bf16.msra.mxu0 %v13173_v56  ;;  %v6130_v58 = vpop.permute.xlu1 %6129  ;;  %v13186_v4 = vpack.c.bf16 %v9441_v24, %v9436_v15  ;;  %v6142_v30 = vmul.f32 %v14241_v61, %v6133_v50  ;;  %v6163_v15 = vsel %vm663_vm9, 0.0, %v6150_v35 }
0x12b1   : > { %v6140_v28 = vsel %vm614_vm8, 0.0, %v6130_v58  ;;  %v6132_v49 = vpop.permute.xlu0 %6131  ;;  %v13184_v40 = vpack.c.bf16 %v6114_v2, %v6113_v46  ;;  %v6165_v35 = vmul.f32 %v10248_v23, %v6163_v15 }
0x12b2   : > { %14296 = vst [vmem:[#allocation50_spill] sm:$0xff] %v13186_v4  ;;  %v6143_v20 = vmul.f32 %v10317_v25, %v6140_v28  ;;  %v6134_v39 = vsel %vm614_vm8, %v6130_v58, %v6132_v49 }
0x12b3   : > { %14295 = vst [vmem:[#allocation46_spill] sm:$0xff] %v13184_v40  ;;  %v6144_v8 = vmul.f32 %v14241_v61, %v6134_v39  ;;  %6412 = vmatprep.subr.bf16.mxu1 %v13184_v40  ;;  %6818 = vmatprep.subr.bf16.mxu0 %v13184_v40 }
0x12b4   : > { %v6154_v1 = vpop.permute.xlu1 %6153  ;;  %8712 = vmatpush1.bf16.msk.msra.mxu1 %vm10292_vm5, %v13186_v4  ;;  %8736 = vmatpush1.bf16.msk.msra.mxu0 %vm10292_vm5, %v13186_v4  ;;  %v13206_v2 = vpack.c.bf16 %v6143_v20, %v6141_v31 }
0x12b5   : > { %v13203_v24 = vpack.c.bf16 %v6144_v8, %v6142_v30  ;;  %v6164_v50 = vsel %vm663_vm9, 0.0, %v6154_v1  ;;  %v6156_v46 = vpop.permute.xlu0 %6155  ;;  %v6191_v8 = vsel %vm720_vm10, %v6180_v38, 0.0 }
0x12b6   : > { %14298 = vst [vmem:[#allocation52_spill] sm:$0xff] %v13206_v2  ;;  %v6167_v53 = vmul.f32 %v10248_v23, %v6164_v50  ;;  %v6158_v58 = vsel %vm663_vm9, %v6154_v1, %v6156_v46  ;;  %v6194_v46 = vmul.f32 %v14241_v61, %v6191_v8 }
0x12b7   : > { %14297 = vst [vmem:[#allocation51_spill] sm:$0xff] %v13203_v24  ;;  %v6168_v28 = vmul.f32 %v10253_v26, %v6158_v58  ;;  %6414 = vmatprep.subr.bf16.mxu1 %v13203_v24  ;;  %6820 = vmatprep.subr.bf16.mxu0 %v13203_v24 }
0x12b8   : > { %v6178_v49 = vpop.permute.xlu1 %6177  ;;  %6415 = vmatpush1.bf16.msra.mxu1 %v13206_v2  ;;  %6821 = vmatpush1.bf16.msra.mxu0 %v13206_v2  ;;  %v13219_v30 = vpack.c.bf16 %v6167_v53, %v6165_v35 }
0x12b9   : > { %v13217_v20 = vpack.c.bf16 %v6168_v28, %v6166_v18  ;;  %v6206_v39 = vpop.permute.xlu0 %6205  ;;  %v6185_v31 = vsel %vm720_vm10, %v6178_v49, %v6180_v38 }
0x12ba   : > { %14300 = vst [vmem:[#allocation55_spill] sm:$0xff] %v13219_v30  ;;  %v6193_v53 = vmul.f32 %v10317_v25, %v6185_v31 }
0x12bb   : > { %14299 = vst [vmem:[#allocation53_spill] sm:$0xff] %v13217_v20  ;;  %6416 = vmatprep.subr.bf16.mxu1 %v13217_v20  ;;  %6822 = vmatprep.subr.bf16.mxu0 %v13217_v20 }
0x12bc   : > { %v6204_v60 = vpop.permute.xlu1 %6203  ;;  %6417 = vmatpush1.bf16.msra.mxu1 %v13219_v30  ;;  %6823 = vmatpush1.bf16.msra.mxu0 %v13219_v30 }
0x12bd   : > { %v6184_v1 = vpop.permute.xlu0 %6183  ;;  %6418 = vmatprep.subr.bf16.mxu1 %v13126_v11  ;;  %6824 = vmatprep.subr.bf16.mxu0 %v13126_v11  ;;  %v6215_v18 = vsel %vm769_vm11, %v6204_v60, 0.0 }
0x12be   : > { %v6186_v15 = vsel %vm720_vm10, %v13161_v12, %v6184_v1  ;;  %v6192_v50 = vsel %vm720_vm10, %v6184_v1, 0.0 }
0x12bf   : > { %v6195_v38 = vmul.f32 %v10317_v25, %v6186_v15  ;;  %v6196_v58 = vmul.f32 %v14241_v61, %v6192_v50  ;;  %v6218_v50 = vmul.f32 %v10253_v26, %v6215_v18 }
0x12c0   : > { %v6202_v28 = vpop.permute.xlu1 %6201  ;;  %6419 = vmatpush1.bf16.msra.mxu1 %v13124_v10  ;;  %6825 = vmatpush1.bf16.msra.mxu0 %v13124_v10 }
0x12c1   : > { %v13239_v35 = vpack.c.bf16 %v6195_v38, %v6193_v53  ;;  %v13241_v12 = vpack.c.bf16 %v6196_v58, %v6194_v46  ;;  %v6209_v49 = vsel %vm769_vm11, %v6202_v28, %v6204_v60  ;;  %v6208_v8 = vpop.permute.xlu0 %6207 }
0x12c2   : > { %v6217_v31 = vmul.f32 %v10248_v23, %v6209_v49  ;;  %v6210_v1 = vsel %vm769_vm11, %v6206_v39, %v6208_v8  ;;  %v6216_v15 = vsel %vm769_vm11, %v6208_v8, 0.0 }
0x12c3   : > { %14301 = vst [vmem:[#allocation56_spill] sm:$0xff] %v13239_v35  ;;  %14302 = vst [vmem:[#allocation57_spill] sm:$0xff] %v13241_v12  ;;  %v6219_v11 = vmul.f32 %v10248_v23, %v6210_v1  ;;  %v6220_v30 = vmul.f32 %v10253_v26, %v6216_v15  ;;  %6420 = vmatprep.subr.bf16.mxu1 %v13241_v12  ;;  %6826 = vmatprep.subr.bf16.mxu0 %v13241_v12 }
0x12c4   : > { %v9445_v46 = vpop.permute.xlu1 %9444  ;;  %6421 = vmatpush1.bf16.msra.mxu1 %v13239_v35  ;;  %6827 = vmatpush1.bf16.msra.mxu0 %v13239_v35 }
0x12c5   : > { %v13254_v60 = vpack.c.bf16 %v6219_v11, %v6217_v31  ;;  %v13256_v39 = vpack.c.bf16 %v6220_v30, %v6218_v50  ;;  %v9447_v53 = vunpack.i.h.bf16 %v9445_v46  ;;  %v9446_v38 = vunpack.i.l.bf16 %v9445_v46  ;;  %v9450_v58 = vpop.permute.xlu0 %9449 }
0x12c6   : > { %v9452_v18 = vunpack.i.h.bf16 %v9450_v58  ;;  %v9451_v28 = vunpack.i.l.bf16 %v9450_v58 }
0x12c7   : > { %14303 = vst [vmem:[#allocation54_spill] sm:$0xff] %v13254_v60  ;;  %14304 = vst [vmem:[#allocation35_spill] sm:$0xff] %v13256_v39  ;;  %v6233_v49 = vsel %vm818_vm12, %v9446_v38, %v9447_v53  ;;  %6422 = vmatprep.subr.bf16.mxu1 %v13256_v39  ;;  %6828 = vmatprep.subr.bf16.mxu0 %v13256_v39 }
0x12c8   : > { %v6234_v8 = vsel %vm818_vm12, %v9451_v28, %v9452_v18  ;;  %v13262_v1 = vpack.c.bf16 %v9452_v18, %v9447_v53  ;;  %v6248_v15 = vpop.permute.xlu1 %6247  ;;  %6423 = vmatpush1.bf16.msra.mxu1 %v13254_v60  ;;  %6829 = vmatpush1.bf16.msra.mxu0 %v13254_v60 }
0x12c9   : > { %v6259_v11 = vsel %vm859_vm14, %v6248_v15, 0.0  ;;  %v6252_v30 = vpop.permute.xlu0 %6251  ;;  %v13267_v31 = vpack.c.bf16 %v6234_v8, %v6233_v49 }
0x12ca   : > { %14305 = vst [vmem:[#allocation25_spill] sm:$0xff] %v13262_v1  ;;  %v6262_v50 = vmul.f32 %v14241_v61, %v6259_v11  ;;  %v6260_v46 = vsel %vm859_vm14, %v6252_v30, 0.0  ;;  %8715 = vmatprep.subr.msk.bf16.mxu1 %vm10488_vm13, %v13262_v1  ;;  %8739 = vmatprep.subr.msk.bf16.mxu0 %vm10488_vm13, %v13262_v1 }
0x12cb   : > { %14306 = vst [vmem:[#allocation26_spill] sm:$0xff] %v13267_v31  ;;  %v6264_v53 = vmul.f32 %v14241_v61, %v6260_v46  ;;  %v9617_v61 = vld [vmem:[#allocation7 + $0x48] ss:$16 sps:$4 sm:$0xff]  }
0x12cc   : > { %v6246_v38 = vpop.permute.xlu1 %6245  ;;  %6425 = vmatpush1.bf16.msra.mxu1 %v13267_v31  ;;  %6831 = vmatpush1.bf16.msra.mxu0 %v13267_v31 }
0x12cd   : > { %v13280_v58 = vpack.c.bf16 %v6264_v53, %v6262_v50  ;;  %v6253_v18 = vsel %vm859_vm14, %v6246_v38, %v6248_v15  ;;  %v6250_v28 = vpop.permute.xlu0 %6249  ;;  %v9620_v15 = vld [vmem:[%s13976_s4 + $0x64] ss:$24 sps:$4 sm:$0xff]   ;;  %v14311_v53 = vld [vmem:[#allocation47_spill] sm:$0xff] }
0x12ce   : > { %v6261_v49 = vmul.f32 %v10317_v25, %v6253_v18  ;;  %v6254_v8 = vsel %vm859_vm14, %v6250_v28, %v6252_v30  ;;  %v14309_v30 = vld [vmem:[#allocation44_spill] sm:$0xff]  ;;  %v14310_v50 = vld [vmem:[#allocation45_spill] sm:$0xff]  ;;  %v14312_v38 = vld [vmem:[#allocation39_spill] sm:$0xff] }
0x12cf   : > { %14307 = vst [vmem:[#allocation27_spill] sm:$0xff] %v13280_v58  ;;  %v6263_v11 = vmul.f32 %v10317_v25, %v6254_v8  ;;  %6426 = vmatprep.subr.bf16.mxu1 %v13280_v58  ;;  %6832 = vmatprep.subr.bf16.mxu0 %v13280_v58  ;;  %v14313_v18 = vld [vmem:[#allocation55_spill] sm:$0xff]  ;;  %v14314_v28 = vld [vmem:[#allocation49_spill] sm:$0xff] }
0x12d1   : > { %v13288_v46 = vpack.c.bf16 %v6263_v11, %v6261_v49 }
0x12d3   : > { %14308 = vst [vmem:[#allocation30_spill] sm:$0xff] %v13288_v46  ;;  %6427 = vmatpush1.bf16.msra.mxu1 %v13288_v46  ;;  %6833 = vmatpush1.bf16.msra.mxu0 %v13288_v46 }
0x12d4   : > { %7240 = vmatprep.subr.bf16.mxu1 %v12790_v45 }
0x12d6   : > { %6439 = vmatmul.mubr.bf16.vlgmr.msra.gmra.mrb[28].mxu1 %v9617_v61  ;;  %v9618_v61 = vld [vmem:[%s13976_s4 + $0x60] ss:$24 sps:$4 sm:$0xff]  }
0x12d7   : > { %7241 = vmatpush1.bf16.msra.mxu1 %v12788_v3  ;;  %7272 = vmatprep.mubr.bf16.mxu1 %v9620_v15 }
0x12d8   : > { %7242 = vmatprep.subr.bf16.mxu1 %v12807_v5 }
0x12db   : > { %7243 = vmatpush1.bf16.msra.mxu1 %v12812_v62 }
0x12dc   : > { %7244 = vmatprep.subr.bf16.mxu1 %v12814_v43 }
0x12dd   : > { %v6334_v49 = vpop.permute.xlu1 %6333 }
0x12df   : > { %8752 = vmatpush1.bf16.msk.msra.mxu1 %vm10292_vm5, %v12826_v32 }
0x12e0   : > { %7246 = vmatprep.subr.bf16.mxu1 %v12845_v55 }
0x12e3   : > { %8757 = vmatpush1.bf16.msk.msra.mxu1 %vm10292_vm5, %v12850_v37 }
0x12e4   : > { %7248 = vmatprep.subr.bf16.mxu1 %v12853_v22 }
0x12e7   : > { %7249 = vmatpush1.bf16.msra.mxu1 %v12877_v16 }
0x12e8   : > { %7250 = vmatprep.subr.bf16.mxu1 %v12882_v52 }
0x12eb   : > { %7251 = vmatpush1.bf16.msra.mxu1 %v12896_v57 }
0x12ec   : > { %7252 = vmatprep.subr.bf16.mxu1 %v12899_v41 }
0x12ef   : > { %7253 = vmatpush1.bf16.msra.mxu1 %v12911_v59 }
0x12f0   : > { %7254 = vmatprep.subr.bf16.mxu1 %v12914_v13 }
0x12f3   : > { %7255 = vmatpush1.bf16.msra.mxu1 %v12921_v51 }
0x12f4   : > { %7256 = vmatprep.subr.bf16.mxu1 %v12925_v21 }
0x12f7   : > { %7257 = vmatpush1.bf16.msra.mxu1 %v12936_v19 }
0x12f8   : > { %7258 = vmatprep.subr.bf16.mxu1 %v12942_v7 }
0x12fb   : > { %7259 = vmatpush1.bf16.msra.mxu1 %v12957_v42 }
0x12fc   : > { %7260 = vmatprep.subr.bf16.mxu1 %v12959_v9 }
0x12ff   : > { %7261 = vmatpush1.bf16.msra.mxu1 %v12971_v47 }
0x1300   : > { %7262 = vmatprep.subr.bf16.mxu1 %v12977_v48 }
0x1303   : > { %7263 = vmatpush1.bf16.msra.mxu1 %v12988_v0 }
0x1304   : > { %7264 = vmatprep.subr.bf16.mxu1 %v12991_v33 }
0x1307   : > { %7265 = vmatpush1.bf16.msra.mxu1 %v13002_v14 }
0x1308   : > { %7266 = vmatprep.subr.bf16.mxu1 %v13006_v6 }
0x130b   : > { %7267 = vmatpush1.bf16.msra.mxu1 %v13012_v27 }
0x130c   : > { %8760 = vmatprep.subr.msk.bf16.mxu1 %vm10488_vm13, %v13016_v54 }
0x130f   : > { %7269 = vmatpush1.bf16.msra.mxu1 %v13027_v34 }
0x1310   : > { %8763 = vmatprep.subr.msk.bf16.mxu1 %vm10488_vm13, %v13033_v29 }
0x1313   : > { %7271 = vmatpush1.bf16.msra.mxu1 %v13038_v44 }
0x1314   : > { %7283 = vmatprep.subr.bf16.mxu1 %v14309_v30 }
0x1316   : > { %7273 = vmatmul.mubr.bf16.vlgmr.msra.gmra.mrb[32].mxu1 %v9618_v61  ;;  %v6339_v61 = vpop.permute.xlu0 %6338 }
0x1317   : > { %7284 = vmatpush1.bf16.msra.mxu1 %v14310_v50 }
0x1318   : > { %7285 = vmatprep.subr.bf16.mxu1 %v14311_v53 }
0x131b   : > { %7286 = vmatpush1.bf16.msra.mxu1 %v14312_v38 }
0x131c   : > { %7287 = vmatprep.subr.bf16.mxu1 %v13171_v36 }
0x131f   : > { %7288 = vmatpush1.bf16.msra.mxu1 %v13173_v56 }
0x1320   : > { %7289 = vmatprep.subr.bf16.mxu1 %v13184_v40 }
0x1323   : > { %8768 = vmatpush1.bf16.msk.msra.mxu1 %vm10292_vm5, %v13186_v4 }
0x1324   : > { %7291 = vmatprep.subr.bf16.mxu1 %v13203_v24 }
0x1327   : > { %7292 = vmatpush1.bf16.msra.mxu1 %v13206_v2 }
0x1328   : > { %7293 = vmatprep.subr.bf16.mxu1 %v13217_v20 }
0x132b   : > { %7294 = vmatpush1.bf16.msra.mxu1 %v14313_v18 }
0x132c   : > { %7295 = vmatprep.subr.bf16.mxu1 %v14314_v28 }
0x132f   : > { %7296 = vmatpush1.bf16.msra.mxu1 %v13124_v10 }
0x1330   : > { %7297 = vmatprep.subr.bf16.mxu1 %v13241_v12 }
0x1333   : > { %7298 = vmatpush1.bf16.msra.mxu1 %v13239_v35 }
0x1334   : > { %7299 = vmatprep.subr.bf16.mxu1 %v13256_v39 }
0x1337   : > { %7300 = vmatpush1.bf16.msra.mxu1 %v13254_v60 }
0x1338   : > { %8771 = vmatprep.subr.msk.bf16.mxu1 %vm10488_vm13, %v13262_v1 }
0x133b   : > { %7302 = vmatpush1.bf16.msra.mxu1 %v13267_v31 }
0x133c   : > { %7303 = vmatprep.subr.bf16.mxu1 %v13280_v58 }
0x133f   : > { %7304 = vmatpush1.bf16.msra.mxu1 %v13288_v46 }
0x13a9   : > { %v6440_v8 = vpop.f32.mrb[28].mxu1 }
0x13aa   : > { %v8888_v11 = vadd.f32 %v6440_v8, %v6334_v49  ;;  %v6442_v15 = vpop.f32.mrb[29].mxu1 }
0x13ab   : > { %v8889_v35 = vadd.f32 %v6442_v15, %v6334_v49  ;;  %v6444_v12 = vpop.f32.mrb[30].mxu1 }
0x13ac   : > { %v6449_v39 = vmul.f32 0.2, %v8888_v11  ;;  %v8890_v10 = vadd.f32 %v6444_v12, %v6339_v61  ;;  %v6446_v60 = vpop.f32.mrb[31].mxu1  ;;  %v8306_v12 = vld [vmem:[%s13980_s8 + $0x20] sm:$0xff] }
0x13ad   : > { %v6450_v28 = vmul.f32 0.2, %v8889_v35  ;;  %v8891_v18 = vadd.f32 %v6446_v60, %v6339_v61  ;;  %v8307_v60 = vld [vmem:[%s13980_s8 + $0x28] sm:$0xff] }
0x13ae   : > { %v6453_v20 = vmax.f32 %v8888_v11, %v6449_v39  ;;  %v6451_v1 = vmul.f32 0.2, %v8890_v10 }
0x13af   : > { %v6454_v2 = vmax.f32 %v8889_v35, %v6450_v28  ;;  %v6452_v31 = vmul.f32 0.2, %v8891_v18  ;;  %v9626_v35 = vld [vmem:[%s13976_s4 + $0x6c] ss:$24 sps:$4 sm:$0xff]  }
0x13b0   : > { %v6455_v24 = vmax.f32 %v8890_v10, %v6451_v1  ;;  %6461 = vrot.lane.b32.xlu1 %v6453_v20, %s9859_s19  ;;  %v9623_v10 = vld [vmem:[#allocation9 + $0x5c] ss:$20 sps:$4 sm:$0xff]   ;;  %7315 = vmatprep.mubr.bf16.mxu1 %v9626_v35 }
0x13b1   : > { %v6456_v46 = vmax.f32 %v8891_v18, %v6452_v31  ;;  %6463 = vrot.lane.b32.xlu0 %v6454_v2, %s9859_s19  ;;  %v9453_v8 = vpack.i.bf16 %v6454_v2, %v6453_v20  ;;  %6844 = vmatprep.mubr.bf16.mxu0 %v9623_v10 }
0x13b2   : > { %v13366_v58 = vpack.c.bf16 %v6455_v24, %v6453_v20 }
0x13b3   : > { %v9458_v49 = vpack.i.bf16 %v6456_v46, %v6455_v24  ;;  %v13368_v15 = vpack.c.bf16 %v6456_v46, %v6454_v2 }
0x13b4   : > { %14315 = vst [vmem:[#allocation31_spill] sm:$0xff] %v13366_v58  ;;  %6505 = vrot.lane.b32.xlu1 %v6453_v20, %s9861_s25 }
0x13b5   : > { %14316 = vst [vmem:[#allocation32_spill] sm:$0xff] %v13368_v15  ;;  %6507 = vrot.lane.b32.xlu0 %v6454_v2, %s9861_s25 }
0x13b8   : > { %6529 = vrot.lane.b32.xlu1 %v6453_v20, %s9862_s14 }
0x13b9   : > { %6531 = vrot.lane.b32.xlu0 %v6454_v2, %s9862_s14 }
0x13bc   : > { %9454 = vrot.lane.b32.xlu1 %v9453_v8, %s9860_s24 }
0x13bd   : > { %6561 = vrot.lane.b32.xlu0 %v6455_v24, %s9863_s16 }
0x13c0   : > { %6465 = vrot.lane.b32.xlu1 %v6455_v24, %s9859_s19 }
0x13c1   : > { %6467 = vrot.lane.b32.xlu0 %v6456_v46, %s9859_s19 }
0x13c4   : > { %6559 = vrot.lane.b32.xlu1 %v6454_v2, %s9863_s16 }
0x13c5   : > { %9459 = vrot.lane.b32.xlu0 %v9458_v49, %s9860_s24 }
0x13c8   : > { %6509 = vrot.lane.b32.xlu1 %v6455_v24, %s9861_s25 }
0x13c9   : > { %6511 = vrot.lane.b32.xlu0 %v6456_v46, %s9861_s25 }
0x13cc   : > { %6533 = vrot.lane.b32.xlu1 %v6455_v24, %s9862_s14 }
0x13cd   : > { %6535 = vrot.lane.b32.xlu0 %v6456_v46, %s9862_s14 }
0x13d0   : > { %6557 = vrot.lane.b32.xlu1 %v6453_v20, %s9863_s16 }
0x13d1   : > { %6585 = vrot.lane.b32.xlu0 %v6455_v24, %s9864_s12 }
0x13d4   : > { %6583 = vrot.lane.b32.xlu1 %v6454_v2, %s9864_s12 }
0x13d5   : > { %6563 = vrot.lane.b32.xlu0 %v6456_v46, %s9863_s16 }
0x13d8   : > { %6581 = vrot.lane.b32.xlu1 %v6453_v20, %s9864_s12 }
0x13d9   : > { %6587 = vrot.lane.b32.xlu0 %v6456_v46, %s9864_s12 }
0x13dc   : > { %9464 = vrot.lane.b32.xlu1 %v9453_v8, %s9865_s15 }
0x13dd   : > { %9469 = vrot.lane.b32.xlu0 %v9458_v49, %s9865_s15 }
0x13e0   : > { %6627 = vrot.lane.b32.xlu1 %v6454_v2, %s9866_s22 }
0x13e1   : > { %6631 = vrot.lane.b32.xlu0 %v6456_v46, %s9866_s22 }
0x13e4   : > { %6625 = vrot.lane.b32.xlu1 %v6453_v20, %s9866_s22 }
0x13e5   : > { %6629 = vrot.lane.b32.xlu0 %v6455_v24, %s9866_s22 }
0x13e8   : > { %6733 = vperm.xlu1 %9192, %v8306_v12  }
0x13e9   : > { %6738 = vperm.xlu0 %9191, %v8307_v60  }
0x1422   : > { %v6462_v39 = vpop.permute.xlu1 %6461 }
0x1423   : > { %v6464_v1 = vpop.permute.xlu0 %6463  ;;  %v6475_v61 = vsel %vm524_vm1, 0.0, %v6462_v39 }
0x1424   : > { %v6469_v24 = vsel %vm524_vm1, %v6462_v39, %v6464_v1  ;;  %v6477_v4 = vmul.f32 %v10248_v23, %v6475_v61 }
0x1425   : > { %v6478_v12 = vmul.f32 %v10253_v26, %v6469_v24 }
0x1426   : > { %v6506_v31 = vpop.permute.xlu1 %6505 }
0x1427   : > { %v6508_v2 = vpop.permute.xlu0 %6507 }
0x1428   : > { %v6513_v24 = vsel %vm614_vm8, %v6506_v31, %v6508_v2 }
0x142a   : > { %v6530_v18 = vpop.permute.xlu1 %6529 }
0x142b   : > { %v6532_v46 = vpop.permute.xlu0 %6531 }
0x142e   : > { %v9455_v28 = vpop.permute.xlu1 %9454 }
0x142f   : > { %v13405_v20 = vpop.permute.xlu0 %6561  ;;  %v9457_v40 = vunpack.i.h.bf16 %v9455_v28  ;;  %v9456_v56 = vunpack.i.l.bf16 %v9455_v28 }
0x1431   : > { %v6493_v28 = vsel %vm573_vm3, %v9456_v56, %v9457_v40 }
0x1432   : > { %v6466_v11 = vpop.permute.xlu1 %6465 }
0x1433   : > { %v6476_v8 = vsel %vm524_vm1, 0.0, %v6466_v11  ;;  %v6468_v49 = vpop.permute.xlu0 %6467 }
0x1434   : > { %v6479_v10 = vmul.f32 %v10248_v23, %v6476_v8  ;;  %v6470_v35 = vsel %vm524_vm1, %v6466_v11, %v6468_v49 }
0x1435   : > { %v6480_v60 = vmul.f32 %v10253_v26, %v6470_v35 }
0x1436   : > { %v6560_v36 = vpop.permute.xlu1 %6559  ;;  %v13417_v39 = vpack.c.bf16 %v6479_v10, %v6477_v4  ;;  %v6519_v4 = vsel %vm614_vm8, 0.0, %v6506_v31 }
0x1437   : > { %v9460_v1 = vpop.permute.xlu0 %9459  ;;  %v13415_v38 = vpack.c.bf16 %v6480_v60, %v6478_v12  ;;  %v14318_v60 = vld [vmem:[#allocation23_spill] sm:$0xff]  ;;  %v6521_v40 = vmul.f32 %v10317_v25, %v6519_v4 }
0x1438   : > { %14317 = vst [vmem:[#allocation33_spill] sm:$0xff] %v13417_v39  ;;  %v9462_v53 = vunpack.i.h.bf16 %v9460_v1  ;;  %v9461_v50 = vunpack.i.l.bf16 %v9460_v1  ;;  %v6522_v1 = vmul.f32 %v14318_v60, %v6513_v24 }
0x1439   : > { %6834 = vmatprep.subr.bf16.mxu0 %v13415_v38  ;;  %7305 = vmatprep.subr.bf16.mxu1 %v13415_v38 }
0x143a   : > { %6835 = vmatpush1.bf16.msra.mxu0 %v13417_v39  ;;  %7306 = vmatpush1.bf16.msra.mxu1 %v13417_v39  ;;  %v6510_v11 = vpop.permute.xlu1 %6509  ;;  %v6494_v61 = vsel %vm573_vm3, %v9461_v50, %v9462_v53  ;;  %v13430_v35 = vpack.c.bf16 %v9461_v50, %v9456_v56  ;;  %v6537_v53 = vsel %vm663_vm9, %v6530_v18, %v6532_v46  ;;  %v6543_v56 = vsel %vm663_vm9, 0.0, %v6530_v18 }
0x143b   : > { %v6520_v8 = vsel %vm614_vm8, 0.0, %v6510_v11  ;;  %v6512_v49 = vpop.permute.xlu0 %6511  ;;  %v13428_v10 = vpack.c.bf16 %v6494_v61, %v6493_v28  ;;  %v6546_v4 = vmul.f32 %v10253_v26, %v6537_v53  ;;  %v6545_v18 = vmul.f32 %v10248_v23, %v6543_v56 }
0x143c   : > { %v6523_v2 = vmul.f32 %v10317_v25, %v6520_v8  ;;  %v6514_v12 = vsel %vm614_vm8, %v6510_v11, %v6512_v49 }
0x143d   : > { %v6524_v39 = vmul.f32 %v14318_v60, %v6514_v12  ;;  %6836 = vmatprep.subr.bf16.mxu0 %v13428_v10  ;;  %7307 = vmatprep.subr.bf16.mxu1 %v13428_v10 }
0x143e   : > { %v6534_v31 = vpop.permute.xlu1 %6533  ;;  %8744 = vmatpush1.bf16.msk.msra.mxu0 %vm10292_vm5, %v13430_v35  ;;  %8776 = vmatpush1.bf16.msk.msra.mxu1 %vm10292_vm5, %v13430_v35  ;;  %v13450_v28 = vpack.c.bf16 %v6523_v2, %v6521_v40 }
0x143f   : > { %v6544_v50 = vsel %vm663_vm9, 0.0, %v6534_v31  ;;  %v6536_v24 = vpop.permute.xlu0 %6535  ;;  %v13448_v11 = vpack.c.bf16 %v6524_v39, %v6522_v1  ;;  %v6571_v1 = vsel %vm720_vm10, %v6560_v36, 0.0 }
0x1440   : > { %v6547_v46 = vmul.f32 %v10248_v23, %v6544_v50  ;;  %v6538_v61 = vsel %vm663_vm9, %v6534_v31, %v6536_v24  ;;  %v6574_v24 = vmul.f32 %v14318_v60, %v6571_v1 }
0x1441   : > { %v6548_v8 = vmul.f32 %v10253_v26, %v6538_v61  ;;  %6838 = vmatprep.subr.bf16.mxu0 %v13448_v11  ;;  %7309 = vmatprep.subr.bf16.mxu1 %v13448_v11 }
0x1442   : > { %v6558_v49 = vpop.permute.xlu1 %6557  ;;  %6839 = vmatpush1.bf16.msra.mxu0 %v13450_v28  ;;  %7310 = vmatpush1.bf16.msra.mxu1 %v13450_v28  ;;  %v13463_v12 = vpack.c.bf16 %v6547_v46, %v6545_v18  ;;  %v9621_v18 = vld [vmem:[#allocation9 + $0x58] ss:$20 sps:$4 sm:$0xff]  }
0x1443   : > { %v6586_v39 = vpop.permute.xlu0 %6585  ;;  %v13461_v2 = vpack.c.bf16 %v6548_v8, %v6546_v4  ;;  %v6565_v40 = vsel %vm720_vm10, %v6558_v49, %v6560_v36 }
0x1444   : > { %14320 = vst [vmem:[#allocation44_spill] sm:$0xff] %v13463_v12  ;;  %v6573_v46 = vmul.f32 %v10317_v25, %v6565_v40 }
0x1445   : > { %14319 = vst [vmem:[#allocation34_spill] sm:$0xff] %v13461_v2  ;;  %6840 = vmatprep.subr.bf16.mxu0 %v13461_v2  ;;  %7311 = vmatprep.subr.bf16.mxu1 %v13461_v2 }
0x1446   : > { %v6584_v53 = vpop.permute.xlu1 %6583  ;;  %6841 = vmatpush1.bf16.msra.mxu0 %v13463_v12  ;;  %7312 = vmatpush1.bf16.msra.mxu1 %v13463_v12 }
0x1447   : > { %v6564_v31 = vpop.permute.xlu0 %6563  ;;  %6842 = vmatprep.subr.bf16.mxu0 %v13368_v15  ;;  %7313 = vmatprep.subr.bf16.mxu1 %v13368_v15  ;;  %v6595_v4 = vsel %vm769_vm11, %v6584_v53, 0.0 }
0x1448   : > { %v6566_v56 = vsel %vm720_vm10, %v13405_v20, %v6564_v31  ;;  %v6572_v50 = vsel %vm720_vm10, %v6564_v31, 0.0  ;;  %v9624_v20 = vld [vmem:[%s13976_s4 + $0x68] ss:$24 sps:$4 sm:$0xff]  }
0x1449   : > { %v6575_v36 = vmul.f32 %v10317_v25, %v6566_v56  ;;  %v6576_v61 = vmul.f32 %v14318_v60, %v6572_v50 }
0x144a   : > { %v6582_v8 = vpop.permute.xlu1 %6581  ;;  %6843 = vmatpush1.bf16.msra.mxu0 %v13366_v58  ;;  %7314 = vmatpush1.bf16.msra.mxu1 %v13366_v58  ;;  %v6598_v58 = vmul.f32 %v10253_v26, %v6595_v4 }
0x144b   : > { %v13486_v49 = vpack.c.bf16 %v6575_v36, %v6573_v46  ;;  %v6589_v1 = vsel %vm769_vm11, %v6582_v8, %v6584_v53  ;;  %v6588_v40 = vpop.permute.xlu0 %6587  ;;  %v13489_v31 = vpack.c.bf16 %v6576_v61, %v6574_v24  ;;  %v14321_v8 = vmov 0  }
0x144c   : > { %v6597_v56 = vmul.f32 %v10248_v23, %v6589_v1  ;;  %v6590_v50 = vsel %vm769_vm11, %v6586_v39, %v6588_v40  ;;  %v6596_v15 = vsel %vm769_vm11, %v6588_v40, 0.0 }
0x144d   : > { %v6599_v12 = vmul.f32 %v10248_v23, %v6590_v50  ;;  %v6600_v2 = vmul.f32 %v10253_v26, %v6596_v15  ;;  %6855 = vmatprep.subr.bf16.mxu0 %v13489_v31  ;;  %7326 = vmatprep.subr.bf16.mxu1 %v13489_v31 }
0x144e   : > { %v9465_v53 = vpop.permute.xlu1 %9464  ;;  %6845 = vmatmul.mubr.bf16.vlgmr.msra.gmra.mrb[24].mxu0 %v9621_v18  ;;  %7316 = vmatmul.mubr.bf16.vlgmr.msra.gmra.mrb[32].mxu1 %v9624_v20 }
0x144f   : > { %v13499_v24 = vpack.c.bf16 %v6599_v12, %v6597_v56  ;;  %v9467_v46 = vunpack.i.h.bf16 %v9465_v53  ;;  %v9466_v36 = vunpack.i.l.bf16 %v9465_v53  ;;  %6856 = vmatpush1.bf16.msra.mxu0 %v13486_v49  ;;  %7327 = vmatpush1.bf16.msra.mxu1 %v13486_v49  ;;  %v9470_v39 = vpop.permute.xlu0 %9469  ;;  %v13503_v61 = vpack.c.bf16 %v6600_v2, %v6598_v58 }
0x1450   : > { %v9472_v4 = vunpack.i.h.bf16 %v9470_v39  ;;  %v9471_v15 = vunpack.i.l.bf16 %v9470_v39  ;;  %6887 = vmatprep.mubr.bf16.mxu0 %v14321_v8 }
0x1451   : > { %v6613_v1 = vsel %vm818_vm12, %v9466_v36, %v9467_v46  ;;  %6857 = vmatprep.subr.bf16.mxu0 %v13503_v61  ;;  %7328 = vmatprep.subr.bf16.mxu1 %v13503_v61 }
0x1452   : > { %v6614_v12 = vsel %vm818_vm12, %v9471_v15, %v9472_v4  ;;  %v13510_v18 = vpack.c.bf16 %v9472_v4, %v9467_v46  ;;  %v6628_v20 = vpop.permute.xlu1 %6627 }
0x1453   : > { %v13512_v40 = vpack.c.bf16 %v6614_v12, %v6613_v1  ;;  %v6639_v58 = vsel %vm859_vm14, %v6628_v20, 0.0  ;;  %6858 = vmatpush1.bf16.msra.mxu0 %v13499_v24  ;;  %7329 = vmatpush1.bf16.msra.mxu1 %v13499_v24  ;;  %v6632_v2 = vpop.permute.xlu0 %6631 }
0x1454   : > { %v6642_v56 = vmul.f32 %v14318_v60, %v6639_v58  ;;  %v6640_v50 = vsel %vm859_vm14, %v6632_v2, 0.0  ;;  %8747 = vmatprep.subr.msk.bf16.mxu0 %vm10488_vm13, %v13510_v18  ;;  %8779 = vmatprep.subr.msk.bf16.mxu1 %vm10488_vm13, %v13510_v18 }
0x1455   : > { %v6644_v53 = vmul.f32 %v14318_v60, %v6640_v50  ;;  %v9630_v50 = vld [vmem:[#allocation10 + $0xe4] ss:$28 sps:$4 sm:$0xff]  }
0x1456   : > { %v6626_v46 = vpop.permute.xlu1 %6625 }
0x1457   : > { %v6633_v36 = vsel %vm859_vm14, %v6626_v46, %v6628_v20  ;;  %6860 = vmatpush1.bf16.msra.mxu0 %v13512_v40  ;;  %7331 = vmatpush1.bf16.msra.mxu1 %v13512_v40  ;;  %v6630_v39 = vpop.permute.xlu0 %6629  ;;  %v13529_v4 = vpack.c.bf16 %v6644_v53, %v6642_v56  ;;  %v9627_v20 = vld [vmem:[#allocation9 + $0x60] ss:$20 sps:$4 sm:$0xff]  }
0x1458   : > { %v6641_v15 = vmul.f32 %v10317_v25, %v6633_v36  ;;  %v6634_v1 = vsel %vm859_vm14, %v6630_v39, %v6632_v2 }
0x1459   : > { %v6643_v12 = vmul.f32 %v10317_v25, %v6634_v1  ;;  %6861 = vmatprep.subr.bf16.mxu0 %v13529_v4  ;;  %7332 = vmatprep.subr.bf16.mxu1 %v13529_v4 }
0x145b   : > { %v13536_v58 = vpack.c.bf16 %v6643_v12, %v6641_v15  ;;  %v9637_v12 = vld [vmem:[%s13976_s4 + $0x74] ss:$24 sps:$4 sm:$0xff]  }
0x145c   : > { %8328 = vmatprep.mubr.msk.bf16.mxu1 %vm2213_vm4, %v9637_v12 }
0x145d   : > { %6862 = vmatpush1.bf16.msra.mxu0 %v13536_v58  ;;  %7333 = vmatpush1.bf16.msra.mxu1 %v13536_v58 }
0x145e   : > { %7795 = vmatprep.subr.bf16.mxu0 %v12790_v45  ;;  %v9631_v45 = vld [vmem:[#allocation10 + $0x11c] ss:$28 sps:$4 sm:$0xff]  }
0x1460   : > { %8313 = vmatmul.mubr.msk.bf16.vlgmr.msra.gmra.mrb[24].mxu0 %vm1743_vm2, %v9627_v20  ;;  %v8321_v20 = vld [vmem:[%s13981_s9 + $0x28] sm:$0xff] }
0x1461   : > { %7796 = vmatpush1.bf16.msra.mxu0 %v12788_v3  ;;  %7827 = vmatprep.mubr.bf16.mxu0 %v9630_v50  ;;  %v9628_v3 = vld [vmem:[#allocation10 + $0xe0] ss:$28 sps:$4 sm:$0xff]  }
0x1462   : > { %7797 = vmatprep.subr.bf16.mxu0 %v12807_v5  ;;  %v14322_v5 = vld [vmem:[#allocation45_spill] sm:$0xff] }
0x1465   : > { %7798 = vmatpush1.bf16.msra.mxu0 %v12812_v62  ;;  %v14323_v62 = vld [vmem:[#allocation47_spill] sm:$0xff] }
0x1466   : > { %7799 = vmatprep.subr.bf16.mxu0 %v12814_v43  ;;  %v9633_v43 = vld [vmem:[#allocation10 + $0x118] ss:$28 sps:$4 sm:$0xff]  }
0x1469   : > { %8792 = vmatpush1.bf16.msk.msra.mxu0 %vm10292_vm5, %v12826_v32  ;;  %v14324_v32 = vld [vmem:[#allocation39_spill] sm:$0xff] }
0x146a   : > { %7801 = vmatprep.subr.bf16.mxu0 %v12845_v55  ;;  %v9636_v55 = vld [vmem:[#allocation10 + $0xec] ss:$28 sps:$4 sm:$0xff]  }
0x146d   : > { %8797 = vmatpush1.bf16.msk.msra.mxu0 %vm10292_vm5, %v12850_v37  ;;  %v14325_v37 = vld [vmem:[#allocation48_spill] sm:$0xff] }
0x146e   : > { %7803 = vmatprep.subr.bf16.mxu0 %v12853_v22  ;;  %v14326_v22 = vld [vmem:[#allocation24_spill] sm:$0xff] }
0x1471   : > { %7804 = vmatpush1.bf16.msra.mxu0 %v12877_v16  ;;  %v14327_v16 = vld [vmem:[#allocation46_spill] sm:$0xff] }
0x1472   : > { %7805 = vmatprep.subr.bf16.mxu0 %v12882_v52  ;;  %v14328_v52 = vld [vmem:[#allocation50_spill] sm:$0xff] }
0x1475   : > { %7806 = vmatpush1.bf16.msra.mxu0 %v12896_v57  ;;  %v14329_v57 = vld [vmem:[#allocation51_spill] sm:$0xff] }
0x1476   : > { %7807 = vmatprep.subr.bf16.mxu0 %v12899_v41  ;;  %v14330_v41 = vld [vmem:[#allocation52_spill] sm:$0xff] }
0x1479   : > { %7808 = vmatpush1.bf16.msra.mxu0 %v12911_v59  ;;  %v14331_v59 = vld [vmem:[#allocation53_spill] sm:$0xff] }
0x147a   : > { %7809 = vmatprep.subr.bf16.mxu0 %v12914_v13  ;;  %v14332_v13 = vld [vmem:[#allocation55_spill] sm:$0xff] }
0x147d   : > { %7810 = vmatpush1.bf16.msra.mxu0 %v12921_v51  ;;  %v14333_v51 = vld [vmem:[#allocation49_spill] sm:$0xff] }
0x147e   : > { %7811 = vmatprep.subr.bf16.mxu0 %v12925_v21  ;;  %v14334_v21 = vld [vmem:[#allocation28_spill] sm:$0xff] }
0x1481   : > { %7812 = vmatpush1.bf16.msra.mxu0 %v12936_v19  ;;  %v14335_v19 = vld [vmem:[#allocation57_spill] sm:$0xff] }
0x1482   : > { %7813 = vmatprep.subr.bf16.mxu0 %v12942_v7  ;;  %v14336_v7 = vld [vmem:[#allocation56_spill] sm:$0xff] }
0x1485   : > { %7814 = vmatpush1.bf16.msra.mxu0 %v12957_v42  ;;  %v14337_v42 = vld [vmem:[#allocation35_spill] sm:$0xff] }
0x1486   : > { %7815 = vmatprep.subr.bf16.mxu0 %v12959_v9  ;;  %v14338_v9 = vld [vmem:[#allocation54_spill] sm:$0xff] }
0x1489   : > { %7816 = vmatpush1.bf16.msra.mxu0 %v12971_v47  ;;  %v14339_v47 = vld [vmem:[#allocation25_spill] sm:$0xff] }
0x148a   : > { %7817 = vmatprep.subr.bf16.mxu0 %v12977_v48  ;;  %v14340_v48 = vld [vmem:[#allocation26_spill] sm:$0xff] }
0x148d   : > { %7818 = vmatpush1.bf16.msra.mxu0 %v12988_v0  ;;  %v14341_v0 = vld [vmem:[#allocation27_spill] sm:$0xff] }
0x148e   : > { %7819 = vmatprep.subr.bf16.mxu0 %v12991_v33  ;;  %v14342_v33 = vld [vmem:[#allocation30_spill] sm:$0xff] }
0x1491   : > { %7820 = vmatpush1.bf16.msra.mxu0 %v13002_v14  ;;  %v14343_v14 = vld [vmem:[#allocation33_spill] sm:$0xff] }
0x1492   : > { %7821 = vmatprep.subr.bf16.mxu0 %v13006_v6  ;;  %v14344_v6 = vld [vmem:[#allocation34_spill] sm:$0xff] }
0x1495   : > { %7822 = vmatpush1.bf16.msra.mxu0 %v13012_v27  ;;  %v14345_v27 = vld [vmem:[#allocation44_spill] sm:$0xff] }
0x1496   : > { %8800 = vmatprep.subr.msk.bf16.mxu0 %vm10488_vm13, %v13016_v54  ;;  %v14346_v54 = vld [vmem:[#allocation32_spill] sm:$0xff] }
0x1499   : > { %7824 = vmatpush1.bf16.msra.mxu0 %v13027_v34  ;;  %v9634_v34 = vld [vmem:[#allocation10 + $0xe8] ss:$28 sps:$4 sm:$0xff]  }
0x149a   : > { %8803 = vmatprep.subr.msk.bf16.mxu0 %vm10488_vm13, %v13033_v29  ;;  %v14347_v29 = vld [vmem:[#allocation31_spill] sm:$0xff] }
0x149d   : > { %7826 = vmatpush1.bf16.msra.mxu0 %v13038_v44  ;;  %v6734_v44 = vpop.permute.xlu1 %6733 }
0x149e   : > { %7848 = vmatprep.subr.bf16.mxu0 %v14309_v30 }
0x14a0   : > { %7828 = vmatmul.mubr.bf16.vlgmr.msra.gmra.mrb[28].mxu0 %v9628_v3 }
0x14a1   : > { %7849 = vmatpush1.bf16.msra.mxu0 %v14322_v5  ;;  %7837 = vmatprep.mubr.bf16.mxu0 %v9631_v45 }
0x14a2   : > { %7850 = vmatprep.subr.bf16.mxu0 %v14323_v62 }
0x14a5   : > { %7851 = vmatpush1.bf16.msra.mxu0 %v14324_v32 }
0x14a6   : > { %7852 = vmatprep.subr.bf16.mxu0 %v14325_v37 }
0x14a8   : > { %7838 = vmatmul.mubr.bf16.gmra.mrb[32].mxu0 %v9633_v43 }
0x14a9   : > { %7853 = vmatpush1.bf16.msra.mxu0 %v14326_v22  ;;  %7880 = vmatprep.mubr.bf16.mxu0 %v9636_v55 }
0x14aa   : > { %7854 = vmatprep.subr.bf16.mxu0 %v14327_v16 }
0x14ad   : > { %8808 = vmatpush1.bf16.msk.msra.mxu0 %vm10292_vm5, %v14328_v52 }
0x14ae   : > { %7856 = vmatprep.subr.bf16.mxu0 %v14329_v57 }
0x14b1   : > { %7857 = vmatpush1.bf16.msra.mxu0 %v14330_v41 }
0x14b2   : > { %7858 = vmatprep.subr.bf16.mxu0 %v14331_v59 }
0x14b5   : > { %7859 = vmatpush1.bf16.msra.mxu0 %v14332_v13 }
0x14b6   : > { %7860 = vmatprep.subr.bf16.mxu0 %v14333_v51 }
0x14b9   : > { %7861 = vmatpush1.bf16.msra.mxu0 %v14334_v21 }
0x14ba   : > { %7862 = vmatprep.subr.bf16.mxu0 %v14335_v19 }
0x14bd   : > { %7863 = vmatpush1.bf16.msra.mxu0 %v14336_v7 }
0x14be   : > { %7864 = vmatprep.subr.bf16.mxu0 %v14337_v42 }
0x14c1   : > { %7865 = vmatpush1.bf16.msra.mxu0 %v14338_v9 }
0x14c2   : > { %8811 = vmatprep.subr.msk.bf16.mxu0 %vm10488_vm13, %v14339_v47 }
0x14c5   : > { %7867 = vmatpush1.bf16.msra.mxu0 %v14340_v48 }
0x14c6   : > { %7868 = vmatprep.subr.bf16.mxu0 %v14341_v0 }
0x14c9   : > { %7869 = vmatpush1.bf16.msra.mxu0 %v14342_v33 }
0x14ca   : > { %7870 = vmatprep.subr.bf16.mxu0 %v13415_v38 }
0x14cd   : > { %7871 = vmatpush1.bf16.msra.mxu0 %v14343_v14 }
0x14ce   : > { %7872 = vmatprep.subr.bf16.mxu0 %v13428_v10 }
0x14d1   : > { %8816 = vmatpush1.bf16.msk.msra.mxu0 %vm10292_vm5, %v13430_v35  ;;  %v6739_v35 = vpop.permute.xlu0 %6738 }
0x14d2   : > { %7874 = vmatprep.subr.bf16.mxu0 %v13448_v11 }
0x14d5   : > { %7875 = vmatpush1.bf16.msra.mxu0 %v13450_v28 }
0x14d6   : > { %7876 = vmatprep.subr.bf16.mxu0 %v14344_v6 }
0x14d9   : > { %7877 = vmatpush1.bf16.msra.mxu0 %v14345_v27 }
0x14da   : > { %7878 = vmatprep.subr.bf16.mxu0 %v14346_v54 }
0x14dd   : > { %7879 = vmatpush1.bf16.msra.mxu0 %v14347_v29 }
0x14de   : > { %7901 = vmatprep.subr.bf16.mxu0 %v13489_v31 }
0x14e0   : > { %7881 = vmatmul.mubr.bf16.vlgmr.msra.gmra.mrb[28].mxu0 %v9634_v34 }
0x14e1   : > { %7902 = vmatpush1.bf16.msra.mxu0 %v13486_v49 }
0x14e2   : > { %7903 = vmatprep.subr.bf16.mxu0 %v13503_v61 }
0x14e5   : > { %7904 = vmatpush1.bf16.msra.mxu0 %v13499_v24 }
0x14e6   : > { %8819 = vmatprep.subr.msk.bf16.mxu0 %vm10488_vm13, %v13510_v18 }
0x14e9   : > { %7906 = vmatpush1.bf16.msra.mxu0 %v13512_v40 }
0x14ea   : > { %7907 = vmatprep.subr.bf16.mxu0 %v13529_v4 }
0x14ed   : > { %7908 = vmatpush1.bf16.msra.mxu0 %v13536_v58  ;;  %v8320_v58 = vld [vmem:[%s13981_s9 + $0x20] sm:$0xff] }
0x1533   : > { %v6889_v30 = vpop.f32.mrb[24].mxu0 }
0x1534   : > { %v8892_v38 = vadd.f32 %v6889_v30, %v6734_v44  ;;  %v6891_v10 = vpop.f32.mrb[25].mxu0 }
0x1535   : > { %v8893_v11 = vadd.f32 %v6891_v10, %v6734_v44  ;;  %v6893_v28 = vpop.f32.mrb[26].mxu0 }
0x1536   : > { %v6898_v49 = vmul.f32 0.2, %v8892_v38  ;;  %v8894_v31 = vadd.f32 %v6893_v28, %v6739_v35  ;;  %v6895_v24 = vpop.f32.mrb[27].mxu0 }
0x1537   : > { %v6899_v61 = vmul.f32 0.2, %v8893_v11  ;;  %v8895_v2 = vadd.f32 %v6895_v24, %v6739_v35 }
0x1538   : > { %v6902_v56 = vmax.f32 %v8892_v38, %v6898_v49  ;;  %v6900_v18 = vmul.f32 0.2, %v8894_v31 }
0x1539   : > { %v6903_v53 = vmax.f32 %v8893_v11, %v6899_v61  ;;  %v6901_v40 = vmul.f32 0.2, %v8895_v2 }
0x153a   : > { %v6904_v46 = vmax.f32 %v8894_v31, %v6900_v18  ;;  %6910 = vrot.lane.b32.xlu1 %v6902_v56, %s9859_s19 }
0x153b   : > { %v6905_v36 = vmax.f32 %v8895_v2, %v6901_v40  ;;  %6912 = vrot.lane.b32.xlu0 %v6903_v53, %s9859_s19  ;;  %v9473_v39 = vpack.i.bf16 %v6903_v53, %v6902_v56 }
0x153c   : > { %v13631_v4 = vpack.c.bf16 %v6904_v46, %v6902_v56 }
0x153d   : > { %v9478_v15 = vpack.i.bf16 %v6905_v36, %v6904_v46  ;;  %v13633_v1 = vpack.c.bf16 %v6905_v36, %v6903_v53 }
0x153e   : > { %6954 = vrot.lane.b32.xlu1 %v6902_v56, %s9861_s25 }
0x153f   : > { %6956 = vrot.lane.b32.xlu0 %v6903_v53, %s9861_s25 }
0x1542   : > { %6978 = vrot.lane.b32.xlu1 %v6902_v56, %s9862_s14 }
0x1543   : > { %6980 = vrot.lane.b32.xlu0 %v6903_v53, %s9862_s14 }
0x1546   : > { %9474 = vrot.lane.b32.xlu1 %v9473_v39, %s9860_s24 }
0x1547   : > { %7010 = vrot.lane.b32.xlu0 %v6904_v46, %s9863_s16 }
0x154a   : > { %6914 = vrot.lane.b32.xlu1 %v6904_v46, %s9859_s19 }
0x154b   : > { %6916 = vrot.lane.b32.xlu0 %v6905_v36, %s9859_s19 }
0x154e   : > { %7008 = vrot.lane.b32.xlu1 %v6903_v53, %s9863_s16 }
0x154f   : > { %9479 = vrot.lane.b32.xlu0 %v9478_v15, %s9860_s24 }
0x1552   : > { %6958 = vrot.lane.b32.xlu1 %v6904_v46, %s9861_s25 }
0x1553   : > { %6960 = vrot.lane.b32.xlu0 %v6905_v36, %s9861_s25 }
0x1556   : > { %6982 = vrot.lane.b32.xlu1 %v6904_v46, %s9862_s14 }
0x1557   : > { %6984 = vrot.lane.b32.xlu0 %v6905_v36, %s9862_s14 }
0x155a   : > { %7006 = vrot.lane.b32.xlu1 %v6902_v56, %s9863_s16 }
0x155b   : > { %7034 = vrot.lane.b32.xlu0 %v6904_v46, %s9864_s12 }
0x155e   : > { %7032 = vrot.lane.b32.xlu1 %v6903_v53, %s9864_s12 }
0x155f   : > { %7012 = vrot.lane.b32.xlu0 %v6905_v36, %s9863_s16 }
0x1562   : > { %7030 = vrot.lane.b32.xlu1 %v6902_v56, %s9864_s12 }
0x1563   : > { %7036 = vrot.lane.b32.xlu0 %v6905_v36, %s9864_s12 }
0x1566   : > { %9484 = vrot.lane.b32.xlu1 %v9473_v39, %s9865_s15 }
0x1567   : > { %9489 = vrot.lane.b32.xlu0 %v9478_v15, %s9865_s15 }
0x156a   : > { %7076 = vrot.lane.b32.xlu1 %v6903_v53, %s9866_s22 }
0x156b   : > { %7080 = vrot.lane.b32.xlu0 %v6905_v36, %s9866_s22 }
0x156e   : > { %7074 = vrot.lane.b32.xlu1 %v6902_v56, %s9866_s22 }
0x156f   : > { %7078 = vrot.lane.b32.xlu0 %v6904_v46, %s9866_s22 }
0x1572   : > { %7200 = vperm.xlu1 %9192, %v8320_v58  }
0x1573   : > { %7205 = vperm.xlu0 %9191, %v8321_v20  }
0x15ac   : > { %v6911_v50 = vpop.permute.xlu1 %6910 }
0x15ad   : > { %v6913_v3 = vpop.permute.xlu0 %6912  ;;  %v6924_v16 = vsel %vm524_vm1, 0.0, %v6911_v50 }
0x15ae   : > { %v6918_v37 = vsel %vm524_vm1, %v6911_v50, %v6913_v3  ;;  %v6926_v21 = vmul.f32 %v10248_v23, %v6924_v16 }
0x15af   : > { %v6927_v13 = vmul.f32 %v10253_v26, %v6918_v37 }
0x15b0   : > { %v6955_v45 = vpop.permute.xlu1 %6954 }
0x15b1   : > { %v6957_v5 = vpop.permute.xlu0 %6956  ;;  %v6968_v34 = vsel %vm614_vm8, 0.0, %v6955_v45 }
0x15b2   : > { %v6962_v14 = vsel %vm614_vm8, %v6955_v45, %v6957_v5  ;;  %v6970_v49 = vmul.f32 %v10317_v25, %v6968_v34 }
0x15b3   : > { %v6971_v11 = vmul.f32 %v14318_v60, %v6962_v14 }
0x15b4   : > { %v6979_v62 = vpop.permute.xlu1 %6978 }
0x15b5   : > { %v6981_v43 = vpop.permute.xlu0 %6980  ;;  %v6992_v61 = vsel %vm663_vm9, 0.0, %v6979_v62 }
0x15b6   : > { %v6986_v31 = vsel %vm663_vm9, %v6979_v62, %v6981_v43  ;;  %v6994_v15 = vmul.f32 %v10248_v23, %v6992_v61 }
0x15b7   : > { %v6995_v36 = vmul.f32 %v10253_v26, %v6986_v31 }
0x15b8   : > { %v9475_v32 = vpop.permute.xlu1 %9474 }
0x15b9   : > { %v13671_v55 = vpop.permute.xlu0 %7010  ;;  %v9477_v19 = vunpack.i.h.bf16 %v9475_v32  ;;  %v9476_v7 = vunpack.i.l.bf16 %v9475_v32 }
0x15bb   : > { %v6942_v27 = vsel %vm573_vm3, %v9476_v7, %v9477_v19 }
0x15bc   : > { %v6915_v22 = vpop.permute.xlu1 %6914 }
0x15bd   : > { %v6925_v52 = vsel %vm524_vm1, 0.0, %v6915_v22  ;;  %v6917_v57 = vpop.permute.xlu0 %6916 }
0x15be   : > { %v6928_v41 = vmul.f32 %v10248_v23, %v6925_v52  ;;  %v6919_v59 = vsel %vm524_vm1, %v6915_v22, %v6917_v57 }
0x15bf   : > { %v6929_v51 = vmul.f32 %v10253_v26, %v6919_v59 }
0x15c0   : > { %v7009_v42 = vpop.permute.xlu1 %7008  ;;  %v6930_v48 = vpack.c.bf16 %v6928_v41, %v6926_v21 }
0x15c1   : > { %v9480_v9 = vpop.permute.xlu0 %9479  ;;  %v6931_v47 = vpack.c.bf16 %v6929_v51, %v6927_v13  ;;  %v7020_v3 = vsel %vm720_vm10, %v7009_v42, 0.0 }
0x15c2   : > { %v9482_v0 = vunpack.i.h.bf16 %v9480_v9  ;;  %v9481_v33 = vunpack.i.l.bf16 %v9480_v9  ;;  %v7023_v37 = vmul.f32 %v14318_v60, %v7020_v3 }
0x15c3   : > { %7334 = vmatprep.subr.bf16.mxu1 %v6931_v47  ;;  %7909 = vmatprep.subr.bf16.mxu0 %v6931_v47 }
0x15c4   : > { %7335 = vmatpush1.bf16.msra.mxu1 %v6930_v48  ;;  %7910 = vmatpush1.bf16.msra.mxu0 %v6930_v48  ;;  %v6959_v6 = vpop.permute.xlu1 %6958  ;;  %v6943_v54 = vsel %vm573_vm3, %v9481_v33, %v9482_v0  ;;  %v8783_v38 = vpack.c.bf16 %v9481_v33, %v9476_v7 }
0x15c5   : > { %v6969_v29 = vsel %vm614_vm8, 0.0, %v6959_v6  ;;  %v6961_v44 = vpop.permute.xlu0 %6960  ;;  %v6951_v30 = vpack.c.bf16 %v6943_v54, %v6942_v27 }
0x15c6   : > { %v6972_v10 = vmul.f32 %v10317_v25, %v6969_v29  ;;  %v6963_v35 = vsel %vm614_vm8, %v6959_v6, %v6961_v44 }
0x15c7   : > { %v6973_v28 = vmul.f32 %v14318_v60, %v6963_v35  ;;  %7336 = vmatprep.subr.bf16.mxu1 %v6951_v30  ;;  %7911 = vmatprep.subr.bf16.mxu0 %v6951_v30 }
0x15c8   : > { %v6983_v24 = vpop.permute.xlu1 %6982  ;;  %8784 = vmatpush1.bf16.msk.msra.mxu1 %vm10292_vm5, %v8783_v38  ;;  %8824 = vmatpush1.bf16.msk.msra.mxu0 %vm10292_vm5, %v8783_v38  ;;  %v6974_v53 = vpack.c.bf16 %v6972_v10, %v6970_v49 }
0x15c9   : > { %v6993_v2 = vsel %vm663_vm9, 0.0, %v6983_v24  ;;  %v6985_v56 = vpop.permute.xlu0 %6984  ;;  %v6975_v18 = vpack.c.bf16 %v6973_v28, %v6971_v11 }
0x15ca   : > { %v6996_v40 = vmul.f32 %v10248_v23, %v6993_v2  ;;  %v6987_v46 = vsel %vm663_vm9, %v6983_v24, %v6985_v56 }
0x15cb   : > { %v6997_v39 = vmul.f32 %v10253_v26, %v6987_v46  ;;  %7338 = vmatprep.subr.bf16.mxu1 %v6975_v18  ;;  %7913 = vmatprep.subr.bf16.mxu0 %v6975_v18 }
0x15cc   : > { %v7007_v12 = vpop.permute.xlu1 %7006  ;;  %7339 = vmatpush1.bf16.msra.mxu1 %v6974_v53  ;;  %7914 = vmatpush1.bf16.msra.mxu0 %v6974_v53  ;;  %v6998_v50 = vpack.c.bf16 %v6996_v40, %v6994_v15  ;;  %v9639_v40 = vld [vmem:[%s13976_s4 + $0x70] ss:$24 sps:$4 sm:$0xff]  }
0x15cd   : > { %v7035_v58 = vpop.permute.xlu0 %7034  ;;  %v6999_v20 = vpack.c.bf16 %v6997_v39, %v6995_v36  ;;  %v7014_v45 = vsel %vm720_vm10, %v7007_v12, %v7009_v42 }
0x15ce   : > { %v7022_v22 = vmul.f32 %v10317_v25, %v7014_v45 }
0x15cf   : > { %7340 = vmatprep.subr.bf16.mxu1 %v6999_v20  ;;  %7915 = vmatprep.subr.bf16.mxu0 %v6999_v20 }
0x15d0   : > { %v7033_v5 = vpop.permute.xlu1 %7032  ;;  %7341 = vmatpush1.bf16.msra.mxu1 %v6998_v50  ;;  %7916 = vmatpush1.bf16.msra.mxu0 %v6998_v50 }
0x15d1   : > { %v7013_v62 = vpop.permute.xlu0 %7012  ;;  %7342 = vmatprep.subr.bf16.mxu1 %v13633_v1  ;;  %7917 = vmatprep.subr.bf16.mxu0 %v13633_v1  ;;  %v7044_v57 = vsel %vm769_vm11, %v7033_v5, 0.0 }
0x15d2   : > { %v7015_v43 = vsel %vm720_vm10, %v13671_v55, %v7013_v62  ;;  %v7021_v32 = vsel %vm720_vm10, %v7013_v62, 0.0  ;;  %v7047_v7 = vmul.f32 %v10253_v26, %v7044_v57 }
0x15d3   : > { %v7024_v16 = vmul.f32 %v10317_v25, %v7015_v43  ;;  %v7025_v52 = vmul.f32 %v14318_v60, %v7021_v32 }
0x15d4   : > { %v7031_v41 = vpop.permute.xlu1 %7030  ;;  %7343 = vmatpush1.bf16.msra.mxu1 %v13631_v4  ;;  %7918 = vmatpush1.bf16.msra.mxu0 %v13631_v4 }
0x15d5   : > { %v7026_v1 = vpack.c.bf16 %v7024_v16, %v7022_v22  ;;  %v7038_v55 = vsel %vm769_vm11, %v7031_v41, %v7033_v5  ;;  %v7037_v59 = vpop.permute.xlu0 %7036  ;;  %v7027_v13 = vpack.c.bf16 %v7025_v52, %v7023_v37 }
0x15d6   : > { %v7046_v51 = vmul.f32 %v10248_v23, %v7038_v55  ;;  %v7039_v21 = vsel %vm769_vm11, %v7035_v58, %v7037_v59  ;;  %v7045_v19 = vsel %vm769_vm11, %v7037_v59, 0.0  ;;  %v9640_v59 = vld [vmem:[#allocation10 + $0x124] ss:$28 sps:$4 sm:$0xff]  }
0x15d7   : > { %v7048_v42 = vmul.f32 %v10248_v23, %v7039_v21  ;;  %v7049_v9 = vmul.f32 %v10253_v26, %v7045_v19  ;;  %7344 = vmatprep.subr.bf16.mxu1 %v7027_v13  ;;  %7919 = vmatprep.subr.bf16.mxu0 %v7027_v13  ;;  %v9642_v13 = vld [vmem:[#allocation10 + $0x120] ss:$28 sps:$4 sm:$0xff]   ;;  %v8330_v19 = vld [vmem:[%s13982_s10 + $0x48] sm:$0xff] }
0x15d8   : > { %v9485_v4 = vpop.permute.xlu1 %9484  ;;  %7345 = vmatpush1.bf16.msra.mxu1 %v7026_v1  ;;  %7920 = vmatpush1.bf16.msra.mxu0 %v7026_v1  ;;  %v8329_v21 = vld [vmem:[%s13982_s10 + $0x40] sm:$0xff] }
0x15d9   : > { %v7050_v47 = vpack.c.bf16 %v7048_v42, %v7046_v51  ;;  %v9487_v48 = vunpack.i.h.bf16 %v9485_v4  ;;  %v9486_v0 = vunpack.i.l.bf16 %v9485_v4  ;;  %v9490_v33 = vpop.permute.xlu0 %9489  ;;  %v7051_v14 = vpack.c.bf16 %v7049_v9, %v7047_v7  ;;  %7890 = vmatprep.mubr.bf16.mxu0 %v9640_v59  ;;  %v9645_v51 = vld [vmem:[#allocation10 + $0xf4] ss:$28 sps:$4 sm:$0xff]   ;;  %v8332_v42 = vld [vmem:[%s13982_s10 + $0x58] sm:$0xff] }
0x15da   : > { %v9492_v6 = vunpack.i.h.bf16 %v9490_v33  ;;  %v9491_v27 = vunpack.i.l.bf16 %v9490_v33  ;;  %7891 = vmatmul.mubr.bf16.gmra.mrb[32].mxu0 %v9642_v13  ;;  %v8331_v7 = vld [vmem:[%s13982_s10 + $0x50] sm:$0xff] }
0x15db   : > { %v7062_v54 = vsel %vm818_vm12, %v9486_v0, %v9487_v48  ;;  %7346 = vmatprep.subr.bf16.mxu1 %v7051_v14  ;;  %7921 = vmatprep.subr.bf16.mxu0 %v7051_v14 }
0x15dc   : > { %v7063_v34 = vsel %vm818_vm12, %v9491_v27, %v9492_v6  ;;  %v8786_v29 = vpack.c.bf16 %v9492_v6, %v9487_v48  ;;  %v7077_v44 = vpop.permute.xlu1 %7076  ;;  %7347 = vmatpush1.bf16.msra.mxu1 %v7050_v47  ;;  %7922 = vmatpush1.bf16.msra.mxu0 %v7050_v47 }
0x15dd   : > { %v7070_v30 = vpack.c.bf16 %v7063_v34, %v7062_v54  ;;  %v7088_v38 = vsel %vm859_vm14, %v7077_v44, 0.0  ;;  %v7081_v10 = vpop.permute.xlu0 %7080  ;;  %7933 = vmatprep.mubr.bf16.mxu0 %v9645_v51 }
0x15de   : > { %v7091_v35 = vmul.f32 %v14318_v60, %v7088_v38  ;;  %v7089_v11 = vsel %vm859_vm14, %v7081_v10, 0.0  ;;  %8787 = vmatprep.subr.msk.bf16.mxu1 %vm10488_vm13, %v8786_v29  ;;  %8827 = vmatprep.subr.msk.bf16.mxu0 %vm10488_vm13, %v8786_v29 }
0x15df   : > { %v7093_v28 = vmul.f32 %v14318_v60, %v7089_v11 }
0x15e0   : > { %v7075_v49 = vpop.permute.xlu1 %7074  ;;  %7349 = vmatpush1.bf16.msra.mxu1 %v7070_v30  ;;  %7924 = vmatpush1.bf16.msra.mxu0 %v7070_v30 }
0x15e1   : > { %v7082_v31 = vsel %vm859_vm14, %v7075_v49, %v7077_v44  ;;  %v7079_v24 = vpop.permute.xlu0 %7078  ;;  %v7095_v61 = vpack.c.bf16 %v7093_v28, %v7091_v35 }
0x15e2   : > { %v7090_v2 = vmul.f32 %v10317_v25, %v7082_v31  ;;  %v7083_v56 = vsel %vm859_vm14, %v7079_v24, %v7081_v10 }
0x15e3   : > { %v7092_v18 = vmul.f32 %v10317_v25, %v7083_v56  ;;  %7350 = vmatprep.subr.bf16.mxu1 %v7095_v61  ;;  %7925 = vmatprep.subr.bf16.mxu0 %v7095_v61 }
0x15e5   : > { %v7094_v53 = vpack.c.bf16 %v7092_v18, %v7090_v2 }
0x15e7   : > { %7351 = vmatpush1.bf16.msra.mxu1 %v7094_v53  ;;  %7926 = vmatpush1.bf16.msra.mxu0 %v7094_v53 }
0x15ea   : > { %7359 = vmatmul.mubr.bf16.vlgmr.msra.gmra.mrb[32].mxu1 %v9639_v40 }
0x15f1   : > { %v7201_v46 = vpop.permute.xlu1 %7200 }
0x15f2   : > { %v7206_v12 = vpop.permute.xlu0 %7205 }
0x16bd   : > { %v7360_v36 = vpop.f32.mrb[32].mxu1 }
0x16be   : > { %v8896_v39 = vadd.f32 %v7360_v36, %v7201_v46  ;;  %v7362_v15 = vpop.f32.mrb[33].mxu1 }
0x16bf   : > { %v8897_v58 = vadd.f32 %v7362_v15, %v7201_v46  ;;  %v7364_v20 = vpop.f32.mrb[34].mxu1 }
0x16c0   : > { %v7369_v50 = vmul.f32 0.2, %v8896_v39  ;;  %v8898_v3 = vadd.f32 %v7364_v20, %v7206_v12  ;;  %v7366_v45 = vpop.f32.mrb[35].mxu1 }
0x16c1   : > { %v7370_v5 = vmul.f32 0.2, %v8897_v58  ;;  %v8899_v62 = vadd.f32 %v7366_v45, %v7206_v12 }
0x16c2   : > { %v13741_v43 = vmax.f32 %v8896_v39, %v7369_v50  ;;  %v7371_v32 = vmul.f32 0.2, %v8898_v3 }
0x16c3   : > { %v13743_v37 = vmax.f32 %v8897_v58, %v7370_v5  ;;  %v7372_v22 = vmul.f32 0.2, %v8899_v62 }
0x16c4   : > { %v13745_v16 = vmax.f32 %v8898_v3, %v7371_v32  ;;  %7381 = vrot.lane.b32.xlu1 %v13741_v43, %s9859_s19 }
0x16c5   : > { %v13749_v52 = vmax.f32 %v8899_v62, %v7372_v22  ;;  %7383 = vrot.lane.b32.xlu0 %v13743_v37, %s9859_s19  ;;  %v9493_v57 = vpack.i.bf16 %v13743_v37, %v13741_v43 }
0x16c6   : > { %v7473_v41 = vpack.c.bf16 %v13745_v16, %v13741_v43 }
0x16c7   : > { %v9498_v1 = vpack.i.bf16 %v13749_v52, %v13745_v16  ;;  %v7474_v55 = vpack.c.bf16 %v13749_v52, %v13743_v37 }
0x16c8   : > { %7425 = vrot.lane.b32.xlu1 %v13741_v43, %s9861_s25 }
0x16c9   : > { %7427 = vrot.lane.b32.xlu0 %v13743_v37, %s9861_s25 }
0x16cc   : > { %7449 = vrot.lane.b32.xlu1 %v13741_v43, %s9862_s14 }
0x16cd   : > { %7451 = vrot.lane.b32.xlu0 %v13743_v37, %s9862_s14 }
0x16d0   : > { %9494 = vrot.lane.b32.xlu1 %v9493_v57, %s9860_s24 }
0x16d1   : > { %7481 = vrot.lane.b32.xlu0 %v13745_v16, %s9863_s16 }
0x16d4   : > { %7385 = vrot.lane.b32.xlu1 %v13745_v16, %s9859_s19 }
0x16d5   : > { %7387 = vrot.lane.b32.xlu0 %v13749_v52, %s9859_s19  ;;  %s13921_s19 = scalar_lea.hbm %s13983_s11, %s8355_s17 }
0x16d8   : > { %7479 = vrot.lane.b32.xlu1 %v13743_v37, %s9863_s16 }
0x16d9   : > { %9499 = vrot.lane.b32.xlu0 %v9498_v1, %s9860_s24 }
0x16dc   : > { %7429 = vrot.lane.b32.xlu1 %v13745_v16, %s9861_s25 }
0x16dd   : > { %7431 = vrot.lane.b32.xlu0 %v13749_v52, %s9861_s25  ;;  %s9869_s25 = smov [#allocation12]  }
0x16e0   : > { %7453 = vrot.lane.b32.xlu1 %v13745_v16, %s9862_s14 }
0x16e1   : > { %7455 = vrot.lane.b32.xlu0 %v13749_v52, %s9862_s14  ;;  %s9775_s14 = sshll.u32 %s9869_s25, 4  ;;  %s9776_s14 = int_to_ptr.vmem [resolvable:$false] %s9775_s14 }
0x16e4   : > { %7477 = vrot.lane.b32.xlu1 %v13741_v43, %s9863_s16 }
0x16e5   : > { %7505 = vrot.lane.b32.xlu0 %v13745_v16, %s9864_s12 }
0x16e8   : > { %7503 = vrot.lane.b32.xlu1 %v13743_v37, %s9864_s12 }
0x16e9   : > { %7483 = vrot.lane.b32.xlu0 %v13749_v52, %s9863_s16  ;;  %s9777_s16 = scalar_lea.vmem %s9776_s14, 2048 }
0x16ec   : > { %7501 = vrot.lane.b32.xlu1 %v13741_v43, %s9864_s12 }
0x16ed   : > { %7507 = vrot.lane.b32.xlu0 %v13749_v52, %s9864_s12 }
0x16f0   : > { %9504 = vrot.lane.b32.xlu1 %v9493_v57, %s9865_s15 }
0x16f1   : > { %9509 = vrot.lane.b32.xlu0 %v9498_v1, %s9865_s15 }
0x16f4   : > { %7547 = vrot.lane.b32.xlu1 %v13743_v37, %s9866_s22 }
0x16f5   : > { %7551 = vrot.lane.b32.xlu0 %v13749_v52, %s9866_s22 }
0x16f8   : > { %7545 = vrot.lane.b32.xlu1 %v13741_v43, %s9866_s22 }
0x16f9   : > { %7549 = vrot.lane.b32.xlu0 %v13745_v16, %s9866_s22  ;;  %s436_s22 = sand.u32 1, %s9837_s18  }
0x16fa   : > { %s8192_s30 = sshll.u32 %s436_s22, 6  ;;  %s13930_s21 = scalar_lea.sflag [#allocation6], %s436_s22 }
0x16fb   : > { %s13901_s28 = scalar_lea.vmem [#allocation12], %s8192_s30 }
0x16fc   : > { %7701 = vperm.xlu1 %9192, %v8329_v21   ;;  %s8077_s20 = sshll.u32 %s13901_s28, 4  ;;  %s13924_s20 = int_to_ptr.vmem [resolvable:$true] %s8077_s20 }
0x16fd   : > { %7706 = vperm.xlu0 %9191, %v8330_v19   ;;  %p9778_p8 = scmp.lt.s32.totalorder %s13924_s20, %s9776_s14 }
0x1700   : > { %7711 = vperm.xlu1 %9192, %v8331_v7  }
0x1701   : > { %7716 = vperm.xlu0 %9191, %v8332_v42  }
0x1736   : > { %v7382_v9 = vpop.permute.xlu1 %7381 }
0x1737   : > { %v7384_v4 = vpop.permute.xlu0 %7383  ;;  %v7395_v34 = vsel %vm524_vm1, 0.0, %v7382_v9 }
0x1738   : > { %v7389_v27 = vsel %vm524_vm1, %v7382_v9, %v7384_v4  ;;  %v7397_v11 = vmul.f32 %v10248_v23, %v7395_v34  ;;  %v9643_v9 = vld [vmem:[#allocation10 + $0xf0] ss:$28 sps:$4 sm:$0xff]  }
0x1739   : > { %v7398_v10 = vmul.f32 %v10253_v26, %v7389_v27 }
0x173a   : > { %v7426_v47 = vpop.permute.xlu1 %7425 }
0x173b   : > { %v7428_v48 = vpop.permute.xlu0 %7427  ;;  %v7439_v39 = vsel %vm614_vm8, 0.0, %v7426_v47 }
0x173c   : > { %v7433_v53 = vsel %vm614_vm8, %v7426_v47, %v7428_v48  ;;  %v7441_v62 = vmul.f32 %v10317_v25, %v7439_v39  ;;  %v9646_v47 = vld [vmem:[#allocation10 + $0x12c] ss:$28 sps:$4 sm:$0xff]  }
0x173d   : > { %v7442_v45 = vmul.f32 %v14318_v60, %v7433_v53 }
0x173e   : > { %v7450_v0 = vpop.permute.xlu1 %7449 }
0x173f   : > { %v7452_v33 = vpop.permute.xlu0 %7451  ;;  %v7463_v57 = vsel %vm663_vm9, 0.0, %v7450_v0 }
0x1740   : > { %v7457_v32 = vsel %vm663_vm9, %v7450_v0, %v7452_v33  ;;  %v7465_v63 = vmul.f32 %v10248_v23, %v7463_v57 }
0x1741   : > { %v7466_v7 = vmul.f32 %v10253_v26, %v7457_v32 }
0x1742   : > { %v9495_v14 = vpop.permute.xlu1 %9494 }
0x1743   : > { %v13821_v6 = vpop.permute.xlu0 %7481  ;;  %v9497_v28 = vunpack.i.h.bf16 %v9495_v14  ;;  %v9496_v49 = vunpack.i.l.bf16 %v9495_v14 }
0x1745   : > { %v7413_v46 = vsel %vm573_vm3, %v9496_v49, %v9497_v28 }
0x1746   : > { %v7386_v54 = vpop.permute.xlu1 %7385 }
0x1747   : > { %v7396_v29 = vsel %vm524_vm1, 0.0, %v7386_v54  ;;  %v7388_v44 = vpop.permute.xlu0 %7387 }
0x1748   : > { %v7399_v30 = vmul.f32 %v10248_v23, %v7396_v29  ;;  %v7390_v38 = vsel %vm524_vm1, %v7386_v54, %v7388_v44 }
0x1749   : > { %v7400_v35 = vmul.f32 %v10253_v26, %v7390_v38 }
0x174a   : > { %v7480_v31 = vpop.permute.xlu1 %7479  ;;  %v7401_v2 = vpack.c.bf16 %v7399_v30, %v7397_v11  ;;  %v9648_v11 = vld [vmem:[#allocation10 + $0x128] ss:$28 sps:$4 sm:$0xff]  }
0x174b   : > { %v9500_v24 = vpop.permute.xlu0 %9499  ;;  %v7402_v61 = vpack.c.bf16 %v7400_v35, %v7398_v10  ;;  %v7491_v14 = vsel %vm720_vm10, %v7480_v31, 0.0 }
0x174c   : > { %v9502_v56 = vunpack.i.h.bf16 %v9500_v24  ;;  %v9501_v18 = vunpack.i.l.bf16 %v9500_v24  ;;  %v7494_v30 = vmul.f32 %v14318_v60, %v7491_v14 }
0x174d   : > { %7927 = vmatprep.subr.bf16.mxu0 %v7402_v61 }
0x174e   : > { %7928 = vmatpush1.bf16.msra.mxu0 %v7401_v2  ;;  %v7430_v40 = vpop.permute.xlu1 %7429  ;;  %v7414_v36 = vsel %vm573_vm3, %v9501_v18, %v9502_v56  ;;  %v8831_v20 = vpack.c.bf16 %v9501_v18, %v9496_v49 }
0x174f   : > { %v7440_v15 = vsel %vm614_vm8, 0.0, %v7430_v40  ;;  %v7432_v12 = vpop.permute.xlu0 %7431  ;;  %v7422_v58 = vpack.c.bf16 %v7414_v36, %v7413_v46 }
0x1750   : > { %v7443_v50 = vmul.f32 %v10317_v25, %v7440_v15  ;;  %v7434_v3 = vsel %vm614_vm8, %v7430_v40, %v7432_v12 }
0x1751   : > { %v7444_v5 = vmul.f32 %v14318_v60, %v7434_v3  ;;  %7929 = vmatprep.subr.bf16.mxu0 %v7422_v58 }
0x1752   : > { %v7454_v22 = vpop.permute.xlu1 %7453  ;;  %8832 = vmatpush1.bf16.msk.msra.mxu0 %vm10292_vm5, %v8831_v20  ;;  %v7445_v51 = vpack.c.bf16 %v7443_v50, %v7441_v62 }
0x1753   : > { %v7464_v1 = vsel %vm663_vm9, 0.0, %v7454_v22  ;;  %v7456_v59 = vpop.permute.xlu0 %7455  ;;  %v7446_v13 = vpack.c.bf16 %v7444_v5, %v7442_v45 }
0x1754   : > { %v7467_v21 = vmul.f32 %v10248_v23, %v7464_v1  ;;  %v7458_v19 = vsel %vm663_vm9, %v7454_v22, %v7456_v59 }
0x1755   : > { %v7468_v42 = vmul.f32 %v10253_v26, %v7458_v19  ;;  %7931 = vmatprep.subr.bf16.mxu0 %v7446_v13 }
0x1756   : > { %v7478_v4 = vpop.permute.xlu1 %7477  ;;  %7932 = vmatpush1.bf16.msra.mxu0 %v7445_v51  ;;  %v7469_v33 = vpack.c.bf16 %v7467_v21, %v7465_v63  ;;  %v9649_v21 = vld [vmem:[#allocation10 + $0xf8] ss:$28 sps:$4 sm:$0xff]  }
0x1757   : > { %v7506_v48 = vpop.permute.xlu0 %7505  ;;  %v7470_v0 = vpack.c.bf16 %v7468_v42, %v7466_v7  ;;  %v7485_v27 = vsel %vm720_vm10, %v7478_v4, %v7480_v31 }
0x1758   : > { %v7493_v38 = vmul.f32 %v10317_v25, %v7485_v27 }
0x1759   : > { %7954 = vmatprep.subr.bf16.mxu0 %v7470_v0  ;;  %7934 = vmatmul.mubr.bf16.vlgmr.msra.gmra.mrb[28].mxu0 %v9643_v9 }
0x175a   : > { %v7504_v54 = vpop.permute.xlu1 %7503  ;;  %7955 = vmatpush1.bf16.msra.mxu0 %v7469_v33  ;;  %7943 = vmatprep.mubr.bf16.mxu0 %v9646_v47  ;;  %v14348_v33 = vld [vmem:[#allocation36_spill] sm:$0xff] }
0x175b   : > { %v7484_v34 = vpop.permute.xlu0 %7483  ;;  %7956 = vmatprep.subr.bf16.mxu0 %v7474_v55  ;;  %v7515_v28 = vsel %vm769_vm11, %v7504_v54, 0.0 }
0x175c   : > { %v7486_v29 = vsel %vm720_vm10, %v13821_v6, %v7484_v34  ;;  %v7492_v44 = vsel %vm720_vm10, %v7484_v34, 0.0  ;;  %v7518_v2 = vmul.f32 %v10253_v26, %v7515_v28  ;;  %v14349_v34 = vld [vmem:[#allocation37_spill] sm:$0xff] }
0x175d   : > { %v7495_v10 = vmul.f32 %v10317_v25, %v7486_v29  ;;  %v7496_v35 = vmul.f32 %v14318_v60, %v7492_v44 }
0x175e   : > { %v7502_v49 = vpop.permute.xlu1 %7501  ;;  %7957 = vmatpush1.bf16.msra.mxu0 %v7473_v41 }
0x175f   : > { %v7497_v37 = vpack.c.bf16 %v7495_v10, %v7493_v38  ;;  %v7509_v52 = vsel %vm769_vm11, %v7502_v49, %v7504_v54  ;;  %v7508_v55 = vpop.permute.xlu0 %7507  ;;  %v7498_v6 = vpack.c.bf16 %v7496_v35, %v7494_v30  ;;  %v8039_v54 = vld [vmem:[%s10096_s26] sm:$0xff]  ;;  %v8040_v38 = vld [vmem:[%s10096_s26 + $0x8] sm:$0xff]  ;;  %v8041_v49 = vld [vmem:[%s10096_s26 + $0x10] sm:$0xff] }
0x1760   : > { %v7517_v31 = vmul.f32 %v10248_v23, %v7509_v52  ;;  %v7510_v24 = vsel %vm769_vm11, %v7506_v48, %v7508_v55  ;;  %v7516_v61 = vsel %vm769_vm11, %v7508_v55, 0.0  ;;  %v14350_v10 = vld [vmem:[#allocation29_spill] sm:$0xff] }
0x1761   : > { %v7519_v56 = vmul.f32 %v10248_v23, %v7510_v24  ;;  %v7520_v18 = vmul.f32 %v10253_v26, %v7516_v61  ;;  %7958 = vmatprep.subr.bf16.mxu0 %v7498_v6  ;;  %7944 = vmatmul.mubr.bf16.gmra.mrb[32].mxu0 %v9648_v11  ;;  %v8042_v24 = vld [vmem:[%s10096_s26 + $0x18] sm:$0xff] }
0x1762   : > { %v9505_v43 = vpop.permute.xlu1 %9504  ;;  %7959 = vmatpush1.bf16.msra.mxu0 %v7497_v37  ;;  %7986 = vmatprep.mubr.bf16.mxu0 %v14321_v8  ;;  %v14351_v37 = vld [vmem:[#allocation38_spill] sm:$0xff] }
0x1763   : > { %v7521_v16 = vpack.c.bf16 %v7519_v56, %v7517_v31  ;;  %v9507_v41 = vunpack.i.h.bf16 %v9505_v43  ;;  %v9506_v53 = vunpack.i.l.bf16 %v9505_v43  ;;  %v9510_v40 = vpop.permute.xlu0 %9509  ;;  %v7522_v46 = vpack.c.bf16 %v7520_v18, %v7518_v2 }
0x1764   : > { %v9512_v36 = vunpack.i.h.bf16 %v9510_v40  ;;  %v9511_v39 = vunpack.i.l.bf16 %v9510_v40 }
0x1765   : > { %v7533_v15 = vsel %vm818_vm12, %v9506_v53, %v9507_v41  ;;  %7960 = vmatprep.subr.bf16.mxu0 %v7522_v46 }
0x1766   : > { %v7534_v23 = vsel %vm818_vm12, %v9511_v39, %v9512_v36  ;;  %v8834_v12 = vpack.c.bf16 %v9512_v36, %v9507_v41  ;;  %v7548_v26 = vpop.permute.xlu1 %7547  ;;  %7961 = vmatpush1.bf16.msra.mxu0 %v7521_v16 }
0x1767   : > { %v7541_v58 = vpack.c.bf16 %v7534_v23, %v7533_v15  ;;  %v7559_v20 = vsel %vm859_vm14, %v7548_v26, 0.0  ;;  %v7552_v50 = vpop.permute.xlu0 %7551 }
0x1768   : > { %v7562_v3 = vmul.f32 %v14318_v60, %v7559_v20  ;;  %v7560_v45 = vsel %vm859_vm14, %v7552_v50, 0.0  ;;  %8835 = vmatprep.subr.msk.bf16.mxu0 %vm10488_vm13, %v8834_v12  ;;  %v14352_v12 = vld [vmem:[#allocation41_spill] sm:$0xff] }
0x1769   : > { %v7564_v5 = vmul.f32 %v14318_v60, %v7560_v45  ;;  %v8043_v20 = vld [vmem:[%s10096_s26 + $0x20] sm:$0xff] }
0x176a   : > { %v7546_v62 = vpop.permute.xlu1 %7545  ;;  %7963 = vmatpush1.bf16.msra.mxu0 %v7541_v58 }
0x176b   : > { %v7553_v32 = vsel %vm859_vm14, %v7546_v62, %v7548_v26  ;;  %v7550_v22 = vpop.permute.xlu0 %7549  ;;  %v7566_v57 = vpack.c.bf16 %v7564_v5, %v7562_v3  ;;  %v8044_v62 = vld [vmem:[%s10096_s26 + $0x28] sm:$0xff] }
0x176c   : > { %v7561_v1 = vmul.f32 %v10317_v25, %v7553_v32  ;;  %v7554_v59 = vsel %vm859_vm14, %v7550_v22, %v7552_v50  ;;  %v14353_v50 = vld [vmem:[#allocation40_spill] sm:$0xff]  ;;  %v14354_v32 = vld [vmem:[#allocation42_spill] sm:$0xff] }
0x176d   : > { %v7563_v13 = vmul.f32 %v10317_v25, %v7554_v59  ;;  %7964 = vmatprep.subr.bf16.mxu0 %v7566_v57  ;;  %v14355_v59 = vld [vmem:[#allocation43_spill] sm:$0xff] }
0x176f   : > { %v7565_v51 = vpack.c.bf16 %v7563_v13, %v7561_v1  ;;  %v8045_v1 = vld [vmem:[%s10096_s26 + $0x30] sm:$0xff] }
0x1771   : > { %7965 = vmatpush1.bf16.msra.mxu0 %v7565_v51 }
0x1774   : > { %8347 = vmatmul.mubr.msk.bf16.vlgmr.msra.gmra.mrb[28].mxu0 %vm2764_vm6, %v9649_v21 }
0x1775   : > { %7996 = vmatprep.mubr.bf16.mxu0 %v14321_v8 }
0x177b   : > { %v7702_v60 = vpop.permute.xlu1 %7701 }
0x177c   : > { %8348 = vmatmul.mubr.msk.bf16.gmra.mrb[32].mxu0 %vm2764_vm6, %v9650_v17  ;;  %v7707_v9 = vpop.permute.xlu0 %7706  ;;  %v8046_v17 = vld [vmem:[%s10096_s26 + $0x38] sm:$0xff]  ;;  %s9771_s26 = scalar_lea.vmem %s13924_s20, 1024 }
0x177d   : > { %p9772_p2 = scmp.ne.s32.totalorder %s13924_s20, %s9771_s26  ;;  %p9779_p11 = scmp.lt.s32.totalorder %s9777_s16, %s9771_s26 }
0x177f   : > { %v7712_v11 = vpop.permute.xlu1 %7711  ;;  %p9773_p4 = pnand %p9772_p2, %p14356_p3  ;;  %p9780_p13 = por %p9779_p11, %p9778_p8 }
0x1780   : > { %v7717_v56 = vpop.permute.xlu0 %7716 }
0x1781   : > { %p9774_p7 = pneg %p9773_p4 }
0x1783   : > { %p9781_p5 = pnand %p9780_p13, %p9774_p7 }
0x1847   : > { %v7988_v19 = vpop.f32.mrb[28].mxu0 }
0x1848   : > { %v8900_v7 = vadd.f32 %v7988_v19, %v7702_v60  ;;  %v7990_v42 = vpop.f32.mrb[29].mxu0 }
0x1849   : > { %v8901_v25 = vadd.f32 %v7990_v42, %v7702_v60  ;;  %v7992_v63 = vpop.f32.mrb[30].mxu0 }
0x184a   : > { %v8007_v4 = vmul.f32 0.2, %v8900_v7  ;;  %v8902_v47 = vadd.f32 %v7992_v63, %v7707_v9  ;;  %v7994_v48 = vpop.f32.mrb[31].mxu0 }
0x184b   : > { %v8008_v0 = vmul.f32 0.2, %v8901_v25  ;;  %v8903_v8 = vadd.f32 %v7994_v48, %v7707_v9 }
0x184c   : > { %v8023_v14 = vadd.f32 %v8007_v4, %v14348_v33  ;;  %v8009_v27 = vmul.f32 0.2, %v8902_v47 }
0x184d   : > { %v8024_v29 = vadd.f32 %v8008_v0, %v14349_v34  ;;  %v8010_v44 = vmul.f32 0.2, %v8903_v8 }
0x184e   : > { %v8031_v30 = vmul.f32 0.2, %v8023_v14  ;;  %v8025_v35 = vadd.f32 %v8009_v27, %v14350_v10 }
0x184f   : > { %v8032_v28 = vmul.f32 0.2, %v8024_v29  ;;  %v8026_v52 = vadd.f32 %v8010_v44, %v14351_v37  ;;  %v7998_v55 = vpop.f32.mrb[32].mxu0 }
0x1850   : > { %v8047_v6 = vadd.f32 %v8039_v54, %v8031_v30  ;;  %v8033_v31 = vmul.f32 0.2, %v8025_v35  ;;  %v8904_v61 = vadd.f32 %v7998_v55, %v7712_v11  ;;  %v8000_v2 = vpop.f32.mrb[33].mxu0 }
0x1851   : > { %v8048_v18 = vadd.f32 %v8040_v38, %v8032_v28  ;;  %v8034_v43 = vmul.f32 0.2, %v8026_v52  ;;  %v8905_v16 = vadd.f32 %v8000_v2, %v7712_v11  ;;  %v8002_v41 = vpop.f32.mrb[34].mxu0 }
0x1852   : > { %8055 = vst [vmem:[%s13901_s28] sm:$0xff] %v8047_v6  ;;  %v8049_v53 = vadd.f32 %v8041_v49, %v8033_v31  ;;  %v8011_v40 = vmul.f32 0.2, %v8904_v61  ;;  %v8906_v46 = vadd.f32 %v8002_v41, %v7717_v56  ;;  %v8004_v36 = vpop.f32.mrb[35].mxu0 }
0x1853   : > { %8056 = vst [vmem:[%s13901_s28 + $0x8] sm:$0xff] %v8048_v18  ;;  %v8050_v39 = vadd.f32 %v8042_v24, %v8034_v43  ;;  %v8012_v15 = vmul.f32 0.2, %v8905_v16  ;;  %v8907_v23 = vadd.f32 %v8004_v36, %v7717_v56 }
0x1854   : > { %8057 = vst [vmem:[%s13901_s28 + $0x10] sm:$0xff] %v8049_v53  ;;  %v8027_v26 = vadd.f32 %v8011_v40, %v14352_v12  ;;  %v8013_v58 = vmul.f32 0.2, %v8906_v46 }
0x1855   : > { %8058 = vst [vmem:[%s13901_s28 + $0x18] sm:$0xff] %v8050_v39  ;;  %v8028_v3 = vadd.f32 %v8012_v15, %v14353_v50  ;;  %v8014_v45 = vmul.f32 0.2, %v8907_v23 }
0x1856   : > { %v8035_v5 = vmul.f32 0.2, %v8027_v26  ;;  %v8029_v22 = vadd.f32 %v8013_v58, %v14354_v32 }
0x1857   : > { %v8036_v57 = vmul.f32 0.2, %v8028_v3  ;;  %v8030_v13 = vadd.f32 %v8014_v45, %v14355_v59 }
0x1858   : > { %v8051_v51 = vadd.f32 %v8043_v20, %v8035_v5  ;;  %v8037_v21 = vmul.f32 0.2, %v8029_v22 }
0x1859   : > { %v8052_v60 = vadd.f32 %v8044_v62, %v8036_v57  ;;  %v8038_v19 = vmul.f32 0.2, %v8030_v13 }
0x185a   : > { %8059 = vst [vmem:[%s13901_s28 + $0x20] sm:$0xff] %v8051_v51  ;;  %v8053_v7 = vadd.f32 %v8045_v1, %v8037_v21 }
0x185b   : > { %8060 = vst [vmem:[%s13901_s28 + $0x28] sm:$0xff] %v8052_v60  ;;  %v8054_v42 = vadd.f32 %v8046_v17, %v8038_v19 }
0x185c   : > { %8061 = vst [vmem:[%s13901_s28 + $0x30] sm:$0xff] %v8053_v7 }
0x185d   : > { %8062 = vst [vmem:[%s13901_s28 + $0x38] sm:$0xff] %v8054_v42 }
0x185e   : > { %9784 = shalt.err (!%p9781_p5)
}
0x185f   : > { %s9785_s12 = scalar_lea.hbm %s13921_s19, 1024  ;;  %s9789_s13 = scalar_lea.hbm %s13983_s11, 2048 }
0x1860   : > { %p9786_p0 = scmp.ne.s32.totalorder %s13921_s19, %s9785_s12  ;;  %p9790_p10 = scmp.lt.u32.totalorder %s13921_s19, %s13983_s11 }
0x1861   : > { %p9791_p12 = scmp.lt.u32.totalorder %s9789_s13, %s9785_s12  ;;  %p9793_p2 = scmp.lt.u32.totalorder %s9785_s12, %s13921_s19 }
0x1862   : > { %p9787_p6 = pnand %p9786_p0, %p14356_p3 }
0x1863   : > { %p9792_p1 = por %p9791_p12, %p9790_p10 }
0x1864   : > { %p9788_p9 = pneg %p9787_p6 }
0x1865   : > { %p9794_p4 = por %p9793_p2, %p9792_p1 }
0x1867   : > { %p9795_p7 = pnand %p9794_p4, %p9788_p9 }
0x1869   : > { %9798 = shalt.err (!%p9795_p7)
}
0x186a   : > { %s9870_s28 = smov 256  }
0x186b   : > { %9068 = dma.vmem_to_hbm [thread:$0]  (%p14356_p3), %s13924_s20, 1024, %s13921_s19, %s13930_s21, %s9870_s28, %s9870_s28, %s9860_s24  }
0x186c PF: > { %s14357_s17 = sld [smem:[#allocation19_spill]]  ;;  %s14358_s2 = sld [smem:[#allocation17_spill]] }
0x186d   : > { %s14359_s23 = sld [smem:[#allocation22_spill]] }
0x1872   : > { %p9095_p8 = scmp.ge.s32.totalorder %s14357_s17, 2  ;;  %s8092_s26 = sand.u32 1, %s14358_s2  }
0x1873   : > { %p14360_p11 = scmp.ne.s32.totalorder %s14359_s23, 0  ;;  %s8093_s25 = scalar_lea.sflag [#allocation6], %s8092_s26 }
0x1875   : > { %p9084_p13 = pnand %p9095_p8, %p14360_p11 }
0x1877   : > { %9828 = dma.done.wait (!%p9084_p13), %s8093_s25, 1024  }
0x1878   : > { %9830 = vsyncadd (!%p9084_p13), %s8093_s25, 4294966272  ;;  %s14361_s20 = sld [smem:[#allocation20_spill]]  ;;  %s14362_s14 = sld [smem:[#allocation18_spill]] }
0x1879   : > { %s14363_s19 = sld [smem:[#allocation21_spill]]  ;;  %s14364_s17 = smov %s9837_s18 }
0x187e   : > { %p24_p5 = scmp.ge.s32.totalorder %s14361_s20, 4   ;;  %s14365_s18 = smov %s14362_s14 }
0x1880   :  { %26 = sbr.rel (!%p24_p5) target bundleno = 8 (0x8), region = 136 }
0x1887   :  { %8098 = vsyncpa [#allocation5], 1 }
0x1888   :  { %8100 = vsyncpa [#allocation5 + $0x1], 1 }
0x1889   :  { %8101 = vsyncpa [#allocation8], 1 }
0x188a   :  { %8102 = vsyncpa [#allocation11], 1 }
0x188b   :  { %8103 = vsyncpa [#allocation6], 1 }
0x188c   :  { %8105 = vsyncpa [#allocation6 + $0x1], 1 }

</bundles_post_ra>
